<compile_context>
chip_gen: v5e
topology: v5e:2x2
jax: 0.10.0
libtpu: 0.0.40
codegen_flags: <defaults>
</compile_context>

<pallas_src>
import numpy as np
import jax
import jax.numpy as jnp
from jax import lax
from jax.experimental import pallas as pl
from jax.experimental.pallas import tpu as pltpu

EPS = 1e-5
LEVELS = 4
C_OUT = 32            # channels of every conv
H_IMG = 2 * C_OUT     # 64 rows of the 2-D "image" (concat of the two 1-D branches)


# ----------------------------------------------------------------------------- helpers
def spp_geometry(H, W, levels):
    geoms = []
    for l in range(levels):
        n = l + 1
        kh = -(-H // n)
        kw = -(-W // n)
        sh = H // n
        sw = W // n
        oh = (H - kh) // sh + 1
        ow = (W - kw) // sw + 1
        geoms.append((kh, kw, sh, sw, oh, ow))
    return geoms


def _tree_max(parts):
    """Balanced max-reduce over a list of equal-shaped arrays (short dep chain)."""
    while len(parts) > 1:
        nxt = [jnp.maximum(parts[t], parts[t + 1]) for t in range(0, len(parts) - 1, 2)]
        if len(parts) % 2:
            nxt.append(parts[-1])
        parts = nxt
    return parts[0]


# ----------------------------------------------------------------------------- kernel
def make_fused_kernel(M):
    """Whole DeepRaman forward for ONE batch element per grid step."""
    C = C_OUT
    H = H_IMG
    geoms = spp_geometry(H, M, LEVELS)

    def kernel(p1_ref, w1_ref, h1_ref,                 # 1-D stage (both branches)
               w2_ref, h2_ref,                         # 2-D stage (banded matmul)
               wf1_ref, bf1_ref, wf2_ref, bf2_ref,     # MLP
               o_ref):
        f32 = jnp.float32
        bf16 = jnp.bfloat16

        # -- stage 1: Conv1d(1->32,k7,p3)+BN+ReLU+MaxPool1d(3), branches A & B fused.
        #    p1: (M, 18) shifted-input columns (9 per branch), w1: (18, 192) block
        #    weight with the BN scale already folded in (3 taps x 2 branches).
        y1 = jnp.dot(p1_ref[0].astype(bf16), w1_ref[...],
                     preferred_element_type=f32)                       # (M, 192)
        a1 = jnp.maximum(y1 + h1_ref[...], 0.0)
        pool_a = _tree_max([a1[:, 0:C], a1[:, C:2 * C], a1[:, 2 * C:3 * C]])
        pool_b = _tree_max([a1[:, 3 * C:4 * C], a1[:, 4 * C:5 * C], a1[:, 5 * C:6 * C]])
        # 2-D image I[h, w] (h = 64 concatenated channels, w = M positions),
        # held as img[w, h]: positions on sublanes, channels on lanes.
        img = jnp.concatenate([pool_a, pool_b], axis=1)                # (M, 64)

        # -- stage 2: Conv2d(1->32, 7x7, pad 3) + BN + ReLU as one banded matmul
        #    (BN scale folded into the banded weight).
        zpad = jnp.zeros((3, H), f32)
        imgp = jnp.concatenate([zpad, img, zpad], axis=0)              # (M+6, 64)
        p2 = jnp.concatenate([imgp[dw:dw + M, :] for dw in range(7)], axis=1)  # (M, 448)
        y2 = jnp.dot(p2.astype(bf16), w2_ref[...],
                     preferred_element_type=f32)                       # (M, 2048)
        a2 = jnp.maximum(y2 + h2_ref[...], 0.0)                        # [w, i*32 + c]

        # -- stage 3: 4-level spatial pyramid max pooling -> (1, 960) features
        def row_group_max(i0, kh):                                     # max over image rows
            return _tree_max([a2[:, (i0 + di) * C:(i0 + di + 1) * C] for di in range(kh)])

        feats = []
        for (kh, kw, sh, sw, oh, ow) in geoms:
            for bi in range(oh):
                g = row_group_max(bi * sh, kh)                         # (M, 32)
                for bj in range(ow):
                    feats.append(jnp.max(g[bj * sw:bj * sw + kw, :],
                                         axis=0, keepdims=True))       # (1, 32)
        feat = jnp.concatenate(feats, axis=1)                          # (1, n_bins*32)

        # -- stage 4: Linear(960,1024)+ReLU+[Dropout=id in eval]+Linear(1024,1)+Sigmoid
        hid = jnp.dot(feat.astype(bf16), wf1_ref[...],
                      preferred_element_type=f32) + bf1_ref[...]
        hid = jnp.maximum(hid, 0.0)                                    # (1, 1024)
        y = jnp.sum(hid * wf2_ref[...], axis=1, keepdims=True) + bf2_ref[...]
        o_ref[0] = 1.0 / (1.0 + jnp.exp(-y))                           # (1, 1)

    return kernel


# ----------------------------------------------------------------------------- forward
def deepraman_forward(x, params):
    N, two, L = x.shape
    assert two == 2 and L % 3 == 0
    M = L // 3

    # Stage-1 shifted columns (tiny XLA fusion on the raw input): for batch n, output
    # position m and shift s in [0, 9) the column value is xpad[n, 3m + s].  Tap
    # duplication (3 pool taps x 7 kernel taps share these 9 shifts) is folded into w1c.
    def branch_shifts(sig):
        xpad = jnp.pad(sig, ((0, 0), (3, 3)))                                   # (N, L+6)
        return jnp.stack([xpad[:, s:s + L:3] for s in range(9)], axis=-1)       # (N, M, 9)

    patches = jnp.concatenate([branch_shifts(x[:, 0, :]),
                               branch_shifts(x[:, 1, :])], axis=-1)             # (N, M, 18)

    n_feat, fc_h = params['w_fc1_perm'].shape
    c6 = 6 * C_OUT
    hc = H_IMG * C_OUT

    out = pl.pallas_call(
        make_fused_kernel(M),
        out_shape=jax.ShapeDtypeStruct((N, 1, 1), jnp.float32),
        grid=(N,),
        in_specs=[
            pl.BlockSpec((1, M, 18), lambda b: (b, 0, 0)),       # shifted input columns
            pl.BlockSpec((18, c6), lambda b: (0, 0)),            # stage-1 block weight
            pl.BlockSpec((1, c6), lambda b: (0, 0)),             # BN1 shift (A|B x taps)
            pl.BlockSpec((7 * H_IMG, hc), lambda b: (0, 0)),     # banded conv2d weight
            pl.BlockSpec((1, hc), lambda b: (0, 0)),             # BN2 shift (tiled)
            pl.BlockSpec((n_feat, fc_h), lambda b: (0, 0)),      # FC1 (rows SPP-permuted)
            pl.BlockSpec((1, fc_h), lambda b: (0, 0)),           # FC1 bias
            pl.BlockSpec((1, fc_h), lambda b: (0, 0)),           # FC2 weight row
            pl.BlockSpec((1, 1), lambda b: (0, 0)),              # FC2 bias
        ],
        out_specs=pl.BlockSpec((1, 1, 1), lambda b: (b, 0, 0)),
        compiler_params=pltpu.CompilerParams(
            dimension_semantics=("parallel",),
            vmem_limit_bytes=32 * 1024 * 1024,
        ),
    )(patches, params['w1c'], params['shift1'],
      params['wbig'], params['shift2'],
      params['w_fc1_perm'], params['b_fc1'], params['w_fc2_row'], params['b_fc2'])
    return out.reshape(N, 1)


# ----------------------------------------------------------------------------- params
def init_params(key):
    keys = iter(jax.random.split(key, 40))
    nk = lambda: next(keys)

    def conv_bn(shape_w, fan_in):
        co = shape_w[0]
        return dict(
            w=jax.random.normal(nk(), shape_w, jnp.float32) * np.sqrt(2.0 / fan_in),
            b=0.05 * jax.random.normal(nk(), (co,), jnp.float32),
            g=1.0 + 0.1 * jax.random.normal(nk(), (co,), jnp.float32),
            beta=0.1 * jax.random.normal(nk(), (co,), jnp.float32),
            mean=0.05 * jax.random.normal(nk(), (co,), jnp.float32),
            var=1.0 + 0.1 * jnp.abs(jax.random.normal(nk(), (co,), jnp.float32)),
        )

    return {
        'cbA': conv_bn((C_OUT, 1, 7), 7),
        'cbB': conv_bn((C_OUT, 1, 7), 7),
        'cb2': conv_bn((C_OUT, 1, 7, 7), 49),
        'w_fc1': jax.random.normal(nk(), (1024, 960), jnp.float32) * np.sqrt(2.0 / 960.0),
        'b_fc1': 0.05 * jax.random.normal(nk(), (1024,), jnp.float32),
        'w_fc2': jax.random.normal(nk(), (1, 1024), jnp.float32) * np.sqrt(2.0 / 1025.0),
        'b_fc2': 0.05 * jax.random.normal(nk(), (1,), jnp.float32),
    }


def fold_params(p, M):
    """One-time host-side preprocessing: BN folding (scale folded into weights),
    branch/tap merging, banded conv2d weight, SPP->PyTorch column permutation folded
    into FC1, bf16 weight casting."""
    C = C_OUT
    H = H_IMG

    def fold_bn(cb):
        scale = np.asarray(cb['g'] / jnp.sqrt(cb['var'] + EPS))
        shift = np.asarray(cb['beta'] + (cb['b'] - cb['mean'])
                           * (cb['g'] / jnp.sqrt(cb['var'] + EPS)))
        return scale, shift

    # --- stage 1: (18, 192) block weight; cols [0:96) = branch A taps, [96:192) = B.
    #     Column value of patch s is xpad[3m + s]; pool-tap j output (col C*j + c)
    #     needs weight wA[s - j, c] (k = s - j).  BN scale is folded into the columns.
    wA = np.asarray(p['cbA']['w'])[:, 0, :].T          # (7, 32) [k, c]
    wB = np.asarray(p['cbB']['w'])[:, 0, :].T
    w1c = np.zeros((18, 6 * C), np.float32)
    for j in range(3):
        for k in range(7):
            s = j + k
            w1c[s, C * j:C * (j + 1)] = wA[k]
            w1c[9 + s, 3 * C + C * j:3 * C + C * (j + 1)] = wB[k]
    sA, hA = fold_bn(p['cbA'])
    sB, hB = fold_bn(p['cbB'])
    scale1 = np.concatenate([np.tile(sA, 3), np.tile(sB, 3)]).astype(np.float32)   # (192,)
    shift1 = np.concatenate([np.tile(hA, 3), np.tile(hB, 3)]).reshape(1, -1).astype(np.float32)
    w1c = w1c * scale1[None, :]

    # --- stage 2: banded matmul weight Wbig[dw*H + h, i*C + c] = w2[c, h-i+3, dw],
    #     BN scale folded into the columns.
    w2 = np.asarray(p['cb2']['w'])[:, 0, :, :]          # (32, 7, 7) [c, dh, dw]
    wbig = np.zeros((7 * H, H * C), np.float32)
    for dw in range(7):
        for h in range(H):
            for i in range(max(0, h - 3), min(H - 1, h + 3) + 1):
                wbig[dw * H + h, i * C:(i + 1) * C] = w2[:, h - i + 3, dw]
    s2, h2 = fold_bn(p['cb2'])
    scale2 = np.tile(s2, H).astype(np.float32)                                      # (2048,)
    shift2 = np.tile(h2, H).reshape(1, -1).astype(np.float32)
    wbig = wbig * scale2[None, :]

    # --- fold SPP "natural" -> PyTorch (channel-major) column order into FC1 rows.
    geoms = spp_geometry(H, M, LEVELS)
    idx = []
    off = 0
    for (_, _, _, _, oh, ow) in geoms:
        for c in range(C):
            for i in range(oh):
                for j in range(ow):
                    idx.append(off + (i * ow + j) * C + c)
        off += oh * ow * C
    idx = np.asarray(idx, np.int64)
    n_feat = off
    inv = np.zeros(n_feat, np.int64)
    inv[idx] = np.arange(n_feat)
    w_fc1_t = np.asarray(p['w_fc1']).T                  # (960, 1024), PyTorch row order
    assert w_fc1_t.shape[0] == n_feat, (w_fc1_t.shape, n_feat)
    w_fc1_perm = w_fc1_t[inv]

    return {
        'w1c': jnp.asarray(w1c, jnp.bfloat16),
        'shift1': jnp.asarray(shift1),
        'wbig': jnp.asarray(wbig, jnp.bfloat16),
        'shift2': jnp.asarray(shift2),
        'w_fc1_perm': jnp.asarray(w_fc1_perm, jnp.bfloat16),
        'b_fc1': jnp.asarray(np.asarray(p['b_fc1']).reshape(1, -1)),
        'w_fc2_row': jnp.asarray(np.asarray(p['w_fc2']).reshape(1, -1)),
        'b_fc2': jnp.asarray(np.asarray(p['b_fc2']).reshape(1, 1)),
    }


# ----------------------------------------------------------------------------- pure-JAX reference
def reference_forward(x, p):
    N = x.shape[0]

    def bn_eval(y, cb):
        sh = [1] * y.ndim
        sh[1] = -1
        return ((y - cb['mean'].reshape(sh)) / jnp.sqrt(cb['var'].reshape(sh) + EPS)
                * cb['g'].reshape(sh) + cb['beta'].reshape(sh))

    def branch(sig, cb):
        y = lax.conv_general_dilated(sig[:, None, :], cb['w'], (1,), [(3, 3)],
                                     dimension_numbers=('NCH', 'OIH', 'NCH'),
                                     precision=lax.Precision.HIGHEST)
        y = y + cb['b'][None, :, None]
        y = jnp.maximum(bn_eval(y, cb), 0.0)
        return lax.reduce_window(y, -jnp.inf, lax.max, (1, 1, 3), (1, 1, 3), 'VALID')

    pa = branch(x[:, 0, :], p['cbA'])
    pb = branch(x[:, 1, :], p['cbB'])
    con = jnp.concatenate([pa, pb], axis=1)[:, None, :, :]
    y2 = lax.conv_general_dilated(con, p['cb2']['w'], (1, 1), [(3, 3), (3, 3)],
                                  dimension_numbers=('NCHW', 'OIHW', 'NCHW'),
                                  precision=lax.Precision.HIGHEST)
    y2 = y2 + p['cb2']['b'][None, :, None, None]
    y2 = jnp.maximum(bn_eval(y2, p['cb2']), 0.0)

    H, W = y2.shape[2], y2.shape[3]
    feats = []
    for (kh, kw, sh_, sw, oh, ow) in spp_geometry(H, W, LEVELS):
        pooled = lax.reduce_window(y2, -jnp.inf, lax.max,
                                   (1, 1, kh, kw), (1, 1, sh_, sw), 'VALID')
        feats.append(pooled.reshape(N, -1))
    feat = jnp.concatenate(feats, axis=1)

    h = jnp.maximum(jnp.dot(feat, p['w_fc1'].T, precision=lax.Precision.HIGHEST)
                    + p['b_fc1'], 0.0)
    y = jnp.dot(h, p['w_fc2'].T, precision=lax.Precision.HIGHEST) + p['b_fc2']
    return 1.0 / (1.0 + jnp.exp(-y))


# ----------------------------------------------------------------------------- main
if __name__ == "__main__":
    key = jax.random.PRNGKey(0)
    pkey, xkey = jax.random.split(key)

    N, L = 2, 36                 # L//3 = 12 -> SPP yields the 960 features Linear expects
    M = L // 3

    params_raw = init_params(pkey)
    params = fold_params(params_raw, M)
    x = jax.random.normal(xkey, (N, 2, L), jnp.float32)

    fwd = jax.jit(deepraman_forward)
    out = jax.block_until_ready(fwd(x, params))
    ref = jax.block_until_ready(reference_forward(x, params_raw))

    assert out.shape == (N, 1), out.shape
    err = float(jnp.max(jnp.abs(out - ref)))
    # Kernel uses bf16 MXU inputs with f32 accumulation; reference is f32 HIGHEST,
    # so allow a few e-2 on the sigmoid output (layout/permutation bugs would be >>).
    assert err < 3e-2, f"mismatch vs pure-JAX reference: max abs err = {err}"
    print("KERNEL_OK")
</pallas_src>

<mosaic_0001>
module attributes {stable_mosaic.version = 11 : i64} {
  func.func @kernel(%arg0: i32, %arg1: memref<1x12x18xf32, #tpu.memory_space<vmem>>, %arg2: memref<18x192xbf16, #tpu.memory_space<vmem>>, %arg3: memref<1x192xf32, #tpu.memory_space<vmem>>, %arg4: memref<448x2048xbf16, #tpu.memory_space<vmem>>, %arg5: memref<1x2048xf32, #tpu.memory_space<vmem>>, %arg6: memref<960x1024xbf16, #tpu.memory_space<vmem>>, %arg7: memref<1x1024xf32, #tpu.memory_space<vmem>>, %arg8: memref<1x1024xf32, #tpu.memory_space<vmem>>, %arg9: memref<1x1xf32, #tpu.memory_space<vmem>>, %arg10: memref<1x1x1xf32, #tpu.memory_space<vmem>>) attributes {dimension_semantics = [#tpu.dimension_semantics<parallel>], iteration_bounds = array<i64: 2>, scalar_prefetch = 0 : i64, scratch_operands = 0 : i64, tpu.core_type = #tpu.core_type<tc>, window_params = [{transform_indices = @transform_0, window_bounds = array<i64: 1, 12, 18>}, {pipeline_mode = #tpu.pipeline_mode<synchronous>, transform_indices = @transform_1, window_bounds = array<i64: 18, 192>}, {pipeline_mode = #tpu.pipeline_mode<synchronous>, transform_indices = @transform_2, window_bounds = array<i64: 1, 192>}, {pipeline_mode = #tpu.pipeline_mode<synchronous>, transform_indices = @transform_3, window_bounds = array<i64: 448, 2048>}, {pipeline_mode = #tpu.pipeline_mode<synchronous>, transform_indices = @transform_4, window_bounds = array<i64: 1, 2048>}, {pipeline_mode = #tpu.pipeline_mode<synchronous>, transform_indices = @transform_5, window_bounds = array<i64: 960, 1024>}, {pipeline_mode = #tpu.pipeline_mode<synchronous>, transform_indices = @transform_6, window_bounds = array<i64: 1, 1024>}, {pipeline_mode = #tpu.pipeline_mode<synchronous>, transform_indices = @transform_7, window_bounds = array<i64: 1, 1024>}, {pipeline_mode = #tpu.pipeline_mode<synchronous>, transform_indices = @transform_8, window_bounds = array<i64: 1, 1>}, {transform_indices = @transform_9, window_bounds = array<i64: 1, 1, 1>}]} {
    %c0 = arith.constant 0 : index
    %c0_0 = arith.constant 0 : index
    %c0_1 = arith.constant 0 : index
    %0 = vector.load %arg1[%c0, %c0_0, %c0_1] : memref<1x12x18xf32, #tpu.memory_space<vmem>>, vector<1x12x18xf32>
    %1 = vector.shape_cast %0 : vector<1x12x18xf32> to vector<12x18xf32>
    %2 = arith.truncf %1 : vector<12x18xf32> to vector<12x18xbf16>
    %c0_2 = arith.constant 0 : index
    %c0_3 = arith.constant 0 : index
    %3 = vector.load %arg2[%c0_2, %c0_3] : memref<18x192xbf16, #tpu.memory_space<vmem>>, vector<18x192xbf16>
    %cst = arith.constant dense<0.000000e+00> : vector<12x192xf32>
    %4 = tpu.matmul %2, %3, %cst {dimension_numbers = #tpu.dot_dimension_numbers<[1], [0], [0], [1], [0, 0, 1, 1], [], []>} : vector<12x18xbf16>, vector<18x192xbf16>, vector<12x192xf32> -> vector<12x192xf32>
    %c0_4 = arith.constant 0 : index
    %c0_5 = arith.constant 0 : index
    %5 = vector.load %arg3[%c0_4, %c0_5] : memref<1x192xf32, #tpu.memory_space<vmem>>, vector<1x192xf32>
    %6 = vector.broadcast %5 : vector<1x192xf32> to vector<12x192xf32>
    %7 = arith.addf %4, %6 : vector<12x192xf32>
    %cst_6 = arith.constant 0.000000e+00 : f32
    %8 = vector.broadcast %cst_6 : f32 to vector<12x192xf32>
    %9 = arith.maximumf %7, %8 : vector<12x192xf32>
    %10 = vector.extract_strided_slice %9 {offsets = [0, 0], sizes = [12, 32], strides = [1, 1]} : vector<12x192xf32> to vector<12x32xf32>
    %11 = vector.extract_strided_slice %9 {offsets = [0, 32], sizes = [12, 32], strides = [1, 1]} : vector<12x192xf32> to vector<12x32xf32>
    %12 = vector.extract_strided_slice %9 {offsets = [0, 64], sizes = [12, 32], strides = [1, 1]} : vector<12x192xf32> to vector<12x32xf32>
    %13 = arith.maximumf %10, %11 : vector<12x32xf32>
    %14 = arith.maximumf %13, %12 : vector<12x32xf32>
    %15 = vector.extract_strided_slice %9 {offsets = [0, 96], sizes = [12, 32], strides = [1, 1]} : vector<12x192xf32> to vector<12x32xf32>
    %16 = vector.extract_strided_slice %9 {offsets = [0, 128], sizes = [12, 32], strides = [1, 1]} : vector<12x192xf32> to vector<12x32xf32>
    %17 = vector.extract_strided_slice %9 {offsets = [0, 160], sizes = [12, 32], strides = [1, 1]} : vector<12x192xf32> to vector<12x32xf32>
    %18 = arith.maximumf %15, %16 : vector<12x32xf32>
    %19 = arith.maximumf %18, %17 : vector<12x32xf32>
    %20 = tpu.concatenate %14, %19 in 1 : vector<12x32xf32>, vector<12x32xf32> -> vector<12x64xf32>
    %cst_7 = arith.constant 0.000000e+00 : f32
    %21 = vector.broadcast %cst_7 : f32 to vector<3x64xf32>
    %22 = tpu.concatenate %21, %20, %21 in 0 : vector<3x64xf32>, vector<12x64xf32>, vector<3x64xf32> -> vector<18x64xf32>
    %23 = vector.extract_strided_slice %22 {offsets = [0, 0], sizes = [12, 64], strides = [1, 1]} : vector<18x64xf32> to vector<12x64xf32>
    %24 = vector.extract_strided_slice %22 {offsets = [1, 0], sizes = [12, 64], strides = [1, 1]} : vector<18x64xf32> to vector<12x64xf32>
    %25 = vector.extract_strided_slice %22 {offsets = [2, 0], sizes = [12, 64], strides = [1, 1]} : vector<18x64xf32> to vector<12x64xf32>
    %26 = vector.extract_strided_slice %22 {offsets = [3, 0], sizes = [12, 64], strides = [1, 1]} : vector<18x64xf32> to vector<12x64xf32>
    %27 = vector.extract_strided_slice %22 {offsets = [4, 0], sizes = [12, 64], strides = [1, 1]} : vector<18x64xf32> to vector<12x64xf32>
    %28 = vector.extract_strided_slice %22 {offsets = [5, 0], sizes = [12, 64], strides = [1, 1]} : vector<18x64xf32> to vector<12x64xf32>
    %29 = vector.extract_strided_slice %22 {offsets = [6, 0], sizes = [12, 64], strides = [1, 1]} : vector<18x64xf32> to vector<12x64xf32>
    %30 = tpu.concatenate %23, %24, %25, %26, %27, %28, %29 in 1 : vector<12x64xf32>, vector<12x64xf32>, vector<12x64xf32>, vector<12x64xf32>, vector<12x64xf32>, vector<12x64xf32>, vector<12x64xf32> -> vector<12x448xf32>
    %31 = arith.truncf %30 : vector<12x448xf32> to vector<12x448xbf16>
    %c0_8 = arith.constant 0 : index
    %c0_9 = arith.constant 0 : index
    %32 = vector.load %arg4[%c0_8, %c0_9] : memref<448x2048xbf16, #tpu.memory_space<vmem>>, vector<448x2048xbf16>
    %cst_10 = arith.constant dense<0.000000e+00> : vector<12x2048xf32>
    %33 = tpu.matmul %31, %32, %cst_10 {dimension_numbers = #tpu.dot_dimension_numbers<[1], [0], [0], [1], [0, 0, 1, 1], [], []>} : vector<12x448xbf16>, vector<448x2048xbf16>, vector<12x2048xf32> -> vector<12x2048xf32>
    %c0_11 = arith.constant 0 : index
    %c0_12 = arith.constant 0 : index
    %34 = vector.load %arg5[%c0_11, %c0_12] : memref<1x2048xf32, #tpu.memory_space<vmem>>, vector<1x2048xf32>
    %35 = vector.broadcast %34 : vector<1x2048xf32> to vector<12x2048xf32>
    %36 = arith.addf %33, %35 : vector<12x2048xf32>
    %cst_13 = arith.constant 0.000000e+00 : f32
    %37 = vector.broadcast %cst_13 : f32 to vector<12x2048xf32>
    %38 = arith.maximumf %36, %37 : vector<12x2048xf32>
    %39 = vector.extract_strided_slice %38 {offsets = [0, 0], sizes = [12, 32], strides = [1, 1]} : vector<12x2048xf32> to vector<12x32xf32>
    %40 = vector.extract_strided_slice %38 {offsets = [0, 32], sizes = [12, 32], strides = [1, 1]} : vector<12x2048xf32> to vector<12x32xf32>
    %41 = vector.extract_strided_slice %38 {offsets = [0, 64], sizes = [12, 32], strides = [1, 1]} : vector<12x2048xf32> to vector<12x32xf32>
    %42 = vector.extract_strided_slice %38 {offsets = [0, 96], sizes = [12, 32], strides = [1, 1]} : vector<12x2048xf32> to vector<12x32xf32>
    %43 = vector.extract_strided_slice %38 {offsets = [0, 128], sizes = [12, 32], strides = [1, 1]} : vector<12x2048xf32> to vector<12x32xf32>
    %44 = vector.extract_strided_slice %38 {offsets = [0, 160], sizes = [12, 32], strides = [1, 1]} : vector<12x2048xf32> to vector<12x32xf32>
    %45 = vector.extract_strided_slice %38 {offsets = [0, 192], sizes = [12, 32], strides = [1, 1]} : vector<12x2048xf32> to vector<12x32xf32>
    %46 = vector.extract_strided_slice %38 {offsets = [0, 224], sizes = [12, 32], strides = [1, 1]} : vector<12x2048xf32> to vector<12x32xf32>
    %47 = vector.extract_strided_slice %38 {offsets = [0, 256], sizes = [12, 32], strides = [1, 1]} : vector<12x2048xf32> to vector<12x32xf32>
    %48 = vector.extract_strided_slice %38 {offsets = [0, 288], sizes = [12, 32], strides = [1, 1]} : vector<12x2048xf32> to vector<12x32xf32>
    %49 = vector.extract_strided_slice %38 {offsets = [0, 320], sizes = [12, 32], strides = [1, 1]} : vector<12x2048xf32> to vector<12x32xf32>
    %50 = vector.extract_strided_slice %38 {offsets = [0, 352], sizes = [12, 32], strides = [1, 1]} : vector<12x2048xf32> to vector<12x32xf32>
    %51 = vector.extract_strided_slice %38 {offsets = [0, 384], sizes = [12, 32], strides = [1, 1]} : vector<12x2048xf32> to vector<12x32xf32>
    %52 = vector.extract_strided_slice %38 {offsets = [0, 416], sizes = [12, 32], strides = [1, 1]} : vector<12x2048xf32> to vector<12x32xf32>
    %53 = vector.extract_strided_slice %38 {offsets = [0, 448], sizes = [12, 32], strides = [1, 1]} : vector<12x2048xf32> to vector<12x32xf32>
    %54 = vector.extract_strided_slice %38 {offsets = [0, 480], sizes = [12, 32], strides = [1, 1]} : vector<12x2048xf32> to vector<12x32xf32>
    %55 = vector.extract_strided_slice %38 {offsets = [0, 512], sizes = [12, 32], strides = [1, 1]} : vector<12x2048xf32> to vector<12x32xf32>
    %56 = vector.extract_strided_slice %38 {offsets = [0, 544], sizes = [12, 32], strides = [1, 1]} : vector<12x2048xf32> to vector<12x32xf32>
    %57 = vector.extract_strided_slice %38 {offsets = [0, 576], sizes = [12, 32], strides = [1, 1]} : vector<12x2048xf32> to vector<12x32xf32>
    %58 = vector.extract_strided_slice %38 {offsets = [0, 608], sizes = [12, 32], strides = [1, 1]} : vector<12x2048xf32> to vector<12x32xf32>
    %59 = vector.extract_strided_slice %38 {offsets = [0, 640], sizes = [12, 32], strides = [1, 1]} : vector<12x2048xf32> to vector<12x32xf32>
    %60 = vector.extract_strided_slice %38 {offsets = [0, 672], sizes = [12, 32], strides = [1, 1]} : vector<12x2048xf32> to vector<12x32xf32>
    %61 = vector.extract_strided_slice %38 {offsets = [0, 704], sizes = [12, 32], strides = [1, 1]} : vector<12x2048xf32> to vector<12x32xf32>
    %62 = vector.extract_strided_slice %38 {offsets = [0, 736], sizes = [12, 32], strides = [1, 1]} : vector<12x2048xf32> to vector<12x32xf32>
    %63 = vector.extract_strided_slice %38 {offsets = [0, 768], sizes = [12, 32], strides = [1, 1]} : vector<12x2048xf32> to vector<12x32xf32>
    %64 = vector.extract_strided_slice %38 {offsets = [0, 800], sizes = [12, 32], strides = [1, 1]} : vector<12x2048xf32> to vector<12x32xf32>
    %65 = vector.extract_strided_slice %38 {offsets = [0, 832], sizes = [12, 32], strides = [1, 1]} : vector<12x2048xf32> to vector<12x32xf32>
    %66 = vector.extract_strided_slice %38 {offsets = [0, 864], sizes = [12, 32], strides = [1, 1]} : vector<12x2048xf32> to vector<12x32xf32>
    %67 = vector.extract_strided_slice %38 {offsets = [0, 896], sizes = [12, 32], strides = [1, 1]} : vector<12x2048xf32> to vector<12x32xf32>
    %68 = vector.extract_strided_slice %38 {offsets = [0, 928], sizes = [12, 32], strides = [1, 1]} : vector<12x2048xf32> to vector<12x32xf32>
    %69 = vector.extract_strided_slice %38 {offsets = [0, 960], sizes = [12, 32], strides = [1, 1]} : vector<12x2048xf32> to vector<12x32xf32>
    %70 = vector.extract_strided_slice %38 {offsets = [0, 992], sizes = [12, 32], strides = [1, 1]} : vector<12x2048xf32> to vector<12x32xf32>
    %71 = vector.extract_strided_slice %38 {offsets = [0, 1024], sizes = [12, 32], strides = [1, 1]} : vector<12x2048xf32> to vector<12x32xf32>
    %72 = vector.extract_strided_slice %38 {offsets = [0, 1056], sizes = [12, 32], strides = [1, 1]} : vector<12x2048xf32> to vector<12x32xf32>
    %73 = vector.extract_strided_slice %38 {offsets = [0, 1088], sizes = [12, 32], strides = [1, 1]} : vector<12x2048xf32> to vector<12x32xf32>
    %74 = vector.extract_strided_slice %38 {offsets = [0, 1120], sizes = [12, 32], strides = [1, 1]} : vector<12x2048xf32> to vector<12x32xf32>
    %75 = vector.extract_strided_slice %38 {offsets = [0, 1152], sizes = [12, 32], strides = [1, 1]} : vector<12x2048xf32> to vector<12x32xf32>
    %76 = vector.extract_strided_slice %38 {offsets = [0, 1184], sizes = [12, 32], strides = [1, 1]} : vector<12x2048xf32> to vector<12x32xf32>
    %77 = vector.extract_strided_slice %38 {offsets = [0, 1216], sizes = [12, 32], strides = [1, 1]} : vector<12x2048xf32> to vector<12x32xf32>
    %78 = vector.extract_strided_slice %38 {offsets = [0, 1248], sizes = [12, 32], strides = [1, 1]} : vector<12x2048xf32> to vector<12x32xf32>
    %79 = vector.extract_strided_slice %38 {offsets = [0, 1280], sizes = [12, 32], strides = [1, 1]} : vector<12x2048xf32> to vector<12x32xf32>
    %80 = vector.extract_strided_slice %38 {offsets = [0, 1312], sizes = [12, 32], strides = [1, 1]} : vector<12x2048xf32> to vector<12x32xf32>
    %81 = vector.extract_strided_slice %38 {offsets = [0, 1344], sizes = [12, 32], strides = [1, 1]} : vector<12x2048xf32> to vector<12x32xf32>
    %82 = vector.extract_strided_slice %38 {offsets = [0, 1376], sizes = [12, 32], strides = [1, 1]} : vector<12x2048xf32> to vector<12x32xf32>
    %83 = vector.extract_strided_slice %38 {offsets = [0, 1408], sizes = [12, 32], strides = [1, 1]} : vector<12x2048xf32> to vector<12x32xf32>
    %84 = vector.extract_strided_slice %38 {offsets = [0, 1440], sizes = [12, 32], strides = [1, 1]} : vector<12x2048xf32> to vector<12x32xf32>
    %85 = vector.extract_strided_slice %38 {offsets = [0, 1472], sizes = [12, 32], strides = [1, 1]} : vector<12x2048xf32> to vector<12x32xf32>
    %86 = vector.extract_strided_slice %38 {offsets = [0, 1504], sizes = [12, 32], strides = [1, 1]} : vector<12x2048xf32> to vector<12x32xf32>
    %87 = vector.extract_strided_slice %38 {offsets = [0, 1536], sizes = [12, 32], strides = [1, 1]} : vector<12x2048xf32> to vector<12x32xf32>
    %88 = vector.extract_strided_slice %38 {offsets = [0, 1568], sizes = [12, 32], strides = [1, 1]} : vector<12x2048xf32> to vector<12x32xf32>
    %89 = vector.extract_strided_slice %38 {offsets = [0, 1600], sizes = [12, 32], strides = [1, 1]} : vector<12x2048xf32> to vector<12x32xf32>
    %90 = vector.extract_strided_slice %38 {offsets = [0, 1632], sizes = [12, 32], strides = [1, 1]} : vector<12x2048xf32> to vector<12x32xf32>
    %91 = vector.extract_strided_slice %38 {offsets = [0, 1664], sizes = [12, 32], strides = [1, 1]} : vector<12x2048xf32> to vector<12x32xf32>
    %92 = vector.extract_strided_slice %38 {offsets = [0, 1696], sizes = [12, 32], strides = [1, 1]} : vector<12x2048xf32> to vector<12x32xf32>
    %93 = vector.extract_strided_slice %38 {offsets = [0, 1728], sizes = [12, 32], strides = [1, 1]} : vector<12x2048xf32> to vector<12x32xf32>
    %94 = vector.extract_strided_slice %38 {offsets = [0, 1760], sizes = [12, 32], strides = [1, 1]} : vector<12x2048xf32> to vector<12x32xf32>
    %95 = vector.extract_strided_slice %38 {offsets = [0, 1792], sizes = [12, 32], strides = [1, 1]} : vector<12x2048xf32> to vector<12x32xf32>
    %96 = vector.extract_strided_slice %38 {offsets = [0, 1824], sizes = [12, 32], strides = [1, 1]} : vector<12x2048xf32> to vector<12x32xf32>
    %97 = vector.extract_strided_slice %38 {offsets = [0, 1856], sizes = [12, 32], strides = [1, 1]} : vector<12x2048xf32> to vector<12x32xf32>
    %98 = vector.extract_strided_slice %38 {offsets = [0, 1888], sizes = [12, 32], strides = [1, 1]} : vector<12x2048xf32> to vector<12x32xf32>
    %99 = vector.extract_strided_slice %38 {offsets = [0, 1920], sizes = [12, 32], strides = [1, 1]} : vector<12x2048xf32> to vector<12x32xf32>
    %100 = vector.extract_strided_slice %38 {offsets = [0, 1952], sizes = [12, 32], strides = [1, 1]} : vector<12x2048xf32> to vector<12x32xf32>
    %101 = vector.extract_strided_slice %38 {offsets = [0, 1984], sizes = [12, 32], strides = [1, 1]} : vector<12x2048xf32> to vector<12x32xf32>
    %102 = vector.extract_strided_slice %38 {offsets = [0, 2016], sizes = [12, 32], strides = [1, 1]} : vector<12x2048xf32> to vector<12x32xf32>
    %103 = arith.maximumf %39, %40 : vector<12x32xf32>
    %104 = arith.maximumf %41, %42 : vector<12x32xf32>
    %105 = arith.maximumf %43, %44 : vector<12x32xf32>
    %106 = arith.maximumf %45, %46 : vector<12x32xf32>
    %107 = arith.maximumf %47, %48 : vector<12x32xf32>
    %108 = arith.maximumf %49, %50 : vector<12x32xf32>
    %109 = arith.maximumf %51, %52 : vector<12x32xf32>
    %110 = arith.maximumf %53, %54 : vector<12x32xf32>
    %111 = arith.maximumf %55, %56 : vector<12x32xf32>
    %112 = arith.maximumf %57, %58 : vector<12x32xf32>
    %113 = arith.maximumf %59, %60 : vector<12x32xf32>
    %114 = arith.maximumf %61, %62 : vector<12x32xf32>
    %115 = arith.maximumf %63, %64 : vector<12x32xf32>
    %116 = arith.maximumf %65, %66 : vector<12x32xf32>
    %117 = arith.maximumf %67, %68 : vector<12x32xf32>
    %118 = arith.maximumf %69, %70 : vector<12x32xf32>
    %119 = arith.maximumf %71, %72 : vector<12x32xf32>
    %120 = arith.maximumf %73, %74 : vector<12x32xf32>
    %121 = arith.maximumf %75, %76 : vector<12x32xf32>
    %122 = arith.maximumf %77, %78 : vector<12x32xf32>
    %123 = arith.maximumf %79, %80 : vector<12x32xf32>
    %124 = arith.maximumf %81, %82 : vector<12x32xf32>
    %125 = arith.maximumf %83, %84 : vector<12x32xf32>
    %126 = arith.maximumf %85, %86 : vector<12x32xf32>
    %127 = arith.maximumf %87, %88 : vector<12x32xf32>
    %128 = arith.maximumf %89, %90 : vector<12x32xf32>
    %129 = arith.maximumf %91, %92 : vector<12x32xf32>
    %130 = arith.maximumf %93, %94 : vector<12x32xf32>
    %131 = arith.maximumf %95, %96 : vector<12x32xf32>
    %132 = arith.maximumf %97, %98 : vector<12x32xf32>
    %133 = arith.maximumf %99, %100 : vector<12x32xf32>
    %134 = arith.maximumf %101, %102 : vector<12x32xf32>
    %135 = arith.maximumf %103, %104 : vector<12x32xf32>
    %136 = arith.maximumf %105, %106 : vector<12x32xf32>
    %137 = arith.maximumf %107, %108 : vector<12x32xf32>
    %138 = arith.maximumf %109, %110 : vector<12x32xf32>
    %139 = arith.maximumf %111, %112 : vector<12x32xf32>
    %140 = arith.maximumf %113, %114 : vector<12x32xf32>
    %141 = arith.maximumf %115, %116 : vector<12x32xf32>
    %142 = arith.maximumf %117, %118 : vector<12x32xf32>
    %143 = arith.maximumf %119, %120 : vector<12x32xf32>
    %144 = arith.maximumf %121, %122 : vector<12x32xf32>
    %145 = arith.maximumf %123, %124 : vector<12x32xf32>
    %146 = arith.maximumf %125, %126 : vector<12x32xf32>
    %147 = arith.maximumf %127, %128 : vector<12x32xf32>
    %148 = arith.maximumf %129, %130 : vector<12x32xf32>
    %149 = arith.maximumf %131, %132 : vector<12x32xf32>
    %150 = arith.maximumf %133, %134 : vector<12x32xf32>
    %151 = arith.maximumf %135, %136 : vector<12x32xf32>
    %152 = arith.maximumf %137, %138 : vector<12x32xf32>
    %153 = arith.maximumf %139, %140 : vector<12x32xf32>
    %154 = arith.maximumf %141, %142 : vector<12x32xf32>
    %155 = arith.maximumf %143, %144 : vector<12x32xf32>
    %156 = arith.maximumf %145, %146 : vector<12x32xf32>
    %157 = arith.maximumf %147, %148 : vector<12x32xf32>
    %158 = arith.maximumf %149, %150 : vector<12x32xf32>
    %159 = arith.maximumf %151, %152 : vector<12x32xf32>
    %160 = arith.maximumf %153, %154 : vector<12x32xf32>
    %161 = arith.maximumf %155, %156 : vector<12x32xf32>
    %162 = arith.maximumf %157, %158 : vector<12x32xf32>
    %163 = arith.maximumf %159, %160 : vector<12x32xf32>
    %164 = arith.maximumf %161, %162 : vector<12x32xf32>
    %165 = arith.maximumf %163, %164 : vector<12x32xf32>
    %cst_14 = arith.constant dense<0xFF800000> : vector<32xf32>
    %166 = vector.multi_reduction <maximumf>, %165, %cst_14 [0] : vector<12x32xf32> to vector<32xf32>
    %167 = vector.shape_cast %166 : vector<32xf32> to vector<1x32xf32>
    %168 = vector.extract_strided_slice %38 {offsets = [0, 0], sizes = [12, 32], strides = [1, 1]} : vector<12x2048xf32> to vector<12x32xf32>
    %169 = vector.extract_strided_slice %38 {offsets = [0, 32], sizes = [12, 32], strides = [1, 1]} : vector<12x2048xf32> to vector<12x32xf32>
    %170 = vector.extract_strided_slice %38 {offsets = [0, 64], sizes = [12, 32], strides = [1, 1]} : vector<12x2048xf32> to vector<12x32xf32>
    %171 = vector.extract_strided_slice %38 {offsets = [0, 96], sizes = [12, 32], strides = [1, 1]} : vector<12x2048xf32> to vector<12x32xf32>
    %172 = vector.extract_strided_slice %38 {offsets = [0, 128], sizes = [12, 32], strides = [1, 1]} : vector<12x2048xf32> to vector<12x32xf32>
    %173 = vector.extract_strided_slice %38 {offsets = [0, 160], sizes = [12, 32], strides = [1, 1]} : vector<12x2048xf32> to vector<12x32xf32>
    %174 = vector.extract_strided_slice %38 {offsets = [0, 192], sizes = [12, 32], strides = [1, 1]} : vector<12x2048xf32> to vector<12x32xf32>
    %175 = vector.extract_strided_slice %38 {offsets = [0, 224], sizes = [12, 32], strides = [1, 1]} : vector<12x2048xf32> to vector<12x32xf32>
    %176 = vector.extract_strided_slice %38 {offsets = [0, 256], sizes = [12, 32], strides = [1, 1]} : vector<12x2048xf32> to vector<12x32xf32>
    %177 = vector.extract_strided_slice %38 {offsets = [0, 288], sizes = [12, 32], strides = [1, 1]} : vector<12x2048xf32> to vector<12x32xf32>
    %178 = vector.extract_strided_slice %38 {offsets = [0, 320], sizes = [12, 32], strides = [1, 1]} : vector<12x2048xf32> to vector<12x32xf32>
    %179 = vector.extract_strided_slice %38 {offsets = [0, 352], sizes = [12, 32], strides = [1, 1]} : vector<12x2048xf32> to vector<12x32xf32>
    %180 = vector.extract_strided_slice %38 {offsets = [0, 384], sizes = [12, 32], strides = [1, 1]} : vector<12x2048xf32> to vector<12x32xf32>
    %181 = vector.extract_strided_slice %38 {offsets = [0, 416], sizes = [12, 32], strides = [1, 1]} : vector<12x2048xf32> to vector<12x32xf32>
    %182 = vector.extract_strided_slice %38 {offsets = [0, 448], sizes = [12, 32], strides = [1, 1]} : vector<12x2048xf32> to vector<12x32xf32>
    %183 = vector.extract_strided_slice %38 {offsets = [0, 480], sizes = [12, 32], strides = [1, 1]} : vector<12x2048xf32> to vector<12x32xf32>
    %184 = vector.extract_strided_slice %38 {offsets = [0, 512], sizes = [12, 32], strides = [1, 1]} : vector<12x2048xf32> to vector<12x32xf32>
    %185 = vector.extract_strided_slice %38 {offsets = [0, 544], sizes = [12, 32], strides = [1, 1]} : vector<12x2048xf32> to vector<12x32xf32>
    %186 = vector.extract_strided_slice %38 {offsets = [0, 576], sizes = [12, 32], strides = [1, 1]} : vector<12x2048xf32> to vector<12x32xf32>
    %187 = vector.extract_strided_slice %38 {offsets = [0, 608], sizes = [12, 32], strides = [1, 1]} : vector<12x2048xf32> to vector<12x32xf32>
    %188 = vector.extract_strided_slice %38 {offsets = [0, 640], sizes = [12, 32], strides = [1, 1]} : vector<12x2048xf32> to vector<12x32xf32>
    %189 = vector.extract_strided_slice %38 {offsets = [0, 672], sizes = [12, 32], strides = [1, 1]} : vector<12x2048xf32> to vector<12x32xf32>
    %190 = vector.extract_strided_slice %38 {offsets = [0, 704], sizes = [12, 32], strides = [1, 1]} : vector<12x2048xf32> to vector<12x32xf32>
    %191 = vector.extract_strided_slice %38 {offsets = [0, 736], sizes = [12, 32], strides = [1, 1]} : vector<12x2048xf32> to vector<12x32xf32>
    %192 = vector.extract_strided_slice %38 {offsets = [0, 768], sizes = [12, 32], strides = [1, 1]} : vector<12x2048xf32> to vector<12x32xf32>
    %193 = vector.extract_strided_slice %38 {offsets = [0, 800], sizes = [12, 32], strides = [1, 1]} : vector<12x2048xf32> to vector<12x32xf32>
    %194 = vector.extract_strided_slice %38 {offsets = [0, 832], sizes = [12, 32], strides = [1, 1]} : vector<12x2048xf32> to vector<12x32xf32>
    %195 = vector.extract_strided_slice %38 {offsets = [0, 864], sizes = [12, 32], strides = [1, 1]} : vector<12x2048xf32> to vector<12x32xf32>
    %196 = vector.extract_strided_slice %38 {offsets = [0, 896], sizes = [12, 32], strides = [1, 1]} : vector<12x2048xf32> to vector<12x32xf32>
    %197 = vector.extract_strided_slice %38 {offsets = [0, 928], sizes = [12, 32], strides = [1, 1]} : vector<12x2048xf32> to vector<12x32xf32>
    %198 = vector.extract_strided_slice %38 {offsets = [0, 960], sizes = [12, 32], strides = [1, 1]} : vector<12x2048xf32> to vector<12x32xf32>
    %199 = vector.extract_strided_slice %38 {offsets = [0, 992], sizes = [12, 32], strides = [1, 1]} : vector<12x2048xf32> to vector<12x32xf32>
    %200 = arith.maximumf %168, %169 : vector<12x32xf32>
    %201 = arith.maximumf %170, %171 : vector<12x32xf32>
    %202 = arith.maximumf %172, %173 : vector<12x32xf32>
    %203 = arith.maximumf %174, %175 : vector<12x32xf32>
    %204 = arith.maximumf %176, %177 : vector<12x32xf32>
    %205 = arith.maximumf %178, %179 : vector<12x32xf32>
    %206 = arith.maximumf %180, %181 : vector<12x32xf32>
    %207 = arith.maximumf %182, %183 : vector<12x32xf32>
    %208 = arith.maximumf %184, %185 : vector<12x32xf32>
    %209 = arith.maximumf %186, %187 : vector<12x32xf32>
    %210 = arith.maximumf %188, %189 : vector<12x32xf32>
    %211 = arith.maximumf %190, %191 : vector<12x32xf32>
    %212 = arith.maximumf %192, %193 : vector<12x32xf32>
    %213 = arith.maximumf %194, %195 : vector<12x32xf32>
    %214 = arith.maximumf %196, %197 : vector<12x32xf32>
    %215 = arith.maximumf %198, %199 : vector<12x32xf32>
    %216 = arith.maximumf %200, %201 : vector<12x32xf32>
    %217 = arith.maximumf %202, %203 : vector<12x32xf32>
    %218 = arith.maximumf %204, %205 : vector<12x32xf32>
    %219 = arith.maximumf %206, %207 : vector<12x32xf32>
    %220 = arith.maximumf %208, %209 : vector<12x32xf32>
    %221 = arith.maximumf %210, %211 : vector<12x32xf32>
    %222 = arith.maximumf %212, %213 : vector<12x32xf32>
    %223 = arith.maximumf %214, %215 : vector<12x32xf32>
    %224 = arith.maximumf %216, %217 : vector<12x32xf32>
    %225 = arith.maximumf %218, %219 : vector<12x32xf32>
    %226 = arith.maximumf %220, %221 : vector<12x32xf32>
    %227 = arith.maximumf %222, %223 : vector<12x32xf32>
    %228 = arith.maximumf %224, %225 : vector<12x32xf32>
    %229 = arith.maximumf %226, %227 : vector<12x32xf32>
    %230 = arith.maximumf %228, %229 : vector<12x32xf32>
    %231 = vector.extract_strided_slice %230 {offsets = [0, 0], sizes = [6, 32], strides = [1, 1]} : vector<12x32xf32> to vector<6x32xf32>
    %cst_15 = arith.constant dense<0xFF800000> : vector<32xf32>
    %232 = vector.multi_reduction <maximumf>, %231, %cst_15 [0] : vector<6x32xf32> to vector<32xf32>
    %233 = vector.shape_cast %232 : vector<32xf32> to vector<1x32xf32>
    %234 = vector.extract_strided_slice %230 {offsets = [6, 0], sizes = [6, 32], strides = [1, 1]} : vector<12x32xf32> to vector<6x32xf32>
    %cst_16 = arith.constant dense<0xFF800000> : vector<32xf32>
    %235 = vector.multi_reduction <maximumf>, %234, %cst_16 [0] : vector<6x32xf32> to vector<32xf32>
    %236 = vector.shape_cast %235 : vector<32xf32> to vector<1x32xf32>
    %237 = vector.extract_strided_slice %38 {offsets = [0, 1024], sizes = [12, 32], strides = [1, 1]} : vector<12x2048xf32> to vector<12x32xf32>
    %238 = vector.extract_strided_slice %38 {offsets = [0, 1056], sizes = [12, 32], strides = [1, 1]} : vector<12x2048xf32> to vector<12x32xf32>
    %239 = vector.extract_strided_slice %38 {offsets = [0, 1088], sizes = [12, 32], strides = [1, 1]} : vector<12x2048xf32> to vector<12x32xf32>
    %240 = vector.extract_strided_slice %38 {offsets = [0, 1120], sizes = [12, 32], strides = [1, 1]} : vector<12x2048xf32> to vector<12x32xf32>
    %241 = vector.extract_strided_slice %38 {offsets = [0, 1152], sizes = [12, 32], strides = [1, 1]} : vector<12x2048xf32> to vector<12x32xf32>
    %242 = vector.extract_strided_slice %38 {offsets = [0, 1184], sizes = [12, 32], strides = [1, 1]} : vector<12x2048xf32> to vector<12x32xf32>
    %243 = vector.extract_strided_slice %38 {offsets = [0, 1216], sizes = [12, 32], strides = [1, 1]} : vector<12x2048xf32> to vector<12x32xf32>
    %244 = vector.extract_strided_slice %38 {offsets = [0, 1248], sizes = [12, 32], strides = [1, 1]} : vector<12x2048xf32> to vector<12x32xf32>
    %245 = vector.extract_strided_slice %38 {offsets = [0, 1280], sizes = [12, 32], strides = [1, 1]} : vector<12x2048xf32> to vector<12x32xf32>
    %246 = vector.extract_strided_slice %38 {offsets = [0, 1312], sizes = [12, 32], strides = [1, 1]} : vector<12x2048xf32> to vector<12x32xf32>
    %247 = vector.extract_strided_slice %38 {offsets = [0, 1344], sizes = [12, 32], strides = [1, 1]} : vector<12x2048xf32> to vector<12x32xf32>
    %248 = vector.extract_strided_slice %38 {offsets = [0, 1376], sizes = [12, 32], strides = [1, 1]} : vector<12x2048xf32> to vector<12x32xf32>
    %249 = vector.extract_strided_slice %38 {offsets = [0, 1408], sizes = [12, 32], strides = [1, 1]} : vector<12x2048xf32> to vector<12x32xf32>
    %250 = vector.extract_strided_slice %38 {offsets = [0, 1440], sizes = [12, 32], strides = [1, 1]} : vector<12x2048xf32> to vector<12x32xf32>
    %251 = vector.extract_strided_slice %38 {offsets = [0, 1472], sizes = [12, 32], strides = [1, 1]} : vector<12x2048xf32> to vector<12x32xf32>
    %252 = vector.extract_strided_slice %38 {offsets = [0, 1504], sizes = [12, 32], strides = [1, 1]} : vector<12x2048xf32> to vector<12x32xf32>
    %253 = vector.extract_strided_slice %38 {offsets = [0, 1536], sizes = [12, 32], strides = [1, 1]} : vector<12x2048xf32> to vector<12x32xf32>
    %254 = vector.extract_strided_slice %38 {offsets = [0, 1568], sizes = [12, 32], strides = [1, 1]} : vector<12x2048xf32> to vector<12x32xf32>
    %255 = vector.extract_strided_slice %38 {offsets = [0, 1600], sizes = [12, 32], strides = [1, 1]} : vector<12x2048xf32> to vector<12x32xf32>
    %256 = vector.extract_strided_slice %38 {offsets = [0, 1632], sizes = [12, 32], strides = [1, 1]} : vector<12x2048xf32> to vector<12x32xf32>
    %257 = vector.extract_strided_slice %38 {offsets = [0, 1664], sizes = [12, 32], strides = [1, 1]} : vector<12x2048xf32> to vector<12x32xf32>
    %258 = vector.extract_strided_slice %38 {offsets = [0, 1696], sizes = [12, 32], strides = [1, 1]} : vector<12x2048xf32> to vector<12x32xf32>
    %259 = vector.extract_strided_slice %38 {offsets = [0, 1728], sizes = [12, 32], strides = [1, 1]} : vector<12x2048xf32> to vector<12x32xf32>
    %260 = vector.extract_strided_slice %38 {offsets = [0, 1760], sizes = [12, 32], strides = [1, 1]} : vector<12x2048xf32> to vector<12x32xf32>
    %261 = vector.extract_strided_slice %38 {offsets = [0, 1792], sizes = [12, 32], strides = [1, 1]} : vector<12x2048xf32> to vector<12x32xf32>
    %262 = vector.extract_strided_slice %38 {offsets = [0, 1824], sizes = [12, 32], strides = [1, 1]} : vector<12x2048xf32> to vector<12x32xf32>
    %263 = vector.extract_strided_slice %38 {offsets = [0, 1856], sizes = [12, 32], strides = [1, 1]} : vector<12x2048xf32> to vector<12x32xf32>
    %264 = vector.extract_strided_slice %38 {offsets = [0, 1888], sizes = [12, 32], strides = [1, 1]} : vector<12x2048xf32> to vector<12x32xf32>
    %265 = vector.extract_strided_slice %38 {offsets = [0, 1920], sizes = [12, 32], strides = [1, 1]} : vector<12x2048xf32> to vector<12x32xf32>
    %266 = vector.extract_strided_slice %38 {offsets = [0, 1952], sizes = [12, 32], strides = [1, 1]} : vector<12x2048xf32> to vector<12x32xf32>
    %267 = vector.extract_strided_slice %38 {offsets = [0, 1984], sizes = [12, 32], strides = [1, 1]} : vector<12x2048xf32> to vector<12x32xf32>
    %268 = vector.extract_strided_slice %38 {offsets = [0, 2016], sizes = [12, 32], strides = [1, 1]} : vector<12x2048xf32> to vector<12x32xf32>
    %269 = arith.maximumf %237, %238 : vector<12x32xf32>
    %270 = arith.maximumf %239, %240 : vector<12x32xf32>
    %271 = arith.maximumf %241, %242 : vector<12x32xf32>
    %272 = arith.maximumf %243, %244 : vector<12x32xf32>
    %273 = arith.maximumf %245, %246 : vector<12x32xf32>
    %274 = arith.maximumf %247, %248 : vector<12x32xf32>
    %275 = arith.maximumf %249, %250 : vector<12x32xf32>
    %276 = arith.maximumf %251, %252 : vector<12x32xf32>
    %277 = arith.maximumf %253, %254 : vector<12x32xf32>
    %278 = arith.maximumf %255, %256 : vector<12x32xf32>
    %279 = arith.maximumf %257, %258 : vector<12x32xf32>
    %280 = arith.maximumf %259, %260 : vector<12x32xf32>
    %281 = arith.maximumf %261, %262 : vector<12x32xf32>
    %282 = arith.maximumf %263, %264 : vector<12x32xf32>
    %283 = arith.maximumf %265, %266 : vector<12x32xf32>
    %284 = arith.maximumf %267, %268 : vector<12x32xf32>
    %285 = arith.maximumf %269, %270 : vector<12x32xf32>
    %286 = arith.maximumf %271, %272 : vector<12x32xf32>
    %287 = arith.maximumf %273, %274 : vector<12x32xf32>
    %288 = arith.maximumf %275, %276 : vector<12x32xf32>
    %289 = arith.maximumf %277, %278 : vector<12x32xf32>
    %290 = arith.maximumf %279, %280 : vector<12x32xf32>
    %291 = arith.maximumf %281, %282 : vector<12x32xf32>
    %292 = arith.maximumf %283, %284 : vector<12x32xf32>
    %293 = arith.maximumf %285, %286 : vector<12x32xf32>
    %294 = arith.maximumf %287, %288 : vector<12x32xf32>
    %295 = arith.maximumf %289, %290 : vector<12x32xf32>
    %296 = arith.maximumf %291, %292 : vector<12x32xf32>
    %297 = arith.maximumf %293, %294 : vector<12x32xf32>
    %298 = arith.maximumf %295, %296 : vector<12x32xf32>
    %299 = arith.maximumf %297, %298 : vector<12x32xf32>
    %300 = vector.extract_strided_slice %299 {offsets = [0, 0], sizes = [6, 32], strides = [1, 1]} : vector<12x32xf32> to vector<6x32xf32>
    %cst_17 = arith.constant dense<0xFF800000> : vector<32xf32>
    %301 = vector.multi_reduction <maximumf>, %300, %cst_17 [0] : vector<6x32xf32> to vector<32xf32>
    %302 = vector.shape_cast %301 : vector<32xf32> to vector<1x32xf32>
    %303 = vector.extract_strided_slice %299 {offsets = [6, 0], sizes = [6, 32], strides = [1, 1]} : vector<12x32xf32> to vector<6x32xf32>
    %cst_18 = arith.constant dense<0xFF800000> : vector<32xf32>
    %304 = vector.multi_reduction <maximumf>, %303, %cst_18 [0] : vector<6x32xf32> to vector<32xf32>
    %305 = vector.shape_cast %304 : vector<32xf32> to vector<1x32xf32>
    %306 = vector.extract_strided_slice %38 {offsets = [0, 0], sizes = [12, 32], strides = [1, 1]} : vector<12x2048xf32> to vector<12x32xf32>
    %307 = vector.extract_strided_slice %38 {offsets = [0, 32], sizes = [12, 32], strides = [1, 1]} : vector<12x2048xf32> to vector<12x32xf32>
    %308 = vector.extract_strided_slice %38 {offsets = [0, 64], sizes = [12, 32], strides = [1, 1]} : vector<12x2048xf32> to vector<12x32xf32>
    %309 = vector.extract_strided_slice %38 {offsets = [0, 96], sizes = [12, 32], strides = [1, 1]} : vector<12x2048xf32> to vector<12x32xf32>
    %310 = vector.extract_strided_slice %38 {offsets = [0, 128], sizes = [12, 32], strides = [1, 1]} : vector<12x2048xf32> to vector<12x32xf32>
    %311 = vector.extract_strided_slice %38 {offsets = [0, 160], sizes = [12, 32], strides = [1, 1]} : vector<12x2048xf32> to vector<12x32xf32>
    %312 = vector.extract_strided_slice %38 {offsets = [0, 192], sizes = [12, 32], strides = [1, 1]} : vector<12x2048xf32> to vector<12x32xf32>
    %313 = vector.extract_strided_slice %38 {offsets = [0, 224], sizes = [12, 32], strides = [1, 1]} : vector<12x2048xf32> to vector<12x32xf32>
    %314 = vector.extract_strided_slice %38 {offsets = [0, 256], sizes = [12, 32], strides = [1, 1]} : vector<12x2048xf32> to vector<12x32xf32>
    %315 = vector.extract_strided_slice %38 {offsets = [0, 288], sizes = [12, 32], strides = [1, 1]} : vector<12x2048xf32> to vector<12x32xf32>
    %316 = vector.extract_strided_slice %38 {offsets = [0, 320], sizes = [12, 32], strides = [1, 1]} : vector<12x2048xf32> to vector<12x32xf32>
    %317 = vector.extract_strided_slice %38 {offsets = [0, 352], sizes = [12, 32], strides = [1, 1]} : vector<12x2048xf32> to vector<12x32xf32>
    %318 = vector.extract_strided_slice %38 {offsets = [0, 384], sizes = [12, 32], strides = [1, 1]} : vector<12x2048xf32> to vector<12x32xf32>
    %319 = vector.extract_strided_slice %38 {offsets = [0, 416], sizes = [12, 32], strides = [1, 1]} : vector<12x2048xf32> to vector<12x32xf32>
    %320 = vector.extract_strided_slice %38 {offsets = [0, 448], sizes = [12, 32], strides = [1, 1]} : vector<12x2048xf32> to vector<12x32xf32>
    %321 = vector.extract_strided_slice %38 {offsets = [0, 480], sizes = [12, 32], strides = [1, 1]} : vector<12x2048xf32> to vector<12x32xf32>
    %322 = vector.extract_strided_slice %38 {offsets = [0, 512], sizes = [12, 32], strides = [1, 1]} : vector<12x2048xf32> to vector<12x32xf32>
    %323 = vector.extract_strided_slice %38 {offsets = [0, 544], sizes = [12, 32], strides = [1, 1]} : vector<12x2048xf32> to vector<12x32xf32>
    %324 = vector.extract_strided_slice %38 {offsets = [0, 576], sizes = [12, 32], strides = [1, 1]} : vector<12x2048xf32> to vector<12x32xf32>
    %325 = vector.extract_strided_slice %38 {offsets = [0, 608], sizes = [12, 32], strides = [1, 1]} : vector<12x2048xf32> to vector<12x32xf32>
    %326 = vector.extract_strided_slice %38 {offsets = [0, 640], sizes = [12, 32], strides = [1, 1]} : vector<12x2048xf32> to vector<12x32xf32>
    %327 = vector.extract_strided_slice %38 {offsets = [0, 672], sizes = [12, 32], strides = [1, 1]} : vector<12x2048xf32> to vector<12x32xf32>
    %328 = arith.maximumf %306, %307 : vector<12x32xf32>
    %329 = arith.maximumf %308, %309 : vector<12x32xf32>
    %330 = arith.maximumf %310, %311 : vector<12x32xf32>
    %331 = arith.maximumf %312, %313 : vector<12x32xf32>
    %332 = arith.maximumf %314, %315 : vector<12x32xf32>
    %333 = arith.maximumf %316, %317 : vector<12x32xf32>
    %334 = arith.maximumf %318, %319 : vector<12x32xf32>
    %335 = arith.maximumf %320, %321 : vector<12x32xf32>
    %336 = arith.maximumf %322, %323 : vector<12x32xf32>
    %337 = arith.maximumf %324, %325 : vector<12x32xf32>
    %338 = arith.maximumf %326, %327 : vector<12x32xf32>
    %339 = arith.maximumf %328, %329 : vector<12x32xf32>
    %340 = arith.maximumf %330, %331 : vector<12x32xf32>
    %341 = arith.maximumf %332, %333 : vector<12x32xf32>
    %342 = arith.maximumf %334, %335 : vector<12x32xf32>
    %343 = arith.maximumf %336, %337 : vector<12x32xf32>
    %344 = arith.maximumf %339, %340 : vector<12x32xf32>
    %345 = arith.maximumf %341, %342 : vector<12x32xf32>
    %346 = arith.maximumf %343, %338 : vector<12x32xf32>
    %347 = arith.maximumf %344, %345 : vector<12x32xf32>
    %348 = arith.maximumf %347, %346 : vector<12x32xf32>
    %349 = vector.extract_strided_slice %348 {offsets = [0, 0], sizes = [4, 32], strides = [1, 1]} : vector<12x32xf32> to vector<4x32xf32>
    %cst_19 = arith.constant dense<0xFF800000> : vector<32xf32>
    %350 = vector.multi_reduction <maximumf>, %349, %cst_19 [0] : vector<4x32xf32> to vector<32xf32>
    %351 = vector.shape_cast %350 : vector<32xf32> to vector<1x32xf32>
    %352 = vector.extract_strided_slice %348 {offsets = [4, 0], sizes = [4, 32], strides = [1, 1]} : vector<12x32xf32> to vector<4x32xf32>
    %cst_20 = arith.constant dense<0xFF800000> : vector<32xf32>
    %353 = vector.multi_reduction <maximumf>, %352, %cst_20 [0] : vector<4x32xf32> to vector<32xf32>
    %354 = vector.shape_cast %353 : vector<32xf32> to vector<1x32xf32>
    %355 = vector.extract_strided_slice %348 {offsets = [8, 0], sizes = [4, 32], strides = [1, 1]} : vector<12x32xf32> to vector<4x32xf32>
    %cst_21 = arith.constant dense<0xFF800000> : vector<32xf32>
    %356 = vector.multi_reduction <maximumf>, %355, %cst_21 [0] : vector<4x32xf32> to vector<32xf32>
    %357 = vector.shape_cast %356 : vector<32xf32> to vector<1x32xf32>
    %358 = vector.extract_strided_slice %38 {offsets = [0, 672], sizes = [12, 32], strides = [1, 1]} : vector<12x2048xf32> to vector<12x32xf32>
    %359 = vector.extract_strided_slice %38 {offsets = [0, 704], sizes = [12, 32], strides = [1, 1]} : vector<12x2048xf32> to vector<12x32xf32>
    %360 = vector.extract_strided_slice %38 {offsets = [0, 736], sizes = [12, 32], strides = [1, 1]} : vector<12x2048xf32> to vector<12x32xf32>
    %361 = vector.extract_strided_slice %38 {offsets = [0, 768], sizes = [12, 32], strides = [1, 1]} : vector<12x2048xf32> to vector<12x32xf32>
    %362 = vector.extract_strided_slice %38 {offsets = [0, 800], sizes = [12, 32], strides = [1, 1]} : vector<12x2048xf32> to vector<12x32xf32>
    %363 = vector.extract_strided_slice %38 {offsets = [0, 832], sizes = [12, 32], strides = [1, 1]} : vector<12x2048xf32> to vector<12x32xf32>
    %364 = vector.extract_strided_slice %38 {offsets = [0, 864], sizes = [12, 32], strides = [1, 1]} : vector<12x2048xf32> to vector<12x32xf32>
    %365 = vector.extract_strided_slice %38 {offsets = [0, 896], sizes = [12, 32], strides = [1, 1]} : vector<12x2048xf32> to vector<12x32xf32>
    %366 = vector.extract_strided_slice %38 {offsets = [0, 928], sizes = [12, 32], strides = [1, 1]} : vector<12x2048xf32> to vector<12x32xf32>
    %367 = vector.extract_strided_slice %38 {offsets = [0, 960], sizes = [12, 32], strides = [1, 1]} : vector<12x2048xf32> to vector<12x32xf32>
    %368 = vector.extract_strided_slice %38 {offsets = [0, 992], sizes = [12, 32], strides = [1, 1]} : vector<12x2048xf32> to vector<12x32xf32>
    %369 = vector.extract_strided_slice %38 {offsets = [0, 1024], sizes = [12, 32], strides = [1, 1]} : vector<12x2048xf32> to vector<12x32xf32>
    %370 = vector.extract_strided_slice %38 {offsets = [0, 1056], sizes = [12, 32], strides = [1, 1]} : vector<12x2048xf32> to vector<12x32xf32>
    %371 = vector.extract_strided_slice %38 {offsets = [0, 1088], sizes = [12, 32], strides = [1, 1]} : vector<12x2048xf32> to vector<12x32xf32>
    %372 = vector.extract_strided_slice %38 {offsets = [0, 1120], sizes = [12, 32], strides = [1, 1]} : vector<12x2048xf32> to vector<12x32xf32>
    %373 = vector.extract_strided_slice %38 {offsets = [0, 1152], sizes = [12, 32], strides = [1, 1]} : vector<12x2048xf32> to vector<12x32xf32>
    %374 = vector.extract_strided_slice %38 {offsets = [0, 1184], sizes = [12, 32], strides = [1, 1]} : vector<12x2048xf32> to vector<12x32xf32>
    %375 = vector.extract_strided_slice %38 {offsets = [0, 1216], sizes = [12, 32], strides = [1, 1]} : vector<12x2048xf32> to vector<12x32xf32>
    %376 = vector.extract_strided_slice %38 {offsets = [0, 1248], sizes = [12, 32], strides = [1, 1]} : vector<12x2048xf32> to vector<12x32xf32>
    %377 = vector.extract_strided_slice %38 {offsets = [0, 1280], sizes = [12, 32], strides = [1, 1]} : vector<12x2048xf32> to vector<12x32xf32>
    %378 = vector.extract_strided_slice %38 {offsets = [0, 1312], sizes = [12, 32], strides = [1, 1]} : vector<12x2048xf32> to vector<12x32xf32>
    %379 = vector.extract_strided_slice %38 {offsets = [0, 1344], sizes = [12, 32], strides = [1, 1]} : vector<12x2048xf32> to vector<12x32xf32>
    %380 = arith.maximumf %358, %359 : vector<12x32xf32>
    %381 = arith.maximumf %360, %361 : vector<12x32xf32>
    %382 = arith.maximumf %362, %363 : vector<12x32xf32>
    %383 = arith.maximumf %364, %365 : vector<12x32xf32>
    %384 = arith.maximumf %366, %367 : vector<12x32xf32>
    %385 = arith.maximumf %368, %369 : vector<12x32xf32>
    %386 = arith.maximumf %370, %371 : vector<12x32xf32>
    %387 = arith.maximumf %372, %373 : vector<12x32xf32>
    %388 = arith.maximumf %374, %375 : vector<12x32xf32>
    %389 = arith.maximumf %376, %377 : vector<12x32xf32>
    %390 = arith.maximumf %378, %379 : vector<12x32xf32>
    %391 = arith.maximumf %380, %381 : vector<12x32xf32>
    %392 = arith.maximumf %382, %383 : vector<12x32xf32>
    %393 = arith.maximumf %384, %385 : vector<12x32xf32>
    %394 = arith.maximumf %386, %387 : vector<12x32xf32>
    %395 = arith.maximumf %388, %389 : vector<12x32xf32>
    %396 = arith.maximumf %391, %392 : vector<12x32xf32>
    %397 = arith.maximumf %393, %394 : vector<12x32xf32>
    %398 = arith.maximumf %395, %390 : vector<12x32xf32>
    %399 = arith.maximumf %396, %397 : vector<12x32xf32>
    %400 = arith.maximumf %399, %398 : vector<12x32xf32>
    %401 = vector.extract_strided_slice %400 {offsets = [0, 0], sizes = [4, 32], strides = [1, 1]} : vector<12x32xf32> to vector<4x32xf32>
    %cst_22 = arith.constant dense<0xFF800000> : vector<32xf32>
    %402 = vector.multi_reduction <maximumf>, %401, %cst_22 [0] : vector<4x32xf32> to vector<32xf32>
    %403 = vector.shape_cast %402 : vector<32xf32> to vector<1x32xf32>
    %404 = vector.extract_strided_slice %400 {offsets = [4, 0], sizes = [4, 32], strides = [1, 1]} : vector<12x32xf32> to vector<4x32xf32>
    %cst_23 = arith.constant dense<0xFF800000> : vector<32xf32>
    %405 = vector.multi_reduction <maximumf>, %404, %cst_23 [0] : vector<4x32xf32> to vector<32xf32>
    %406 = vector.shape_cast %405 : vector<32xf32> to vector<1x32xf32>
    %407 = vector.extract_strided_slice %400 {offsets = [8, 0], sizes = [4, 32], strides = [1, 1]} : vector<12x32xf32> to vector<4x32xf32>
    %cst_24 = arith.constant dense<0xFF800000> : vector<32xf32>
    %408 = vector.multi_reduction <maximumf>, %407, %cst_24 [0] : vector<4x32xf32> to vector<32xf32>
    %409 = vector.shape_cast %408 : vector<32xf32> to vector<1x32xf32>
    %410 = vector.extract_strided_slice %38 {offsets = [0, 1344], sizes = [12, 32], strides = [1, 1]} : vector<12x2048xf32> to vector<12x32xf32>
    %411 = vector.extract_strided_slice %38 {offsets = [0, 1376], sizes = [12, 32], strides = [1, 1]} : vector<12x2048xf32> to vector<12x32xf32>
    %412 = vector.extract_strided_slice %38 {offsets = [0, 1408], sizes = [12, 32], strides = [1, 1]} : vector<12x2048xf32> to vector<12x32xf32>
    %413 = vector.extract_strided_slice %38 {offsets = [0, 1440], sizes = [12, 32], strides = [1, 1]} : vector<12x2048xf32> to vector<12x32xf32>
    %414 = vector.extract_strided_slice %38 {offsets = [0, 1472], sizes = [12, 32], strides = [1, 1]} : vector<12x2048xf32> to vector<12x32xf32>
    %415 = vector.extract_strided_slice %38 {offsets = [0, 1504], sizes = [12, 32], strides = [1, 1]} : vector<12x2048xf32> to vector<12x32xf32>
    %416 = vector.extract_strided_slice %38 {offsets = [0, 1536], sizes = [12, 32], strides = [1, 1]} : vector<12x2048xf32> to vector<12x32xf32>
    %417 = vector.extract_strided_slice %38 {offsets = [0, 1568], sizes = [12, 32], strides = [1, 1]} : vector<12x2048xf32> to vector<12x32xf32>
    %418 = vector.extract_strided_slice %38 {offsets = [0, 1600], sizes = [12, 32], strides = [1, 1]} : vector<12x2048xf32> to vector<12x32xf32>
    %419 = vector.extract_strided_slice %38 {offsets = [0, 1632], sizes = [12, 32], strides = [1, 1]} : vector<12x2048xf32> to vector<12x32xf32>
    %420 = vector.extract_strided_slice %38 {offsets = [0, 1664], sizes = [12, 32], strides = [1, 1]} : vector<12x2048xf32> to vector<12x32xf32>
    %421 = vector.extract_strided_slice %38 {offsets = [0, 1696], sizes = [12, 32], strides = [1, 1]} : vector<12x2048xf32> to vector<12x32xf32>
    %422 = vector.extract_strided_slice %38 {offsets = [0, 1728], sizes = [12, 32], strides = [1, 1]} : vector<12x2048xf32> to vector<12x32xf32>
    %423 = vector.extract_strided_slice %38 {offsets = [0, 1760], sizes = [12, 32], strides = [1, 1]} : vector<12x2048xf32> to vector<12x32xf32>
    %424 = vector.extract_strided_slice %38 {offsets = [0, 1792], sizes = [12, 32], strides = [1, 1]} : vector<12x2048xf32> to vector<12x32xf32>
    %425 = vector.extract_strided_slice %38 {offsets = [0, 1824], sizes = [12, 32], strides = [1, 1]} : vector<12x2048xf32> to vector<12x32xf32>
    %426 = vector.extract_strided_slice %38 {offsets = [0, 1856], sizes = [12, 32], strides = [1, 1]} : vector<12x2048xf32> to vector<12x32xf32>
    %427 = vector.extract_strided_slice %38 {offsets = [0, 1888], sizes = [12, 32], strides = [1, 1]} : vector<12x2048xf32> to vector<12x32xf32>
    %428 = vector.extract_strided_slice %38 {offsets = [0, 1920], sizes = [12, 32], strides = [1, 1]} : vector<12x2048xf32> to vector<12x32xf32>
    %429 = vector.extract_strided_slice %38 {offsets = [0, 1952], sizes = [12, 32], strides = [1, 1]} : vector<12x2048xf32> to vector<12x32xf32>
    %430 = vector.extract_strided_slice %38 {offsets = [0, 1984], sizes = [12, 32], strides = [1, 1]} : vector<12x2048xf32> to vector<12x32xf32>
    %431 = vector.extract_strided_slice %38 {offsets = [0, 2016], sizes = [12, 32], strides = [1, 1]} : vector<12x2048xf32> to vector<12x32xf32>
    %432 = arith.maximumf %410, %411 : vector<12x32xf32>
    %433 = arith.maximumf %412, %413 : vector<12x32xf32>
    %434 = arith.maximumf %414, %415 : vector<12x32xf32>
    %435 = arith.maximumf %416, %417 : vector<12x32xf32>
    %436 = arith.maximumf %418, %419 : vector<12x32xf32>
    %437 = arith.maximumf %420, %421 : vector<12x32xf32>
    %438 = arith.maximumf %422, %423 : vector<12x32xf32>
    %439 = arith.maximumf %424, %425 : vector<12x32xf32>
    %440 = arith.maximumf %426, %427 : vector<12x32xf32>
    %441 = arith.maximumf %428, %429 : vector<12x32xf32>
    %442 = arith.maximumf %430, %431 : vector<12x32xf32>
    %443 = arith.maximumf %432, %433 : vector<12x32xf32>
    %444 = arith.maximumf %434, %435 : vector<12x32xf32>
    %445 = arith.maximumf %436, %437 : vector<12x32xf32>
    %446 = arith.maximumf %438, %439 : vector<12x32xf32>
    %447 = arith.maximumf %440, %441 : vector<12x32xf32>
    %448 = arith.maximumf %443, %444 : vector<12x32xf32>
    %449 = arith.maximumf %445, %446 : vector<12x32xf32>
    %450 = arith.maximumf %447, %442 : vector<12x32xf32>
    %451 = arith.maximumf %448, %449 : vector<12x32xf32>
    %452 = arith.maximumf %451, %450 : vector<12x32xf32>
    %453 = vector.extract_strided_slice %452 {offsets = [0, 0], sizes = [4, 32], strides = [1, 1]} : vector<12x32xf32> to vector<4x32xf32>
    %cst_25 = arith.constant dense<0xFF800000> : vector<32xf32>
    %454 = vector.multi_reduction <maximumf>, %453, %cst_25 [0] : vector<4x32xf32> to vector<32xf32>
    %455 = vector.shape_cast %454 : vector<32xf32> to vector<1x32xf32>
    %456 = vector.extract_strided_slice %452 {offsets = [4, 0], sizes = [4, 32], strides = [1, 1]} : vector<12x32xf32> to vector<4x32xf32>
    %cst_26 = arith.constant dense<0xFF800000> : vector<32xf32>
    %457 = vector.multi_reduction <maximumf>, %456, %cst_26 [0] : vector<4x32xf32> to vector<32xf32>
    %458 = vector.shape_cast %457 : vector<32xf32> to vector<1x32xf32>
    %459 = vector.extract_strided_slice %452 {offsets = [8, 0], sizes = [4, 32], strides = [1, 1]} : vector<12x32xf32> to vector<4x32xf32>
    %cst_27 = arith.constant dense<0xFF800000> : vector<32xf32>
    %460 = vector.multi_reduction <maximumf>, %459, %cst_27 [0] : vector<4x32xf32> to vector<32xf32>
    %461 = vector.shape_cast %460 : vector<32xf32> to vector<1x32xf32>
    %462 = vector.extract_strided_slice %38 {offsets = [0, 0], sizes = [12, 32], strides = [1, 1]} : vector<12x2048xf32> to vector<12x32xf32>
    %463 = vector.extract_strided_slice %38 {offsets = [0, 32], sizes = [12, 32], strides = [1, 1]} : vector<12x2048xf32> to vector<12x32xf32>
    %464 = vector.extract_strided_slice %38 {offsets = [0, 64], sizes = [12, 32], strides = [1, 1]} : vector<12x2048xf32> to vector<12x32xf32>
    %465 = vector.extract_strided_slice %38 {offsets = [0, 96], sizes = [12, 32], strides = [1, 1]} : vector<12x2048xf32> to vector<12x32xf32>
    %466 = vector.extract_strided_slice %38 {offsets = [0, 128], sizes = [12, 32], strides = [1, 1]} : vector<12x2048xf32> to vector<12x32xf32>
    %467 = vector.extract_strided_slice %38 {offsets = [0, 160], sizes = [12, 32], strides = [1, 1]} : vector<12x2048xf32> to vector<12x32xf32>
    %468 = vector.extract_strided_slice %38 {offsets = [0, 192], sizes = [12, 32], strides = [1, 1]} : vector<12x2048xf32> to vector<12x32xf32>
    %469 = vector.extract_strided_slice %38 {offsets = [0, 224], sizes = [12, 32], strides = [1, 1]} : vector<12x2048xf32> to vector<12x32xf32>
    %470 = vector.extract_strided_slice %38 {offsets = [0, 256], sizes = [12, 32], strides = [1, 1]} : vector<12x2048xf32> to vector<12x32xf32>
    %471 = vector.extract_strided_slice %38 {offsets = [0, 288], sizes = [12, 32], strides = [1, 1]} : vector<12x2048xf32> to vector<12x32xf32>
    %472 = vector.extract_strided_slice %38 {offsets = [0, 320], sizes = [12, 32], strides = [1, 1]} : vector<12x2048xf32> to vector<12x32xf32>
    %473 = vector.extract_strided_slice %38 {offsets = [0, 352], sizes = [12, 32], strides = [1, 1]} : vector<12x2048xf32> to vector<12x32xf32>
    %474 = vector.extract_strided_slice %38 {offsets = [0, 384], sizes = [12, 32], strides = [1, 1]} : vector<12x2048xf32> to vector<12x32xf32>
    %475 = vector.extract_strided_slice %38 {offsets = [0, 416], sizes = [12, 32], strides = [1, 1]} : vector<12x2048xf32> to vector<12x32xf32>
    %476 = vector.extract_strided_slice %38 {offsets = [0, 448], sizes = [12, 32], strides = [1, 1]} : vector<12x2048xf32> to vector<12x32xf32>
    %477 = vector.extract_strided_slice %38 {offsets = [0, 480], sizes = [12, 32], strides = [1, 1]} : vector<12x2048xf32> to vector<12x32xf32>
    %478 = arith.maximumf %462, %463 : vector<12x32xf32>
    %479 = arith.maximumf %464, %465 : vector<12x32xf32>
    %480 = arith.maximumf %466, %467 : vector<12x32xf32>
    %481 = arith.maximumf %468, %469 : vector<12x32xf32>
    %482 = arith.maximumf %470, %471 : vector<12x32xf32>
    %483 = arith.maximumf %472, %473 : vector<12x32xf32>
    %484 = arith.maximumf %474, %475 : vector<12x32xf32>
    %485 = arith.maximumf %476, %477 : vector<12x32xf32>
    %486 = arith.maximumf %478, %479 : vector<12x32xf32>
    %487 = arith.maximumf %480, %481 : vector<12x32xf32>
    %488 = arith.maximumf %482, %483 : vector<12x32xf32>
    %489 = arith.maximumf %484, %485 : vector<12x32xf32>
    %490 = arith.maximumf %486, %487 : vector<12x32xf32>
    %491 = arith.maximumf %488, %489 : vector<12x32xf32>
    %492 = arith.maximumf %490, %491 : vector<12x32xf32>
    %493 = vector.extract_strided_slice %492 {offsets = [0, 0], sizes = [3, 32], strides = [1, 1]} : vector<12x32xf32> to vector<3x32xf32>
    %cst_28 = arith.constant dense<0xFF800000> : vector<32xf32>
    %494 = vector.multi_reduction <maximumf>, %493, %cst_28 [0] : vector<3x32xf32> to vector<32xf32>
    %495 = vector.shape_cast %494 : vector<32xf32> to vector<1x32xf32>
    %496 = vector.extract_strided_slice %492 {offsets = [3, 0], sizes = [3, 32], strides = [1, 1]} : vector<12x32xf32> to vector<3x32xf32>
    %cst_29 = arith.constant dense<0xFF800000> : vector<32xf32>
    %497 = vector.multi_reduction <maximumf>, %496, %cst_29 [0] : vector<3x32xf32> to vector<32xf32>
    %498 = vector.shape_cast %497 : vector<32xf32> to vector<1x32xf32>
    %499 = vector.extract_strided_slice %492 {offsets = [6, 0], sizes = [3, 32], strides = [1, 1]} : vector<12x32xf32> to vector<3x32xf32>
    %cst_30 = arith.constant dense<0xFF800000> : vector<32xf32>
    %500 = vector.multi_reduction <maximumf>, %499, %cst_30 [0] : vector<3x32xf32> to vector<32xf32>
    %501 = vector.shape_cast %500 : vector<32xf32> to vector<1x32xf32>
    %502 = vector.extract_strided_slice %492 {offsets = [9, 0], sizes = [3, 32], strides = [1, 1]} : vector<12x32xf32> to vector<3x32xf32>
    %cst_31 = arith.constant dense<0xFF800000> : vector<32xf32>
    %503 = vector.multi_reduction <maximumf>, %502, %cst_31 [0] : vector<3x32xf32> to vector<32xf32>
    %504 = vector.shape_cast %503 : vector<32xf32> to vector<1x32xf32>
    %505 = vector.extract_strided_slice %38 {offsets = [0, 512], sizes = [12, 32], strides = [1, 1]} : vector<12x2048xf32> to vector<12x32xf32>
    %506 = vector.extract_strided_slice %38 {offsets = [0, 544], sizes = [12, 32], strides = [1, 1]} : vector<12x2048xf32> to vector<12x32xf32>
    %507 = vector.extract_strided_slice %38 {offsets = [0, 576], sizes = [12, 32], strides = [1, 1]} : vector<12x2048xf32> to vector<12x32xf32>
    %508 = vector.extract_strided_slice %38 {offsets = [0, 608], sizes = [12, 32], strides = [1, 1]} : vector<12x2048xf32> to vector<12x32xf32>
    %509 = vector.extract_strided_slice %38 {offsets = [0, 640], sizes = [12, 32], strides = [1, 1]} : vector<12x2048xf32> to vector<12x32xf32>
    %510 = vector.extract_strided_slice %38 {offsets = [0, 672], sizes = [12, 32], strides = [1, 1]} : vector<12x2048xf32> to vector<12x32xf32>
    %511 = vector.extract_strided_slice %38 {offsets = [0, 704], sizes = [12, 32], strides = [1, 1]} : vector<12x2048xf32> to vector<12x32xf32>
    %512 = vector.extract_strided_slice %38 {offsets = [0, 736], sizes = [12, 32], strides = [1, 1]} : vector<12x2048xf32> to vector<12x32xf32>
    %513 = vector.extract_strided_slice %38 {offsets = [0, 768], sizes = [12, 32], strides = [1, 1]} : vector<12x2048xf32> to vector<12x32xf32>
    %514 = vector.extract_strided_slice %38 {offsets = [0, 800], sizes = [12, 32], strides = [1, 1]} : vector<12x2048xf32> to vector<12x32xf32>
    %515 = vector.extract_strided_slice %38 {offsets = [0, 832], sizes = [12, 32], strides = [1, 1]} : vector<12x2048xf32> to vector<12x32xf32>
    %516 = vector.extract_strided_slice %38 {offsets = [0, 864], sizes = [12, 32], strides = [1, 1]} : vector<12x2048xf32> to vector<12x32xf32>
    %517 = vector.extract_strided_slice %38 {offsets = [0, 896], sizes = [12, 32], strides = [1, 1]} : vector<12x2048xf32> to vector<12x32xf32>
    %518 = vector.extract_strided_slice %38 {offsets = [0, 928], sizes = [12, 32], strides = [1, 1]} : vector<12x2048xf32> to vector<12x32xf32>
    %519 = vector.extract_strided_slice %38 {offsets = [0, 960], sizes = [12, 32], strides = [1, 1]} : vector<12x2048xf32> to vector<12x32xf32>
    %520 = vector.extract_strided_slice %38 {offsets = [0, 992], sizes = [12, 32], strides = [1, 1]} : vector<12x2048xf32> to vector<12x32xf32>
    %521 = arith.maximumf %505, %506 : vector<12x32xf32>
    %522 = arith.maximumf %507, %508 : vector<12x32xf32>
    %523 = arith.maximumf %509, %510 : vector<12x32xf32>
    %524 = arith.maximumf %511, %512 : vector<12x32xf32>
    %525 = arith.maximumf %513, %514 : vector<12x32xf32>
    %526 = arith.maximumf %515, %516 : vector<12x32xf32>
    %527 = arith.maximumf %517, %518 : vector<12x32xf32>
    %528 = arith.maximumf %519, %520 : vector<12x32xf32>
    %529 = arith.maximumf %521, %522 : vector<12x32xf32>
    %530 = arith.maximumf %523, %524 : vector<12x32xf32>
    %531 = arith.maximumf %525, %526 : vector<12x32xf32>
    %532 = arith.maximumf %527, %528 : vector<12x32xf32>
    %533 = arith.maximumf %529, %530 : vector<12x32xf32>
    %534 = arith.maximumf %531, %532 : vector<12x32xf32>
    %535 = arith.maximumf %533, %534 : vector<12x32xf32>
    %536 = vector.extract_strided_slice %535 {offsets = [0, 0], sizes = [3, 32], strides = [1, 1]} : vector<12x32xf32> to vector<3x32xf32>
    %cst_32 = arith.constant dense<0xFF800000> : vector<32xf32>
    %537 = vector.multi_reduction <maximumf>, %536, %cst_32 [0] : vector<3x32xf32> to vector<32xf32>
    %538 = vector.shape_cast %537 : vector<32xf32> to vector<1x32xf32>
    %539 = vector.extract_strided_slice %535 {offsets = [3, 0], sizes = [3, 32], strides = [1, 1]} : vector<12x32xf32> to vector<3x32xf32>
    %cst_33 = arith.constant dense<0xFF800000> : vector<32xf32>
    %540 = vector.multi_reduction <maximumf>, %539, %cst_33 [0] : vector<3x32xf32> to vector<32xf32>
    %541 = vector.shape_cast %540 : vector<32xf32> to vector<1x32xf32>
    %542 = vector.extract_strided_slice %535 {offsets = [6, 0], sizes = [3, 32], strides = [1, 1]} : vector<12x32xf32> to vector<3x32xf32>
    %cst_34 = arith.constant dense<0xFF800000> : vector<32xf32>
    %543 = vector.multi_reduction <maximumf>, %542, %cst_34 [0] : vector<3x32xf32> to vector<32xf32>
    %544 = vector.shape_cast %543 : vector<32xf32> to vector<1x32xf32>
    %545 = vector.extract_strided_slice %535 {offsets = [9, 0], sizes = [3, 32], strides = [1, 1]} : vector<12x32xf32> to vector<3x32xf32>
    %cst_35 = arith.constant dense<0xFF800000> : vector<32xf32>
    %546 = vector.multi_reduction <maximumf>, %545, %cst_35 [0] : vector<3x32xf32> to vector<32xf32>
    %547 = vector.shape_cast %546 : vector<32xf32> to vector<1x32xf32>
    %548 = vector.extract_strided_slice %38 {offsets = [0, 1024], sizes = [12, 32], strides = [1, 1]} : vector<12x2048xf32> to vector<12x32xf32>
    %549 = vector.extract_strided_slice %38 {offsets = [0, 1056], sizes = [12, 32], strides = [1, 1]} : vector<12x2048xf32> to vector<12x32xf32>
    %550 = vector.extract_strided_slice %38 {offsets = [0, 1088], sizes = [12, 32], strides = [1, 1]} : vector<12x2048xf32> to vector<12x32xf32>
    %551 = vector.extract_strided_slice %38 {offsets = [0, 1120], sizes = [12, 32], strides = [1, 1]} : vector<12x2048xf32> to vector<12x32xf32>
    %552 = vector.extract_strided_slice %38 {offsets = [0, 1152], sizes = [12, 32], strides = [1, 1]} : vector<12x2048xf32> to vector<12x32xf32>
    %553 = vector.extract_strided_slice %38 {offsets = [0, 1184], sizes = [12, 32], strides = [1, 1]} : vector<12x2048xf32> to vector<12x32xf32>
    %554 = vector.extract_strided_slice %38 {offsets = [0, 1216], sizes = [12, 32], strides = [1, 1]} : vector<12x2048xf32> to vector<12x32xf32>
    %555 = vector.extract_strided_slice %38 {offsets = [0, 1248], sizes = [12, 32], strides = [1, 1]} : vector<12x2048xf32> to vector<12x32xf32>
    %556 = vector.extract_strided_slice %38 {offsets = [0, 1280], sizes = [12, 32], strides = [1, 1]} : vector<12x2048xf32> to vector<12x32xf32>
    %557 = vector.extract_strided_slice %38 {offsets = [0, 1312], sizes = [12, 32], strides = [1, 1]} : vector<12x2048xf32> to vector<12x32xf32>
    %558 = vector.extract_strided_slice %38 {offsets = [0, 1344], sizes = [12, 32], strides = [1, 1]} : vector<12x2048xf32> to vector<12x32xf32>
    %559 = vector.extract_strided_slice %38 {offsets = [0, 1376], sizes = [12, 32], strides = [1, 1]} : vector<12x2048xf32> to vector<12x32xf32>
    %560 = vector.extract_strided_slice %38 {offsets = [0, 1408], sizes = [12, 32], strides = [1, 1]} : vector<12x2048xf32> to vector<12x32xf32>
    %561 = vector.extract_strided_slice %38 {offsets = [0, 1440], sizes = [12, 32], strides = [1, 1]} : vector<12x2048xf32> to vector<12x32xf32>
    %562 = vector.extract_strided_slice %38 {offsets = [0, 1472], sizes = [12, 32], strides = [1, 1]} : vector<12x2048xf32> to vector<12x32xf32>
    %563 = vector.extract_strided_slice %38 {offsets = [0, 1504], sizes = [12, 32], strides = [1, 1]} : vector<12x2048xf32> to vector<12x32xf32>
    %564 = arith.maximumf %548, %549 : vector<12x32xf32>
    %565 = arith.maximumf %550, %551 : vector<12x32xf32>
    %566 = arith.maximumf %552, %553 : vector<12x32xf32>
    %567 = arith.maximumf %554, %555 : vector<12x32xf32>
    %568 = arith.maximumf %556, %557 : vector<12x32xf32>
    %569 = arith.maximumf %558, %559 : vector<12x32xf32>
    %570 = arith.maximumf %560, %561 : vector<12x32xf32>
    %571 = arith.maximumf %562, %563 : vector<12x32xf32>
    %572 = arith.maximumf %564, %565 : vector<12x32xf32>
    %573 = arith.maximumf %566, %567 : vector<12x32xf32>
    %574 = arith.maximumf %568, %569 : vector<12x32xf32>
    %575 = arith.maximumf %570, %571 : vector<12x32xf32>
    %576 = arith.maximumf %572, %573 : vector<12x32xf32>
    %577 = arith.maximumf %574, %575 : vector<12x32xf32>
    %578 = arith.maximumf %576, %577 : vector<12x32xf32>
    %579 = vector.extract_strided_slice %578 {offsets = [0, 0], sizes = [3, 32], strides = [1, 1]} : vector<12x32xf32> to vector<3x32xf32>
    %cst_36 = arith.constant dense<0xFF800000> : vector<32xf32>
    %580 = vector.multi_reduction <maximumf>, %579, %cst_36 [0] : vector<3x32xf32> to vector<32xf32>
    %581 = vector.shape_cast %580 : vector<32xf32> to vector<1x32xf32>
    %582 = vector.extract_strided_slice %578 {offsets = [3, 0], sizes = [3, 32], strides = [1, 1]} : vector<12x32xf32> to vector<3x32xf32>
    %cst_37 = arith.constant dense<0xFF800000> : vector<32xf32>
    %583 = vector.multi_reduction <maximumf>, %582, %cst_37 [0] : vector<3x32xf32> to vector<32xf32>
    %584 = vector.shape_cast %583 : vector<32xf32> to vector<1x32xf32>
    %585 = vector.extract_strided_slice %578 {offsets = [6, 0], sizes = [3, 32], strides = [1, 1]} : vector<12x32xf32> to vector<3x32xf32>
    %cst_38 = arith.constant dense<0xFF800000> : vector<32xf32>
    %586 = vector.multi_reduction <maximumf>, %585, %cst_38 [0] : vector<3x32xf32> to vector<32xf32>
    %587 = vector.shape_cast %586 : vector<32xf32> to vector<1x32xf32>
    %588 = vector.extract_strided_slice %578 {offsets = [9, 0], sizes = [3, 32], strides = [1, 1]} : vector<12x32xf32> to vector<3x32xf32>
    %cst_39 = arith.constant dense<0xFF800000> : vector<32xf32>
    %589 = vector.multi_reduction <maximumf>, %588, %cst_39 [0] : vector<3x32xf32> to vector<32xf32>
    %590 = vector.shape_cast %589 : vector<32xf32> to vector<1x32xf32>
    %591 = vector.extract_strided_slice %38 {offsets = [0, 1536], sizes = [12, 32], strides = [1, 1]} : vector<12x2048xf32> to vector<12x32xf32>
    %592 = vector.extract_strided_slice %38 {offsets = [0, 1568], sizes = [12, 32], strides = [1, 1]} : vector<12x2048xf32> to vector<12x32xf32>
    %593 = vector.extract_strided_slice %38 {offsets = [0, 1600], sizes = [12, 32], strides = [1, 1]} : vector<12x2048xf32> to vector<12x32xf32>
    %594 = vector.extract_strided_slice %38 {offsets = [0, 1632], sizes = [12, 32], strides = [1, 1]} : vector<12x2048xf32> to vector<12x32xf32>
    %595 = vector.extract_strided_slice %38 {offsets = [0, 1664], sizes = [12, 32], strides = [1, 1]} : vector<12x2048xf32> to vector<12x32xf32>
    %596 = vector.extract_strided_slice %38 {offsets = [0, 1696], sizes = [12, 32], strides = [1, 1]} : vector<12x2048xf32> to vector<12x32xf32>
    %597 = vector.extract_strided_slice %38 {offsets = [0, 1728], sizes = [12, 32], strides = [1, 1]} : vector<12x2048xf32> to vector<12x32xf32>
    %598 = vector.extract_strided_slice %38 {offsets = [0, 1760], sizes = [12, 32], strides = [1, 1]} : vector<12x2048xf32> to vector<12x32xf32>
    %599 = vector.extract_strided_slice %38 {offsets = [0, 1792], sizes = [12, 32], strides = [1, 1]} : vector<12x2048xf32> to vector<12x32xf32>
    %600 = vector.extract_strided_slice %38 {offsets = [0, 1824], sizes = [12, 32], strides = [1, 1]} : vector<12x2048xf32> to vector<12x32xf32>
    %601 = vector.extract_strided_slice %38 {offsets = [0, 1856], sizes = [12, 32], strides = [1, 1]} : vector<12x2048xf32> to vector<12x32xf32>
    %602 = vector.extract_strided_slice %38 {offsets = [0, 1888], sizes = [12, 32], strides = [1, 1]} : vector<12x2048xf32> to vector<12x32xf32>
    %603 = vector.extract_strided_slice %38 {offsets = [0, 1920], sizes = [12, 32], strides = [1, 1]} : vector<12x2048xf32> to vector<12x32xf32>
    %604 = vector.extract_strided_slice %38 {offsets = [0, 1952], sizes = [12, 32], strides = [1, 1]} : vector<12x2048xf32> to vector<12x32xf32>
    %605 = vector.extract_strided_slice %38 {offsets = [0, 1984], sizes = [12, 32], strides = [1, 1]} : vector<12x2048xf32> to vector<12x32xf32>
    %606 = vector.extract_strided_slice %38 {offsets = [0, 2016], sizes = [12, 32], strides = [1, 1]} : vector<12x2048xf32> to vector<12x32xf32>
    %607 = arith.maximumf %591, %592 : vector<12x32xf32>
    %608 = arith.maximumf %593, %594 : vector<12x32xf32>
    %609 = arith.maximumf %595, %596 : vector<12x32xf32>
    %610 = arith.maximumf %597, %598 : vector<12x32xf32>
    %611 = arith.maximumf %599, %600 : vector<12x32xf32>
    %612 = arith.maximumf %601, %602 : vector<12x32xf32>
    %613 = arith.maximumf %603, %604 : vector<12x32xf32>
    %614 = arith.maximumf %605, %606 : vector<12x32xf32>
    %615 = arith.maximumf %607, %608 : vector<12x32xf32>
    %616 = arith.maximumf %609, %610 : vector<12x32xf32>
    %617 = arith.maximumf %611, %612 : vector<12x32xf32>
    %618 = arith.maximumf %613, %614 : vector<12x32xf32>
    %619 = arith.maximumf %615, %616 : vector<12x32xf32>
    %620 = arith.maximumf %617, %618 : vector<12x32xf32>
    %621 = arith.maximumf %619, %620 : vector<12x32xf32>
    %622 = vector.extract_strided_slice %621 {offsets = [0, 0], sizes = [3, 32], strides = [1, 1]} : vector<12x32xf32> to vector<3x32xf32>
    %cst_40 = arith.constant dense<0xFF800000> : vector<32xf32>
    %623 = vector.multi_reduction <maximumf>, %622, %cst_40 [0] : vector<3x32xf32> to vector<32xf32>
    %624 = vector.shape_cast %623 : vector<32xf32> to vector<1x32xf32>
    %625 = vector.extract_strided_slice %621 {offsets = [3, 0], sizes = [3, 32], strides = [1, 1]} : vector<12x32xf32> to vector<3x32xf32>
    %cst_41 = arith.constant dense<0xFF800000> : vector<32xf32>
    %626 = vector.multi_reduction <maximumf>, %625, %cst_41 [0] : vector<3x32xf32> to vector<32xf32>
    %627 = vector.shape_cast %626 : vector<32xf32> to vector<1x32xf32>
    %628 = vector.extract_strided_slice %621 {offsets = [6, 0], sizes = [3, 32], strides = [1, 1]} : vector<12x32xf32> to vector<3x32xf32>
    %cst_42 = arith.constant dense<0xFF800000> : vector<32xf32>
    %629 = vector.multi_reduction <maximumf>, %628, %cst_42 [0] : vector<3x32xf32> to vector<32xf32>
    %630 = vector.shape_cast %629 : vector<32xf32> to vector<1x32xf32>
    %631 = vector.extract_strided_slice %621 {offsets = [9, 0], sizes = [3, 32], strides = [1, 1]} : vector<12x32xf32> to vector<3x32xf32>
    %cst_43 = arith.constant dense<0xFF800000> : vector<32xf32>
    %632 = vector.multi_reduction <maximumf>, %631, %cst_43 [0] : vector<3x32xf32> to vector<32xf32>
    %633 = vector.shape_cast %632 : vector<32xf32> to vector<1x32xf32>
    %634 = tpu.concatenate %167, %233, %236, %302, %305, %351, %354, %357, %403, %406, %409, %455, %458, %461, %495, %498 in 1 : vector<1x32xf32>, vector<1x32xf32>, vector<1x32xf32>, vector<1x32xf32>, vector<1x32xf32>, vector<1x32xf32>, vector<1x32xf32>, vector<1x32xf32>, vector<1x32xf32>, vector<1x32xf32>, vector<1x32xf32>, vector<1x32xf32>, vector<1x32xf32>, vector<1x32xf32>, vector<1x32xf32>, vector<1x32xf32> -> vector<1x512xf32>
    %635 = tpu.concatenate %501, %504, %538, %541, %544, %547, %581, %584, %587, %590, %624, %627, %630, %633 in 1 : vector<1x32xf32>, vector<1x32xf32>, vector<1x32xf32>, vector<1x32xf32>, vector<1x32xf32>, vector<1x32xf32>, vector<1x32xf32>, vector<1x32xf32>, vector<1x32xf32>, vector<1x32xf32>, vector<1x32xf32>, vector<1x32xf32>, vector<1x32xf32>, vector<1x32xf32> -> vector<1x448xf32>
    %636 = tpu.concatenate %634, %635 in 1 : vector<1x512xf32>, vector<1x448xf32> -> vector<1x960xf32>
    %637 = arith.truncf %636 : vector<1x960xf32> to vector<1x960xbf16>
    %c0_44 = arith.constant 0 : index
    %c0_45 = arith.constant 0 : index
    %638 = vector.load %arg6[%c0_44, %c0_45] : memref<960x1024xbf16, #tpu.memory_space<vmem>>, vector<960x1024xbf16>
    %cst_46 = arith.constant dense<0.000000e+00> : vector<1x1024xf32>
    %639 = tpu.matmul %637, %638, %cst_46 {dimension_numbers = #tpu.dot_dimension_numbers<[1], [0], [0], [1], [0, 0, 1, 1], [], []>} : vector<1x960xbf16>, vector<960x1024xbf16>, vector<1x1024xf32> -> vector<1x1024xf32>
    %c0_47 = arith.constant 0 : index
    %c0_48 = arith.constant 0 : index
    %640 = vector.load %arg7[%c0_47, %c0_48] : memref<1x1024xf32, #tpu.memory_space<vmem>>, vector<1x1024xf32>
    %641 = arith.addf %639, %640 : vector<1x1024xf32>
    %cst_49 = arith.constant 0.000000e+00 : f32
    %642 = vector.broadcast %cst_49 : f32 to vector<1x1024xf32>
    %643 = arith.maximumf %641, %642 : vector<1x1024xf32>
    %c0_50 = arith.constant 0 : index
    %c0_51 = arith.constant 0 : index
    %644 = vector.load %arg8[%c0_50, %c0_51] : memref<1x1024xf32, #tpu.memory_space<vmem>>, vector<1x1024xf32>
    %645 = arith.mulf %643, %644 : vector<1x1024xf32>
    %cst_52 = arith.constant dense<0.000000e+00> : vector<1xf32>
    %646 = vector.multi_reduction <add>, %645, %cst_52 [1] : vector<1x1024xf32> to vector<1xf32>
    %647 = vector.shape_cast %646 : vector<1xf32> to vector<1x1xf32>
    %c0_53 = arith.constant 0 : index
    %c0_54 = arith.constant 0 : index
    %648 = vector.load %arg9[%c0_53, %c0_54] : memref<1x1xf32, #tpu.memory_space<vmem>>, vector<1x1xf32>
    %649 = arith.addf %647, %648 : vector<1x1xf32>
    %cst_55 = arith.constant 0.000000e+00 : f32
    %650 = vector.broadcast %cst_55 : f32 to vector<1x1xf32>
    %651 = arith.subf %650, %649 : vector<1x1xf32>
    %652 = math.exp %651 : vector<1x1xf32>
    %cst_56 = arith.constant 1.000000e+00 : f32
    %653 = vector.broadcast %cst_56 : f32 to vector<1x1xf32>
    %654 = arith.addf %653, %652 : vector<1x1xf32>
    %cst_57 = arith.constant 1.000000e+00 : f32
    %655 = vector.broadcast %cst_57 : f32 to vector<1x1xf32>
    %656 = arith.divf %655, %654 : vector<1x1xf32>
    %c0_58 = arith.constant 0 : index
    %c0_59 = arith.constant 0 : index
    %c0_60 = arith.constant 0 : index
    %657 = vector.load %arg10[%c0_58, %c0_59, %c0_60] : memref<1x1x1xf32, #tpu.memory_space<vmem>>, vector<1x1x1xf32>
    %658 = vector.shape_cast %657 : vector<1x1x1xf32> to vector<1x1xf32>
    %659 = vector.shape_cast %656 : vector<1x1xf32> to vector<1x1x1xf32>
    tpu.vector_store %arg10[%c0_58, %c0_59, %c0_60], %659 {strides = array<i32>} : memref<1x1x1xf32, #tpu.memory_space<vmem>>, vector<1x1x1xf32>,
    return
  }
  func.func @transform_0(%arg0: i32) -> (i32, i32, i32) {
    %c0_i32 = arith.constant 0 : i32
    %c0_i32_0 = arith.constant 0 : i32
    %c0_i32_1 = arith.constant 0 : i32
    return %arg0, %c0_i32, %c0_i32_0 : i32, i32, i32
  }
  func.func @transform_1(%arg0: i32) -> (i32, i32) {
    %c0_i32 = arith.constant 0 : i32
    %c0_i32_0 = arith.constant 0 : i32
    %c0_i32_1 = arith.constant 0 : i32
    return %c0_i32, %c0_i32_0 : i32, i32
  }
  func.func @transform_2(%arg0: i32) -> (i32, i32) {
    %c0_i32 = arith.constant 0 : i32
    %c0_i32_0 = arith.constant 0 : i32
    %c0_i32_1 = arith.constant 0 : i32
    return %c0_i32, %c0_i32_0 : i32, i32
  }
  func.func @transform_3(%arg0: i32) -> (i32, i32) {
    %c0_i32 = arith.constant 0 : i32
    %c0_i32_0 = arith.constant 0 : i32
    %c0_i32_1 = arith.constant 0 : i32
    return %c0_i32, %c0_i32_0 : i32, i32
  }
  func.func @transform_4(%arg0: i32) -> (i32, i32) {
    %c0_i32 = arith.constant 0 : i32
    %c0_i32_0 = arith.constant 0 : i32
    %c0_i32_1 = arith.constant 0 : i32
    return %c0_i32, %c0_i32_0 : i32, i32
  }
  func.func @transform_5(%arg0: i32) -> (i32, i32) {
    %c0_i32 = arith.constant 0 : i32
    %c0_i32_0 = arith.constant 0 : i32
    %c0_i32_1 = arith.constant 0 : i32
    return %c0_i32, %c0_i32_0 : i32, i32
  }
  func.func @transform_6(%arg0: i32) -> (i32, i32) {
    %c0_i32 = arith.constant 0 : i32
    %c0_i32_0 = arith.constant 0 : i32
    %c0_i32_1 = arith.constant 0 : i32
    return %c0_i32, %c0_i32_0 : i32, i32
  }
  func.func @transform_7(%arg0: i32) -> (i32, i32) {
    %c0_i32 = arith.constant 0 : i32
    %c0_i32_0 = arith.constant 0 : i32
    %c0_i32_1 = arith.constant 0 : i32
    return %c0_i32, %c0_i32_0 : i32, i32
  }
  func.func @transform_8(%arg0: i32) -> (i32, i32) {
    %c0_i32 = arith.constant 0 : i32
    %c0_i32_0 = arith.constant 0 : i32
    %c0_i32_1 = arith.constant 0 : i32
    return %c0_i32, %c0_i32_0 : i32, i32
  }
  func.func @transform_9(%arg0: i32) -> (i32, i32, i32) {
    %c0_i32 = arith.constant 0 : i32
    %c0_i32_0 = arith.constant 0 : i32
    %c0_i32_1 = arith.constant 0 : i32
    return %arg0, %c0_i32, %c0_i32_0 : i32, i32, i32
  }
}

</mosaic_0001>

<bundles_post_ra>
// kernel: deepraman_forward.1
= control target key start
LH: loop header
LB: loop body
LE: loop exit
PB: predicated region body
PF: predicated region fallthrough
CT: control target
= control target key end

     0   :  { %s15606_s0 = inlined_call_operand.vmem [shape: f32[2,12,18], index: 0, kind: input, shape index: {}]   ;;  %s15607_s1 = inlined_call_operand.hbm [shape: bf16[18,192], index: 1, kind: input, shape index: {}]   ;;  %s15608_s2 = inlined_call_operand.hbm [shape: f32[1,192], index: 2, kind: input, shape index: {}]   ;;  %s15609_s3 = inlined_call_operand.hbm [shape: bf16[448,2048], index: 3, kind: input, shape index: {}]   ;;  %s15610_s4 = inlined_call_operand.hbm [shape: f32[1,2048], index: 4, kind: input, shape index: {}]   ;;  %s15611_s5 = inlined_call_operand.hbm [shape: bf16[960,1024], index: 5, kind: input, shape index: {}]   ;;  %s15612_s6 = inlined_call_operand.hbm [shape: f32[1,1024], index: 6, kind: input, shape index: {}]   ;;  %s15613_s7 = inlined_call_operand.hbm [shape: f32[1,1024], index: 7, kind: input, shape index: {}]   ;;  %s15614_s8 = inlined_call_operand.<no memory space> [shape: f32[1,1], index: 8, kind: input, shape index: {}]   ;;  %s15615_s9 = inlined_call_operand.vmem [shape: f32[2,1,1], index: 9, kind: output, shape index: {}]  }
   0x1   :  { %v14_v0 = vstv %s15614_s8 }
   0x2   :  { %15 = vst [vmem:[#allocation2] sm:$0x1] %v14_v0 }
   0x3   :  { %16 = vsyncpa [#allocation4], 0 }
   0x4   :  { %17 = vsyncpa [#allocation6], 0 }
   0x5   :  { %18 = vsyncpa [#allocation9], 0 }
   0x6   :  { %19 = vsyncpa [#allocation12], 0  ;;  %s14389_s11 = smov 0  }
   0x7 LB: > { %s276_s14 = sshll.u32 %s15608_s2, 4  ;;  %s14398_s8 = sadd.s32 4294967295, %s14317_s11   ;;  %s14317_s11 = sphi %s14389_s11, %s25_s11   ;;  %s277_s14 = int_to_ptr.hbm [resolvable:$true] %s276_s14 }
   0x8   : > { %p9015_p0 = scmp.ge.s32.totalorder %s14317_s11, 1  ;;  %p250_p1 = scmp.lt.s32.totalorder %s14317_s11, 3 }
   0x9   : > { %p13763_p2 = scmp.eq.s32.totalorder %s14398_s8, 0  ;;  %s14319_s16 = smov [#allocation5]  }
   0xa   : > { %p14403_p3 = pnand %p9015_p0, %p250_p1  ;;  %s278_s17 = sshll.u32 %s14319_s16, 4  ;;  %s279_s17 = int_to_ptr.vmem [resolvable:$true] %s278_s17 }
   0xb   : > { %s302_s20 = sshll.u32 %s15610_s4, 4  ;;  %s328_s23 = sshll.u32 %s15612_s6, 4  ;;  %s303_s20 = int_to_ptr.hbm [resolvable:$true] %s302_s20  ;;  %s329_s23 = int_to_ptr.hbm [resolvable:$true] %s328_s23 }
   0xc   : > { %p13741_p4 = pneg %p14403_p3  ;;  %s14320_s25 = smov [#allocation8]  }
   0xd   : > { %s304_s26 = sshll.u32 %s14320_s25, 4  ;;  %s14321_s27 = smov [#allocation11]   ;;  %s305_s26 = int_to_ptr.vmem [resolvable:$true] %s304_s26 }
   0xe   : > { %p14417_p5 = pnand %p13763_p2, %p13741_p4  ;;  %s330_s28 = sshll.u32 %s14321_s27, 4  ;;  %s331_s28 = int_to_ptr.vmem [resolvable:$true] %s330_s28 }
   0xf   : > { %s261_s10 = sshll.u32 %s15607_s1, 4  ;;  %s14322_s12 = smov [#allocation3]   ;;  %s262_s10 = int_to_ptr.hbm [resolvable:$true] %s261_s10 }
  0x10   : > { %13747 = dma.hbm_to_vmem [thread:$0]  (!%p14417_p5), %s277_s14, 32, %s279_s17, [#allocation6]  }
  0x11   : > { %13753 = dma.hbm_to_vmem [thread:$0]  (!%p14417_p5), %s303_s20, 256, %s305_s26, [#allocation9]  }
  0x12   : > { %13759 = dma.hbm_to_vmem [thread:$0]  (!%p14417_p5), %s329_s23, 128, %s331_s28, [#allocation12]  }
  0x13   : > { %s263_s13 = sshll.u32 %s14322_s12, 4  ;;  %s287_s14 = sshll.u32 %s15609_s3, 4  ;;  %s264_s13 = int_to_ptr.vmem [resolvable:$true] %s263_s13  ;;  %s288_s14 = int_to_ptr.hbm [resolvable:$true] %s287_s14 }
  0x14   : > { %s14323_s17 = smov 128   ;;  %s14324_s19 = smov 8  }
  0x15   : > { %13744 = dma.hbm_to_vmem [thread:$0]  (!%p14417_p5), %s262_s10, 384, %s264_s13, [#allocation4], %s14323_s17, %s14323_s17, %s14324_s19  }
  0x16   : > { %s14325_s20 = smov [#allocation7]   ;;  %s14326_s22 = smov 1024  }
  0x17   : > { %s289_s21 = sshll.u32 %s14325_s20, 4  ;;  %s14327_s25 = smov 64   ;;  %s290_s21 = int_to_ptr.vmem [resolvable:$true] %s289_s21 }
  0x18   : > { %13750 = dma.hbm_to_vmem [thread:$0]  (!%p14417_p5), %s288_s14, 57344, %s290_s21, [#allocation6], %s14326_s22, %s14326_s22, %s14327_s25  }
  0x19   : > { %s313_s27 = sshll.u32 %s15611_s5, 4  ;;  %s14328_s28 = smov [#allocation10]   ;;  %s314_s27 = int_to_ptr.hbm [resolvable:$true] %s313_s27 }
  0x1a   : > { %s315_s29 = sshll.u32 %s14328_s28, 4  ;;  %s340_s12 = sshll.u32 %s15613_s7, 4  ;;  %s316_s29 = int_to_ptr.vmem [resolvable:$true] %s315_s29  ;;  %s341_s12 = int_to_ptr.hbm [resolvable:$true] %s340_s12 }
  0x1b   : > { %s14329_s13 = smov 512   ;;  %s14330_s16 = smov 32  }
  0x1c   : > { %13756 = dma.hbm_to_vmem [thread:$0]  (!%p14417_p5), %s314_s27, 61440, %s316_s29, [#allocation9], %s14329_s13, %s14329_s13, %s14330_s16  }
  0x1d   : > { %s14331_s18 = smov [#allocation13]   ;;  %366 = sbr.rel (%p14403_p3) target bundleno = 2251 (0x8cb), region = 56 }
  0x1e   : > { %s342_s17 = sshll.u32 %s14331_s18, 4  ;;  %s343_s17 = int_to_ptr.vmem [resolvable:$true] %s342_s17 }
  0x1f   : > { %13762 = dma.hbm_to_vmem [thread:$0]  (!%p14417_p5), %s341_s12, 128, %s343_s17, [#allocation12]  }
  0x22   : > { %14300 = dma.done.wait (%p13763_p2), [#allocation4], 384  }
  0x23   : > { %14302 = vsyncadd (%p13763_p2), [#allocation4], 4294966912 }
  0x24   : > { %14304 = dma.done.wait (%p13763_p2), [#allocation6], 57376  }
  0x25   : > { %14306 = vsyncadd (%p13763_p2), [#allocation6], 4294909920 }
  0x26   : > { %14308 = dma.done.wait (%p13763_p2), [#allocation9], 61696  }
  0x27   : > { %14310 = vsyncadd (%p13763_p2), [#allocation9], 4294905600 }
  0x28   : > { %14312 = dma.done.wait (%p13763_p2), [#allocation12], 256  }
  0x29   : > { %14314 = vsyncadd (%p13763_p2), [#allocation12], 4294967040  ;;  %p431_p6 = scmp.lt.s32.totalorder %s14398_s8, 1  ;;  %v445_v1 = vld [vmem:[#allocation3 + $0x10] sm:$0x11]  ;;  %vm471_vm0 = vcmask 1040384  }
  0x2a   : > { %v459_v2 = vunpack.c.l.b16 %v445_v1  ;;  %v460_v3 = vunpack.c.h.b16 %v445_v1  ;;  %v9036_v4 = vld [vmem:[#allocation3] sm:$0xf]  ;;  %v12784_v7 = vld [vmem:[#allocation3 + $0x4] sm:$0xf0]  ;;  %v12783_v8 = vld [vmem:[#allocation3 + $0x4] sm:$0xf] }
  0x2b   : > { %s15635_s8 = smov (!%p431_p6, %s14398_s8), 1  ;;  %v9038_v9 = vld [vmem:[#allocation3 + $0x8] sm:$0xf0]  ;;  %v9037_v12 = vor.u32 %v12784_v7, %v9036_v4  ;;  %vm467_vm1 = vcmask 146432   ;;  %v446_v17 = vld [vmem:[#allocation5] sm:$0x3] }
  0x2c   : > { %s12782_s15 = sshll.u32 %s15635_s8, 4  ;;  %v463_v5 = vpack.c.b16 %v459_v2, %v459_v2  ;;  %v464_v6 = vpack.c.b16 %v460_v3, %v460_v3  ;;  %v9041_v13 = vor.u32 %v12783_v8, %v9038_v9  ;;  %v448_v20 = vperm.slane %v446_v17, 0  ;;  %s14332_s20 = smov 96   ;;  %v10774_v34 = vld [vmem:[#allocation7 + $0xd80] sm:$0xf] }
  0x2d   : > { %s435_s19 = scalar_lea.vmem %s15606_s0, %s12782_s15  ;;  %v449_v21 = vperm.slane %v446_v17, 1  ;;  %s14333_s21 = smov 64   ;;  %v13225_v35 = vld [vmem:[#allocation7 + $0xdbc] sm:$0xf0]  ;;  %v12897_v2 = vld [vmem:[#allocation7 + $0x384] sm:$0xf] }
  0x2e   : > { %v473_v10 = vsel %vm471_vm0, %v463_v5, 0  ;;  %v476_v11 = vsel %vm471_vm0, %v464_v6, 0  ;;  %v440_v14 = vld [vmem:[%s435_s19] sm:$0xff]  ;;  %v441_v15 = vld [vmem:[%s435_s19 + $0x8] sm:$0xf]  ;;  %v10775_v36 = vor.u32 %v13225_v35, %v10774_v34  ;;  %vm554_vm2 = vcmask 261120   ;;  %s438_s26 = scalar_lea.vmem %s15615_s9, %s15635_s8 }
  0x2f   : > { %484 = vmatpush.bf16.msra.mxu0 %v473_v10  ;;  %498 = vmatpush.bf16.msra.mxu1 %v476_v11  ;;  %v442_v16 = vpack.c.bf16 %v441_v15, %v440_v14  ;;  %v10710_v48 = vld [vmem:[#allocation7 + $0xd00] sm:$0xf]  ;;  %v9496_v3 = vld [vmem:[#allocation7 + $0x3c0] sm:$0xf0]  ;;  %vm559_vm3 = vcmask 1042432   ;;  %vm566_vm4 = vcmask 1046528  }
  0x30   : > { %v13209_v49 = vld [vmem:[#allocation7 + $0xd3c] sm:$0xf0]  ;;  %v9499_v7 = vor.u32 %v12897_v2, %v9496_v3  ;;  %v12881_v10 = vld [vmem:[#allocation7 + $0x304] sm:$0xf]  ;;  %vm613_vm5 = vcmask 1041408   ;;  %vm585_vm6 = vcmask 1044480  }
  0x31   : > { %v10711_v50 = vor.u32 %v13209_v49, %v10710_v48  ;;  %v10646_v51 = vld [vmem:[#allocation7 + $0xc80] sm:$0xf]  ;;  %v9432_v11 = vld [vmem:[#allocation7 + $0x340] sm:$0xf0]  ;;  %vm621_vm7 = vcmask 523264   ;;  %vm579_vm8 = vcmask 1045504  }
  0x32   : > { %v13193_v52 = vld [vmem:[#allocation7 + $0xcbc] sm:$0xf0]  ;;  %v12865_v17 = vld [vmem:[#allocation7 + $0x284] sm:$0xf]  ;;  %vm595_vm9 = vcmask 1043456   ;;  %vm4638_vm10 = vcmask 257024  }
  0x33   : > { %485 = vmatpush.bf16.msra.mxu0 %v9037_v12  ;;  %499 = vmatpush.bf16.msra.mxu1 %v9041_v13  ;;  %v10647_v53 = vor.u32 %v13193_v52, %v10646_v51  ;;  %v10582_v54 = vld [vmem:[#allocation7 + $0xc00] sm:$0xf]  ;;  %v9435_v13 = vor.u32 %v12881_v10, %v9432_v11  ;;  %v12833_v48 = vld [vmem:[#allocation7 + $0x184] sm:$0xf]  ;;  %vm4869_vm11 = vcmask 257025   ;;  %vm4692_vm12 = vcmask 261124  }
  0x34   : > { %v13177_v55 = vld [vmem:[#allocation7 + $0xc3c] sm:$0xf0]  ;;  %v9240_v49 = vld [vmem:[#allocation7 + $0x1c0] sm:$0xf0]  ;;  %vm4860_vm13 = vcmask 253952   ;;  %vm4655_vm14 = vcmask 261126  }
  0x35   : > { %v10583_v56 = vor.u32 %v13177_v55, %v10582_v54  ;;  %v10006_v58 = vld [vmem:[#allocation7 + $0x780] sm:$0xf]  ;;  %vm4647_vm15 = vcmask 259072   ;;  %s14335_s22 = smov 32  }
  0x36   : > { %9042 = vmatmul.msk.bf16.vlgmr.msra.gmra.mxu0 %vm467_vm1, %v442_v16  ;;  %9043 = vmatmul.msk.bf16.vlgmr.msra.gmra.mxu1 %vm467_vm1, %v442_v16  ;;  %v13033_v59 = vld [vmem:[#allocation7 + $0x7bc] sm:$0xf0]  ;;  %vm4843_vm1 = vcmask 256000  }
  0x37   : > { %3405 = vmatpush.bf16.msrb.mxu1 %v10775_v36  ;;  %v9942_v60 = vld [vmem:[#allocation7 + $0x700] sm:$0xf]  ;;  %v10007_v61 = vor.u32 %v13033_v59, %v10006_v58 }
  0x38   : > { %v13017_v62 = vld [vmem:[#allocation7 + $0x73c] sm:$0xf0] }
  0x39   : > { %v9494_v63 = vld [vmem:[#allocation7 + $0x380] sm:$0xf]  ;;  %3373 = vmatpush.bf16.msra.mxu3 %v10007_v61  ;;  %v9943_v0 = vor.u32 %v13017_v62, %v9942_v60 }
  0x3a   : > { %v12905_v1 = vld [vmem:[#allocation7 + $0x3bc] sm:$0xf0] }
  0x3b   : > { %3406 = vmatpush.bf16.msrb.mxu1 %v10711_v50  ;;  %v9878_v4 = vld [vmem:[#allocation7 + $0x680] sm:$0xf]  ;;  %v9495_v6 = vor.u32 %v12905_v1, %v9494_v63  ;;  %v9243_v63 = vor.u32 %v12833_v48, %v9240_v49  ;;  %v12785_v49 = vld [vmem:[#allocation7 + $0x4] sm:$0xf] }
  0x3c   : > { %v13001_v5 = vld [vmem:[#allocation7 + $0x6bc] sm:$0xf0] }
  0x3d   : > { %v9430_v8 = vld [vmem:[#allocation7 + $0x300] sm:$0xf]  ;;  %3359 = vmatpush.bf16.msra.mxu2 %v9495_v6  ;;  %3374 = vmatpush.bf16.msra.mxu3 %v9943_v0  ;;  %v9879_v15 = vor.u32 %v13001_v5, %v9878_v4  ;;  %v12817_v4 = vld [vmem:[#allocation7 + $0x104] sm:$0xf] }
  0x3e   : > { %v12889_v9 = vld [vmem:[#allocation7 + $0x33c] sm:$0xf0]  ;;  %v9176_v5 = vld [vmem:[#allocation7 + $0x140] sm:$0xf0] }
  0x3f   : > { %3407 = vmatpush.bf16.msrb.mxu1 %v10647_v53  ;;  %v9431_v12 = vor.u32 %v12889_v9, %v9430_v8  ;;  %v9366_v14 = vld [vmem:[#allocation7 + $0x280] sm:$0xf] }
  0x40   : > { %v12873_v16 = vld [vmem:[#allocation7 + $0x2bc] sm:$0xf0] }
  0x41   : > { %3360 = vmatpush.bf16.msra.mxu2 %v9431_v12  ;;  %3375 = vmatpush.bf16.msra.mxu3 %v9879_v15  ;;  %v9750_v35 = vld [vmem:[#allocation7 + $0x580] sm:$0xf] }
  0x42   : > { %v12969_v36 = vld [vmem:[#allocation7 + $0x5bc] sm:$0xf0] }
  0x43   : > { %3408 = vmatpush.bf16.msrb.mxu1 %v10583_v56  ;;  %v9686_v52 = vld [vmem:[#allocation7 + $0x500] sm:$0xf]  ;;  %v14334_v56 = vmov 0.0  }
  0x44   : > { %v12953_v53 = vld [vmem:[#allocation7 + $0x53c] sm:$0xf0] }
  0x45   : > { %v10390_v54 = vld [vmem:[#allocation7 + $0xa80] sm:$0xf]  ;;  %v9687_v2 = vor.u32 %v12953_v53, %v9686_v52 }
  0x46   : > { %v13129_v58 = vld [vmem:[#allocation7 + $0xabc] sm:$0xf0] }
  0x47   : > { %3415 = vmatpush.bf16.msra.mxu1 %v9499_v7  ;;  %v9622_v60 = vld [vmem:[#allocation7 + $0x480] sm:$0xf]  ;;  %v10391_v6 = vor.u32 %v13129_v58, %v10390_v54 }
  0x48   : > { %v12937_v61 = vld [vmem:[#allocation7 + $0x4bc] sm:$0xf0] }
  0x49   : > { %v9174_v0 = vld [vmem:[#allocation7 + $0x100] sm:$0xf] }
  0x4a   : > { %v12825_v3 = vld [vmem:[#allocation7 + $0x13c] sm:$0xf0] }
  0x4b   : > { %3416 = vmatpush.bf16.msra.mxu1 %v9435_v13  ;;  %v9110_v7 = vld [vmem:[#allocation7 + $0x80] sm:$0xf]  ;;  %v12801_v13 = vld [vmem:[#allocation7 + $0x84] sm:$0xf] }
  0x4c   : > { %v10326_v8 = vld [vmem:[#allocation7 + $0xa00] sm:$0xf] }
  0x4d   : > { %v13113_v9 = vld [vmem:[#allocation7 + $0xa3c] sm:$0xf0] }
  0x4e   : > { %v12809_v12 = vld [vmem:[#allocation7 + $0xbc] sm:$0xf0] }
  0xb3   : > { %v487_v18 = vpop.f32.mrf.mxu0  ;;  %v501_v19 = vpop.f32.mrf.mxu1 }
  0xb4   : > { %v488_v22 = vadd.f32 %v487_v18, %v448_v20  ;;  %v502_v23 = vadd.f32 %v501_v19, %v449_v21  ;;  %v9368_v18 = vld [vmem:[#allocation7 + $0x2c0] sm:$0xf0]  ;;  %v9814_v19 = vld [vmem:[#allocation7 + $0x600] sm:$0xf] }
  0xb6   : > { %v14475_v26 = vmax.f32 %v488_v22, 0.0  ;;  %v507_v29 = vmax.f32 %v502_v23, 0.0  ;;  %v9367_v22 = vor.u32 %v12873_v16, %v9366_v14  ;;  %v9371_v23 = vor.u32 %v12865_v17, %v9368_v18  ;;  %v9112_v14 = vld [vmem:[#allocation7 + $0xc0] sm:$0xf0] }
  0xb7   : > { %v9175_v17 = vor.u32 %v12825_v3, %v9174_v0  ;;  %v9179_v18 = vor.u32 %v12817_v4, %v9176_v5  ;;  %v13105_v0 = vld [vmem:[#allocation7 + $0xa04] sm:$0xf]  ;;  %v10014_v4 = vld [vmem:[#allocation7 + $0x788] sm:$0xf] }
  0xb8   : > { %3361 = vmatpush.bf16.msra.mxu2 %v9367_v22  ;;  %3417 = vmatpush.bf16.msra.mxu1 %v9371_v23  ;;  %v12921_v22 = vld [vmem:[#allocation7 + $0x43c] sm:$0xf0]  ;;  %v10327_v23 = vor.u32 %v13113_v9, %v10326_v8  ;;  %v10008_v3 = vld [vmem:[#allocation7 + $0x7c0] sm:$0xf0] }
  0xb9   : > { %v10262_v8 = vld [vmem:[#allocation7 + $0x980] sm:$0xf] }
  0xba   : > { %v13097_v9 = vld [vmem:[#allocation7 + $0x9bc] sm:$0xf0] }
  0xbb   : > { %v489_v24 = vpop.f32.mrf.mxu0  ;;  %v503_v25 = vpop.f32.mrf.mxu1 }
  0xbc   : > { %v490_v27 = vadd.f32 %v489_v24, %v448_v20  ;;  %v504_v28 = vadd.f32 %v503_v25, %v449_v21  ;;  %v12985_v20 = vld [vmem:[#allocation7 + $0x63c] sm:$0xf0] }
  0xbd   : > { %v9302_v24 = vld [vmem:[#allocation7 + $0x200] sm:$0xf] }
  0xbe   : > { %v14477_v30 = vmax.f32 %v490_v27, 0.0  ;;  %v509_v31 = vmax.f32 %v504_v28, 0.0  ;;  %v12857_v25 = vld [vmem:[#allocation7 + $0x23c] sm:$0xf0]  ;;  %v12849_v27 = vld [vmem:[#allocation7 + $0x204] sm:$0xf] }
  0xc0   : > { %v13802_v32 = vpack.i.bf16 %v509_v31, %v507_v29  ;;  %v13812_v33 = vpack.i.bf16 %v14477_v30, %v14475_v26  ;;  %v9815_v29 = vor.u32 %v12985_v20, %v9814_v19  ;;  %v9304_v31 = vld [vmem:[#allocation7 + $0x240] sm:$0xf0]  ;;  %v605_v19 = vrot.slane %v14334_v56, 5 }
  0xc1   : > { %v9623_v20 = vor.u32 %v12937_v61, %v9622_v60  ;;  %v13121_v61 = vld [vmem:[#allocation7 + $0xa84] sm:$0xf] }
  0xc2   : > { %13803 = vrot.lane.b32.xlu0 %v13802_v32, %s14332_s20  ;;  %13813 = vrot.lane.b32.xlu1 %v13812_v33, %s14332_s20 }
  0xc3   : > { %3376 = vmatpush.bf16.msra.mxu3 %v9815_v29  ;;  %v9111_v29 = vor.u32 %v12809_v12, %v9110_v7  ;;  %v10264_v12 = vld [vmem:[#allocation7 + $0x9c0] sm:$0xf0] }
  0xca   : > { %13808 = vrot.lane.b32.xlu0 %v13802_v32, %s14333_s21  ;;  %13818 = vrot.lane.b32.xlu1 %v13812_v33, %s14333_s21  ;;  %v10518_v32 = vld [vmem:[#allocation7 + $0xb80] sm:$0xf] }
  0xcb   : > { %v13161_v33 = vld [vmem:[#allocation7 + $0xbbc] sm:$0xf0] }
 0x134   : > { %v13804_v37 = vpop.permute.xlu0 %13803  ;;  %v14488_v57 = vpop.permute.xlu1 %13813 }
 0x135   : > { %v13806_v38 = vunpack.i.h.bf16 %v13804_v37  ;;  %v13805_v39 = vunpack.i.l.bf16 %v13804_v37  ;;  %v13815_v28 = vunpack.i.l.bf16 %v14488_v57  ;;  %v13816_v34 = vunpack.i.h.bf16 %v14488_v57 }
 0x136   : > { %v10519_v37 = vor.u32 %v13161_v33, %v10518_v32  ;;  %v14494_v57 = vrot.slane %v14334_v56, 6 }
 0x137   : > { %v536_v41 = vmax.f32 %v14475_v26, %v13805_v39  ;;  %v537_v42 = vmax.f32 %v14477_v30, %v13806_v38  ;;  %v519_v51 = vmax.f32 %v14477_v30, %v13816_v34 }
 0x138   : > { %3387 = vmatpush.bf16.msrb.mxu0 %v10519_v37 }
 0x13c   : > { %v13809_v40 = vpop.permute.xlu0 %13808  ;;  %v13819_v21 = vpop.permute.xlu1 %13818 }
 0x13d   : > { %v13811_v43 = vunpack.i.h.bf16 %v13809_v40  ;;  %v13810_v44 = vunpack.i.l.bf16 %v13809_v40  ;;  %v13820_v38 = vunpack.i.l.bf16 %v13819_v21  ;;  %v13821_v39 = vunpack.i.h.bf16 %v13819_v21  ;;  %v9558_v21 = vld [vmem:[#allocation7 + $0x400] sm:$0xf] }
 0x13e   : > { %v9303_v40 = vor.u32 %v12857_v25, %v9302_v24 }
 0x13f   : > { %v544_v45 = vmax.f32 %v536_v41, %v13810_v44  ;;  %v545_v46 = vmax.f32 %v537_v42, %v13811_v43  ;;  %v9307_v41 = vor.u32 %v12849_v27, %v9304_v31  ;;  %v9238_v42 = vld [vmem:[#allocation7 + $0x180] sm:$0xf]  ;;  %v13153_v27 = vld [vmem:[#allocation7 + $0xb84] sm:$0xf]  ;;  %v9115_v31 = vor.u32 %v12801_v13, %v9112_v14 }
 0x140   : > { %v10454_v43 = vld [vmem:[#allocation7 + $0xb00] sm:$0xf]  ;;  %3362 = vmatpush.bf16.msra.mxu2 %v9303_v40  ;;  %v13009_v13 = vld [vmem:[#allocation7 + $0x704] sm:$0xf] }
 0x141   : > { %v13822_v47 = vpack.i.bf16 %v545_v46, %v544_v45  ;;  %v13145_v44 = vld [vmem:[#allocation7 + $0xb3c] sm:$0xf0]  ;;  %v518_v45 = vmax.f32 %v14475_v26, %v13815_v28  ;;  %v9751_v46 = vor.u32 %v12969_v36, %v9750_v35  ;;  %v527_v26 = vmax.f32 %v519_v51, %v13821_v39  ;;  %3418 = vmatpush.bf16.msra.mxu1 %v9307_v41  ;;  %v10520_v28 = vld [vmem:[#allocation7 + $0xbc0] sm:$0xf0] }
 0x142   : > { %v10455_v50 = vor.u32 %v13145_v44, %v10454_v43  ;;  %v9559_v41 = vor.u32 %v12921_v22, %v9558_v21  ;;  %v9046_v43 = vld [vmem:[#allocation7] sm:$0xf]  ;;  %v9944_v14 = vld [vmem:[#allocation7 + $0x740] sm:$0xf0] }
 0x143   : > { %13823 = vrot.lane.b32.xlu2 %v13822_v47, %s14333_s21  ;;  %v12841_v47 = vld [vmem:[#allocation7 + $0x1bc] sm:$0xf0]  ;;  %v526_v55 = vmax.f32 %v518_v45, %v13820_v38  ;;  %3377 = vmatpush.bf16.msra.mxu3 %v9751_v46  ;;  %v13073_v22 = vld [vmem:[#allocation7 + $0x904] sm:$0xf] }
 0x144   : > { %v9239_v62 = vor.u32 %v12841_v47, %v9238_v42  ;;  %3388 = vmatpush.bf16.msrb.mxu0 %v10455_v50  ;;  %v10523_v42 = vor.u32 %v13153_v27, %v10520_v28  ;;  %v12793_v44 = vld [vmem:[#allocation7 + $0x3c] sm:$0xf0]  ;;  %v9048_v50 = vld [vmem:[#allocation7 + $0x40] sm:$0xf0] }
 0x145   : > { %3419 = vmatpush.bf16.msra.mxu1 %v9243_v63  ;;  %v9047_v58 = vor.u32 %v12793_v44, %v9046_v43  ;;  %v13081_v21 = vld [vmem:[#allocation7 + $0x93c] sm:$0xf0]  ;;  %v12993_v27 = vld [vmem:[#allocation7 + $0x684] sm:$0xf]  ;;  %v9822_v44 = vld [vmem:[#allocation7 + $0x608] sm:$0xf] }
 0x146   : > { %3363 = vmatpush.bf16.msra.mxu2 %v9239_v62  ;;  %v10392_v62 = vld [vmem:[#allocation7 + $0xac0] sm:$0xf0] }
 0x147   : > { %3378 = vmatpush.bf16.msra.mxu3 %v9687_v2  ;;  %v10395_v63 = vor.u32 %v13121_v61, %v10392_v62  ;;  %v13025_v2 = vld [vmem:[#allocation7 + $0x784] sm:$0xf] }
 0x148   : > { %3389 = vmatpush.bf16.msrb.mxu0 %v10391_v6  ;;  %v10011_v5 = vor.u32 %v13025_v2, %v10008_v3  ;;  %v13034_v6 = vld [vmem:[#allocation7 + $0x7c4] sm:$0xf0]  ;;  %v9880_v28 = vld [vmem:[#allocation7 + $0x6c0] sm:$0xf0] }
 0x149   : > { %3420 = vmatpush.bf16.msra.mxu1 %v9179_v18  ;;  %v10015_v7 = vor.u32 %v13034_v6, %v10014_v4  ;;  %v13018_v18 = vld [vmem:[#allocation7 + $0x744] sm:$0xf0]  ;;  %v9816_v43 = vld [vmem:[#allocation7 + $0x640] sm:$0xf0] }
 0x14a   : > { %3364 = vmatpush.bf16.msra.mxu2 %v9175_v17  ;;  %v9950_v17 = vld [vmem:[#allocation7 + $0x708] sm:$0xf] }
 0x14b   : > { %3379 = vmatpush.bf16.msra.mxu3 %v9623_v20  ;;  %v10198_v20 = vld [vmem:[#allocation7 + $0x900] sm:$0xf]  ;;  %v9694_v2 = vld [vmem:[#allocation7 + $0x508] sm:$0xf] }
 0x14c   : > { %3390 = vmatpush.bf16.msrb.mxu0 %v10327_v23  ;;  %v10199_v23 = vor.u32 %v13081_v21, %v10198_v20  ;;  %v12954_v3 = vld [vmem:[#allocation7 + $0x544] sm:$0xf0]  ;;  %v10584_v20 = vld [vmem:[#allocation7 + $0xc40] sm:$0xf0] }
 0x14d   : > { %3421 = vmatpush.bf16.msra.mxu1 %v9115_v31  ;;  %v9883_v31 = vor.u32 %v12993_v27, %v9880_v28  ;;  %v9695_v6 = vor.u32 %v12954_v3, %v9694_v2  ;;  %v9566_v21 = vld [vmem:[#allocation7 + $0x408] sm:$0xf] }
 0x14e   : > { %3365 = vmatpush.bf16.msra.mxu2 %v9111_v29 }
 0x14f   : > { %3380 = vmatpush.bf16.msra.mxu3 %v9559_v41 }
 0x152   : > { %3366 = vmatpush.bf16.msra.mxu2 %v9047_v58  ;;  %v10776_v58 = vld [vmem:[#allocation7 + $0xdc0] sm:$0xf0] }
 0x153   : > { %3443 = vmatpush.bf16.msrb.mxu3 %v10523_v42  ;;  %v12977_v42 = vld [vmem:[#allocation7 + $0x604] sm:$0xf] }
 0x156   : > { %3429 = vmatpush.bf16.msrb.mxu2 %v10011_v5 }
 0x19d   : > { %v13824_v59 = vpop.permute.xlu2 %13823 }
 0x19e   : > { %v13826_v30 = vunpack.i.h.bf16 %v13824_v59  ;;  %v13825_v1 = vunpack.i.l.bf16 %v13824_v59  ;;  %v9051_v59 = vor.u32 %v12785_v49, %v9048_v50  ;;  %v13041_v50 = vld [vmem:[#allocation7 + $0x804] sm:$0xf] }
 0x1a0   : > { %v556_v10 = vsel %vm554_vm2, %v527_v26, %v13826_v30  ;;  %v555_v11 = vsel %vm554_vm2, %v526_v55, %v13825_v1  ;;  %v10456_v26 = vld [vmem:[#allocation7 + $0xb40] sm:$0xf0]  ;;  %3422 = vmatpush.bf16.msra.mxu1 %v9051_v59  ;;  %v9758_v59 = vld [vmem:[#allocation7 + $0x588] sm:$0xf] }
 0x1a1   : > { %v561_v15 = vrot.slane %v556_v10, 5  ;;  %v560_v16 = vrot.slane %v555_v11, 5  ;;  %v10328_v30 = vld [vmem:[#allocation7 + $0xa40] sm:$0xf0]  ;;  %v10263_v11 = vor.u32 %v13097_v9, %v10262_v8 }
 0x1a2   : > { %v10331_v1 = vor.u32 %v13105_v0, %v10328_v30  ;;  %v13089_v10 = vld [vmem:[#allocation7 + $0x984] sm:$0xf] }
 0x1a3   : > { %v562_v24 = vsel %vm559_vm3, %v560_v16, %v561_v15  ;;  %v14500_v25 = vsel %vm559_vm3, 0.0, %v560_v16  ;;  %v10267_v15 = vor.u32 %v13089_v10, %v10264_v12  ;;  %v9947_v16 = vor.u32 %v13009_v13, %v9944_v14  ;;  %3391 = vmatpush.bf16.msrb.mxu0 %v10263_v11  ;;  %v9688_v0 = vld [vmem:[#allocation7 + $0x540] sm:$0xf0]  ;;  %v9630_v12 = vld [vmem:[#allocation7 + $0x488] sm:$0xf] }
 0x1a4   : > { %v14503_v32 = vsel %vm566_vm4, %v562_v24, 0.0  ;;  %v614_v33 = vrot.slane %v14500_v25, 6  ;;  %v602_v34 = vrot.slane %v14500_v25, 5  ;;  %v586_v35 = vrot.slane %v14500_v25, 3  ;;  %v10200_v24 = vld [vmem:[#allocation7 + $0x940] sm:$0xf0] }
 0x1a5   : > { %v615_v36 = vrot.slane %v14503_v32, 6  ;;  %v603_v37 = vrot.slane %v14503_v32, 5  ;;  %v587_v38 = vrot.slane %v14503_v32, 3  ;;  %v570_v39 = vrot.slane %v14500_v25, 1  ;;  %3430 = vmatpush.bf16.msrb.mxu2 %v9947_v16  ;;  %v13201_v30 = vld [vmem:[#allocation7 + $0xd04] sm:$0xf] }
 0x1a6   : > { %v571_v40 = vrot.slane %v14503_v32, 1  ;;  %v10203_v29 = vor.u32 %v13073_v22, %v10200_v24  ;;  %v9624_v8 = vld [vmem:[#allocation7 + $0x4c0] sm:$0xf0]  ;;  %v12938_v13 = vld [vmem:[#allocation7 + $0x4c4] sm:$0xf0]  ;;  %v581_v24 = vrot.slane %v14503_v32, 2 }
 0x1a7   : > { %v616_v45 = vsel %vm613_vm5, %v614_v33, %v615_v36  ;;  %v618_v46 = vsel %vm613_vm5, %v615_v36, %v14494_v57  ;;  %v604_v47 = vsel %vm559_vm3, %v602_v34, %v603_v37  ;;  %v606_v48 = vsel %vm559_vm3, %v603_v37, %v605_v19  ;;  %v13137_v57 = vld [vmem:[#allocation7 + $0xb04] sm:$0xf]  ;;  %v9886_v33 = vld [vmem:[#allocation7 + $0x688] sm:$0xf]  ;;  %3392 = vmatpush.bf16.msrb.mxu0 %v10199_v23  ;;  %v13065_v37 = vld [vmem:[#allocation7 + $0x8bc] sm:$0xf0] }
 0x1a8   : > { %v14518_v51 = vpack.c.bf16 %v618_v46, %v616_v45  ;;  %v13837_v52 = vpack.i.bf16 %v606_v48, %v604_v47  ;;  %v588_v53 = vsel %vm585_vm6, %v586_v35, %v587_v38  ;;  %v572_v54 = vsel %vm566_vm4, %v570_v39, %v571_v40  ;;  %v13002_v34 = vld [vmem:[#allocation7 + $0x6c4] sm:$0xf0]  ;;  %v10134_v35 = vld [vmem:[#allocation7 + $0x880] sm:$0xf]  ;;  %v10136_v39 = vld [vmem:[#allocation7 + $0x8c0] sm:$0xf0] }
 0x1a9   : > { %v13827_v55 = vpack.i.bf16 %v587_v38, %v588_v53  ;;  %v13832_v56 = vpack.i.bf16 %v571_v40, %v572_v54  ;;  %v10459_v60 = vor.u32 %v13137_v57, %v10456_v26  ;;  %v9951_v19 = vor.u32 %v13018_v18, %v9950_v17  ;;  %v13057_v38 = vld [vmem:[#allocation7 + $0x884] sm:$0xf]  ;;  %3431 = vmatpush.bf16.msrb.mxu2 %v9883_v31  ;;  %v12986_v46 = vld [vmem:[#allocation7 + $0x644] sm:$0xf0]  ;;  %v10070_v47 = vld [vmem:[#allocation7 + $0x800] sm:$0xf] }
 0x1aa   : > { %10836 = vmatmul.msk.bf16.vlgmr.msrb.gmra.mxu1 %vm621_vm7, %v14518_v51  ;;  %13838 = vrot.lane.b32.xlu1 %v13837_v52, %s14333_s21  ;;  %v9887_v36 = vor.u32 %v13002_v34, %v9886_v33  ;;  %v10135_v40 = vor.u32 %v13065_v37, %v10134_v35  ;;  %v10139_v41 = vor.u32 %v13057_v38, %v10136_v39  ;;  %v13049_v48 = vld [vmem:[#allocation7 + $0x83c] sm:$0xf0]  ;;  %v10072_v52 = vld [vmem:[#allocation7 + $0x840] sm:$0xf0]  ;;  %v12922_v22 = vld [vmem:[#allocation7 + $0x444] sm:$0xf0] }
 0x1ab   : > { %13828 = vrot.lane.b32.xlu2 %v13827_v55, %s14333_s21  ;;  %13833 = vrot.lane.b32.xlu0 %v13832_v56, %s14333_s21  ;;  %v9819_v45 = vor.u32 %v12977_v42, %v9816_v43  ;;  %v9823_v49 = vor.u32 %v12986_v46, %v9822_v44  ;;  %v12961_v53 = vld [vmem:[#allocation7 + $0x584] sm:$0xf]  ;;  %v10071_v54 = vor.u32 %v13049_v48, %v10070_v47  ;;  %v580_v23 = vrot.slane %v14500_v25, 2  ;;  %v10782_v31 = vld [vmem:[#allocation7 + $0xd88] sm:$0xf] }
 0x1ac   : > { %3444 = vmatpush.bf16.msrb.mxu3 %v10459_v60  ;;  %3485 = vmatpush.bf16.msrb.mxu1 %v10015_v7  ;;  %v9752_v55 = vld [vmem:[#allocation7 + $0x5c0] sm:$0xf0]  ;;  %v10075_v57 = vor.u32 %v13041_v50, %v10072_v52  ;;  %v12970_v60 = vld [vmem:[#allocation7 + $0x5c4] sm:$0xf0]  ;;  %v9567_v28 = vor.u32 %v12922_v22, %v9566_v21  ;;  %v596_v50 = vrot.slane %v14500_v25, 4  ;;  %v597_v52 = vrot.slane %v14503_v32, 4 }
 0x1ad   : > { %3393 = vmatpush.bf16.msrb.mxu0 %v10135_v40  ;;  %v13217_v56 = vld [vmem:[#allocation7 + $0xd84] sm:$0xf]  ;;  %3432 = vmatpush.bf16.msrb.mxu2 %v9819_v45  ;;  %v9755_v26 = vor.u32 %v12961_v53, %v9752_v55  ;;  %v9759_v62 = vor.u32 %v12970_v60, %v9758_v59  ;;  %v13226_v33 = vld [vmem:[#allocation7 + $0xdc4] sm:$0xf0]  ;;  %v12898_v60 = vld [vmem:[#allocation7 + $0x38c] sm:$0xf] }
 0x1ae   : > { %v10779_v61 = vor.u32 %v13217_v56, %v10776_v58  ;;  %v12929_v7 = vld [vmem:[#allocation7 + $0x484] sm:$0xf]  ;;  %v10783_v39 = vor.u32 %v13226_v33, %v10782_v31  ;;  %v13210_v42 = vld [vmem:[#allocation7 + $0xd44] sm:$0xf0]  ;;  %v13122_v31 = vld [vmem:[#allocation7 + $0xa8c] sm:$0xf] }
 0x1af   : > { %v13185_v9 = vld [vmem:[#allocation7 + $0xc84] sm:$0xf]  ;;  %v9627_v10 = vor.u32 %v12929_v7, %v9624_v8  ;;  %v10654_v44 = vld [vmem:[#allocation7 + $0xc88] sm:$0xf]  ;;  %v10400_v33 = vld [vmem:[#allocation7 + $0xac8] sm:$0xf0] }
 0x1b0   : > { %3445 = vmatpush.bf16.msrb.mxu3 %v10395_v63  ;;  %3486 = vmatpush.bf16.msrb.mxu1 %v9951_v19  ;;  %v12945_v63 = vld [vmem:[#allocation7 + $0x504] sm:$0xf]  ;;  %v13194_v45 = vld [vmem:[#allocation7 + $0xcc4] sm:$0xf0]  ;;  %vm4851_vm3 = vcmask 259075   ;;  %vm4820_vm4 = vcmask 781824  }
 0x1b1   : > { %3394 = vmatpush.bf16.msrb.mxu0 %v10071_v54  ;;  %3433 = vmatpush.bf16.msrb.mxu2 %v9755_v26  ;;  %v9691_v4 = vor.u32 %v12945_v63, %v9688_v0  ;;  %v10648_v11 = vld [vmem:[#allocation7 + $0xcc0] sm:$0xf0]  ;;  %v10655_v46 = vor.u32 %v13194_v45, %v10654_v44  ;;  %v10590_v47 = vld [vmem:[#allocation7 + $0xc08] sm:$0xf]  ;;  %v9504_v0 = vld [vmem:[#allocation7 + $0x3c8] sm:$0xf0] }
 0x1b2   : > { %v10651_v14 = vor.u32 %v13185_v9, %v10648_v11  ;;  %v12913_v16 = vld [vmem:[#allocation7 + $0x404] sm:$0xf]  ;;  %v13178_v48 = vld [vmem:[#allocation7 + $0xc44] sm:$0xf0]  ;;  %v9312_v44 = vld [vmem:[#allocation7 + $0x248] sm:$0xf0] }
 0x1b3   : > { %v9560_v17 = vld [vmem:[#allocation7 + $0x440] sm:$0xf0]  ;;  %v9502_v54 = vld [vmem:[#allocation7 + $0x388] sm:$0xf]  ;;  %v13106_v45 = vld [vmem:[#allocation7 + $0xa0c] sm:$0xf] }
 0x1b4   : > { %3446 = vmatpush.bf16.msrb.mxu3 %v10331_v1  ;;  %3487 = vmatpush.bf16.msrb.mxu1 %v9887_v36  ;;  %v10712_v1 = vld [vmem:[#allocation7 + $0xd40] sm:$0xf0]  ;;  %v9563_v19 = vor.u32 %v12913_v16, %v9560_v17  ;;  %v582_v36 = vsel %vm579_vm8, %v580_v23, %v581_v24  ;;  %v12906_v55 = vld [vmem:[#allocation7 + $0x3c4] sm:$0xf0]  ;;  %v12882_v16 = vld [vmem:[#allocation7 + $0x30c] sm:$0xf] }
 0x1b5   : > { %3461 = vmatpush.bf16.msra.mxu0 %v10779_v61  ;;  %v10715_v5 = vor.u32 %v13201_v30, %v10712_v1  ;;  %3434 = vmatpush.bf16.msrb.mxu2 %v9691_v4  ;;  %v13169_v18 = vld [vmem:[#allocation7 + $0xc04] sm:$0xf]  ;;  %v10526_v26 = vld [vmem:[#allocation7 + $0xb88] sm:$0xf]  ;;  %v598_v61 = vsel %vm595_vm9, %v596_v50, %v597_v52  ;;  %v13154_v30 = vld [vmem:[#allocation7 + $0xb8c] sm:$0xf]  ;;  %v9503_v4 = vor.u32 %v12906_v55, %v9502_v54 }
 0x1b6   : > { %v10587_v27 = vor.u32 %v13169_v18, %v10584_v20  ;;  %v13162_v59 = vld [vmem:[#allocation7 + $0xbc4] sm:$0xf0]  ;;  %v10528_v1 = vld [vmem:[#allocation7 + $0xbc8] sm:$0xf0]  ;;  %vm4828_vm5 = vcmask 785924   ;;  %vm4777_vm6 = vcmask 519424  }
 0x1b7   : > { %v10527_v8 = vor.u32 %v13162_v59, %v10526_v26  ;;  %v9438_v9 = vld [vmem:[#allocation7 + $0x308] sm:$0xf]  ;;  %v9440_v17 = vld [vmem:[#allocation7 + $0x348] sm:$0xf0]  ;;  %vm4785_vm8 = vcmask 523524   ;;  %vm5021_vm9 = vcmask 785408  }
 0x1b8   : > { %3447 = vmatpush.bf16.msrb.mxu3 %v10267_v15  ;;  %3488 = vmatpush.bf16.msrb.mxu1 %v9823_v49  ;;  %v9631_v15 = vor.u32 %v12938_v13, %v9630_v12  ;;  %v10591_v49 = vor.u32 %v13178_v48, %v10590_v47  ;;  %v9507_v12 = vor.u32 %v12898_v60, %v9504_v0  ;;  %v13138_v18 = vld [vmem:[#allocation7 + $0xb0c] sm:$0xf]  ;;  %v9374_v20 = vld [vmem:[#allocation7 + $0x288] sm:$0xf] }
 0x1b9   : > { %3462 = vmatpush.bf16.msra.mxu0 %v10715_v5  ;;  %3435 = vmatpush.bf16.msrb.mxu2 %v9627_v10  ;;  %v12890_v10 = vld [vmem:[#allocation7 + $0x344] sm:$0xf0]  ;;  %v10531_v13 = vor.u32 %v13154_v30, %v10528_v1  ;;  %v9443_v22 = vor.u32 %v12882_v16, %v9440_v17  ;;  %v10272_v26 = vld [vmem:[#allocation7 + $0x9c8] sm:$0xf0] }
 0x1ba   : > { %v12874_v21 = vld [vmem:[#allocation7 + $0x2c4] sm:$0xf0]  ;;  %v12802_v16 = vld [vmem:[#allocation7 + $0x8c] sm:$0xf] }
 0x1bb   : > { %v12842_v50 = vld [vmem:[#allocation7 + $0x1c4] sm:$0xf0]  ;;  %v9120_v17 = vld [vmem:[#allocation7 + $0xc8] sm:$0xf0] }
 0x1bc   : > { %3448 = vmatpush.bf16.msrb.mxu3 %v10203_v29  ;;  %3489 = vmatpush.bf16.msrb.mxu1 %v9759_v62  ;;  %v10270_v54 = vld [vmem:[#allocation7 + $0x988] sm:$0xf] }
 0x1bd   : > { %3463 = vmatpush.bf16.msra.mxu0 %v10651_v14  ;;  %3436 = vmatpush.bf16.msrb.mxu2 %v9563_v19  ;;  %v10462_v14 = vld [vmem:[#allocation7 + $0xb08] sm:$0xf] }
 0x1be   : > { %v13098_v55 = vld [vmem:[#allocation7 + $0x9c4] sm:$0xf0] }
 0x1bf   : > { %v10271_v60 = vor.u32 %v13098_v55, %v10270_v54  ;;  %v10206_v30 = vld [vmem:[#allocation7 + $0x908] sm:$0xf]  ;;  %v13202_v54 = vld [vmem:[#allocation7 + $0xd0c] sm:$0xf] }
 0x1c0   : > { %3449 = vmatpush.bf16.msrb.mxu3 %v10139_v41  ;;  %3490 = vmatpush.bf16.msrb.mxu1 %v9695_v6  ;;  %v10718_v41 = vld [vmem:[#allocation7 + $0xd08] sm:$0xf]  ;;  %v10720_v55 = vld [vmem:[#allocation7 + $0xd48] sm:$0xf0] }
 0x1c1   : > { %3464 = vmatpush.bf16.msra.mxu0 %v10587_v27  ;;  %v10719_v43 = vor.u32 %v13210_v42, %v10718_v41  ;;  %v13130_v27 = vld [vmem:[#allocation7 + $0xac4] sm:$0xf0] }
 0x1c2   : > { %v10334_v41 = vld [vmem:[#allocation7 + $0xa08] sm:$0xf] }
 0x1c3   : > { %v13114_v42 = vld [vmem:[#allocation7 + $0xa44] sm:$0xf0] }
 0x1c4   : > { %3450 = vmatpush.bf16.msrb.mxu3 %v10075_v57  ;;  %3491 = vmatpush.bf16.msrb.mxu1 %v9631_v15  ;;  %v13146_v15 = vld [vmem:[#allocation7 + $0xb44] sm:$0xf0]  ;;  %v10335_v48 = vor.u32 %v13114_v42, %v10334_v41  ;;  %v13035_v42 = vld [vmem:[#allocation7 + $0x7cc] sm:$0xf0] }
 0x1c5   : > { %v10463_v19 = vor.u32 %v13146_v15, %v10462_v14  ;;  %v13082_v1 = vld [vmem:[#allocation7 + $0x944] sm:$0xf0] }
 0x1c6   : > { %v10142_v14 = vld [vmem:[#allocation7 + $0x888] sm:$0xf] }
 0x1c7   : > { %v13066_v15 = vld [vmem:[#allocation7 + $0x8c4] sm:$0xf0] }
 0x1c8   : > { %3492 = vmatpush.bf16.msrb.mxu1 %v9567_v28  ;;  %v12866_v28 = vld [vmem:[#allocation7 + $0x28c] sm:$0xf] }
 0x205   : > { %v13829_v29 = vpop.permute.xlu2 %13828 }
 0x206   : > { %v13831_v34 = vunpack.i.h.bf16 %v13829_v29  ;;  %v13830_v35 = vunpack.i.l.bf16 %v13829_v29  ;;  %v9376_v29 = vld [vmem:[#allocation7 + $0x2c8] sm:$0xf0] }
 0x208   : > { %v624_v37 = vsel %vm621_vm7, %v582_v36, %v13830_v35  ;;  %v625_v38 = vsel %vm621_vm7, %v581_v24, %v13831_v34  ;;  %v10398_v24 = vld [vmem:[#allocation7 + $0xa88] sm:$0xf]  ;;  %v9375_v34 = vor.u32 %v12874_v21, %v9374_v20  ;;  %v10143_v20 = vor.u32 %v13066_v15, %v10142_v14  ;;  %v10592_v15 = vld [vmem:[#allocation7 + $0xc48] sm:$0xf0] }
 0x209   : > { %v14531_v40 = vpack.c.bf16 %v625_v38, %v624_v37  ;;  %v10399_v35 = vor.u32 %v13130_v27, %v10398_v24  ;;  %v9310_v36 = vld [vmem:[#allocation7 + $0x208] sm:$0xf]  ;;  %v9379_v38 = vor.u32 %v12866_v28, %v9376_v29  ;;  %v9123_v24 = vor.u32 %v12802_v16, %v9120_v17  ;;  %v12786_v28 = vld [vmem:[#allocation7 + $0xc] sm:$0xf]  ;;  %v9830_v16 = vld [vmem:[#allocation7 + $0x610] sm:$0xf] }
 0x20a   : > { %v12858_v37 = vld [vmem:[#allocation7 + $0x244] sm:$0xf0]  ;;  %v9056_v29 = vld [vmem:[#allocation7 + $0x48] sm:$0xf0]  ;;  %v12987_v17 = vld [vmem:[#allocation7 + $0x64c] sm:$0xf0] }
 0x20b   : > { %3381 = vmatmul.bf16.vlgmr.msra.gmra.mxu3 %v14531_v40  ;;  %v9311_v47 = vor.u32 %v12858_v37, %v9310_v36  ;;  %v12794_v21 = vld [vmem:[#allocation7 + $0x44] sm:$0xf0]  ;;  %v13218_v36 = vld [vmem:[#allocation7 + $0xd8c] sm:$0xf] }
 0x20c   : > { %3517 = vmatpush.bf16.msra.mxu3 %v10783_v39  ;;  %v10403_v39 = vor.u32 %v13122_v31, %v10400_v33  ;;  %v13042_v31 = vld [vmem:[#allocation7 + $0x80c] sm:$0xf] }
 0x20d   : > { %v10080_v33 = vld [vmem:[#allocation7 + $0x848] sm:$0xf0] }
 0x20e   : > { %v10784_v37 = vld [vmem:[#allocation7 + $0xdc8] sm:$0xf0] }
 0x210   : > { %3518 = vmatpush.bf16.msra.mxu3 %v10719_v43  ;;  %v12850_v43 = vld [vmem:[#allocation7 + $0x20c] sm:$0xf] }
 0x214   : > { %3519 = vmatpush.bf16.msra.mxu3 %v10655_v46  ;;  %v10336_v46 = vld [vmem:[#allocation7 + $0xa48] sm:$0xf0] }
 0x218   : > { %3520 = vmatpush.bf16.msra.mxu3 %v10591_v49  ;;  %v9246_v49 = vld [vmem:[#allocation7 + $0x188] sm:$0xf] }
 0x219   : > { %v9247_v59 = vor.u32 %v12842_v50, %v9246_v49  ;;  %v13010_v49 = vld [vmem:[#allocation7 + $0x70c] sm:$0xf] }
 0x21a   : > { %v9952_v50 = vld [vmem:[#allocation7 + $0x748] sm:$0xf0] }
 0x21c   : > { %v13839_v53 = vpop.permute.xlu1 %13838 }
 0x21d   : > { %v13841_v56 = vunpack.i.h.bf16 %v13839_v53  ;;  %v13840_v58 = vunpack.i.l.bf16 %v13839_v53  ;;  %v13834_v57 = vpop.permute.xlu0 %13833  ;;  %v10339_v53 = vor.u32 %v13106_v45, %v10336_v46  ;;  %v9059_v45 = vor.u32 %v12786_v28, %v9056_v29  ;;  %v12962_v28 = vld [vmem:[#allocation7 + $0x58c] sm:$0xf] }
 0x21e   : > { %v13836_v62 = vunpack.i.h.bf16 %v13834_v57  ;;  %v13835_v63 = vunpack.i.l.bf16 %v13834_v57  ;;  %v13090_v57 = vld [vmem:[#allocation7 + $0x98c] sm:$0xf]  ;;  %v10083_v46 = vor.u32 %v13042_v31, %v10080_v33 }
 0x21f   : > { %v626_v2 = vsel %vm621_vm7, %v598_v61, %v13840_v58  ;;  %v627_v3 = vsel %vm621_vm7, %v597_v52, %v13841_v56  ;;  %v9315_v52 = vor.u32 %v12850_v43, %v9312_v44  ;;  %v12834_v56 = vld [vmem:[#allocation7 + $0x18c] sm:$0xf]  ;;  %v9182_v61 = vld [vmem:[#allocation7 + $0x108] sm:$0xf]  ;;  %v10275_v0 = vor.u32 %v13090_v57, %v10272_v26  ;;  %v10790_v43 = vld [vmem:[#allocation7 + $0xd90] sm:$0xf] }
 0x220   : > { %v14538_v5 = vpack.c.bf16 %v627_v3, %v626_v2  ;;  %v623_v6 = vsel %vm621_vm7, %v14503_v32, %v13836_v62  ;;  %v622_v7 = vsel %vm621_vm7, %v14500_v25, %v13835_v63  ;;  %v10464_v32 = vld [vmem:[#allocation7 + $0xb48] sm:$0xf0]  ;;  %v9439_v25 = vor.u32 %v12890_v10, %v9438_v9  ;;  %v12826_v62 = vld [vmem:[#allocation7 + $0x144] sm:$0xf0]  ;;  %v13227_v44 = vld [vmem:[#allocation7 + $0xdcc] sm:$0xf0] }
 0x221   : > { %v14544_v11 = vpack.c.bf16 %v623_v6, %v622_v7  ;;  %v10467_v23 = vor.u32 %v13138_v18, %v10464_v32  ;;  %v9248_v58 = vld [vmem:[#allocation7 + $0x1c8] sm:$0xf0]  ;;  %v9183_v7 = vor.u32 %v12826_v62, %v9182_v61  ;;  %v9118_v9 = vld [vmem:[#allocation7 + $0x88] sm:$0xf]  ;;  %v10726_v57 = vld [vmem:[#allocation7 + $0xd10] sm:$0xf] }
 0x222   : > { %3395 = vmatmul.bf16.vlgmr.msrb.gmra.mxu0 %v14538_v5  ;;  %3451 = vmatmul.bf16.vlgmr.msrb.gmra.mxu3 %v14538_v5  ;;  %v9251_v63 = vor.u32 %v12834_v56, %v9248_v58  ;;  %v12818_v2 = vld [vmem:[#allocation7 + $0x10c] sm:$0xf]  ;;  %v12810_v10 = vld [vmem:[#allocation7 + $0xc4] sm:$0xf0]  ;;  %v9958_v56 = vld [vmem:[#allocation7 + $0x710] sm:$0xf] }
 0x223   : > { %3367 = vmatmul.bf16.vlgmr.msra.gmra.mxu2 %v14544_v11  ;;  %3423 = vmatmul.bf16.vlgmr.msra.gmra.mxu1 %v14544_v11  ;;  %v9184_v3 = vld [vmem:[#allocation7 + $0x148] sm:$0xf0]  ;;  %v13019_v58 = vld [vmem:[#allocation7 + $0x74c] sm:$0xf0] }
 0x224   : > { %3471 = vmatpush.bf16.msrb.mxu0 %v9503_v4  ;;  %3499 = vmatpush.bf16.msra.mxu2 %v10527_v8  ;;  %v13074_v4 = vld [vmem:[#allocation7 + $0x90c] sm:$0xf]  ;;  %v10207_v8 = vor.u32 %v13082_v1, %v10206_v30  ;;  %v13211_v26 = vld [vmem:[#allocation7 + $0xd4c] sm:$0xf0] }
 0x225   : > { %3527 = vmatpush.bf16.msrb.mxu3 %v9507_v12  ;;  %3555 = vmatpush.bf16.msra.mxu1 %v10531_v13  ;;  %v10208_v6 = vld [vmem:[#allocation7 + $0x948] sm:$0xf0]  ;;  %v9187_v12 = vor.u32 %v12818_v2, %v9184_v3  ;;  %v9894_v2 = vld [vmem:[#allocation7 + $0x690] sm:$0xf] }
 0x226   : > { %v10211_v13 = vor.u32 %v13074_v4, %v10208_v6  ;;  %v13058_v18 = vld [vmem:[#allocation7 + $0x88c] sm:$0xf]  ;;  %v13003_v3 = vld [vmem:[#allocation7 + $0x6cc] sm:$0xf0] }
 0x227   : > { %v10144_v32 = vld [vmem:[#allocation7 + $0x8c8] sm:$0xf0]  ;;  %v10662_v4 = vld [vmem:[#allocation7 + $0xc90] sm:$0xf] }
 0x228   : > { %3472 = vmatpush.bf16.msrb.mxu0 %v9439_v25  ;;  %3500 = vmatpush.bf16.msra.mxu2 %v10463_v19  ;;  %v9054_v25 = vld [vmem:[#allocation7 + $0x8] sm:$0xf]  ;;  %v9119_v19 = vor.u32 %v12810_v10, %v9118_v9  ;;  %v10147_v27 = vor.u32 %v13058_v18, %v10144_v32  ;;  %v12994_v61 = vld [vmem:[#allocation7 + $0x68c] sm:$0xf]  ;;  %v13195_v6 = vld [vmem:[#allocation7 + $0xccc] sm:$0xf0] }
 0x229   : > { %3528 = vmatpush.bf16.msrb.mxu3 %v9443_v22  ;;  %3556 = vmatpush.bf16.msra.mxu1 %v10467_v23  ;;  %v10078_v22 = vld [vmem:[#allocation7 + $0x808] sm:$0xf]  ;;  %v9888_v62 = vld [vmem:[#allocation7 + $0x6c8] sm:$0xf0]  ;;  %v10663_v14 = vor.u32 %v13195_v6, %v10662_v4  ;;  %v10598_v18 = vld [vmem:[#allocation7 + $0xc10] sm:$0xf] }
 0x22a   : > { %v13050_v23 = vld [vmem:[#allocation7 + $0x844] sm:$0xf0]  ;;  %v13186_v30 = vld [vmem:[#allocation7 + $0xc8c] sm:$0xf]  ;;  %v13179_v32 = vld [vmem:[#allocation7 + $0xc4c] sm:$0xf0] }
 0x22b   : > { %v10079_v41 = vor.u32 %v13050_v23, %v10078_v22  ;;  %v10656_v1 = vld [vmem:[#allocation7 + $0xcc8] sm:$0xf0]  ;;  %v9574_v4 = vld [vmem:[#allocation7 + $0x410] sm:$0xf] }
 0x22c   : > { %3473 = vmatpush.bf16.msrb.mxu0 %v9375_v34  ;;  %3501 = vmatpush.bf16.msra.mxu2 %v10399_v35  ;;  %v13026_v34 = vld [vmem:[#allocation7 + $0x78c] sm:$0xf]  ;;  %v12923_v6 = vld [vmem:[#allocation7 + $0x44c] sm:$0xf0] }
 0x22d   : > { %3529 = vmatpush.bf16.msrb.mxu3 %v9379_v38  ;;  %3557 = vmatpush.bf16.msra.mxu1 %v10403_v39  ;;  %v10016_v35 = vld [vmem:[#allocation7 + $0x7c8] sm:$0xf0]  ;;  %v10022_v38 = vld [vmem:[#allocation7 + $0x790] sm:$0xf]  ;;  %v9055_v39 = vor.u32 %v12794_v21, %v9054_v25  ;;  %v9512_v21 = vld [vmem:[#allocation7 + $0x3d0] sm:$0xf0] }
 0x22e   : > { %v12978_v9 = vld [vmem:[#allocation7 + $0x60c] sm:$0xf]  ;;  %v9510_v25 = vld [vmem:[#allocation7 + $0x390] sm:$0xf] }
 0x22f   : > { %v9824_v10 = vld [vmem:[#allocation7 + $0x648] sm:$0xf0] }
 0x230   : > { %3474 = vmatpush.bf16.msrb.mxu0 %v9311_v47  ;;  %3502 = vmatpush.bf16.msra.mxu2 %v10335_v48  ;;  %v10019_v47 = vor.u32 %v13026_v34, %v10016_v35  ;;  %v10787_v48 = vor.u32 %v13218_v36, %v10784_v37  ;;  %v9827_v22 = vor.u32 %v12978_v9, %v9824_v10  ;;  %v9760_v29 = vld [vmem:[#allocation7 + $0x5c8] sm:$0xf0]  ;;  %v9766_v34 = vld [vmem:[#allocation7 + $0x590] sm:$0xf] }
 0x231   : > { %3530 = vmatpush.bf16.msrb.mxu3 %v9315_v52  ;;  %3558 = vmatpush.bf16.msra.mxu1 %v10339_v53  ;;  %v10023_v52 = vor.u32 %v13035_v42, %v10022_v38  ;;  %v10791_v53 = vor.u32 %v13227_v44, %v10790_v43  ;;  %v12971_v35 = vld [vmem:[#allocation7 + $0x5cc] sm:$0xf0]  ;;  %v12883_v38 = vld [vmem:[#allocation7 + $0x314] sm:$0xf]  ;;  %v12946_v43 = vld [vmem:[#allocation7 + $0x50c] sm:$0xf] }
 0x232   : > { %10837 = vmatmul.msk.bf16.vlgmr.msra.gmra.mxu0 %vm621_vm7, %v14518_v51  ;;  %10838 = vmatmul.msk.bf16.vlgmr.msra.gmra.mxu3 %vm621_vm7, %v14518_v51  ;;  %v9446_v36 = vld [vmem:[#allocation7 + $0x310] sm:$0xf]  ;;  %v9767_v42 = vor.u32 %v12971_v35, %v9766_v34  ;;  %v9696_v44 = vld [vmem:[#allocation7 + $0x548] sm:$0xf0] }
 0x233   : > { %3437 = vmatmul.bf16.vlgmr.msrb.gmra.mxu2 %v14531_v40  ;;  %3493 = vmatmul.bf16.vlgmr.msrb.gmra.mxu1 %v14531_v40  ;;  %v12891_v37 = vld [vmem:[#allocation7 + $0x34c] sm:$0xf0] }
 0x234   : > { %3475 = vmatpush.bf16.msrb.mxu0 %v9247_v59  ;;  %3503 = vmatpush.bf16.msra.mxu2 %v10271_v60  ;;  %v9955_v59 = vor.u32 %v13010_v49, %v9952_v50  ;;  %v10723_v60 = vor.u32 %v13202_v54, %v10720_v55  ;;  %v9382_v49 = vld [vmem:[#allocation7 + $0x290] sm:$0xf]  ;;  %v9699_v54 = vor.u32 %v12946_v43, %v9696_v44  ;;  %v12803_v43 = vld [vmem:[#allocation7 + $0x94] sm:$0xf] }
 0x235   : > { %3531 = vmatpush.bf16.msrb.mxu3 %v9251_v63  ;;  %3559 = vmatpush.bf16.msra.mxu1 %v10275_v0  ;;  %v9959_v63 = vor.u32 %v13019_v58, %v9958_v56  ;;  %v10727_v0 = vor.u32 %v13211_v26, %v10726_v57  ;;  %v12875_v50 = vld [vmem:[#allocation7 + $0x2cc] sm:$0xf0]  ;;  %v12930_v56 = vld [vmem:[#allocation7 + $0x48c] sm:$0xf]  ;;  %v9128_v44 = vld [vmem:[#allocation7 + $0xd0] sm:$0xf0] }
 0x236   : > { %v9632_v58 = vld [vmem:[#allocation7 + $0x4c8] sm:$0xf0]  ;;  %v9383_v57 = vor.u32 %v12875_v50, %v9382_v49  ;;  %v9254_v9 = vld [vmem:[#allocation7 + $0x190] sm:$0xf]  ;;  %v9131_v50 = vor.u32 %v12803_v43, %v9128_v44 }
 0x237   : > { %v10534_v10 = vld [vmem:[#allocation7 + $0xb90] sm:$0xf] }
 0x238   : > { %3476 = vmatpush.bf16.msrb.mxu0 %v9183_v7  ;;  %3504 = vmatpush.bf16.msra.mxu2 %v10207_v8  ;;  %v9891_v7 = vor.u32 %v12994_v61, %v9888_v62  ;;  %v10659_v8 = vor.u32 %v13186_v30, %v10656_v1  ;;  %v9318_v61 = vld [vmem:[#allocation7 + $0x210] sm:$0xf]  ;;  %v9635_v30 = vor.u32 %v12930_v56, %v9632_v58  ;;  %v12914_v1 = vld [vmem:[#allocation7 + $0x40c] sm:$0xf]  ;;  %v12787_v56 = vld [vmem:[#allocation7 + $0x14] sm:$0xf] }
 0x239   : > { %3532 = vmatpush.bf16.msrb.mxu3 %v9187_v12  ;;  %3560 = vmatpush.bf16.msra.mxu1 %v10211_v13  ;;  %v13170_v12 = vld [vmem:[#allocation7 + $0xc0c] sm:$0xf]  ;;  %v9895_v13 = vor.u32 %v13003_v3, %v9894_v2  ;;  %v12859_v62 = vld [vmem:[#allocation7 + $0x24c] sm:$0xf0]  ;;  %v9064_v58 = vld [vmem:[#allocation7 + $0x50] sm:$0xf0] }
 0x23a   : > { %v10595_v23 = vor.u32 %v13170_v12, %v10592_v15  ;;  %v9568_v3 = vld [vmem:[#allocation7 + $0x448] sm:$0xf0]  ;;  %v13163_v12 = vld [vmem:[#allocation7 + $0xbcc] sm:$0xf0]  ;;  %v9256_v15 = vld [vmem:[#allocation7 + $0x1d0] sm:$0xf0] }
 0x23c   : > { %3477 = vmatpush.bf16.msrb.mxu0 %v9119_v19  ;;  %3505 = vmatpush.bf16.msra.mxu2 %v10143_v20  ;;  %v12907_v19 = vld [vmem:[#allocation7 + $0x3cc] sm:$0xf0]  ;;  %v12899_v20 = vld [vmem:[#allocation7 + $0x394] sm:$0xf] }
 0x23d   : > { %3533 = vmatpush.bf16.msrb.mxu3 %v9123_v24  ;;  %3561 = vmatpush.bf16.msra.mxu1 %v10147_v27  ;;  %v9831_v24 = vor.u32 %v12987_v17, %v9830_v16  ;;  %v10599_v27 = vor.u32 %v13179_v32, %v10598_v18  ;;  %v9511_v31 = vor.u32 %v12907_v19, %v9510_v25  ;;  %v13155_v17 = vld [vmem:[#allocation7 + $0xb94] sm:$0xf] }
 0x23e   : > { %v9515_v33 = vor.u32 %v12899_v20, %v9512_v21  ;;  %v9571_v16 = vor.u32 %v12914_v1, %v9568_v3  ;;  %v10536_v18 = vld [vmem:[#allocation7 + $0xbd0] sm:$0xf0]  ;;  %v9575_v32 = vor.u32 %v12923_v6, %v9574_v4  ;;  %v10535_v25 = vor.u32 %v13163_v12, %v10534_v10  ;;  %v9190_v21 = vld [vmem:[#allocation7 + $0x110] sm:$0xf]  ;;  %v9966_v12 = vld [vmem:[#allocation7 + $0x718] sm:$0xf] }
 0x23f   : > { %v10278_v3 = vld [vmem:[#allocation7 + $0x990] sm:$0xf]  ;;  %v13091_v6 = vld [vmem:[#allocation7 + $0x994] sm:$0xf] }
 0x240   : > { %3478 = vmatpush.bf16.msrb.mxu0 %v9055_v39  ;;  %3506 = vmatpush.bf16.msra.mxu2 %v10079_v41  ;;  %v9448_v39 = vld [vmem:[#allocation7 + $0x350] sm:$0xf0]  ;;  %v9763_v41 = vor.u32 %v12962_v28, %v9760_v29  ;;  %v13099_v4 = vld [vmem:[#allocation7 + $0x9cc] sm:$0xf0] }
 0x241   : > { %3534 = vmatpush.bf16.msrb.mxu3 %v9059_v45  ;;  %3562 = vmatpush.bf16.msra.mxu1 %v10083_v46  ;;  %v9447_v45 = vor.u32 %v12891_v37, %v9446_v36  ;;  %v9451_v46 = vor.u32 %v12883_v38, %v9448_v39  ;;  %v12819_v28 = vld [vmem:[#allocation7 + $0x114] sm:$0xf]  ;;  %v9126_v37 = vld [vmem:[#allocation7 + $0x90] sm:$0xf] }
 0x242   : > { %v9192_v29 = vld [vmem:[#allocation7 + $0x150] sm:$0xf0]  ;;  %v10406_v38 = vld [vmem:[#allocation7 + $0xa90] sm:$0xf] }
 0x243   : > { %3479 = vmatmul.bf16.vlgmr.msrb.gmra.mxu0 %v14544_v11  ;;  %3507 = vmatmul.bf16.vlgmr.msra.gmra.mxu2 %v14538_v5  ;;  %v9195_v36 = vor.u32 %v12819_v28, %v9192_v29  ;;  %v13131_v39 = vld [vmem:[#allocation7 + $0xacc] sm:$0xf0]  ;;  %v9960_v10 = vld [vmem:[#allocation7 + $0x750] sm:$0xf0] }
 0x244   : > { %3541 = vmatpush.bf16.msra.mxu0 %v10019_v47  ;;  %3573 = vmatpush.bf16.msrb.mxu2 %v10787_v48  ;;  %v9702_v47 = vld [vmem:[#allocation7 + $0x510] sm:$0xf] }
 0x245   : > { %3597 = vmatpush.bf16.msra.mxu3 %v10023_v52  ;;  %3629 = vmatpush.bf16.msrb.mxu1 %v10791_v53  ;;  %v12955_v48 = vld [vmem:[#allocation7 + $0x54c] sm:$0xf0]  ;;  %v12867_v52 = vld [vmem:[#allocation7 + $0x294] sm:$0xf] }
 0x246   : > { %3535 = vmatmul.bf16.vlgmr.msrb.gmra.mxu3 %v14544_v11  ;;  %3563 = vmatmul.bf16.vlgmr.msra.gmra.mxu1 %v14538_v5  ;;  %v9384_v53 = vld [vmem:[#allocation7 + $0x2d0] sm:$0xf0]  ;;  %v9703_v55 = vor.u32 %v12955_v48, %v9702_v47  ;;  %v10407_v47 = vor.u32 %v13131_v39, %v10406_v38  ;;  %v9062_v48 = vld [vmem:[#allocation7 + $0x10] sm:$0xf]  ;;  %v9838_v38 = vld [vmem:[#allocation7 + $0x618] sm:$0xf] }
 0x247   : > { %v9387_v26 = vor.u32 %v12867_v52, %v9384_v53  ;;  %v12795_v52 = vld [vmem:[#allocation7 + $0x4c] sm:$0xf0]  ;;  %v12988_v39 = vld [vmem:[#allocation7 + $0x654] sm:$0xf0] }
 0x248   : > { %3542 = vmatpush.bf16.msra.mxu0 %v9955_v59  ;;  %3574 = vmatpush.bf16.msrb.mxu2 %v10723_v60  ;;  %v9638_v59 = vld [vmem:[#allocation7 + $0x490] sm:$0xf] }
 0x249   : > { %3598 = vmatpush.bf16.msra.mxu3 %v9959_v63  ;;  %3630 = vmatpush.bf16.msrb.mxu1 %v10727_v0  ;;  %v12939_v60 = vld [vmem:[#allocation7 + $0x4cc] sm:$0xf0]  ;;  %v12851_v63 = vld [vmem:[#allocation7 + $0x214] sm:$0xf] }
 0x24a   : > { %v9320_v0 = vld [vmem:[#allocation7 + $0x250] sm:$0xf0]  ;;  %v9639_v2 = vor.u32 %v12939_v60, %v9638_v59  ;;  %v10342_v53 = vld [vmem:[#allocation7 + $0xa10] sm:$0xf] }
 0x24b   : > { %v13027_v59 = vld [vmem:[#allocation7 + $0x794] sm:$0xf]  ;;  %v10150_v29 = vld [vmem:[#allocation7 + $0x890] sm:$0xf] }
 0x24c   : > { %3543 = vmatpush.bf16.msra.mxu0 %v9891_v7  ;;  %3575 = vmatpush.bf16.msrb.mxu2 %v10659_v8  ;;  %v9319_v7 = vor.u32 %v12859_v62, %v9318_v61  ;;  %v9323_v8 = vor.u32 %v12851_v63, %v9320_v0  ;;  %v10024_v60 = vld [vmem:[#allocation7 + $0x7d0] sm:$0xf0]  ;;  %v10030_v62 = vld [vmem:[#allocation7 + $0x798] sm:$0xf]  ;;  %v9063_v0 = vor.u32 %v12795_v52, %v9062_v48 }
 0x24d   : > { %3599 = vmatpush.bf16.msra.mxu3 %v9895_v13  ;;  %3631 = vmatpush.bf16.msrb.mxu1 %v10663_v14  ;;  %v12843_v13 = vld [vmem:[#allocation7 + $0x1cc] sm:$0xf0]  ;;  %v12835_v14 = vld [vmem:[#allocation7 + $0x194] sm:$0xf]  ;;  %v13036_v63 = vld [vmem:[#allocation7 + $0x7d4] sm:$0xf0]  ;;  %v9839_v48 = vor.u32 %v12988_v39, %v9838_v38 }
 0x24e   : > { %v9255_v19 = vor.u32 %v12843_v13, %v9254_v9  ;;  %v9259_v20 = vor.u32 %v12835_v14, %v9256_v15  ;;  %v13011_v9 = vld [vmem:[#allocation7 + $0x714] sm:$0xf]  ;;  %v13020_v13 = vld [vmem:[#allocation7 + $0x754] sm:$0xf0]  ;;  %v10279_v14 = vor.u32 %v13099_v4, %v10278_v3  ;;  %v12900_v39 = vld [vmem:[#allocation7 + $0x39c] sm:$0xf] }
 0x24f   : > { %v13219_v52 = vld [vmem:[#allocation7 + $0xd94] sm:$0xf]  ;;  %v12956_v3 = vld [vmem:[#allocation7 + $0x554] sm:$0xf0] }
 0x250   : > { %3544 = vmatpush.bf16.msra.mxu0 %v9827_v22  ;;  %3576 = vmatpush.bf16.msrb.mxu2 %v10595_v23  ;;  %v10470_v22 = vld [vmem:[#allocation7 + $0xb10] sm:$0xf]  ;;  %v10734_v4 = vld [vmem:[#allocation7 + $0xd18] sm:$0xf] }
 0x251   : > { %3600 = vmatpush.bf16.msra.mxu3 %v9831_v24  ;;  %3632 = vmatpush.bf16.msrb.mxu1 %v10599_v27  ;;  %v13147_v23 = vld [vmem:[#allocation7 + $0xb4c] sm:$0xf0]  ;;  %v10539_v24 = vor.u32 %v13155_v17, %v10536_v18  ;;  %v13164_v38 = vld [vmem:[#allocation7 + $0xbd4] sm:$0xf0] }
 0x252   : > { %v12827_v27 = vld [vmem:[#allocation7 + $0x14c] sm:$0xf0]  ;;  %v10471_v34 = vor.u32 %v13147_v23, %v10470_v22  ;;  %v9902_v22 = vld [vmem:[#allocation7 + $0x698] sm:$0xf] }
 0x253   : > { %10839 = vmatmul.msk.bf16.vlgmr.msrb.gmra.mxu2 %vm621_vm7, %v14518_v51  ;;  %v9191_v35 = vor.u32 %v12827_v27, %v9190_v21  ;;  %v10214_v17 = vld [vmem:[#allocation7 + $0x910] sm:$0xf]  ;;  %v9896_v21 = vld [vmem:[#allocation7 + $0x6d0] sm:$0xf0]  ;;  %v13004_v23 = vld [vmem:[#allocation7 + $0x6d4] sm:$0xf0] }
 0x254   : > { %3583 = vmatpush.bf16.msra.mxu2 %v9511_v31  ;;  %3545 = vmatpush.bf16.msra.mxu0 %v9763_v41  ;;  %v13139_v31 = vld [vmem:[#allocation7 + $0xb14] sm:$0xf]  ;;  %v13083_v18 = vld [vmem:[#allocation7 + $0x94c] sm:$0xf0] }
 0x255   : > { %3639 = vmatpush.bf16.msra.mxu1 %v9515_v33  ;;  %3601 = vmatpush.bf16.msra.mxu3 %v9767_v42  ;;  %v10472_v33 = vld [vmem:[#allocation7 + $0xb50] sm:$0xf0]  ;;  %v12811_v42 = vld [vmem:[#allocation7 + $0xcc] sm:$0xf0] }
 0x256   : > { %10840 = vmatmul.msk.bf16.vlgmr.msrb.gmra.mxu1 %vm621_vm7, %v14518_v51  ;;  %v10475_v41 = vor.u32 %v13139_v31, %v10472_v33  ;;  %v9127_v49 = vor.u32 %v12811_v42, %v9126_v37  ;;  %v13067_v31 = vld [vmem:[#allocation7 + $0x8cc] sm:$0xf0]  ;;  %v13059_v33 = vld [vmem:[#allocation7 + $0x894] sm:$0xf] }
 0x257   : > { %v9832_v37 = vld [vmem:[#allocation7 + $0x650] sm:$0xf0]  ;;  %v10086_v42 = vld [vmem:[#allocation7 + $0x810] sm:$0xf] }
 0x258   : > { %3584 = vmatpush.bf16.msra.mxu2 %v9447_v45  ;;  %3546 = vmatpush.bf16.msra.mxu0 %v9699_v54  ;;  %v13123_v45 = vld [vmem:[#allocation7 + $0xa94] sm:$0xf]  ;;  %v13115_v54 = vld [vmem:[#allocation7 + $0xa4c] sm:$0xf0] }
 0x259   : > { %3640 = vmatpush.bf16.msra.mxu1 %v9451_v46  ;;  %3602 = vmatpush.bf16.msra.mxu3 %v9703_v55  ;;  %v10408_v46 = vld [vmem:[#allocation7 + $0xad0] sm:$0xf0]  ;;  %v10343_v61 = vor.u32 %v13115_v54, %v10342_v53  ;;  %v9774_v54 = vld [vmem:[#allocation7 + $0x598] sm:$0xf] }
 0x25a   : > { %v10411_v55 = vor.u32 %v13123_v45, %v10408_v46  ;;  %v13051_v45 = vld [vmem:[#allocation7 + $0x84c] sm:$0xf0]  ;;  %v13043_v46 = vld [vmem:[#allocation7 + $0x814] sm:$0xf] }
 0x25b   : > { %v10792_v53 = vld [vmem:[#allocation7 + $0xdd0] sm:$0xf0] }
 0x25c   : > { %3585 = vmatpush.bf16.msra.mxu2 %v9383_v57  ;;  %3547 = vmatpush.bf16.msra.mxu0 %v9635_v30  ;;  %v13107_v57 = vld [vmem:[#allocation7 + $0xa14] sm:$0xf]  ;;  %v9067_v30 = vor.u32 %v12787_v56, %v9064_v58  ;;  %v10087_v56 = vor.u32 %v13051_v45, %v10086_v42  ;;  %v10798_v58 = vld [vmem:[#allocation7 + $0xd98] sm:$0xf]  ;;  %v10544_v45 = vld [vmem:[#allocation7 + $0xbd8] sm:$0xf0] }
 0x25d   : > { %3641 = vmatpush.bf16.msra.mxu1 %v9387_v26  ;;  %3603 = vmatpush.bf16.msra.mxu3 %v9639_v2  ;;  %v10344_v26 = vld [vmem:[#allocation7 + $0xa50] sm:$0xf0]  ;;  %v10027_v2 = vor.u32 %v13027_v59, %v10024_v60  ;;  %v10795_v60 = vor.u32 %v13219_v52, %v10792_v53  ;;  %v12892_v52 = vld [vmem:[#allocation7 + $0x354] sm:$0xf0] }
 0x25e   : > { %v10347_v1 = vor.u32 %v13107_v57, %v10344_v26  ;;  %v13228_v57 = vld [vmem:[#allocation7 + $0xdd4] sm:$0xf0] }
 0x25f   : > { %v10478_v53 = vld [vmem:[#allocation7 + $0xb18] sm:$0xf] }
 0x260   : > { %3586 = vmatpush.bf16.msra.mxu2 %v9319_v7  ;;  %3548 = vmatpush.bf16.msra.mxu0 %v9571_v16  ;;  %v10031_v7 = vor.u32 %v13036_v63, %v10030_v62  ;;  %v9963_v16 = vor.u32 %v13011_v9, %v9960_v10  ;;  %v12947_v62 = vld [vmem:[#allocation7 + $0x514] sm:$0xf] }
 0x261   : > { %3642 = vmatpush.bf16.msra.mxu1 %v9323_v8  ;;  %3604 = vmatpush.bf16.msra.mxu3 %v9575_v32  ;;  %v10280_v8 = vld [vmem:[#allocation7 + $0x9d0] sm:$0xf0] }
 0x262   : > { %v10283_v15 = vor.u32 %v13091_v6, %v10280_v8  ;;  %v13075_v32 = vld [vmem:[#allocation7 + $0x914] sm:$0xf]  ;;  %v13212_v6 = vld [vmem:[#allocation7 + $0xd54] sm:$0xf0] }
 0x263   : > { %3549 = vmatmul.bf16.vlgmr.msra.gmra.mxu0 %v14531_v40  ;;  %v9704_v63 = vld [vmem:[#allocation7 + $0x550] sm:$0xf0] }
 0x264   : > { %3611 = vmatpush.bf16.msrb.mxu0 %v10535_v25  ;;  %3587 = vmatpush.bf16.msra.mxu2 %v9255_v19  ;;  %v9967_v25 = vor.u32 %v13020_v13, %v9966_v12  ;;  %v10216_v19 = vld [vmem:[#allocation7 + $0x950] sm:$0xf0] }
 0x265   : > { %3643 = vmatpush.bf16.msra.mxu1 %v9259_v20  ;;  %3667 = vmatpush.bf16.msrb.mxu3 %v10539_v24  ;;  %v12995_v20 = vld [vmem:[#allocation7 + $0x694] sm:$0xf]  ;;  %v10215_v24 = vor.u32 %v13083_v18, %v10214_v17  ;;  %v10219_v27 = vor.u32 %v13075_v32, %v10216_v19  ;;  %v12940_v17 = vld [vmem:[#allocation7 + $0x4d4] sm:$0xf0] }
 0x266   : > { %3605 = vmatmul.bf16.vlgmr.msra.gmra.mxu3 %v14531_v40  ;;  %v9899_v28 = vor.u32 %v12995_v20, %v9896_v21  ;;  %v12931_v10 = vld [vmem:[#allocation7 + $0x494] sm:$0xf]  ;;  %v10670_v18 = vld [vmem:[#allocation7 + $0xc98] sm:$0xf] }
 0x267   : > { %v9640_v12 = vld [vmem:[#allocation7 + $0x4d0] sm:$0xf0]  ;;  %v13196_v32 = vld [vmem:[#allocation7 + $0xcd4] sm:$0xf0] }
 0x268   : > { %3612 = vmatpush.bf16.msrb.mxu0 %v10471_v34  ;;  %3588 = vmatpush.bf16.msra.mxu2 %v9191_v35  ;;  %v9903_v34 = vor.u32 %v13004_v23, %v9902_v22  ;;  %v10152_v35 = vld [vmem:[#allocation7 + $0x8d0] sm:$0xf0] }
 0x269   : > { %3644 = vmatpush.bf16.msra.mxu1 %v9195_v36  ;;  %3668 = vmatpush.bf16.msrb.mxu3 %v10475_v41  ;;  %v12979_v36 = vld [vmem:[#allocation7 + $0x614] sm:$0xf]  ;;  %v10151_v41 = vor.u32 %v13067_v31, %v10150_v29  ;;  %v10155_v43 = vor.u32 %v13059_v33, %v10152_v35  ;;  %v12924_v29 = vld [vmem:[#allocation7 + $0x454] sm:$0xf0] }
 0x26a   : > { %v9835_v44 = vor.u32 %v12979_v36, %v9832_v37  ;;  %v13187_v13 = vld [vmem:[#allocation7 + $0xc94] sm:$0xf]  ;;  %v10606_v31 = vld [vmem:[#allocation7 + $0xc18] sm:$0xf] }
 0x26b   : > { %v12915_v19 = vld [vmem:[#allocation7 + $0x414] sm:$0xf]  ;;  %v13180_v33 = vld [vmem:[#allocation7 + $0xc54] sm:$0xf0] }
 0x26c   : > { %3613 = vmatpush.bf16.msrb.mxu0 %v10407_v47  ;;  %3589 = vmatpush.bf16.msra.mxu2 %v9127_v49  ;;  %v10088_v47 = vld [vmem:[#allocation7 + $0x850] sm:$0xf0]  ;;  %v12908_v35 = vld [vmem:[#allocation7 + $0x3d4] sm:$0xf0] }
 0x26d   : > { %3645 = vmatpush.bf16.msra.mxu1 %v9131_v50  ;;  %3669 = vmatpush.bf16.msrb.mxu3 %v10411_v55  ;;  %v12963_v49 = vld [vmem:[#allocation7 + $0x594] sm:$0xf]  ;;  %v12972_v55 = vld [vmem:[#allocation7 + $0x5d4] sm:$0xf0]  ;;  %v10091_v26 = vor.u32 %v13043_v46, %v10088_v47  ;;  %v10607_v46 = vor.u32 %v13180_v33, %v10606_v31  ;;  %v13092_v31 = vld [vmem:[#allocation7 + $0x99c] sm:$0xf] }
 0x26e   : > { %v9768_v50 = vld [vmem:[#allocation7 + $0x5d0] sm:$0xf0]  ;;  %v10542_v36 = vld [vmem:[#allocation7 + $0xb98] sm:$0xf]  ;;  %v10288_v33 = vld [vmem:[#allocation7 + $0x9d8] sm:$0xf0] }
 0x26f   : > { %v9771_v59 = vor.u32 %v12963_v49, %v9768_v50  ;;  %v9576_v20 = vld [vmem:[#allocation7 + $0x450] sm:$0xf0]  ;;  %v9454_v50 = vld [vmem:[#allocation7 + $0x318] sm:$0xf] }
 0x270   : > { %3614 = vmatpush.bf16.msrb.mxu0 %v10343_v61  ;;  %3590 = vmatpush.bf16.msra.mxu2 %v9063_v0  ;;  %v9775_v61 = vor.u32 %v12972_v55, %v9774_v54  ;;  %v13203_v0 = vld [vmem:[#allocation7 + $0xd14] sm:$0xf]  ;;  %v9579_v37 = vor.u32 %v12915_v19, %v9576_v20  ;;  %v13148_v55 = vld [vmem:[#allocation7 + $0xb54] sm:$0xf0] }
 0x271   : > { %3646 = vmatpush.bf16.msra.mxu1 %v9067_v30  ;;  %3670 = vmatpush.bf16.msrb.mxu3 %v10347_v1  ;;  %v10799_v30 = vor.u32 %v13228_v57, %v10798_v58  ;;  %v10728_v1 = vld [vmem:[#allocation7 + $0xd50] sm:$0xf0]  ;;  %v9456_v58 = vld [vmem:[#allocation7 + $0x358] sm:$0xf0] }
 0x272   : > { %v10731_v8 = vor.u32 %v13203_v0, %v10728_v1  ;;  %v13171_v23 = vld [vmem:[#allocation7 + $0xc14] sm:$0xf]  ;;  %v13140_v57 = vld [vmem:[#allocation7 + $0xb1c] sm:$0xf]  ;;  %v10414_v0 = vld [vmem:[#allocation7 + $0xa98] sm:$0xf] }
 0x273   : > { %3591 = vmatmul.bf16.vlgmr.msra.gmra.mxu2 %v14544_v11  ;;  %v13132_v1 = vld [vmem:[#allocation7 + $0xad4] sm:$0xf0] }
 0x274   : > { %3653 = vmatpush.bf16.msrb.mxu2 %v10027_v2  ;;  %3647 = vmatmul.bf16.vlgmr.msra.gmra.mxu1 %v14544_v11  ;;  %v9710_v2 = vld [vmem:[#allocation7 + $0x518] sm:$0xf] }
 0x275   : > { %3709 = vmatpush.bf16.msrb.mxu1 %v10031_v7  ;;  %3615 = vmatpush.bf16.msrb.mxu0 %v10279_v14  ;;  %v9707_v7 = vor.u32 %v12947_v62, %v9704_v63  ;;  %v9711_v9 = vor.u32 %v12956_v3, %v9710_v2  ;;  %v10735_v14 = vor.u32 %v13212_v6, %v10734_v4  ;;  %v9390_v62 = vld [vmem:[#allocation7 + $0x298] sm:$0xf]  ;;  %v12868_v2 = vld [vmem:[#allocation7 + $0x29c] sm:$0xf] }
 0x276   : > { %3671 = vmatpush.bf16.msrb.mxu3 %v10283_v15  ;;  %v10664_v15 = vld [vmem:[#allocation7 + $0xcd0] sm:$0xf0]  ;;  %v12876_v63 = vld [vmem:[#allocation7 + $0x2d4] sm:$0xf0]  ;;  %v9392_v3 = vld [vmem:[#allocation7 + $0x2d8] sm:$0xf0] }
 0x277   : > { %v10667_v21 = vor.u32 %v13187_v13, %v10664_v15  ;;  %v13124_v4 = vld [vmem:[#allocation7 + $0xa9c] sm:$0xf]  ;;  %v10350_v13 = vld [vmem:[#allocation7 + $0xa18] sm:$0xf] }
 0x278   : > { %3654 = vmatpush.bf16.msrb.mxu2 %v9963_v16  ;;  %v9646_v16 = vld [vmem:[#allocation7 + $0x498] sm:$0xf]  ;;  %v10416_v6 = vld [vmem:[#allocation7 + $0xad8] sm:$0xf0] }
 0x279   : > { %3710 = vmatpush.bf16.msrb.mxu1 %v9967_v25  ;;  %3616 = vmatpush.bf16.msrb.mxu0 %v10215_v24  ;;  %v9643_v25 = vor.u32 %v12931_v10, %v9640_v12  ;;  %v9647_v22 = vor.u32 %v12940_v17, %v9646_v16  ;;  %v10600_v24 = vld [vmem:[#allocation7 + $0xc50] sm:$0xf0]  ;;  %v9326_v10 = vld [vmem:[#allocation7 + $0x218] sm:$0xf]  ;;  %v12852_v16 = vld [vmem:[#allocation7 + $0x21c] sm:$0xf] }
 0x27a   : > { %3672 = vmatpush.bf16.msrb.mxu3 %v10219_v27  ;;  %v9582_v27 = vld [vmem:[#allocation7 + $0x418] sm:$0xf]  ;;  %v10603_v42 = vor.u32 %v13171_v23, %v10600_v24  ;;  %v9328_v17 = vld [vmem:[#allocation7 + $0x258] sm:$0xf0] }
 0x27b   : > { %v12860_v12 = vld [vmem:[#allocation7 + $0x254] sm:$0xf0]  ;;  %v9331_v20 = vor.u32 %v12852_v16, %v9328_v17  ;;  %v13037_v16 = vld [vmem:[#allocation7 + $0x7dc] sm:$0xf0] }
 0x27c   : > { %3655 = vmatpush.bf16.msrb.mxu2 %v9899_v28  ;;  %v10671_v28 = vor.u32 %v13196_v32, %v10670_v18  ;;  %v13116_v15 = vld [vmem:[#allocation7 + $0xa54] sm:$0xf0]  ;;  %v13108_v18 = vld [vmem:[#allocation7 + $0xa1c] sm:$0xf] }
 0x27d   : > { %3711 = vmatpush.bf16.msrb.mxu1 %v9903_v34  ;;  %3617 = vmatpush.bf16.msrb.mxu0 %v10151_v41  ;;  %v9518_v34 = vld [vmem:[#allocation7 + $0x398] sm:$0xf]  ;;  %v9520_v41 = vld [vmem:[#allocation7 + $0x3d8] sm:$0xf0]  ;;  %v10351_v19 = vor.u32 %v13116_v15, %v10350_v13  ;;  %v10038_v15 = vld [vmem:[#allocation7 + $0x7a0] sm:$0xf] }
 0x27e   : > { %3673 = vmatpush.bf16.msrb.mxu3 %v10155_v43  ;;  %v9583_v43 = vor.u32 %v12924_v29, %v9582_v27  ;;  %v9519_v47 = vor.u32 %v12908_v35, %v9518_v34  ;;  %v9523_v49 = vor.u32 %v12900_v39, %v9520_v41  ;;  %v10352_v32 = vld [vmem:[#allocation7 + $0xa58] sm:$0xf0]  ;;  %v10286_v23 = vld [vmem:[#allocation7 + $0x998] sm:$0xf]  ;;  %v10291_v41 = vor.u32 %v13092_v31, %v10288_v33 }
 0x27f   : > { %v10355_v24 = vor.u32 %v13108_v18, %v10352_v32  ;;  %v13100_v27 = vld [vmem:[#allocation7 + $0x9d4] sm:$0xf0]  ;;  %v9264_v29 = vld [vmem:[#allocation7 + $0x1d8] sm:$0xf0] }
 0x280   : > { %3656 = vmatpush.bf16.msrb.mxu2 %v9835_v44  ;;  %v13156_v44 = vld [vmem:[#allocation7 + $0xb9c] sm:$0xf]  ;;  %v10287_v35 = vor.u32 %v13100_v27, %v10286_v23  ;;  %v10222_v39 = vld [vmem:[#allocation7 + $0x918] sm:$0xf]  ;;  %v10039_v23 = vor.u32 %v13037_v16, %v10038_v15  ;;  %v12901_v16 = vld [vmem:[#allocation7 + $0x3a4] sm:$0xf] }
 0x281   : > { %3712 = vmatpush.bf16.msrb.mxu1 %v9839_v48  ;;  %3618 = vmatpush.bf16.msrb.mxu0 %v10087_v56  ;;  %v10543_v48 = vor.u32 %v13164_v38, %v10542_v36  ;;  %v10547_v54 = vor.u32 %v13156_v44, %v10544_v45  ;;  %v12884_v56 = vld [vmem:[#allocation7 + $0x31c] sm:$0xf]  ;;  %v12828_v38 = vld [vmem:[#allocation7 + $0x154] sm:$0xf0] }
 0x282   : > { %3674 = vmatpush.bf16.msrb.mxu3 %v10091_v26  ;;  %v10480_v26 = vld [vmem:[#allocation7 + $0xb58] sm:$0xf0] }
 0x283   : > { %v9200_v44 = vld [vmem:[#allocation7 + $0x158] sm:$0xf0] }
 0x284   : > { %3657 = vmatpush.bf16.msrb.mxu2 %v9771_v59  ;;  %3619 = vmatmul.bf16.vlgmr.msrb.gmra.mxu0 %v14538_v5  ;;  %v9455_v59 = vor.u32 %v12892_v52, %v9454_v50  ;;  %v13076_v45 = vld [vmem:[#allocation7 + $0x91c] sm:$0xf]  ;;  %v9134_v50 = vld [vmem:[#allocation7 + $0x98] sm:$0xf] }
 0x285   : > { %3685 = vmatpush.bf16.msra.mxu0 %v10795_v60  ;;  %3713 = vmatpush.bf16.msrb.mxu1 %v9775_v61  ;;  %v10479_v60 = vor.u32 %v13148_v55, %v10478_v53  ;;  %v9459_v61 = vor.u32 %v12884_v56, %v9456_v58  ;;  %v12812_v52 = vld [vmem:[#allocation7 + $0xd4] sm:$0xf0]  ;;  %v12804_v56 = vld [vmem:[#allocation7 + $0x9c] sm:$0xf] }
 0x286   : > { %3741 = vmatpush.bf16.msra.mxu3 %v10799_v30  ;;  %v10483_v30 = vor.u32 %v13140_v57, %v10480_v26  ;;  %v10158_v53 = vld [vmem:[#allocation7 + $0x898] sm:$0xf]  ;;  %v9136_v58 = vld [vmem:[#allocation7 + $0xd8] sm:$0xf0]  ;;  %v14576_v57 = vpop.f32.mrf.mxu1 }
 0x287   : > { %3675 = vmatmul.bf16.vlgmr.msrb.gmra.mxu3 %v14538_v5  ;;  %v13068_v55 = vld [vmem:[#allocation7 + $0x8d4] sm:$0xf0]  ;;  %v13012_v27 = vld [vmem:[#allocation7 + $0x71c] sm:$0xf] }
 0x288   : > { %3658 = vmatpush.bf16.msrb.mxu2 %v9707_v7  ;;  %v9391_v7 = vor.u32 %v12876_v63, %v9390_v62  ;;  %v9070_v62 = vld [vmem:[#allocation7 + $0x18] sm:$0xf]  ;;  %v10736_v33 = vld [vmem:[#allocation7 + $0xd58] sm:$0xf0] }
 0x289   : > { %3686 = vmatpush.bf16.msra.mxu0 %v10731_v8  ;;  %3714 = vmatpush.bf16.msrb.mxu1 %v9711_v9  ;;  %v10415_v8 = vor.u32 %v13132_v1, %v10414_v0  ;;  %v9395_v9 = vor.u32 %v12868_v2, %v9392_v3  ;;  %v12796_v63 = vld [vmem:[#allocation7 + $0x54] sm:$0xf0]  ;;  %v10159_v0 = vor.u32 %v13068_v55, %v10158_v53  ;;  %v12788_v3 = vld [vmem:[#allocation7 + $0x1c] sm:$0xf]  ;;  %v13005_v53 = vld [vmem:[#allocation7 + $0x6dc] sm:$0xf0] }
 0x28a   : > { %3742 = vmatpush.bf16.msra.mxu3 %v10735_v14  ;;  %v10419_v14 = vor.u32 %v13124_v4, %v10416_v6  ;;  %v10094_v1 = vld [vmem:[#allocation7 + $0x818] sm:$0xf]  ;;  %v9072_v6 = vld [vmem:[#allocation7 + $0x58] sm:$0xf0]  ;;  %v9071_v13 = vor.u32 %v12796_v63, %v9070_v62  ;;  %v13197_v55 = vld [vmem:[#allocation7 + $0xcdc] sm:$0xf0] }
 0x28b   : > { %v13052_v2 = vld [vmem:[#allocation7 + $0x854] sm:$0xf0]  ;;  %v9075_v32 = vor.u32 %v12788_v3, %v9072_v6  ;;  %v9846_v3 = vld [vmem:[#allocation7 + $0x620] sm:$0xf] }
 0x28c   : > { %3659 = vmatpush.bf16.msrb.mxu2 %v9643_v25  ;;  %v9327_v25 = vor.u32 %v12860_v12, %v9326_v10  ;;  %v10032_v10 = vld [vmem:[#allocation7 + $0x7d8] sm:$0xf0]  ;;  %v10095_v18 = vor.u32 %v13052_v2, %v10094_v1  ;;  %v10614_v6 = vld [vmem:[#allocation7 + $0xc20] sm:$0xf] }
 0x28d   : > { %3687 = vmatpush.bf16.msra.mxu0 %v10667_v21  ;;  %3715 = vmatpush.bf16.msrb.mxu1 %v9647_v22  ;;  %v9262_v21 = vld [vmem:[#allocation7 + $0x198] sm:$0xf]  ;;  %v13220_v12 = vld [vmem:[#allocation7 + $0xd9c] sm:$0xf] }
 0x28e   : > { %3743 = vmatpush.bf16.msra.mxu3 %v10671_v28  ;;  %v12844_v22 = vld [vmem:[#allocation7 + $0x1d4] sm:$0xf0]  ;;  %v12836_v28 = vld [vmem:[#allocation7 + $0x19c] sm:$0xf]  ;;  %v14578_v26 = vpop.f32.mrf.mxu3 }
 0x28f   : > { %v9263_v34 = vor.u32 %v12844_v22, %v9262_v21  ;;  %v9267_v36 = vor.u32 %v12836_v28, %v9264_v29  ;;  %v9968_v28 = vld [vmem:[#allocation7 + $0x758] sm:$0xf0] }
 0x290   : > { %3660 = vmatpush.bf16.msrb.mxu2 %v9579_v37  ;;  %v9198_v37 = vld [vmem:[#allocation7 + $0x118] sm:$0xf]  ;;  %v13204_v29 = vld [vmem:[#allocation7 + $0xd1c] sm:$0xf] }
 0x291   : > { %3688 = vmatpush.bf16.msra.mxu0 %v10603_v42  ;;  %3716 = vmatpush.bf16.msrb.mxu1 %v9583_v43  ;;  %v13084_v42 = vld [vmem:[#allocation7 + $0x954] sm:$0xf0]  ;;  %v12820_v43 = vld [vmem:[#allocation7 + $0x11c] sm:$0xf] }
 0x292   : > { %3744 = vmatpush.bf16.msra.mxu3 %v10607_v46  ;;  %v10224_v46 = vld [vmem:[#allocation7 + $0x958] sm:$0xf0] }
 0x293   : > { %3661 = vmatmul.bf16.vlgmr.msrb.gmra.mxu2 %v14531_v40  ;;  %v10608_v1 = vld [vmem:[#allocation7 + $0xc58] sm:$0xf0] }
 0x294   : > { %3723 = vmatpush.bf16.msra.mxu2 %v10543_v48  ;;  %3717 = vmatmul.bf16.vlgmr.msrb.gmra.mxu1 %v14531_v40  ;;  %v10223_v48 = vor.u32 %v13084_v42, %v10222_v39  ;;  %v10742_v39 = vld [vmem:[#allocation7 + $0xd20] sm:$0xf] }
 0x295   : > { %3695 = vmatpush.bf16.msrb.mxu0 %v9519_v47  ;;  %3779 = vmatpush.bf16.msra.mxu1 %v10547_v54  ;;  %v9199_v47 = vor.u32 %v12828_v38, %v9198_v37  ;;  %v10227_v54 = vor.u32 %v13076_v45, %v10224_v46  ;;  %v14586_v38 = vld [vmem:[#allocation8] sm:$0xff]  ;;  %v12996_v46 = vld [vmem:[#allocation7 + $0x69c] sm:$0xf] }
 0x296   : > { %3751 = vmatpush.bf16.msrb.mxu3 %v9523_v49  ;;  %10841 = vmatmul.msk.bf16.vlgmr.msra.gmra.mxu0 %vm621_vm7, %v14518_v51  ;;  %v9203_v49 = vor.u32 %v12820_v43, %v9200_v44  ;;  %v14584_v37 = vpop.f32.mrf.mxu3  ;;  %v1084_v42 = vperm.slane %v14586_v38, 0  ;;  %v9971_v43 = vor.u32 %v13012_v27, %v9968_v28  ;;  %v10739_v44 = vor.u32 %v13204_v29, %v10736_v33  ;;  %v9462_v28 = vld [vmem:[#allocation7 + $0x320] sm:$0xf] }
 0x297   : > { %10842 = vmatmul.msk.bf16.vlgmr.msra.gmra.mxu3 %vm621_vm7, %v14518_v51  ;;  %v12893_v29 = vld [vmem:[#allocation7 + $0x35c] sm:$0xf0] }
 0x298   : > { %3724 = vmatpush.bf16.msra.mxu2 %v10479_v60  ;;  %v10160_v60 = vld [vmem:[#allocation7 + $0x8d8] sm:$0xf0] }
 0x299   : > { %3696 = vmatpush.bf16.msrb.mxu0 %v9455_v59  ;;  %3780 = vmatpush.bf16.msra.mxu1 %v10483_v30  ;;  %v13060_v59 = vld [vmem:[#allocation7 + $0x89c] sm:$0xf]  ;;  %v9139_v30 = vor.u32 %v12804_v56, %v9136_v58 }
 0x29a   : > { %3752 = vmatpush.bf16.msrb.mxu3 %v9459_v61  ;;  %v9135_v61 = vor.u32 %v12812_v52, %v9134_v50  ;;  %v10163_v4 = vor.u32 %v13060_v59, %v10160_v60  ;;  %v10672_v50 = vld [vmem:[#allocation7 + $0xcd8] sm:$0xf0]  ;;  %v9910_v52 = vld [vmem:[#allocation7 + $0x6a0] sm:$0xf] }
 0x29b   : > { %v12980_v59 = vld [vmem:[#allocation7 + $0x61c] sm:$0xf]  ;;  %v9911_v62 = vor.u32 %v13005_v53, %v9910_v52  ;;  %v12877_v52 = vld [vmem:[#allocation7 + $0x2dc] sm:$0xf0]  ;;  %v12869_v53 = vld [vmem:[#allocation7 + $0x2a4] sm:$0xf] }
 0x29c   : > { %3725 = vmatpush.bf16.msra.mxu2 %v10415_v8  ;;  %v10096_v8 = vld [vmem:[#allocation7 + $0x858] sm:$0xf0] }
 0x29d   : > { %3697 = vmatpush.bf16.msrb.mxu0 %v9391_v7  ;;  %3781 = vmatpush.bf16.msra.mxu1 %v10419_v14  ;;  %v13044_v7 = vld [vmem:[#allocation7 + $0x81c] sm:$0xf] }
 0x29e   : > { %3753 = vmatpush.bf16.msrb.mxu3 %v9395_v9  ;;  %v13028_v9 = vld [vmem:[#allocation7 + $0x79c] sm:$0xf] }
 0x29f   : > { %v10800_v14 = vld [vmem:[#allocation7 + $0xdd8] sm:$0xf0]  ;;  %v14580_v17 = vpop.f32.mrf.mxu0  ;;  %v10035_v21 = vor.u32 %v13028_v9, %v10032_v10  ;;  %v13181_v9 = vld [vmem:[#allocation7 + $0xc5c] sm:$0xf0] }
 0x2a0   : > { %3726 = vmatpush.bf16.msra.mxu2 %v10351_v19  ;;  %v13229_v19 = vld [vmem:[#allocation7 + $0xddc] sm:$0xf0]  ;;  %v10803_v22 = vor.u32 %v13220_v12, %v10800_v14 }
 0x2a1   : > { %3698 = vmatpush.bf16.msrb.mxu0 %v9327_v25  ;;  %3782 = vmatpush.bf16.msra.mxu1 %v10355_v24  ;;  %v10806_v25 = vld [vmem:[#allocation7 + $0xda0] sm:$0xf] }
 0x2a2   : > { %3754 = vmatpush.bf16.msrb.mxu3 %v9331_v20  ;;  %v10099_v20 = vor.u32 %v13044_v7, %v10096_v8  ;;  %v10807_v31 = vor.u32 %v13229_v19, %v10806_v25  ;;  %v9526_v10 = vld [vmem:[#allocation7 + $0x3a0] sm:$0xf]  ;;  %v12964_v19 = vld [vmem:[#allocation7 + $0x59c] sm:$0xf] }
 0x2a3   : > { %v12909_v12 = vld [vmem:[#allocation7 + $0x3dc] sm:$0xf0] }
 0x2a4   : > { %3727 = vmatpush.bf16.msra.mxu2 %v10287_v35  ;;  %v13021_v35 = vld [vmem:[#allocation7 + $0x75c] sm:$0xf0] }
 0x2a5   : > { %3699 = vmatpush.bf16.msrb.mxu0 %v9263_v34  ;;  %3783 = vmatpush.bf16.msra.mxu1 %v10291_v41  ;;  %v9974_v34 = vld [vmem:[#allocation7 + $0x720] sm:$0xf]  ;;  %v3452_v8 = vpop.f32.mrf.mxu3 }
 0x2a6   : > { %3755 = vmatpush.bf16.msrb.mxu3 %v9267_v36  ;;  %v3368_v24 = vpop.f32.mrf.mxu2  ;;  %v14582_v36 = vpop.f32.mrf.mxu1  ;;  %v13213_v41 = vld [vmem:[#allocation7 + $0xd5c] sm:$0xf0]  ;;  %v9975_v45 = vor.u32 %v13021_v35, %v9974_v34  ;;  %v12885_v35 = vld [vmem:[#allocation7 + $0x324] sm:$0xf] }
 0x2a7   : > { %v3369_v56 = vadd.f32 %v3368_v24, %v1084_v42  ;;  %v14595_v60 = vpop.f32.mrf.mxu0  ;;  %v12973_v24 = vld [vmem:[#allocation7 + $0x5dc] sm:$0xf0] }
 0x2a8   : > { %3728 = vmatpush.bf16.msra.mxu2 %v10223_v48  ;;  %v13188_v48 = vld [vmem:[#allocation7 + $0xc9c] sm:$0xf] }
 0x2a9   : > { %3700 = vmatpush.bf16.msrb.mxu0 %v9199_v47  ;;  %3784 = vmatpush.bf16.msra.mxu1 %v10227_v54  ;;  %v9904_v47 = vld [vmem:[#allocation7 + $0x6d8] sm:$0xf0]  ;;  %v10678_v54 = vld [vmem:[#allocation7 + $0xca0] sm:$0xf]  ;;  %v3383_v14 = vadd.f32 %v14578_v26, %v3369_v56 }
 0x2aa   : > { %3756 = vmatpush.bf16.msrb.mxu3 %v9203_v49  ;;  %v10743_v49 = vor.u32 %v13213_v41, %v10742_v39  ;;  %v9907_v58 = vor.u32 %v12996_v46, %v9904_v47  ;;  %v10679_v2 = vor.u32 %v13197_v55, %v10678_v54  ;;  %v9464_v39 = vld [vmem:[#allocation7 + $0x360] sm:$0xf0]  ;;  %v9463_v46 = vor.u32 %v12893_v29, %v9462_v28  ;;  %v12845_v28 = vld [vmem:[#allocation7 + $0x1dc] sm:$0xf0] }
 0x2ab   : > { %v13157_v29 = vld [vmem:[#allocation7 + $0xba4] sm:$0xf] }
 0x2ac   : > { %3729 = vmatpush.bf16.msra.mxu2 %v10159_v0  ;;  %v9840_v0 = vld [vmem:[#allocation7 + $0x658] sm:$0xf0] }
 0x2ad   : > { %3701 = vmatpush.bf16.msrb.mxu0 %v9135_v61  ;;  %3785 = vmatpush.bf16.msra.mxu1 %v10163_v4  ;;  %v10675_v61 = vor.u32 %v13188_v48, %v10672_v50  ;;  %v12989_v4 = vld [vmem:[#allocation7 + $0x65c] sm:$0xf0]  ;;  %v9843_v15 = vor.u32 %v12980_v59, %v9840_v0  ;;  %v9467_v50 = vor.u32 %v12885_v35, %v9464_v39  ;;  %v12932_v59 = vld [vmem:[#allocation7 + $0x49c] sm:$0xf]  ;;  %v3454_v0 = vpop.f32.mrf.mxu3  ;;  %v9272_v35 = vld [vmem:[#allocation7 + $0x1e0] sm:$0xf0] }
 0x2ae   : > { %3757 = vmatpush.bf16.msrb.mxu3 %v9139_v30  ;;  %v3370_v63 = vpop.f32.mrf.mxu2  ;;  %v13172_v30 = vld [vmem:[#allocation7 + $0xc1c] sm:$0xf]  ;;  %v3424_v7 = vpop.f32.mrf.mxu1  ;;  %v9847_v25 = vor.u32 %v12989_v4, %v9846_v3  ;;  %v9718_v48 = vld [vmem:[#allocation7 + $0x520] sm:$0xf] }
 0x2af   : > { %v3371_v33 = vadd.f32 %v3370_v63, %v1084_v42  ;;  %v9398_v42 = vld [vmem:[#allocation7 + $0x2a0] sm:$0xf] }
 0x2b0   : > { %3730 = vmatpush.bf16.msra.mxu2 %v10095_v18  ;;  %v9528_v18 = vld [vmem:[#allocation7 + $0x3e0] sm:$0xf0]  ;;  %v9654_v3 = vld [vmem:[#allocation7 + $0x4a0] sm:$0xf] }
 0x2b1   : > { %3702 = vmatpush.bf16.msrb.mxu0 %v9071_v13  ;;  %3786 = vmatpush.bf16.msra.mxu1 %v10099_v20  ;;  %v1085_v13 = vperm.slane %v14586_v38, 1  ;;  %v9776_v20 = vld [vmem:[#allocation7 + $0x5d8] sm:$0xf0]  ;;  %v9531_v27 = vor.u32 %v12901_v16, %v9528_v18  ;;  %v3385_v54 = vadd.f32 %v14584_v37, %v3371_v33  ;;  %v12941_v4 = vld [vmem:[#allocation7 + $0x4dc] sm:$0xf0] }
 0x2b2   : > { %3758 = vmatpush.bf16.msrb.mxu3 %v9075_v32  ;;  %v10611_v32 = vor.u32 %v13172_v30, %v10608_v1  ;;  %v9779_v34 = vor.u32 %v12964_v19, %v9776_v20  ;;  %v9655_v18 = vor.u32 %v12941_v4, %v9654_v3  ;;  %v9590_v19 = vld [vmem:[#allocation7 + $0x420] sm:$0xf] }
 0x2b3   : > { %3731 = vmatmul.bf16.vlgmr.msra.gmra.mxu2 %v14538_v5  ;;  %v3425_v26 = vadd.f32 %v3424_v7, %v1085_v13  ;;  %v9334_v7 = vld [vmem:[#allocation7 + $0x220] sm:$0xf] }
 0x2b4   : > { %3797 = vmatpush.bf16.msrb.mxu2 %v10803_v22  ;;  %3703 = vmatmul.bf16.vlgmr.msrb.gmra.mxu0 %v14544_v11  ;;  %v9527_v22 = vor.u32 %v12909_v12, %v9526_v10  ;;  %v3399_v10 = vadd.f32 %v14595_v60, %v3385_v54  ;;  %v12925_v20 = vld [vmem:[#allocation7 + $0x45c] sm:$0xf0]  ;;  %v12821_v54 = vld [vmem:[#allocation7 + $0x124] sm:$0xf] }
 0x2b5   : > { %3765 = vmatpush.bf16.msra.mxu0 %v10035_v21  ;;  %3853 = vmatpush.bf16.msrb.mxu1 %v10807_v31  ;;  %v10615_v21 = vor.u32 %v13181_v9, %v10614_v6  ;;  %v3397_v31 = vadd.f32 %v14580_v17, %v3383_v14  ;;  %v3466_v17 = vpop.f32.mrf.mxu0  ;;  %v9336_v14 = vld [vmem:[#allocation7 + $0x260] sm:$0xf0]  ;;  %v9270_v60 = vld [vmem:[#allocation7 + $0x1a0] sm:$0xf] }
 0x2b6   : > { %3821 = vmatpush.bf16.msra.mxu3 %v10039_v23  ;;  %3787 = vmatmul.bf16.vlgmr.msra.gmra.mxu1 %v14538_v5  ;;  %v9782_v23 = vld [vmem:[#allocation7 + $0x5a0] sm:$0xf]  ;;  %v3426_v63 = vpop.f32.mrf.mxu1  ;;  %v14625_v39 = vadd.f32 %v14582_v36, %v3399_v10  ;;  %v10488_v36 = vld [vmem:[#allocation7 + $0xb60] sm:$0xf0] }
 0x2b7   : > { %3759 = vmatmul.bf16.vlgmr.msrb.gmra.mxu3 %v14544_v11  ;;  %v9783_v41 = vor.u32 %v12973_v24, %v9782_v23  ;;  %v3427_v9 = vadd.f32 %v3426_v63, %v1085_v13  ;;  %v13165_v23 = vld [vmem:[#allocation7 + $0xbdc] sm:$0xf0] }
 0x2b8   : > { %3798 = vmatpush.bf16.msrb.mxu2 %v10739_v44  ;;  %v12948_v44 = vld [vmem:[#allocation7 + $0x51c] sm:$0xf] }
 0x2b9   : > { %3766 = vmatpush.bf16.msra.mxu0 %v9971_v43  ;;  %3854 = vmatpush.bf16.msrb.mxu1 %v10743_v49  ;;  %v3438_v43 = vpop.f32.mrf.mxu2  ;;  %v12957_v49 = vld [vmem:[#allocation7 + $0x55c] sm:$0xf0] }
 0x2ba   : > { %3822 = vmatpush.bf16.msra.mxu3 %v9975_v45  ;;  %v9712_v45 = vld [vmem:[#allocation7 + $0x558] sm:$0xf0]  ;;  %v3439_v47 = vadd.f32 %v3438_v43, %v3425_v26  ;;  %v9719_v30 = vor.u32 %v12957_v49, %v9718_v48  ;;  %v10552_v26 = vld [vmem:[#allocation7 + $0xbe0] sm:$0xf0]  ;;  %v9591_v43 = vor.u32 %v12925_v20, %v9590_v19  ;;  %v9206_v48 = vld [vmem:[#allocation7 + $0x120] sm:$0xf] }
 0x2bb   : > { %v9715_v56 = vor.u32 %v12948_v44, %v9712_v45  ;;  %v10486_v49 = vld [vmem:[#allocation7 + $0xb20] sm:$0xf] }
 0x2bc   : > { %3799 = vmatpush.bf16.msrb.mxu2 %v10675_v61  ;;  %v3453_v55 = vadd.f32 %v3452_v8, %v3439_v47  ;;  %v9648_v61 = vld [vmem:[#allocation7 + $0x4d8] sm:$0xf0]  ;;  %v12861_v8 = vld [vmem:[#allocation7 + $0x25c] sm:$0xf0]  ;;  %v10555_v47 = vor.u32 %v13157_v29, %v10552_v26 }
 0x2bd   : > { %3767 = vmatpush.bf16.msra.mxu0 %v9907_v58  ;;  %3855 = vmatpush.bf16.msrb.mxu1 %v10679_v2  ;;  %v9400_v58 = vld [vmem:[#allocation7 + $0x2e0] sm:$0xf0]  ;;  %v9399_v2 = vor.u32 %v12877_v52, %v9398_v42  ;;  %v9651_v6 = vor.u32 %v12932_v59, %v9648_v61  ;;  %v9335_v13 = vor.u32 %v12861_v8, %v9334_v7  ;;  %v12829_v52 = vld [vmem:[#allocation7 + $0x15c] sm:$0xf0] }
 0x2be   : > { %3823 = vmatpush.bf16.msra.mxu3 %v9911_v62  ;;  %v14606_v62 = vadd.f32 %v14576_v57, %v3397_v31  ;;  %v14608_v1 = vadd.f32 %v3466_v17, %v3453_v55  ;;  %v9403_v37 = vor.u32 %v12869_v53, %v9400_v58  ;;  %v12853_v57 = vld [vmem:[#allocation7 + $0x224] sm:$0xf]  ;;  %v13149_v17 = vld [vmem:[#allocation7 + $0xb5c] sm:$0xf0]  ;;  %v9207_v61 = vor.u32 %v12829_v52, %v9206_v48 }
 0x2bf   : > { %v13141_v53 = vld [vmem:[#allocation7 + $0xb24] sm:$0xf]  ;;  %v10487_v59 = vor.u32 %v13149_v17, %v10486_v49  ;;  %v13117_v19 = vld [vmem:[#allocation7 + $0xa5c] sm:$0xf0] }
 0x2c0   : > { %3800 = vmatpush.bf16.msrb.mxu2 %v10611_v32  ;;  %v4256_v12 = vmax.f32 %v14608_v1, 0.0  ;;  %v4255_v16 = vmax.f32 %v14606_v62, 0.0  ;;  %v9208_v55 = vld [vmem:[#allocation7 + $0x160] sm:$0xf0]  ;;  %v10491_v63 = vor.u32 %v13141_v53, %v10488_v36  ;;  %v9982_v53 = vld [vmem:[#allocation7 + $0x728] sm:$0xf] }
 0x2c1   : > { %3768 = vmatpush.bf16.msra.mxu0 %v9843_v15  ;;  %3856 = vmatpush.bf16.msrb.mxu1 %v10615_v21  ;;  %v12916_v15 = vld [vmem:[#allocation7 + $0x41c] sm:$0xf]  ;;  %v3440_v32 = vpop.f32.mrf.mxu2  ;;  %v9211_v4 = vor.u32 %v12821_v54, %v9208_v55  ;;  %v10424_v7 = vld [vmem:[#allocation7 + $0xae0] sm:$0xf0]  ;;  %v13022_v36 = vld [vmem:[#allocation7 + $0x764] sm:$0xf0] }
 0x2c2   : > { %3824 = vmatpush.bf16.msra.mxu3 %v9847_v25  ;;  %v9584_v25 = vld [vmem:[#allocation7 + $0x458] sm:$0xf0]  ;;  %v3441_v21 = vadd.f32 %v3440_v32, %v3427_v9  ;;  %v13842_v24 = vpack.i.bf16 %v4256_v12, %v4255_v16  ;;  %v12805_v8 = vld [vmem:[#allocation7 + $0xa4] sm:$0xf]  ;;  %v14640_v9 = vpop.f32.mrf.mxu1  ;;  %v12797_v32 = vld [vmem:[#allocation7 + $0x5c] sm:$0xf0] }
 0x2c3   : > { %10843 = vmatmul.msk.bf16.vlgmr.msrb.gmra.mxu2 %vm621_vm7, %v14518_v51  ;;  %v9587_v33 = vor.u32 %v12916_v15, %v9584_v25  ;;  %v10358_v25 = vld [vmem:[#allocation7 + $0xa20] sm:$0xf]  ;;  %v10296_v48 = vld [vmem:[#allocation7 + $0x9e0] sm:$0xf0]  ;;  %v1086_v54 = vperm.slane %v14586_v38, 2 }
 0x2c4   : > { %3807 = vmatpush.bf16.msra.mxu2 %v9527_v22  ;;  %v10550_v22 = vld [vmem:[#allocation7 + $0xba0] sm:$0xf]  ;;  %v3455_v31 = vadd.f32 %v3454_v0, %v3441_v21  ;;  %13843 = vrot.lane.b32.xlu2 %v13842_v24, %s14332_s20  ;;  %v9080_v24 = vld [vmem:[#allocation7 + $0x60] sm:$0xf0]  ;;  %v10359_v26 = vor.u32 %v13117_v19, %v10358_v25  ;;  %v13112_v62 = vld [vmem:[#allocation7 + $0xa3c] sm:$0xf] }
 0x2c5   : > { %3863 = vmatpush.bf16.msra.mxu1 %v9531_v27  ;;  %3769 = vmatpush.bf16.msra.mxu0 %v9779_v34  ;;  %v9339_v27 = vor.u32 %v12853_v57, %v9336_v14  ;;  %v12837_v34 = vld [vmem:[#allocation7 + $0x1a4] sm:$0xf]  ;;  %v10551_v44 = vor.u32 %v13165_v23, %v10550_v22  ;;  %v9142_v0 = vld [vmem:[#allocation7 + $0xa0] sm:$0xf] }
 0x2c6   : > { %3825 = vmatpush.bf16.msra.mxu3 %v9783_v41  ;;  %10844 = vmatmul.msk.bf16.vlgmr.msrb.gmra.mxu1 %vm621_vm7, %v14518_v51  ;;  %v3468_v41 = vpop.f32.mrf.mxu0  ;;  %v9275_v42 = vor.u32 %v12837_v34, %v9272_v35  ;;  %v9144_v57 = vld [vmem:[#allocation7 + $0xe0] sm:$0xf0]  ;;  %v9078_v14 = vld [vmem:[#allocation7 + $0x20] sm:$0xf] }
 0x2c7   : > { %v14627_v45 = vadd.f32 %v3468_v41, %v3455_v31  ;;  %v9147_v21 = vor.u32 %v12805_v8, %v9144_v57  ;;  %v13109_v22 = vld [vmem:[#allocation7 + $0xa24] sm:$0xf]  ;;  %v10046_v31 = vld [vmem:[#allocation7 + $0x7a8] sm:$0xf]  ;;  %v9079_v34 = vor.u32 %v12797_v32, %v9078_v14  ;;  %v10294_v41 = vld [vmem:[#allocation7 + $0x9a0] sm:$0xf] }
 0x2c8   : > { %3808 = vmatpush.bf16.msra.mxu2 %v9463_v46  ;;  %v9271_v46 = vor.u32 %v12845_v28, %v9270_v60  ;;  %v12789_v60 = vld [vmem:[#allocation7 + $0x24] sm:$0xf]  ;;  %v9918_v57 = vld [vmem:[#allocation7 + $0x6a8] sm:$0xf]  ;;  %v13069_v32 = vld [vmem:[#allocation7 + $0x8dc] sm:$0xf0] }
 0x2c9   : > { %3864 = vmatpush.bf16.msra.mxu1 %v9467_v50  ;;  %3770 = vmatpush.bf16.msra.mxu0 %v9715_v56  ;;  %v14629_v50 = vpop.f32.mrf.mxu3  ;;  %v4271_v56 = vmax.f32 %v14625_v39, 0.0  ;;  %v4272_v58 = vmax.f32 %v14627_v45, 0.0  ;;  %v10360_v23 = vld [vmem:[#allocation7 + $0xa60] sm:$0xf0]  ;;  %v10824_v45 = vld [vmem:[#allocation7 + $0xdf0] sm:$0xf0] }
 0x2ca   : > { %3826 = vmatpush.bf16.msra.mxu3 %v9719_v30  ;;  %v10422_v30 = vld [vmem:[#allocation7 + $0xaa0] sm:$0xf]  ;;  %v10040_v28 = vld [vmem:[#allocation7 + $0x7e0] sm:$0xf0]  ;;  %v10363_v35 = vor.u32 %v13109_v22, %v10360_v23  ;;  %v1087_v22 = vperm.slane %v14586_v38, 3 }
 0x2cb   : > { %v13847_v3 = vpack.i.bf16 %v4272_v58, %v4271_v56  ;;  %v13013_v17 = vld [vmem:[#allocation7 + $0x724] sm:$0xf]  ;;  %v10830_v39 = vld [vmem:[#allocation7 + $0xdb8] sm:$0xf] }
 0x2cc   : > { %3809 = vmatpush.bf16.msra.mxu2 %v9399_v2  ;;  %v13133_v2 = vld [vmem:[#allocation7 + $0xadc] sm:$0xf0] }
 0x2cd   : > { %3865 = vmatpush.bf16.msra.mxu1 %v9403_v37  ;;  %3771 = vmatpush.bf16.msra.mxu0 %v9651_v6  ;;  %v12813_v37 = vld [vmem:[#allocation7 + $0xdc] sm:$0xf0]  ;;  %v13125_v6 = vld [vmem:[#allocation7 + $0xaa4] sm:$0xf]  ;;  %v10423_v10 = vor.u32 %v13133_v2, %v10422_v30 }
 0x2ce   : > { %3827 = vmatpush.bf16.msra.mxu3 %v9655_v18  ;;  %13848 = vrot.lane.b32.xlu1 %v13847_v3, %s14332_s20  ;;  %v9143_v15 = vor.u32 %v12813_v37, %v9142_v0  ;;  %v10427_v18 = vor.u32 %v13125_v6, %v10424_v7  ;;  %v3480_v20 = vpop.f32.mrf.mxu0  ;;  %v13077_v30 = vld [vmem:[#allocation7 + $0x924] sm:$0xf]  ;;  %v9983_v3 = vor.u32 %v13022_v36, %v9982_v53  ;;  %v10814_v53 = vld [vmem:[#allocation7 + $0xda8] sm:$0xf] }
 0x2cf   : > { %v10232_v2 = vld [vmem:[#allocation7 + $0x960] sm:$0xf0]  ;;  %v3481_v14 = vadd.f32 %v3480_v20, %v1086_v54  ;;  %v9854_v20 = vld [vmem:[#allocation7 + $0x628] sm:$0xf] }
 0x2d0   : > { %3810 = vmatpush.bf16.msra.mxu2 %v9335_v13  ;;  %v14642_v13 = vpop.f32.mrf.mxu2  ;;  %v9912_v37 = vld [vmem:[#allocation7 + $0x6e0] sm:$0xf0] }
 0x2d1   : > { %3866 = vmatpush.bf16.msra.mxu1 %v9339_v27  ;;  %3772 = vmatpush.bf16.msra.mxu0 %v9587_v33  ;;  %v13029_v27 = vld [vmem:[#allocation7 + $0x7a4] sm:$0xf]  ;;  %v14644_v29 = vpop.f32.mrf.mxu3  ;;  %v13038_v33 = vld [vmem:[#allocation7 + $0x7e4] sm:$0xf0] }
 0x2d2   : > { %3828 = vmatpush.bf16.msra.mxu3 %v9591_v43  ;;  %v13101_v43 = vld [vmem:[#allocation7 + $0x9dc] sm:$0xf0]  ;;  %v10047_v49 = vor.u32 %v13038_v33, %v10046_v31  ;;  %v3495_v33 = vadd.f32 %v14640_v9, %v3481_v14  ;;  %v13230_v9 = vld [vmem:[#allocation7 + $0xde4] sm:$0xf0]  ;;  %v13205_v14 = vld [vmem:[#allocation7 + $0xd24] sm:$0xf] }
 0x2d3   : > { %v10295_v52 = vor.u32 %v13101_v43, %v10294_v41  ;;  %v10102_v31 = vld [vmem:[#allocation7 + $0x820] sm:$0xf]  ;;  %v13045_v41 = vld [vmem:[#allocation7 + $0x824] sm:$0xf] }
 0x2d4   : > { %3811 = vmatpush.bf16.msra.mxu2 %v9271_v46  ;;  %3773 = vmatmul.bf16.vlgmr.msra.gmra.mxu0 %v14531_v40  ;;  %v10043_v46 = vor.u32 %v13029_v27, %v10040_v28  ;;  %v9848_v27 = vld [vmem:[#allocation7 + $0x660] sm:$0xf0] }
 0x2d5   : > { %3835 = vmatpush.bf16.msrb.mxu0 %v10551_v44  ;;  %3867 = vmatpush.bf16.msra.mxu1 %v9275_v42  ;;  %v9083_v44 = vor.u32 %v12789_v60, %v9080_v24  ;;  %v9976_v42 = vld [vmem:[#allocation7 + $0x760] sm:$0xf0] }
 0x2d6   : > { %3891 = vmatpush.bf16.msrb.mxu3 %v10555_v47  ;;  %v13093_v47 = vld [vmem:[#allocation7 + $0x9a4] sm:$0xf]  ;;  %v9979_v0 = vor.u32 %v13013_v17, %v9976_v42  ;;  %v3482_v6 = vpop.f32.mrf.mxu0 }
 0x2d7   : > { %3829 = vmatmul.bf16.vlgmr.msra.gmra.mxu3 %v14531_v40  ;;  %v10299_v55 = vor.u32 %v13093_v47, %v10296_v48  ;;  %v10168_v60 = vld [vmem:[#allocation7 + $0x8e0] sm:$0xf0] }
 0x2d8   : > { %3812 = vmatpush.bf16.msra.mxu2 %v9207_v61  ;;  %v13085_v61 = vld [vmem:[#allocation7 + $0x95c] sm:$0xf0]  ;;  %v14649_v7 = vpop.f32.mrf.mxu2  ;;  %v12981_v24 = vld [vmem:[#allocation7 + $0x624] sm:$0xf] }
 0x2d9   : > { %3836 = vmatpush.bf16.msrb.mxu0 %v10487_v59  ;;  %3868 = vmatpush.bf16.msra.mxu1 %v9211_v4  ;;  %v10230_v59 = vld [vmem:[#allocation7 + $0x920] sm:$0xf]  ;;  %v12997_v4 = vld [vmem:[#allocation7 + $0x6a4] sm:$0xf]  ;;  %v3536_v25 = vpop.f32.mrf.mxu3 }
 0x2da   : > { %3892 = vmatpush.bf16.msrb.mxu3 %v10491_v63  ;;  %v14647_v63 = vpop.f32.mrf.mxu1  ;;  %v10231_v8 = vor.u32 %v13085_v61, %v10230_v59  ;;  %v9915_v19 = vor.u32 %v12997_v4, %v9912_v37  ;;  %v10104_v43 = vld [vmem:[#allocation7 + $0x860] sm:$0xf0]  ;;  %v3537_v17 = vadd.f32 %v3536_v25, %v1087_v22  ;;  %v9790_v61 = vld [vmem:[#allocation7 + $0x5a8] sm:$0xf] }
 0x2db   : > { %v13221_v47 = vld [vmem:[#allocation7 + $0xda4] sm:$0xf] }
 0x2dc   : > { %3813 = vmatpush.bf16.msra.mxu2 %v9143_v15  ;;  %v10235_v15 = vor.u32 %v13077_v30, %v10232_v2  ;;  %v10808_v48 = vld [vmem:[#allocation7 + $0xde0] sm:$0xf0]  ;;  %v3483_v30 = vadd.f32 %v3482_v6, %v1086_v54  ;;  %v12958_v54 = vld [vmem:[#allocation7 + $0x564] sm:$0xf0] }
 0x2dd   : > { %3837 = vmatpush.bf16.msrb.mxu0 %v10423_v10  ;;  %3869 = vmatpush.bf16.msra.mxu1 %v9147_v21  ;;  %v13006_v10 = vld [vmem:[#allocation7 + $0x6e4] sm:$0xf0]  ;;  %v13061_v21 = vld [vmem:[#allocation7 + $0x8a4] sm:$0xf] }
 0x2de   : > { %3893 = vmatpush.bf16.msrb.mxu3 %v10427_v18  ;;  %v10166_v18 = vld [vmem:[#allocation7 + $0x8a0] sm:$0xf]  ;;  %v9919_v23 = vor.u32 %v13006_v10, %v9918_v57  ;;  %v12949_v4 = vld [vmem:[#allocation7 + $0x524] sm:$0xf]  ;;  %v10815_v10 = vor.u32 %v13230_v9, %v10814_v53  ;;  %v10750_v6 = vld [vmem:[#allocation7 + $0xd28] sm:$0xf] }
 0x2df   : > { %v10167_v28 = vor.u32 %v13069_v32, %v10166_v18  ;;  %v9720_v37 = vld [vmem:[#allocation7 + $0x560] sm:$0xf0]  ;;  %v9726_v18 = vld [vmem:[#allocation7 + $0x528] sm:$0xf] }
 0x2e0   : > { %3814 = vmatpush.bf16.msra.mxu2 %v9079_v34  ;;  %v10171_v34 = vor.u32 %v13061_v21, %v10168_v60  ;;  %v13214_v21 = vld [vmem:[#allocation7 + $0xd64] sm:$0xf0] }
 0x2e1   : > { %3838 = vmatpush.bf16.msrb.mxu0 %v10359_v26  ;;  %3870 = vmatpush.bf16.msra.mxu1 %v9083_v44  ;;  %v12990_v26 = vld [vmem:[#allocation7 + $0x664] sm:$0xf0]  ;;  %v9851_v44 = vor.u32 %v12981_v24, %v9848_v27  ;;  %v3538_v60 = vpop.f32.mrf.mxu3 }
 0x2e2   : > { %3894 = vmatpush.bf16.msrb.mxu3 %v10363_v35  ;;  %v13053_v35 = vld [vmem:[#allocation7 + $0x85c] sm:$0xf0]  ;;  %v9855_v42 = vor.u32 %v12990_v26, %v9854_v20  ;;  %v3564_v36 = vpop.f32.mrf.mxu1  ;;  %v9727_v20 = vor.u32 %v12958_v54, %v9726_v18  ;;  %v10751_v26 = vor.u32 %v13214_v21, %v10750_v6  ;;  %v13166_v18 = vld [vmem:[#allocation7 + $0xbe4] sm:$0xf0]  ;;  %v13158_v6 = vld [vmem:[#allocation7 + $0xbac] sm:$0xf] }
 0x2e3   : > { %3815 = vmatmul.bf16.vlgmr.msra.gmra.mxu2 %v14544_v11  ;;  %v10103_v59 = vor.u32 %v13053_v35, %v10102_v31  ;;  %v9656_v31 = vld [vmem:[#allocation7 + $0x4e0] sm:$0xf0]  ;;  %v10560_v21 = vld [vmem:[#allocation7 + $0xbe8] sm:$0xf0] }
 0x2e4   : > { %3877 = vmatpush.bf16.msrb.mxu2 %v10043_v46  ;;  %3871 = vmatmul.bf16.vlgmr.msra.gmra.mxu1 %v14544_v11  ;;  %v12965_v46 = vld [vmem:[#allocation7 + $0x5a4] sm:$0xf] }
 0x2e5   : > { %3933 = vmatpush.bf16.msrb.mxu1 %v10047_v49  ;;  %3839 = vmatpush.bf16.msrb.mxu0 %v10295_v52  ;;  %v3509_v49 = vadd.f32 %v14642_v13, %v3495_v33  ;;  %v9784_v52 = vld [vmem:[#allocation7 + $0x5e0] sm:$0xf0]  ;;  %v10107_v13 = vor.u32 %v13045_v41, %v10104_v43 }
 0x2e6   : > { %3895 = vmatpush.bf16.msrb.mxu3 %v10299_v55  ;;  %v3550_v55 = vpop.f32.mrf.mxu0  ;;  %v9787_v57 = vor.u32 %v12965_v46, %v9784_v52  ;;  %v13189_v33 = vld [vmem:[#allocation7 + $0xca4] sm:$0xf]  ;;  %v13198_v46 = vld [vmem:[#allocation7 + $0xce4] sm:$0xf0] }
 0x2e7   : > { %v3551_v2 = vadd.f32 %v3550_v55, %v3537_v17  ;;  %v14663_v32 = vadd.f32 %v14629_v50, %v3509_v49  ;;  %v9723_v50 = vor.u32 %v12949_v4, %v9720_v37  ;;  %v12942_v49 = vld [vmem:[#allocation7 + $0x4e4] sm:$0xf0]  ;;  %v9592_v52 = vld [vmem:[#allocation7 + $0x460] sm:$0xf0] }
 0x2e8   : > { %3878 = vmatpush.bf16.msrb.mxu2 %v9979_v0  ;;  %v12974_v0 = vld [vmem:[#allocation7 + $0x5e4] sm:$0xf0]  ;;  %v13173_v55 = vld [vmem:[#allocation7 + $0xc24] sm:$0xf] }
 0x2e9   : > { %3934 = vmatpush.bf16.msrb.mxu1 %v9983_v3  ;;  %3840 = vmatpush.bf16.msrb.mxu0 %v10231_v8  ;;  %v10811_v3 = vor.u32 %v13221_v47, %v10808_v48  ;;  %v3578_v8 = vpop.f32.mrf.mxu2  ;;  %v3565_v25 = vadd.f32 %v3564_v36, %v3551_v2  ;;  %v4257_v35 = vmax.f32 %v14663_v32, 0.0  ;;  %v9662_v48 = vld [vmem:[#allocation7 + $0x4a8] sm:$0xf] }
 0x2ea   : > { %3896 = vmatpush.bf16.msrb.mxu3 %v10235_v15  ;;  %v10744_v15 = vld [vmem:[#allocation7 + $0xd60] sm:$0xf0]  ;;  %v3566_v53 = vpop.f32.mrf.mxu1  ;;  %v9663_v2 = vor.u32 %v12942_v49, %v9662_v48  ;;  %v13182_v4 = vld [vmem:[#allocation7 + $0xc64] sm:$0xf0] }
 0x2eb   : > { %v14666_v24 = vadd.f32 %v3578_v8, %v3565_v25  ;;  %v10747_v27 = vor.u32 %v13205_v14, %v10744_v15  ;;  %v9534_v8 = vld [vmem:[#allocation7 + $0x3a8] sm:$0xf]  ;;  %v12902_v25 = vld [vmem:[#allocation7 + $0x3ac] sm:$0xf] }
 0x2ec   : > { %3879 = vmatpush.bf16.msrb.mxu2 %v9915_v19  ;;  %v9791_v19 = vor.u32 %v12974_v0, %v9790_v61  ;;  %v9598_v61 = vld [vmem:[#allocation7 + $0x428] sm:$0xf] }
 0x2ed   : > { %3935 = vmatpush.bf16.msrb.mxu1 %v9919_v23  ;;  %3841 = vmatpush.bf16.msrb.mxu0 %v10167_v28  ;;  %v3497_v23 = vadd.f32 %v14647_v63, %v3483_v30  ;;  %v12933_v28 = vld [vmem:[#allocation7 + $0x4a4] sm:$0xf]  ;;  %v3539_v63 = vadd.f32 %v3538_v60, %v1087_v22  ;;  %v4258_v43 = vmax.f32 %v14666_v24, 0.0 }
 0x2ee   : > { %3897 = vmatpush.bf16.msrb.mxu3 %v10171_v34  ;;  %v10680_v34 = vld [vmem:[#allocation7 + $0xce0] sm:$0xf0]  ;;  %v3552_v47 = vpop.f32.mrf.mxu0  ;;  %v9659_v9 = vor.u32 %v12933_v28, %v9656_v31  ;;  %v12894_v31 = vld [vmem:[#allocation7 + $0x364] sm:$0xf0] }
 0x2ef   : > { %v3511_v41 = vadd.f32 %v14649_v7, %v3497_v23  ;;  %v3553_v17 = vadd.f32 %v3552_v47, %v3539_v63  ;;  %v13852_v7 = vpack.i.bf16 %v4258_v43, %v4257_v35  ;;  %v12917_v22 = vld [vmem:[#allocation7 + $0x424] sm:$0xf]  ;;  %v12886_v63 = vld [vmem:[#allocation7 + $0x32c] sm:$0xf] }
 0x2f0   : > { %3880 = vmatpush.bf16.msrb.mxu2 %v9851_v44  ;;  %v10686_v44 = vld [vmem:[#allocation7 + $0xca8] sm:$0xf]  ;;  %v10496_v47 = vld [vmem:[#allocation7 + $0xb68] sm:$0xf0] }
 0x2f1   : > { %3936 = vmatpush.bf16.msrb.mxu1 %v9855_v42  ;;  %3842 = vmatpush.bf16.msrb.mxu0 %v10103_v59  ;;  %v10683_v42 = vor.u32 %v13189_v33, %v10680_v34  ;;  %v10687_v36 = vor.u32 %v13198_v46, %v10686_v44  ;;  %v10616_v59 = vld [vmem:[#allocation7 + $0xc60] sm:$0xf0]  ;;  %v14680_v0 = vadd.f32 %v14644_v29, %v3511_v41  ;;  %v3580_v37 = vpop.f32.mrf.mxu2  ;;  %v9536_v29 = vld [vmem:[#allocation7 + $0x3e8] sm:$0xf0]  ;;  %v10494_v33 = vld [vmem:[#allocation7 + $0xb28] sm:$0xf] }
 0x2f2   : > { %3898 = vmatpush.bf16.msrb.mxu3 %v10107_v13  ;;  %v3567_v30 = vadd.f32 %v3566_v53, %v3553_v17  ;;  %13853 = vrot.lane.b32.xlu0 %v13852_v7, %s14332_s20  ;;  %v12926_v13 = vld [vmem:[#allocation7 + $0x464] sm:$0xf0]  ;;  %v10619_v15 = vor.u32 %v13173_v55, %v10616_v59  ;;  %v10563_v34 = vor.u32 %v13158_v6, %v10560_v21  ;;  %v9472_v44 = vld [vmem:[#allocation7 + $0x368] sm:$0xf0] }
 0x2f3   : > { %v4273_v60 = vmax.f32 %v14680_v0, 0.0  ;;  %v9599_v23 = vor.u32 %v12926_v13, %v9598_v61  ;;  %v13150_v41 = vld [vmem:[#allocation7 + $0xb64] sm:$0xf0]  ;;  %v13142_v46 = vld [vmem:[#allocation7 + $0xb2c] sm:$0xf]  ;;  %v9475_v7 = vor.u32 %v12886_v63, %v9472_v44 }
 0x2f4   : > { %3881 = vmatpush.bf16.msrb.mxu2 %v9787_v57  ;;  %3843 = vmatmul.bf16.vlgmr.msrb.gmra.mxu0 %v14538_v5  ;;  %v12910_v57 = vld [vmem:[#allocation7 + $0x3e4] sm:$0xf0]  ;;  %v14683_v14 = vadd.f32 %v3580_v37, %v3567_v30  ;;  %v12870_v55 = vld [vmem:[#allocation7 + $0x2ac] sm:$0xf] }
 0x2f5   : > { %3909 = vmatpush.bf16.msra.mxu0 %v10811_v3  ;;  %3937 = vmatpush.bf16.msrb.mxu1 %v9791_v19  ;;  %v10622_v3 = vld [vmem:[#allocation7 + $0xc28] sm:$0xf]  ;;  %v9595_v19 = vor.u32 %v12917_v22, %v9592_v52  ;;  %v9408_v59 = vld [vmem:[#allocation7 + $0x2e8] sm:$0xf0] }
 0x2f6   : > { %3965 = vmatpush.bf16.msra.mxu3 %v10815_v10  ;;  %v10558_v10 = vld [vmem:[#allocation7 + $0xba8] sm:$0xf]  ;;  %v10623_v54 = vor.u32 %v13182_v4, %v10622_v3  ;;  %v4274_v28 = vmax.f32 %v14683_v14, 0.0  ;;  %v13126_v61 = vld [vmem:[#allocation7 + $0xaac] sm:$0xf]  ;;  %v9411_v4 = vor.u32 %v12870_v55, %v9408_v59 }
 0x2f7   : > { %3899 = vmatmul.bf16.vlgmr.msrb.gmra.mxu3 %v14538_v5  ;;  %v9406_v22 = vld [vmem:[#allocation7 + $0x2a8] sm:$0xf]  ;;  %v10432_v30 = vld [vmem:[#allocation7 + $0xae8] sm:$0xf0] }
 0x2f8   : > { %3882 = vmatpush.bf16.msrb.mxu2 %v9723_v50  ;;  %v10559_v50 = vor.u32 %v13166_v18, %v10558_v10  ;;  %v13857_v48 = vpack.i.bf16 %v4274_v28, %v4273_v60  ;;  %v12878_v52 = vld [vmem:[#allocation7 + $0x2e4] sm:$0xf0]  ;;  %v10435_v10 = vor.u32 %v13126_v61, %v10432_v30  ;;  %v12854_v18 = vld [vmem:[#allocation7 + $0x22c] sm:$0xf] }
 0x2f9   : > { %3910 = vmatpush.bf16.msra.mxu0 %v10747_v27  ;;  %3938 = vmatpush.bf16.msrb.mxu1 %v9727_v20  ;;  %v9535_v27 = vor.u32 %v12910_v57, %v9534_v8  ;;  %v9539_v20 = vor.u32 %v12902_v25, %v9536_v29  ;;  %v3592_v17 = vpop.f32.mrf.mxu2  ;;  %v10430_v53 = vld [vmem:[#allocation7 + $0xaa8] sm:$0xf]  ;;  %v9407_v13 = vor.u32 %v12878_v52, %v9406_v22  ;;  %v9344_v25 = vld [vmem:[#allocation7 + $0x268] sm:$0xf0]  ;;  %v14697_v29 = vpop.f32.mrf.mxu1 }
 0x2fa   : > { %3966 = vmatpush.bf16.msra.mxu3 %v10751_v26  ;;  %v9470_v26 = vld [vmem:[#allocation7 + $0x328] sm:$0xf]  ;;  %13858 = vrot.lane.b32.xlu2 %v13857_v48, %s14332_s20  ;;  %v12822_v55 = vld [vmem:[#allocation7 + $0x12c] sm:$0xf] }
 0x2fb   : > { %v9471_v49 = vor.u32 %v12894_v31, %v9470_v26  ;;  %v9342_v37 = vld [vmem:[#allocation7 + $0x228] sm:$0xf]  ;;  %v9216_v59 = vld [vmem:[#allocation7 + $0x168] sm:$0xf0] }
 0x2fc   : > { %3883 = vmatpush.bf16.msrb.mxu2 %v9659_v9  ;;  %v10499_v9 = vor.u32 %v13142_v46, %v10496_v47  ;;  %v12862_v8 = vld [vmem:[#allocation7 + $0x264] sm:$0xf0]  ;;  %v13094_v46 = vld [vmem:[#allocation7 + $0x9ac] sm:$0xf] }
 0x2fd   : > { %3911 = vmatpush.bf16.msra.mxu0 %v10683_v42  ;;  %3939 = vmatpush.bf16.msrb.mxu1 %v9663_v2  ;;  %v10495_v42 = vor.u32 %v13150_v41, %v10494_v33  ;;  %v1088_v2 = vperm.slane %v14586_v38, 4  ;;  %v10366_v57 = vld [vmem:[#allocation7 + $0xa28] sm:$0xf]  ;;  %v3606_v38 = vpop.f32.mrf.mxu3  ;;  %v9343_v6 = vor.u32 %v12862_v8, %v9342_v37  ;;  %v9280_v41 = vld [vmem:[#allocation7 + $0x1e8] sm:$0xf0] }
 0x2fe   : > { %3967 = vmatpush.bf16.msra.mxu3 %v10687_v36  ;;  %v13134_v36 = vld [vmem:[#allocation7 + $0xae4] sm:$0xf0]  ;;  %v10304_v47 = vld [vmem:[#allocation7 + $0x9e8] sm:$0xf0] }
 0x2ff   : > { %v10431_v3 = vor.u32 %v13134_v36, %v10430_v53  ;;  %v3593_v26 = vadd.f32 %v3592_v17, %v1088_v2  ;;  %v13102_v33 = vld [vmem:[#allocation7 + $0x9e4] sm:$0xf0]  ;;  %v13078_v61 = vld [vmem:[#allocation7 + $0x92c] sm:$0xf] }
 0x300   : > { %3884 = vmatpush.bf16.msrb.mxu2 %v9595_v19  ;;  %v13110_v19 = vld [vmem:[#allocation7 + $0xa2c] sm:$0xf]  ;;  %v12830_v22 = vld [vmem:[#allocation7 + $0x164] sm:$0xf0] }
 0x301   : > { %3912 = vmatpush.bf16.msra.mxu0 %v10619_v15  ;;  %3940 = vmatpush.bf16.msrb.mxu1 %v9599_v23  ;;  %v13118_v15 = vld [vmem:[#allocation7 + $0xa64] sm:$0xf0]  ;;  %v9347_v23 = vor.u32 %v12854_v18, %v9344_v25  ;;  %v3594_v63 = vpop.f32.mrf.mxu2  ;;  %v3620_v44 = vpop.f32.mrf.mxu0  ;;  %v3607_v17 = vadd.f32 %v3606_v38, %v3593_v26  ;;  %v10240_v30 = vld [vmem:[#allocation7 + $0x968] sm:$0xf0] }
 0x302   : > { %3968 = vmatpush.bf16.msra.mxu3 %v10623_v54  ;;  %v10368_v54 = vld [vmem:[#allocation7 + $0xa68] sm:$0xf0]  ;;  %v10367_v21 = vor.u32 %v13118_v15, %v10366_v57  ;;  %v10238_v52 = vld [vmem:[#allocation7 + $0x928] sm:$0xf]  ;;  %v3595_v53 = vadd.f32 %v3594_v63, %v1088_v2  ;;  %v9219_v57 = vor.u32 %v12822_v55, %v9216_v59  ;;  %v10243_v18 = vor.u32 %v13078_v61, %v10240_v30  ;;  %v13039_v55 = vld [vmem:[#allocation7 + $0x7ec] sm:$0xf0] }
 0x303   : > { %3885 = vmatmul.bf16.vlgmr.msrb.gmra.mxu2 %v14531_v40  ;;  %v10371_v31 = vor.u32 %v13110_v19, %v10368_v54  ;;  %v13086_v36 = vld [vmem:[#allocation7 + $0x964] sm:$0xf0]  ;;  %v12806_v19 = vld [vmem:[#allocation7 + $0xac] sm:$0xf] }
 0x304   : > { %3947 = vmatpush.bf16.msra.mxu2 %v10559_v50  ;;  %3941 = vmatmul.bf16.vlgmr.msrb.gmra.mxu1 %v14531_v40  ;;  %v12846_v50 = vld [vmem:[#allocation7 + $0x1e4] sm:$0xf0]  ;;  %v10239_v8 = vor.u32 %v13086_v36, %v10238_v52  ;;  %v9152_v54 = vld [vmem:[#allocation7 + $0xe8] sm:$0xf0]  ;;  %v10054_v36 = vld [vmem:[#allocation7 + $0x7b0] sm:$0xf] }
 0x305   : > { %3919 = vmatpush.bf16.msrb.mxu0 %v9535_v27  ;;  %4003 = vmatpush.bf16.msra.mxu1 %v10563_v34  ;;  %v9278_v27 = vld [vmem:[#allocation7 + $0x1a8] sm:$0xf]  ;;  %v12838_v34 = vld [vmem:[#allocation7 + $0x1ac] sm:$0xf]  ;;  %v3608_v37 = vpop.f32.mrf.mxu3 }
 0x306   : > { %3975 = vmatpush.bf16.msrb.mxu3 %v9539_v20  ;;  %10845 = vmatmul.msk.bf16.vlgmr.msra.gmra.mxu0 %vm621_vm7, %v14518_v51  ;;  %v10302_v20 = vld [vmem:[#allocation7 + $0x9a8] sm:$0xf]  ;;  %v9279_v48 = vor.u32 %v12846_v50, %v9278_v27  ;;  %v3609_v25 = vadd.f32 %v3608_v37, %v3595_v53  ;;  %v10816_v52 = vld [vmem:[#allocation7 + $0xde8] sm:$0xf0] }
 0x307   : > { %10846 = vmatmul.msk.bf16.vlgmr.msra.gmra.mxu3 %vm621_vm7, %v14518_v51  ;;  %v12814_v15 = vld [vmem:[#allocation7 + $0xe4] sm:$0xf0] }
 0x308   : > { %3948 = vmatpush.bf16.msra.mxu2 %v10495_v42  ;;  %v9283_v42 = vor.u32 %v12838_v34, %v9280_v41  ;;  %v10174_v2 = vld [vmem:[#allocation7 + $0x8a8] sm:$0xf]  ;;  %v9155_v41 = vor.u32 %v12806_v19, %v9152_v54  ;;  %v10752_v54 = vld [vmem:[#allocation7 + $0xd68] sm:$0xf0] }
 0x309   : > { %3920 = vmatpush.bf16.msrb.mxu0 %v9471_v49  ;;  %4004 = vmatpush.bf16.msra.mxu1 %v10499_v9  ;;  %v10303_v49 = vor.u32 %v13102_v33, %v10302_v20  ;;  %v10307_v9 = vor.u32 %v13094_v46, %v10304_v47  ;;  %v13070_v38 = vld [vmem:[#allocation7 + $0x8e4] sm:$0xf0]  ;;  %v9088_v46 = vld [vmem:[#allocation7 + $0x68] sm:$0xf0] }
 0x30a   : > { %3976 = vmatpush.bf16.msrb.mxu3 %v9475_v7  ;;  %v9214_v7 = vld [vmem:[#allocation7 + $0x128] sm:$0xf]  ;;  %v10175_v34 = vor.u32 %v13070_v38, %v10174_v2  ;;  %v10055_v2 = vor.u32 %v13039_v55, %v10054_v36  ;;  %v13206_v38 = vld [vmem:[#allocation7 + $0xd2c] sm:$0xf] }
 0x30b   : > { %v9086_v26 = vld [vmem:[#allocation7 + $0x28] sm:$0xf]  ;;  %v12982_v55 = vld [vmem:[#allocation7 + $0x62c] sm:$0xf] }
 0x30c   : > { %3949 = vmatpush.bf16.msra.mxu2 %v10431_v3  ;;  %v9215_v3 = vor.u32 %v12830_v22, %v9214_v7  ;;  %v10110_v33 = vld [vmem:[#allocation7 + $0x828] sm:$0xf]  ;;  %v10048_v7 = vld [vmem:[#allocation7 + $0x7e8] sm:$0xf0] }
 0x30d   : > { %3921 = vmatpush.bf16.msrb.mxu0 %v9407_v13  ;;  %4005 = vmatpush.bf16.msra.mxu1 %v10435_v10  ;;  %v3621_v13 = vadd.f32 %v3620_v44, %v3607_v17  ;;  %v9150_v10 = vld [vmem:[#allocation7 + $0xa8] sm:$0xf]  ;;  %v12790_v44 = vld [vmem:[#allocation7 + $0x2c] sm:$0xf] }
 0x30e   : > { %3977 = vmatpush.bf16.msrb.mxu3 %v9411_v4  ;;  %v3636_v4 = vpop.f32.mrf.mxu1  ;;  %v9151_v20 = vor.u32 %v12814_v15, %v9150_v10  ;;  %v13054_v63 = vld [vmem:[#allocation7 + $0x864] sm:$0xf0]  ;;  %v13222_v22 = vld [vmem:[#allocation7 + $0xdac] sm:$0xf]  ;;  %v9091_v30 = vor.u32 %v12790_v44, %v9088_v46 }
 0x30f   : > { %v14702_v27 = vadd.f32 %v14697_v29, %v3621_v13  ;;  %v10112_v29 = vld [vmem:[#allocation7 + $0x868] sm:$0xf0]  ;;  %v10111_v61 = vor.u32 %v13054_v63, %v10110_v33  ;;  %v10822_v13 = vld [vmem:[#allocation7 + $0xdb0] sm:$0xf]  ;;  %v10819_v15 = vor.u32 %v13222_v22, %v10816_v52  ;;  %v10755_v33 = vor.u32 %v13206_v38, %v10752_v54 }
 0x310   : > { %3950 = vmatpush.bf16.msra.mxu2 %v10367_v21  ;;  %v13062_v21 = vld [vmem:[#allocation7 + $0x8ac] sm:$0xf]  ;;  %v10694_v22 = vld [vmem:[#allocation7 + $0xcb0] sm:$0xf] }
 0x311   : > { %3922 = vmatpush.bf16.msrb.mxu0 %v9343_v6  ;;  %4006 = vmatpush.bf16.msra.mxu1 %v10371_v31  ;;  %v3622_v6 = vpop.f32.mrf.mxu0  ;;  %v12798_v31 = vld [vmem:[#allocation7 + $0x64] sm:$0xf0]  ;;  %v15622_v53 = vmax.f32 %v14702_v27, 0.0  ;;  %v9920_v63 = vld [vmem:[#allocation7 + $0x6e8] sm:$0xf0] }
 0x312   : > { %3978 = vmatpush.bf16.msrb.mxu3 %v9347_v23  ;;  %v10176_v23 = vld [vmem:[#allocation7 + $0x8e8] sm:$0xf0]  ;;  %v3623_v50 = vadd.f32 %v3622_v6, %v3609_v25  ;;  %v9990_v6 = vld [vmem:[#allocation7 + $0x730] sm:$0xf] }
 0x313   : > { %v9984_v25 = vld [vmem:[#allocation7 + $0x768] sm:$0xf0]  ;;  %v13199_v52 = vld [vmem:[#allocation7 + $0xcec] sm:$0xf0] }
 0x314   : > { %3951 = vmatpush.bf16.msra.mxu2 %v10303_v49  ;;  %v14704_v47 = vadd.f32 %v3636_v4, %v3623_v50  ;;  %v13046_v49 = vld [vmem:[#allocation7 + $0x82c] sm:$0xf]  ;;  %v14708_v4 = vld [vmem:[#allocation8] sm:$0xff]  ;;  %v13215_v50 = vld [vmem:[#allocation7 + $0xd6c] sm:$0xf0] }
 0x315   : > { %3923 = vmatpush.bf16.msrb.mxu0 %v9279_v48  ;;  %4007 = vmatpush.bf16.msra.mxu1 %v10307_v9  ;;  %v10179_v48 = vor.u32 %v13062_v21, %v10176_v23  ;;  %v9087_v9 = vor.u32 %v12798_v31, %v9086_v26  ;;  %v1089_v37 = vperm.slane %v14708_v4, 5  ;;  %v13023_v21 = vld [vmem:[#allocation7 + $0x76c] sm:$0xf0]  ;;  %v3676_v26 = vpop.f32.mrf.mxu3  ;;  %v13190_v44 = vld [vmem:[#allocation7 + $0xcac] sm:$0xf] }
 0x316   : > { %3979 = vmatpush.bf16.msrb.mxu3 %v9283_v42  ;;  %v13030_v42 = vld [vmem:[#allocation7 + $0x7ac] sm:$0xf]  ;;  %v15623_v17 = vmax.f32 %v14704_v47, 0.0  ;;  %v3648_v59 = vpop.f32.mrf.mxu1  ;;  %v10758_v23 = vld [vmem:[#allocation7 + $0xd30] sm:$0xf]  ;;  %v3662_v31 = vpop.f32.mrf.mxu2 }
 0x317   : > { %v3649_v46 = vadd.f32 %v3648_v59, %v1089_v37  ;;  %v12911_v38 = vld [vmem:[#allocation7 + $0x3ec] sm:$0xf0] }
 0x318   : > { %3952 = vmatpush.bf16.msra.mxu2 %v10239_v8  ;;  %v10115_v8 = vor.u32 %v13046_v49, %v10112_v29  ;;  %v13862_v10 = vpack.i.bf16 %v15623_v17, %v15622_v53  ;;  %v10688_v49 = vld [vmem:[#allocation7 + $0xce8] sm:$0xf0]  ;;  %v9926_v29 = vld [vmem:[#allocation7 + $0x6b0] sm:$0xf] }
 0x319   : > { %3924 = vmatpush.bf16.msrb.mxu0 %v9215_v3  ;;  %4008 = vmatpush.bf16.msra.mxu1 %v10243_v18  ;;  %v13231_v3 = vld [vmem:[#allocation7 + $0xdec] sm:$0xf0]  ;;  %v13014_v18 = vld [vmem:[#allocation7 + $0x72c] sm:$0xf] }
 0x31a   : > { %3980 = vmatpush.bf16.msrb.mxu3 %v9219_v57  ;;  %v10051_v57 = vor.u32 %v13030_v42, %v10048_v7  ;;  %v10823_v19 = vor.u32 %v13231_v3, %v10822_v13  ;;  %13863 = vrot.lane.b32.xlu0 %v13862_v10, %s14332_s20  ;;  %v13007_v42 = vld [vmem:[#allocation7 + $0x6ec] sm:$0xf0]  ;;  %v3690_v7 = vpop.f32.mrf.mxu0  ;;  %v9856_v13 = vld [vmem:[#allocation7 + $0x668] sm:$0xf0] }
 0x31b   : > { %v13174_v3 = vld [vmem:[#allocation7 + $0xc2c] sm:$0xf]  ;;  %v9862_v10 = vld [vmem:[#allocation7 + $0x630] sm:$0xf] }
 0x31c   : > { %3953 = vmatpush.bf16.msra.mxu2 %v10175_v34  ;;  %v9991_v34 = vor.u32 %v13023_v21, %v9990_v6  ;;  %v9859_v6 = vor.u32 %v12982_v55, %v9856_v13  ;;  %v12903_v21 = vld [vmem:[#allocation7 + $0x3b4] sm:$0xf] }
 0x31d   : > { %3925 = vmatpush.bf16.msrb.mxu0 %v9151_v20  ;;  %4009 = vmatpush.bf16.msra.mxu1 %v10179_v48  ;;  %v9987_v20 = vor.u32 %v13014_v18, %v9984_v25  ;;  %v10759_v48 = vor.u32 %v13215_v50, %v10758_v23  ;;  %v13183_v18 = vld [vmem:[#allocation7 + $0xc6c] sm:$0xf0]  ;;  %v9544_v23 = vld [vmem:[#allocation7 + $0x3f0] sm:$0xf0] }
 0x31e   : > { %3981 = vmatpush.bf16.msrb.mxu3 %v9155_v41  ;;  %v12998_v41 = vld [vmem:[#allocation7 + $0x6ac] sm:$0xf]  ;;  %v3650_v59 = vpop.f32.mrf.mxu1  ;;  %v9542_v25 = vld [vmem:[#allocation7 + $0x3b0] sm:$0xf]  ;;  %v3664_v50 = vpop.f32.mrf.mxu2 }
 0x31f   : > { %v9923_v36 = vor.u32 %v12998_v41, %v9920_v63 }
 0x320   : > { %3954 = vmatpush.bf16.msra.mxu2 %v10111_v61  ;;  %v10691_v61 = vor.u32 %v13190_v44, %v10688_v49  ;;  %v9543_v44 = vor.u32 %v12911_v38, %v9542_v25  ;;  %v3678_v49 = vpop.f32.mrf.mxu3  ;;  %v12871_v38 = vld [vmem:[#allocation7 + $0x2b4] sm:$0xf] }
 0x321   : > { %3926 = vmatpush.bf16.msrb.mxu0 %v9087_v9  ;;  %4010 = vmatpush.bf16.msra.mxu1 %v10115_v8  ;;  %v3663_v9 = vadd.f32 %v3662_v31, %v3649_v46  ;;  %v10624_v8 = vld [vmem:[#allocation7 + $0xc68] sm:$0xf0]  ;;  %v9798_v46 = vld [vmem:[#allocation7 + $0x5b0] sm:$0xf] }
 0x322   : > { %3982 = vmatpush.bf16.msrb.mxu3 %v9091_v30  ;;  %v9927_v30 = vor.u32 %v13007_v42, %v9926_v29  ;;  %v12895_v29 = vld [vmem:[#allocation7 + $0x36c] sm:$0xf0]  ;;  %v3692_v55 = vpop.f32.mrf.mxu0 }
 0x323   : > { %3955 = vmatmul.bf16.vlgmr.msra.gmra.mxu2 %v14538_v5  ;;  %v3677_v54 = vadd.f32 %v3676_v26, %v3663_v9  ;;  %v9478_v26 = vld [vmem:[#allocation7 + $0x330] sm:$0xf]  ;;  %v12887_v9 = vld [vmem:[#allocation7 + $0x334] sm:$0xf] }
 0x324   : > { %4021 = vmatpush.bf16.msrb.mxu2 %v10819_v15  ;;  %3927 = vmatmul.bf16.vlgmr.msrb.gmra.mxu0 %v14544_v11  ;;  %v12991_v15 = vld [vmem:[#allocation7 + $0x66c] sm:$0xf0] }
 0x325   : > { %3989 = vmatpush.bf16.msra.mxu0 %v10051_v57  ;;  %4077 = vmatpush.bf16.msrb.mxu1 %v10823_v19  ;;  %v10695_v57 = vor.u32 %v13199_v52, %v10694_v22  ;;  %v3651_v19 = vadd.f32 %v3650_v59, %v1089_v37  ;;  %v9863_v31 = vor.u32 %v12991_v15, %v9862_v10  ;;  %v12879_v15 = vld [vmem:[#allocation7 + $0x2ec] sm:$0xf0] }
 0x326   : > { %4045 = vmatpush.bf16.msra.mxu3 %v10055_v2  ;;  %4011 = vmatmul.bf16.vlgmr.msra.gmra.mxu1 %v14538_v5  ;;  %v10630_v2 = vld [vmem:[#allocation7 + $0xc30] sm:$0xf]  ;;  %v9547_v37 = vor.u32 %v12903_v21, %v9544_v23  ;;  %v3691_v42 = vadd.f32 %v3690_v7, %v3677_v54  ;;  %v9664_v21 = vld [vmem:[#allocation7 + $0x4e8] sm:$0xf0] }
 0x327   : > { %3983 = vmatmul.bf16.vlgmr.msrb.gmra.mxu3 %v14544_v11  ;;  %v3665_v41 = vadd.f32 %v3664_v50, %v3651_v19  ;;  %v10631_v63 = vor.u32 %v13183_v18, %v10630_v2  ;;  %v9414_v7 = vld [vmem:[#allocation7 + $0x2b0] sm:$0xf]  ;;  %v9416_v19 = vld [vmem:[#allocation7 + $0x2f0] sm:$0xf0] }
 0x328   : > { %4022 = vmatpush.bf16.msrb.mxu2 %v10755_v33  ;;  %v12966_v33 = vld [vmem:[#allocation7 + $0x5ac] sm:$0xf]  ;;  %v14724_v2 = vmax.f32 %v3691_v42, 0.0  ;;  %v9415_v23 = vor.u32 %v12879_v15, %v9414_v7 }
 0x329   : > { %3990 = vmatpush.bf16.msra.mxu0 %v9987_v20  ;;  %4078 = vmatpush.bf16.msrb.mxu1 %v10759_v48  ;;  %v10627_v20 = vor.u32 %v13174_v3, %v10624_v8  ;;  %v12975_v48 = vld [vmem:[#allocation7 + $0x5ec] sm:$0xf0]  ;;  %v3679_v22 = vadd.f32 %v3678_v49, %v3665_v41  ;;  %v9479_v3 = vor.u32 %v12895_v29, %v9478_v26 }
 0x32a   : > { %4046 = vmatpush.bf16.msra.mxu3 %v9991_v34  ;;  %v9792_v34 = vld [vmem:[#allocation7 + $0x5e8] sm:$0xf0]  ;;  %v9799_v59 = vor.u32 %v12975_v48, %v9798_v46  ;;  %v9734_v8 = vld [vmem:[#allocation7 + $0x530] sm:$0xf]  ;;  %v9352_v46 = vld [vmem:[#allocation7 + $0x270] sm:$0xf0] }
 0x32b   : > { %v9795_v52 = vor.u32 %v12966_v33, %v9792_v34  ;;  %v3693_v13 = vadd.f32 %v3692_v55, %v3679_v22  ;;  %v9419_v33 = vor.u32 %v12871_v38, %v9416_v19  ;;  %v9350_v34 = vld [vmem:[#allocation7 + $0x230] sm:$0xf]  ;;  %v12918_v48 = vld [vmem:[#allocation7 + $0x42c] sm:$0xf] }
 0x32c   : > { %4023 = vmatpush.bf16.msrb.mxu2 %v10691_v61  ;;  %v12950_v61 = vld [vmem:[#allocation7 + $0x52c] sm:$0xf]  ;;  %v12863_v41 = vld [vmem:[#allocation7 + $0x26c] sm:$0xf0] }
 0x32d   : > { %3991 = vmatpush.bf16.msra.mxu0 %v9923_v36  ;;  %4079 = vmatpush.bf16.msrb.mxu1 %v10695_v57  ;;  %v9480_v36 = vld [vmem:[#allocation7 + $0x370] sm:$0xf0]  ;;  %v12959_v57 = vld [vmem:[#allocation7 + $0x56c] sm:$0xf0]  ;;  %v14726_v18 = vmax.f32 %v3693_v13, 0.0  ;;  %v9351_v42 = vor.u32 %v12863_v41, %v9350_v34  ;;  %v14736_v41 = vpop.f32.mrf.mxu3 }
 0x32e   : > { %4047 = vmatpush.bf16.msra.mxu3 %v9927_v30  ;;  %v9728_v30 = vld [vmem:[#allocation7 + $0x568] sm:$0xf0]  ;;  %v9483_v10 = vor.u32 %v12887_v9, %v9480_v36  ;;  %v9735_v54 = vor.u32 %v12959_v57, %v9734_v8  ;;  %v9606_v26 = vld [vmem:[#allocation7 + $0x430] sm:$0xf]  ;;  %v12839_v13 = vld [vmem:[#allocation7 + $0x1b4] sm:$0xf] }
 0x32f   : > { %v9731_v25 = vor.u32 %v12950_v61, %v9728_v30  ;;  %v13867_v50 = vpack.i.bf16 %v14726_v18, %v14724_v2  ;;  %v12927_v29 = vld [vmem:[#allocation7 + $0x46c] sm:$0xf0]  ;;  %v10568_v61 = vld [vmem:[#allocation7 + $0xbf0] sm:$0xf0]  ;;  %v1090_v8 = vperm.slane %v14708_v4, 6 }
 0x330   : > { %4024 = vmatpush.bf16.msrb.mxu2 %v10627_v20  ;;  %v9670_v20 = vld [vmem:[#allocation7 + $0x4b0] sm:$0xf] }
 0x331   : > { %3992 = vmatpush.bf16.msra.mxu0 %v9859_v6  ;;  %4080 = vmatpush.bf16.msrb.mxu1 %v10631_v63  ;;  %v12934_v6 = vld [vmem:[#allocation7 + $0x4ac] sm:$0xf]  ;;  %v9286_v22 = vld [vmem:[#allocation7 + $0x1b0] sm:$0xf]  ;;  %v3704_v57 = vpop.f32.mrf.mxu0 }
 0x332   : > { %4048 = vmatpush.bf16.msra.mxu3 %v9863_v31  ;;  %v12943_v31 = vld [vmem:[#allocation7 + $0x4ec] sm:$0xf0]  ;;  %v9667_v63 = vor.u32 %v12934_v6, %v9664_v21  ;;  %13868 = vrot.lane.b32.xlu1 %v13867_v50, %s14332_s20  ;;  %v10504_v50 = vld [vmem:[#allocation7 + $0xb70] sm:$0xf0] }
 0x333   : > { %10847 = vmatmul.msk.bf16.vlgmr.msrb.gmra.mxu2 %vm621_vm7, %v14518_v51  ;;  %v9671_v49 = vor.u32 %v12943_v31, %v9670_v20  ;;  %v13167_v9 = vld [vmem:[#allocation7 + $0xbec] sm:$0xf0]  ;;  %v3718_v20 = vpop.f32.mrf.mxu1  ;;  %v12823_v31 = vld [vmem:[#allocation7 + $0x134] sm:$0xf] }
 0x334   : > { %4031 = vmatpush.bf16.msra.mxu2 %v9543_v44  ;;  %v12855_v44 = vld [vmem:[#allocation7 + $0x234] sm:$0xf]  ;;  %v12847_v55 = vld [vmem:[#allocation7 + $0x1ec] sm:$0xf0] }
 0x335   : > { %4087 = vmatpush.bf16.msra.mxu1 %v9547_v37  ;;  %3993 = vmatpush.bf16.msra.mxu0 %v9795_v52  ;;  %v9600_v37 = vld [vmem:[#allocation7 + $0x468] sm:$0xf0]  ;;  %v10566_v52 = vld [vmem:[#allocation7 + $0xbb0] sm:$0xf]  ;;  %v9355_v36 = vor.u32 %v12855_v44, %v9352_v46  ;;  %v9287_v15 = vor.u32 %v12847_v55, %v9286_v22  ;;  %v10440_v22 = vld [vmem:[#allocation7 + $0xaf0] sm:$0xf0] }
 0x336   : > { %4049 = vmatpush.bf16.msra.mxu3 %v9799_v59  ;;  %10848 = vmatmul.msk.bf16.vlgmr.msrb.gmra.mxu1 %vm621_vm7, %v14518_v51  ;;  %v13159_v59 = vld [vmem:[#allocation7 + $0xbb4] sm:$0xf]  ;;  %v9603_v30 = vor.u32 %v12918_v48, %v9600_v37  ;;  %v10567_v7 = vor.u32 %v13167_v9, %v10566_v52  ;;  %v9222_v38 = vld [vmem:[#allocation7 + $0x130] sm:$0xf]  ;;  %v3705_v37 = vadd.f32 %v3704_v57, %v1090_v8  ;;  %v3732_v52 = vpop.f32.mrf.mxu2 }
 0x337   : > { %v10502_v19 = vld [vmem:[#allocation7 + $0xb30] sm:$0xf]  ;;  %v12807_v9 = vld [vmem:[#allocation7 + $0xb4] sm:$0xf] }
 0x338   : > { %4032 = vmatpush.bf16.msra.mxu2 %v9479_v3  ;;  %v9288_v3 = vld [vmem:[#allocation7 + $0x1f0] sm:$0xf0]  ;;  %v12831_v21 = vld [vmem:[#allocation7 + $0x16c] sm:$0xf0] }
 0x339   : > { %4088 = vmatpush.bf16.msra.mxu1 %v9483_v10  ;;  %3994 = vmatpush.bf16.msra.mxu0 %v9731_v25  ;;  %v9607_v10 = vor.u32 %v12927_v29, %v9606_v26  ;;  %v10571_v25 = vor.u32 %v13159_v59, %v10568_v61  ;;  %v9291_v6 = vor.u32 %v12839_v13, %v9288_v3  ;;  %v9158_v46 = vld [vmem:[#allocation7 + $0xb0] sm:$0xf]  ;;  %v3706_v55 = vpop.f32.mrf.mxu0 }
 0x33a   : > { %4050 = vmatpush.bf16.msra.mxu3 %v9735_v54  ;;  %v13151_v54 = vld [vmem:[#allocation7 + $0xb6c] sm:$0xf0] }
 0x33b   : > { %v10503_v34 = vor.u32 %v13151_v54, %v10502_v19  ;;  %v10438_v48 = vld [vmem:[#allocation7 + $0xab0] sm:$0xf]  ;;  %v13111_v19 = vld [vmem:[#allocation7 + $0xa34] sm:$0xf] }
 0x33c   : > { %4033 = vmatpush.bf16.msra.mxu2 %v9415_v23  ;;  %v13143_v23 = vld [vmem:[#allocation7 + $0xb34] sm:$0xf]  ;;  %v12815_v29 = vld [vmem:[#allocation7 + $0xec] sm:$0xf0] }
 0x33d   : > { %4089 = vmatpush.bf16.msra.mxu1 %v9419_v33  ;;  %3995 = vmatpush.bf16.msra.mxu0 %v9667_v63  ;;  %v9224_v33 = vld [vmem:[#allocation7 + $0x170] sm:$0xf0]  ;;  %v9223_v63 = vor.u32 %v12831_v21, %v9222_v38  ;;  %v10507_v44 = vor.u32 %v13143_v23, %v10504_v50  ;;  %v9094_v61 = vld [vmem:[#allocation7 + $0x30] sm:$0xf] }
 0x33e   : > { %4051 = vmatpush.bf16.msra.mxu3 %v9671_v49  ;;  %v13135_v49 = vld [vmem:[#allocation7 + $0xaec] sm:$0xf0]  ;;  %v9227_v26 = vor.u32 %v12823_v31, %v9224_v33  ;;  %v12791_v38 = vld [vmem:[#allocation7 + $0x34] sm:$0xf]  ;;  %v10062_v33 = vld [vmem:[#allocation7 + $0x7b8] sm:$0xf] }
 0x33f   : > { %v10439_v59 = vor.u32 %v13135_v49, %v10438_v48  ;;  %v12799_v3 = vld [vmem:[#allocation7 + $0x6c] sm:$0xf0]  ;;  %v10376_v54 = vld [vmem:[#allocation7 + $0xa70] sm:$0xf0] }
 0x340   : > { %4034 = vmatpush.bf16.msra.mxu2 %v9351_v42  ;;  %v13127_v42 = vld [vmem:[#allocation7 + $0xab4] sm:$0xf]  ;;  %v10374_v57 = vld [vmem:[#allocation7 + $0xa30] sm:$0xf] }
 0x341   : > { %4090 = vmatpush.bf16.msra.mxu1 %v9355_v36  ;;  %3996 = vmatpush.bf16.msra.mxu0 %v9603_v30  ;;  %v9160_v36 = vld [vmem:[#allocation7 + $0xf0] sm:$0xf0]  ;;  %v9159_v30 = vor.u32 %v12815_v29, %v9158_v46  ;;  %v10443_v13 = vor.u32 %v13127_v42, %v10440_v22  ;;  %v10379_v46 = vor.u32 %v13111_v19, %v10376_v54  ;;  %v13103_v48 = vld [vmem:[#allocation7 + $0x9ec] sm:$0xf0]  ;;  %v3748_v42 = vpop.f32.mrf.mxu3  ;;  %v3734_v22 = vpop.f32.mrf.mxu2 }
 0x342   : > { %4052 = vmatpush.bf16.msra.mxu3 %v9607_v10  ;;  %v13119_v10 = vld [vmem:[#allocation7 + $0xa6c] sm:$0xf0]  ;;  %v13031_v21 = vld [vmem:[#allocation7 + $0x7b4] sm:$0xf] }
 0x343   : > { %v10056_v23 = vld [vmem:[#allocation7 + $0x7f0] sm:$0xf0]  ;;  %v10375_v31 = vor.u32 %v13119_v10, %v10374_v57  ;;  %v13087_v57 = vld [vmem:[#allocation7 + $0x96c] sm:$0xf0] }
 0x344   : > { %4035 = vmatpush.bf16.msra.mxu2 %v9287_v15  ;;  %3997 = vmatmul.bf16.vlgmr.msra.gmra.mxu0 %v14531_v40  ;;  %v3707_v15 = vadd.f32 %v3706_v55, %v1090_v8  ;;  %v10312_v29 = vld [vmem:[#allocation7 + $0x9f0] sm:$0xf0]  ;;  %v9998_v55 = vld [vmem:[#allocation7 + $0x738] sm:$0xf] }
 0x345   : > { %4059 = vmatpush.bf16.msrb.mxu0 %v10567_v7  ;;  %4091 = vmatpush.bf16.msra.mxu1 %v9291_v6  ;;  %v3719_v7 = vadd.f32 %v3718_v20, %v3705_v37  ;;  %v9096_v6 = vld [vmem:[#allocation7 + $0x70] sm:$0xf0]  ;;  %v10310_v20 = vld [vmem:[#allocation7 + $0x9b0] sm:$0xf]  ;;  %v10059_v37 = vor.u32 %v13031_v21, %v10056_v23  ;;  %v13849_v21 = vpop.permute.xlu1 %13848 }
 0x346   : > { %4115 = vmatpush.bf16.msrb.mxu3 %v10571_v25  ;;  %v9163_v25 = vor.u32 %v12807_v9, %v9160_v36  ;;  %v9099_v49 = vor.u32 %v12791_v38, %v9096_v6  ;;  %v13015_v9 = vld [vmem:[#allocation7 + $0x734] sm:$0xf] }
 0x347   : > { %4053 = vmatmul.bf16.vlgmr.msra.gmra.mxu3 %v14531_v40  ;;  %v3733_v50 = vadd.f32 %v3732_v52, %v3719_v7  ;;  %v9992_v36 = vld [vmem:[#allocation7 + $0x770] sm:$0xf0] }
 0x348   : > { %4036 = vmatpush.bf16.msra.mxu2 %v9223_v63  ;;  %v3720_v63 = vpop.f32.mrf.mxu1  ;;  %v10248_v38 = vld [vmem:[#allocation7 + $0x970] sm:$0xf0] }
 0x349   : > { %4060 = vmatpush.bf16.msrb.mxu0 %v10503_v34  ;;  %4092 = vmatpush.bf16.msra.mxu1 %v9227_v26  ;;  %v13040_v34 = vld [vmem:[#allocation7 + $0x7f4] sm:$0xf0]  ;;  %v3721_v8 = vadd.f32 %v3720_v63, %v3707_v15  ;;  %v13095_v26 = vld [vmem:[#allocation7 + $0x9b4] sm:$0xf]  ;;  %v9995_v15 = vor.u32 %v13015_v9, %v9992_v36  ;;  %v13850_v63 = vunpack.i.l.bf16 %v13849_v21 }
 0x34a   : > { %4116 = vmatpush.bf16.msrb.mxu3 %v10507_v44  ;;  %v9095_v44 = vor.u32 %v12799_v3, %v9094_v61  ;;  %v10063_v52 = vor.u32 %v13040_v34, %v10062_v33  ;;  %v10311_v61 = vor.u32 %v13103_v48, %v10310_v20  ;;  %v10246_v3 = vld [vmem:[#allocation7 + $0x930] sm:$0xf]  ;;  %v10315_v10 = vor.u32 %v13095_v26, %v10312_v29  ;;  %v12999_v6 = vld [vmem:[#allocation7 + $0x6b4] sm:$0xf]  ;;  %v13008_v33 = vld [vmem:[#allocation7 + $0x6f4] sm:$0xf0]  ;;  %v3760_v29 = vpop.f32.mrf.mxu3 }
 0x34b   : > { %v10247_v54 = vor.u32 %v13087_v57, %v10246_v3  ;;  %v13851_v34 = vunpack.i.h.bf16 %v13849_v21  ;;  %v13071_v20 = vld [vmem:[#allocation7 + $0x8ec] sm:$0xf0]  ;;  %v1091_v26 = vperm.slane %v14708_v4, 7  ;;  %v14757_v36 = vmax.f32 %v4271_v56, %v13850_v63  ;;  %v13047_v57 = vld [vmem:[#allocation7 + $0x834] sm:$0xf] }
 0x34c   : > { %4037 = vmatpush.bf16.msra.mxu2 %v9159_v30  ;;  %v3735_v30 = vadd.f32 %v3734_v22, %v3721_v8  ;;  %v12983_v22 = vld [vmem:[#allocation7 + $0x634] sm:$0xf]  ;;  %v13055_v3 = vld [vmem:[#allocation7 + $0x86c] sm:$0xf0]  ;;  %v13232_v56 = vld [vmem:[#allocation7 + $0xdf4] sm:$0xf0] }
 0x34d   : > { %4061 = vmatpush.bf16.msrb.mxu0 %v10439_v59  ;;  %4093 = vmatpush.bf16.msra.mxu1 %v9163_v25  ;;  %v3747_v59 = vadd.f32 %v14736_v41, %v3733_v50  ;;  %v13079_v25 = vld [vmem:[#allocation7 + $0x934] sm:$0xf]  ;;  %v14753_v9 = vmax.f32 %v4272_v58, %v13851_v34  ;;  %v3761_v63 = vadd.f32 %v3760_v29, %v1091_v26 }
 0x34e   : > { %4117 = vmatpush.bf16.msrb.mxu3 %v10443_v13  ;;  %v13024_v13 = vld [vmem:[#allocation7 + $0x774] sm:$0xf0]  ;;  %v3749_v7 = vadd.f32 %v3748_v42, %v3735_v30  ;;  %v9928_v41 = vld [vmem:[#allocation7 + $0x6f0] sm:$0xf0] }
 0x34f   : > { %v9999_v19 = vor.u32 %v13024_v13, %v9998_v55  ;;  %v14741_v23 = vmax.f32 %v3747_v59, 0.0  ;;  %v9931_v48 = vor.u32 %v12999_v6, %v9928_v41  ;;  %v9870_v59 = vld [vmem:[#allocation7 + $0x638] sm:$0xf]  ;;  %v13887_v41 = vpack.i.bf16 %v14753_v9, %v14757_v36 }
 0x350   : > { %4038 = vmatpush.bf16.msra.mxu2 %v9095_v44  ;;  %v14743_v50 = vmax.f32 %v3749_v7, 0.0  ;;  %v10251_v44 = vor.u32 %v13079_v25, %v10248_v38  ;;  %v12992_v30 = vld [vmem:[#allocation7 + $0x674] sm:$0xf0]  ;;  %v13223_v25 = vld [vmem:[#allocation7 + $0xdb4] sm:$0xf]  ;;  %v3788_v21 = vpop.f32.mrf.mxu1 }
 0x351   : > { %4062 = vmatpush.bf16.msrb.mxu0 %v10375_v31  ;;  %4094 = vmatpush.bf16.msra.mxu1 %v9099_v49  ;;  %v9934_v31 = vld [vmem:[#allocation7 + $0x6b8] sm:$0xf]  ;;  %v13063_v49 = vld [vmem:[#allocation7 + $0x8b4] sm:$0xf]  ;;  %v9871_v58 = vor.u32 %v12992_v30, %v9870_v59  ;;  %v10827_v34 = vor.u32 %v13223_v25, %v10824_v45 }
 0x352   : > { %4118 = vmatpush.bf16.msrb.mxu3 %v10379_v46  ;;  %v10182_v46 = vld [vmem:[#allocation7 + $0x8b0] sm:$0xf]  ;;  %v13872_v8 = vpack.i.bf16 %v14743_v50, %v14741_v23  ;;  %v9935_v42 = vor.u32 %v13008_v33, %v9934_v31  ;;  %v9800_v38 = vld [vmem:[#allocation7 + $0x5f0] sm:$0xf0]  ;;  %v12976_v6 = vld [vmem:[#allocation7 + $0x5f4] sm:$0xf0]  ;;  %v3774_v31 = vpop.f32.mrf.mxu0 }
 0x353   : > { %4039 = vmatmul.bf16.vlgmr.msra.gmra.mxu2 %v14544_v11  ;;  %v10183_v55 = vor.u32 %v13071_v20, %v10182_v46  ;;  %v10831_v46 = vor.u32 %v13232_v56, %v10830_v39  ;;  %v12951_v20 = vld [vmem:[#allocation7 + $0x534] sm:$0xf]  ;;  %v9742_v59 = vld [vmem:[#allocation7 + $0x538] sm:$0xf] }
 0x354   : > { %4101 = vmatpush.bf16.msrb.mxu2 %v10059_v37  ;;  %4095 = vmatmul.bf16.vlgmr.msra.gmra.mxu1 %v14544_v11  ;;  %v10184_v37 = vld [vmem:[#allocation7 + $0x8f0] sm:$0xf0]  ;;  %v12960_v30 = vld [vmem:[#allocation7 + $0x574] sm:$0xf0] }
 0x355   : > { %4157 = vmatpush.bf16.msrb.mxu1 %v10063_v52  ;;  %4063 = vmatpush.bf16.msrb.mxu0 %v10311_v61  ;;  %v9864_v52 = vld [vmem:[#allocation7 + $0x670] sm:$0xf0]  ;;  %v10118_v61 = vld [vmem:[#allocation7 + $0x830] sm:$0xf]  ;;  %v10187_v13 = vor.u32 %v13063_v49, %v10184_v37  ;;  %v3802_v49 = vpop.f32.mrf.mxu2  ;;  %v10702_v45 = vld [vmem:[#allocation7 + $0xcb8] sm:$0xf] }
 0x356   : > { %4119 = vmatpush.bf16.msrb.mxu3 %v10315_v10  ;;  %13873 = vrot.lane.b32.xlu2 %v13872_v8, %s14332_s20  ;;  %v10120_v10 = vld [vmem:[#allocation7 + $0x870] sm:$0xf0]  ;;  %v9867_v7 = vor.u32 %v12983_v22, %v9864_v52  ;;  %v10766_v22 = vld [vmem:[#allocation7 + $0xd38] sm:$0xf] }
 0x357   : > { %v10123_v33 = vor.u32 %v13047_v57, %v10120_v10  ;;  %v10760_v8 = vld [vmem:[#allocation7 + $0xd70] sm:$0xf0]  ;;  %v13216_v52 = vld [vmem:[#allocation7 + $0xd74] sm:$0xf0] }
 0x358   : > { %4102 = vmatpush.bf16.msrb.mxu2 %v9995_v15  ;;  %v12967_v15 = vld [vmem:[#allocation7 + $0x5b4] sm:$0xf]  ;;  %v9678_v56 = vld [vmem:[#allocation7 + $0x4b8] sm:$0xf]  ;;  %v3790_v4 = vpop.f32.mrf.mxu1 }
 0x359   : > { %4158 = vmatpush.bf16.msrb.mxu1 %v9999_v19  ;;  %4064 = vmatpush.bf16.msrb.mxu0 %v10247_v54  ;;  %v10119_v19 = vor.u32 %v13055_v3, %v10118_v61  ;;  %v9806_v54 = vld [vmem:[#allocation7 + $0x5b8] sm:$0xf]  ;;  %v3762_v61 = vpop.f32.mrf.mxu3  ;;  %v10767_v3 = vor.u32 %v13216_v52, %v10766_v22  ;;  %v12935_v57 = vld [vmem:[#allocation7 + $0x4b4] sm:$0xf] }
 0x35a   : > { %4120 = vmatpush.bf16.msrb.mxu3 %v10251_v44  ;;  %v9803_v44 = vor.u32 %v12967_v15, %v9800_v38  ;;  %v9807_v37 = vor.u32 %v12976_v6, %v9806_v54  ;;  %v13191_v10 = vld [vmem:[#allocation7 + $0xcb4] sm:$0xf]  ;;  %v9743_v15 = vor.u32 %v12960_v30, %v9742_v59  ;;  %v3763_v38 = vadd.f32 %v3762_v61, %v1091_v26  ;;  %v3776_v54 = vpop.f32.mrf.mxu0  ;;  %v9550_v22 = vld [vmem:[#allocation7 + $0x3b8] sm:$0xf] }
 0x35b   : > { %v9672_v25 = vld [vmem:[#allocation7 + $0x4f0] sm:$0xf0]  ;;  %v12912_v52 = vld [vmem:[#allocation7 + $0x3f4] sm:$0xf0] }
 0x35c   : > { %4103 = vmatpush.bf16.msrb.mxu2 %v9931_v48  ;;  %v13207_v48 = vld [vmem:[#allocation7 + $0xd34] sm:$0xf]  ;;  %v13168_v61 = vld [vmem:[#allocation7 + $0xbf4] sm:$0xf0] }
 0x35d   : > { %4159 = vmatpush.bf16.msrb.mxu1 %v9935_v42  ;;  %4065 = vmatpush.bf16.msrb.mxu0 %v10183_v55  ;;  %v9736_v42 = vld [vmem:[#allocation7 + $0x570] sm:$0xf0]  ;;  %v3775_v55 = vadd.f32 %v3774_v31, %v3761_v63  ;;  %v10763_v29 = vor.u32 %v13207_v48, %v10760_v8  ;;  %v10638_v48 = vld [vmem:[#allocation7 + $0xc38] sm:$0xf]  ;;  %v3804_v59 = vpop.f32.mrf.mxu2 }
 0x35e   : > { %4121 = vmatpush.bf16.msrb.mxu3 %v10187_v13  ;;  %13888 = vrot.lane.b32.xlu2 %v13887_v41, %s14333_s21  ;;  %v9739_v13 = vor.u32 %v12951_v20, %v9736_v42  ;;  %v12919_v41 = vld [vmem:[#allocation7 + $0x434] sm:$0xf]  ;;  %v9614_v20 = vld [vmem:[#allocation7 + $0x438] sm:$0xf] }
 0x35f   : > { %v3789_v39 = vadd.f32 %v3788_v21, %v3775_v55  ;;  %v9608_v31 = vld [vmem:[#allocation7 + $0x470] sm:$0xf0]  ;;  %v12928_v21 = vld [vmem:[#allocation7 + $0x474] sm:$0xf0] }
 0x360   : > { %4104 = vmatpush.bf16.msrb.mxu2 %v9867_v7  ;;  %v10696_v7 = vld [vmem:[#allocation7 + $0xcf0] sm:$0xf0]  ;;  %v13184_v8 = vld [vmem:[#allocation7 + $0xc74] sm:$0xf0] }
 0x361   : > { %4160 = vmatpush.bf16.msrb.mxu1 %v9871_v58  ;;  %4066 = vmatpush.bf16.msrb.mxu0 %v10119_v19  ;;  %v13200_v58 = vld [vmem:[#allocation7 + $0xcf4] sm:$0xf0]  ;;  %v10699_v6 = vor.u32 %v13191_v10, %v10696_v7  ;;  %v10639_v10 = vor.u32 %v13184_v8, %v10638_v48  ;;  %v13160_v7 = vld [vmem:[#allocation7 + $0xbbc] sm:$0xf] }
 0x362   : > { %4122 = vmatpush.bf16.msrb.mxu3 %v10123_v33  ;;  %v12944_v19 = vld [vmem:[#allocation7 + $0x4f4] sm:$0xf0]  ;;  %v3777_v33 = vadd.f32 %v3776_v54, %v3763_v38  ;;  %v10703_v63 = vor.u32 %v13200_v58, %v10702_v45  ;;  %v13844_v58 = vpop.permute.xlu2 %13843 }
 0x363   : > { %v9679_v26 = vor.u32 %v12944_v19, %v9678_v56  ;;  %v10574_v55 = vld [vmem:[#allocation7 + $0xbb8] sm:$0xf] }
 0x364   : > { %4105 = vmatpush.bf16.msrb.mxu2 %v9803_v44  ;;  %4067 = vmatmul.bf16.vlgmr.msrb.gmra.mxu0 %v14538_v5  ;;  %v13175_v44 = vld [vmem:[#allocation7 + $0xc34] sm:$0xf]  ;;  %v3791_v42 = vadd.f32 %v3790_v4, %v3777_v33  ;;  %v9486_v45 = vld [vmem:[#allocation7 + $0x338] sm:$0xf]  ;;  %v10575_v56 = vor.u32 %v13168_v61, %v10574_v55  ;;  %v12872_v55 = vld [vmem:[#allocation7 + $0x2bc] sm:$0xf] }
 0x365   : > { %4133 = vmatpush.bf16.msra.mxu0 %v10827_v34  ;;  %4161 = vmatpush.bf16.msrb.mxu1 %v9807_v37  ;;  %v9675_v34 = vor.u32 %v12935_v57, %v9672_v25  ;;  %v3803_v37 = vadd.f32 %v3802_v49, %v3789_v39  ;;  %v9611_v57 = vor.u32 %v12919_v41, %v9608_v31  ;;  %v12896_v54 = vld [vmem:[#allocation7 + $0x374] sm:$0xf0]  ;;  %v12888_v41 = vld [vmem:[#allocation7 + $0x33c] sm:$0xf] }
 0x366   : > { %4189 = vmatpush.bf16.msra.mxu3 %v10831_v46  ;;  %v10632_v46 = vld [vmem:[#allocation7 + $0xc70] sm:$0xf0]  ;;  %v9615_v25 = vor.u32 %v12928_v21, %v9614_v20  ;;  %v9551_v49 = vor.u32 %v12912_v52, %v9550_v22  ;;  %v9488_v31 = vld [vmem:[#allocation7 + $0x378] sm:$0xf0]  ;;  %v13846_v20 = vunpack.i.h.bf16 %v13844_v58  ;;  %v9487_v4 = vor.u32 %v12896_v54, %v9486_v45  ;;  %v9422_v8 = vld [vmem:[#allocation7 + $0x2b8] sm:$0xf] }
 0x367   : > { %4123 = vmatmul.bf16.vlgmr.msrb.gmra.mxu3 %v14538_v5  ;;  %v10635_v30 = vor.u32 %v13175_v44, %v10632_v46  ;;  %v14768_v38 = vmax.f32 %v3803_v37, 0.0  ;;  %v10512_v44 = vld [vmem:[#allocation7 + $0xb78] sm:$0xf0]  ;;  %v9491_v48 = vor.u32 %v12888_v41, %v9488_v31  ;;  %v12880_v37 = vld [vmem:[#allocation7 + $0x2f4] sm:$0xf0] }
 0x368   : > { %4106 = vmatpush.bf16.msrb.mxu2 %v9739_v13  ;;  %v9552_v13 = vld [vmem:[#allocation7 + $0x3f8] sm:$0xf0]  ;;  %v13136_v52 = vld [vmem:[#allocation7 + $0xaf4] sm:$0xf0] }
 0x369   : > { %4134 = vmatpush.bf16.msra.mxu0 %v10763_v29  ;;  %4162 = vmatpush.bf16.msrb.mxu1 %v9743_v15  ;;  %v12904_v29 = vld [vmem:[#allocation7 + $0x3bc] sm:$0xf]  ;;  %v10318_v41 = vld [vmem:[#allocation7 + $0x9b8] sm:$0xf] }
 0x36a   : > { %4190 = vmatpush.bf16.msra.mxu3 %v10767_v3  ;;  %v3805_v3 = vadd.f32 %v3804_v59, %v3791_v42  ;;  %v10576_v15 = vld [vmem:[#allocation7 + $0xbf8] sm:$0xf0]  ;;  %v9555_v19 = vor.u32 %v12904_v29, %v9552_v13  ;;  %v10446_v42 = vld [vmem:[#allocation7 + $0xab8] sm:$0xf]  ;;  %v14779_v29 = vmax.f32 %v4256_v12, %v13846_v20  ;;  %v9423_v13 = vor.u32 %v12880_v37, %v9422_v8 }
 0x36b   : > { %v10579_v33 = vor.u32 %v13160_v7, %v10576_v15  ;;  %v9424_v59 = vld [vmem:[#allocation7 + $0x2f8] sm:$0xf0]  ;;  %v9358_v7 = vld [vmem:[#allocation7 + $0x238] sm:$0xf] }
 0x36c   : > { %4107 = vmatpush.bf16.msrb.mxu2 %v9675_v34  ;;  %v14770_v39 = vmax.f32 %v3805_v3, 0.0  ;;  %v13152_v34 = vld [vmem:[#allocation7 + $0xb74] sm:$0xf0]  ;;  %v10448_v61 = vld [vmem:[#allocation7 + $0xaf8] sm:$0xf0] }
 0x36d   : > { %4135 = vmatpush.bf16.msra.mxu0 %v10699_v6  ;;  %4163 = vmatpush.bf16.msrb.mxu1 %v9679_v26  ;;  %v10510_v6 = vld [vmem:[#allocation7 + $0xb38] sm:$0xf]  ;;  %v13845_v26 = vunpack.i.l.bf16 %v13844_v58  ;;  %v12856_v45 = vld [vmem:[#allocation7 + $0x23c] sm:$0xf] }
 0x36e   : > { %4191 = vmatpush.bf16.msra.mxu3 %v10703_v63  ;;  %v13144_v63 = vld [vmem:[#allocation7 + $0xb3c] sm:$0xf]  ;;  %v13877_v46 = vpack.i.bf16 %v14770_v39, %v14768_v38  ;;  %v10511_v21 = vor.u32 %v13152_v34, %v10510_v6  ;;  %v12864_v15 = vld [vmem:[#allocation7 + $0x274] sm:$0xf0] }
 0x36f   : > { %v10515_v22 = vor.u32 %v13144_v63, %v10512_v44  ;;  %v14783_v3 = vmax.f32 %v4255_v16, %v13845_v26  ;;  %v13120_v12 = vld [vmem:[#allocation7 + $0xa74] sm:$0xf0]  ;;  %v9360_v58 = vld [vmem:[#allocation7 + $0x278] sm:$0xf0]  ;;  %v14794_v26 = vpop.f32.mrf.mxu3 }
 0x370   : > { %4108 = vmatpush.bf16.msrb.mxu2 %v9611_v57  ;;  %13878 = vrot.lane.b32.xlu0 %v13877_v46, %s14332_s20  ;;  %v10447_v57 = vor.u32 %v13136_v52, %v10446_v42  ;;  %v10384_v16 = vld [vmem:[#allocation7 + $0xa78] sm:$0xf0]  ;;  %v9363_v54 = vor.u32 %v12856_v45, %v9360_v58  ;;  %v12848_v34 = vld [vmem:[#allocation7 + $0x1f4] sm:$0xf0] }
 0x371   : > { %4136 = vmatpush.bf16.msra.mxu0 %v10635_v30  ;;  %4164 = vmatpush.bf16.msrb.mxu1 %v9615_v25  ;;  %v13128_v30 = vld [vmem:[#allocation7 + $0xabc] sm:$0xf]  ;;  %v10382_v25 = vld [vmem:[#allocation7 + $0xa38] sm:$0xf]  ;;  %v13882_v6 = vpack.i.bf16 %v14779_v29, %v14783_v3  ;;  %v10387_v31 = vor.u32 %v13112_v62, %v10384_v16  ;;  %v14796_v8 = vpop.f32.mrf.mxu0 }
 0x372   : > { %4192 = vmatpush.bf16.msra.mxu3 %v10639_v10  ;;  %v9427_v10 = vor.u32 %v12872_v55, %v9424_v59  ;;  %v10451_v1 = vor.u32 %v13128_v30, %v10448_v61  ;;  %v13104_v63 = vld [vmem:[#allocation7 + $0x9f4] sm:$0xf0]  ;;  %v12840_v44 = vld [vmem:[#allocation7 + $0x1bc] sm:$0xf] }
 0x373   : > { %4109 = vmatmul.bf16.vlgmr.msrb.gmra.mxu2 %v14531_v40  ;;  %v9296_v46 = vld [vmem:[#allocation7 + $0x1f8] sm:$0xf0]  ;;  %v10319_v37 = vor.u32 %v13104_v63, %v10318_v41  ;;  %v12832_v52 = vld [vmem:[#allocation7 + $0x174] sm:$0xf0] }
 0x374   : > { %4171 = vmatpush.bf16.msra.mxu2 %v10575_v56  ;;  %4165 = vmatmul.bf16.vlgmr.msrb.gmra.mxu1 %v14531_v40  ;;  %v9359_v56 = vor.u32 %v12864_v15, %v9358_v7  ;;  %v13096_v20 = vld [vmem:[#allocation7 + $0x9bc] sm:$0xf]  ;;  %v9299_v42 = vor.u32 %v12840_v44, %v9296_v46  ;;  %v10254_v55 = vld [vmem:[#allocation7 + $0x938] sm:$0xf] }
 0x375   : > { %4143 = vmatpush.bf16.msrb.mxu0 %v9551_v49  ;;  %4227 = vmatpush.bf16.msra.mxu1 %v10579_v33  ;;  %v14785_v49 = vpop.f32.mrf.mxu1  ;;  %v9294_v33 = vld [vmem:[#allocation7 + $0x1b8] sm:$0xf]  ;;  %v12824_v61 = vld [vmem:[#allocation7 + $0x13c] sm:$0xf] }
 0x376   : > { %4199 = vmatpush.bf16.msrb.mxu3 %v9555_v19  ;;  %10849 = vmatmul.msk.bf16.vlgmr.msra.gmra.mxu0 %vm621_vm7, %v14518_v51  ;;  %v10383_v19 = vor.u32 %v13120_v12, %v10382_v25  ;;  %v13088_v30 = vld [vmem:[#allocation7 + $0x974] sm:$0xf0] }
 0x377   : > { %10850 = vmatmul.msk.bf16.vlgmr.msra.gmra.mxu3 %vm621_vm7, %v14518_v51  ;;  %v10255_v25 = vor.u32 %v13088_v30, %v10254_v55  ;;  %v9166_v12 = vld [vmem:[#allocation7 + $0xb8] sm:$0xf]  ;;  %v10128_v30 = vld [vmem:[#allocation7 + $0x878] sm:$0xf0] }
 0x378   : > { %4172 = vmatpush.bf16.msra.mxu2 %v10511_v21  ;;  %13883 = vrot.lane.b32.xlu0 %v13882_v6, %s14333_s21  ;;  %v9295_v21 = vor.u32 %v12848_v34, %v9294_v33  ;;  %v12816_v45 = vld [vmem:[#allocation7 + $0xf4] sm:$0xf0]  ;;  %v13064_v6 = vld [vmem:[#allocation7 + $0x8bc] sm:$0xf] }
 0x379   : > { %4144 = vmatpush.bf16.msrb.mxu0 %v9487_v4  ;;  %4228 = vmatpush.bf16.msra.mxu1 %v10515_v22  ;;  %v10320_v4 = vld [vmem:[#allocation7 + $0x9f8] sm:$0xf0]  ;;  %v9230_v22 = vld [vmem:[#allocation7 + $0x138] sm:$0xf]  ;;  %v9167_v41 = vor.u32 %v12816_v45, %v9166_v12 }
 0x37a   : > { %4200 = vmatpush.bf16.msrb.mxu3 %v9491_v48  ;;  %v3816_v48 = vpop.f32.mrf.mxu2  ;;  %v10323_v59 = vor.u32 %v13096_v20, %v10320_v4  ;;  %v9231_v15 = vor.u32 %v12832_v52, %v9230_v22  ;;  %v10190_v58 = vld [vmem:[#allocation7 + $0x8b8] sm:$0xf]  ;;  %v10192_v33 = vld [vmem:[#allocation7 + $0x8f8] sm:$0xf0] }
 0x37b   : > { %v13072_v16 = vld [vmem:[#allocation7 + $0x8f4] sm:$0xf0]  ;;  %v9104_v22 = vld [vmem:[#allocation7 + $0x78] sm:$0xf0] }
 0x37c   : > { %4173 = vmatpush.bf16.msra.mxu2 %v10447_v57  ;;  %v13080_v57 = vld [vmem:[#allocation7 + $0x93c] sm:$0xf]  ;;  %v10191_v63 = vor.u32 %v13072_v16, %v10190_v58  ;;  %v12800_v46 = vld [vmem:[#allocation7 + $0x74] sm:$0xf0] }
 0x37d   : > { %4145 = vmatpush.bf16.msrb.mxu0 %v9423_v13  ;;  %4229 = vmatpush.bf16.msra.mxu1 %v10451_v1  ;;  %v9232_v13 = vld [vmem:[#allocation7 + $0x178] sm:$0xf0]  ;;  %v14798_v7 = vpop.f32.mrf.mxu1  ;;  %v10126_v20 = vld [vmem:[#allocation7 + $0x838] sm:$0xf] }
 0x37e   : > { %4201 = vmatpush.bf16.msrb.mxu3 %v9427_v10  ;;  %v10256_v10 = vld [vmem:[#allocation7 + $0x978] sm:$0xf0]  ;;  %v9235_v1 = vor.u32 %v12824_v61, %v9232_v13  ;;  %v13056_v4 = vld [vmem:[#allocation7 + $0x874] sm:$0xf0] }
 0x37f   : > { %v10259_v62 = vor.u32 %v13080_v57, %v10256_v10  ;;  %v13048_v52 = vld [vmem:[#allocation7 + $0x83c] sm:$0xf]  ;;  %v10127_v12 = vor.u32 %v13056_v4, %v10126_v20 }
 0x380   : > { %4174 = vmatpush.bf16.msra.mxu2 %v10383_v19  ;;  %v9168_v19 = vld [vmem:[#allocation7 + $0xf8] sm:$0xf0] }
 0x381   : > { %4146 = vmatpush.bf16.msrb.mxu0 %v9359_v56  ;;  %4230 = vmatpush.bf16.msra.mxu1 %v10387_v31  ;;  %v12808_v56 = vld [vmem:[#allocation7 + $0xbc] sm:$0xf]  ;;  %v9102_v31 = vld [vmem:[#allocation7 + $0x38] sm:$0xf] }
 0x382   : > { %4202 = vmatpush.bf16.msrb.mxu3 %v9363_v54  ;;  %v14800_v54 = vld [vmem:[#allocation8 + $0x8] sm:$0xff]  ;;  %v9171_v44 = vor.u32 %v12808_v56, %v9168_v19  ;;  %v3818_v55 = vpop.f32.mrf.mxu2  ;;  %v13032_v61 = vld [vmem:[#allocation7 + $0x7bc] sm:$0xf] }
 0x383   : > { %v1092_v34 = vperm.slane %v14800_v54, 0  ;;  %v10064_v13 = vld [vmem:[#allocation7 + $0x7f8] sm:$0xf0]  ;;  %v1093_v58 = vperm.slane %v14800_v54, 1 }
 0x384   : > { %4175 = vmatpush.bf16.msra.mxu2 %v10319_v37  ;;  %v10195_v37 = vor.u32 %v13064_v6, %v10192_v33  ;;  %v10067_v16 = vor.u32 %v13032_v61, %v10064_v13  ;;  %v13016_v19 = vld [vmem:[#allocation7 + $0x73c] sm:$0xf] }
 0x385   : > { %4147 = vmatpush.bf16.msrb.mxu0 %v9295_v21  ;;  %4231 = vmatpush.bf16.msra.mxu1 %v10323_v59  ;;  %v14803_v21 = vpop.f32.mrf.mxu3  ;;  %v14805_v59 = vpop.f32.mrf.mxu0  ;;  %v3817_v10 = vadd.f32 %v3816_v48, %v1092_v34  ;;  %v10000_v6 = vld [vmem:[#allocation7 + $0x778] sm:$0xf0] }
 0x386   : > { %4203 = vmatpush.bf16.msrb.mxu3 %v9299_v42  ;;  %v12792_v42 = vld [vmem:[#allocation7 + $0x3c] sm:$0xf]  ;;  %v3872_v57 = vpop.f32.mrf.mxu1 }
 0x387   : > { %v9107_v45 = vor.u32 %v12792_v42, %v9104_v22  ;;  %v3831_v33 = vadd.f32 %v14794_v26, %v3817_v10  ;;  %v13208_v48 = vld [vmem:[#allocation7 + $0xd3c] sm:$0xf]  ;;  %v3819_v26 = vadd.f32 %v3818_v55, %v1092_v34 }
 0x388   : > { %4176 = vmatpush.bf16.msra.mxu2 %v10255_v25  ;;  %v13224_v25 = vld [vmem:[#allocation7 + $0xdbc] sm:$0xf] }
 0x389   : > { %4148 = vmatpush.bf16.msrb.mxu0 %v9231_v15  ;;  %4232 = vmatpush.bf16.msra.mxu1 %v10259_v62  ;;  %v9103_v15 = vor.u32 %v12800_v46, %v9102_v31  ;;  %v10131_v62 = vor.u32 %v13048_v52, %v10128_v30  ;;  %v3873_v31 = vadd.f32 %v3872_v57, %v1093_v58  ;;  %v9936_v42 = vld [vmem:[#allocation7 + $0x6f8] sm:$0xf0] }
 0x38a   : > { %4204 = vmatpush.bf16.msrb.mxu3 %v9235_v1  ;;  %v10832_v1 = vld [vmem:[#allocation7 + $0xdf8] sm:$0xf0]  ;;  %v3886_v20 = vpop.f32.mrf.mxu2  ;;  %v3833_v55 = vadd.f32 %v14803_v21, %v3819_v26 }
 0x38b   : > { %v10835_v56 = vor.u32 %v13224_v25, %v10832_v1  ;;  %v3887_v22 = vadd.f32 %v3886_v20, %v3873_v31  ;;  %v13192_v52 = vld [vmem:[#allocation7 + $0xcbc] sm:$0xf] }
 0x38c   : > { %4177 = vmatpush.bf16.msra.mxu2 %v10191_v63  ;;  %v3845_v63 = vadd.f32 %v14796_v8, %v3831_v33  ;;  %v10704_v30 = vld [vmem:[#allocation7 + $0xcf8] sm:$0xf0] }
 0x38d   : > { %4149 = vmatpush.bf16.msrb.mxu0 %v9167_v41  ;;  %4233 = vmatpush.bf16.msra.mxu1 %v10195_v37  ;;  %v10768_v41 = vld [vmem:[#allocation7 + $0xd78] sm:$0xf0]  ;;  %v3900_v46 = vpop.f32.mrf.mxu3  ;;  %v3914_v8 = vpop.f32.mrf.mxu0 }
 0x38e   : > { %4205 = vmatpush.bf16.msrb.mxu3 %v9171_v44  ;;  %v10003_v44 = vor.u32 %v13016_v19, %v10000_v6  ;;  %v10771_v4 = vor.u32 %v13208_v48, %v10768_v41  ;;  %v13000_v37 = vld [vmem:[#allocation7 + $0x6bc] sm:$0xf]  ;;  %v3874_v61 = vpop.f32.mrf.mxu1  ;;  %v3859_v13 = vadd.f32 %v14785_v49, %v3845_v63  ;;  %v3901_v57 = vadd.f32 %v3900_v46, %v3887_v22 }
 0x38f   : > { %v9939_v10 = vor.u32 %v13000_v37, %v9936_v42  ;;  %v12984_v25 = vld [vmem:[#allocation7 + $0x63c] sm:$0xf] }
 0x390   : > { %4178 = vmatpush.bf16.msra.mxu2 %v10127_v12  ;;  %v9872_v34 = vld [vmem:[#allocation7 + $0x678] sm:$0xf0]  ;;  %v3915_v1 = vadd.f32 %v3914_v8, %v3901_v57 }
 0x391   : > { %4150 = vmatpush.bf16.msrb.mxu0 %v9103_v15  ;;  %4234 = vmatpush.bf16.msra.mxu1 %v10131_v62  ;;  %v10707_v15 = vor.u32 %v13192_v52, %v10704_v30  ;;  %v10640_v12 = vld [vmem:[#allocation7 + $0xc78] sm:$0xf0]  ;;  %v13854_v62 = vpop.permute.xlu0 %13853  ;;  %v9875_v49 = vor.u32 %v12984_v25, %v9872_v34 }
 0x392   : > { %4206 = vmatpush.bf16.msrb.mxu3 %v9107_v45  ;;  %v3875_v45 = vadd.f32 %v3874_v61, %v1093_v58  ;;  %v3888_v19 = vpop.f32.mrf.mxu2  ;;  %v12968_v33 = vld [vmem:[#allocation7 + $0x5bc] sm:$0xf]  ;;  %v13856_v41 = vunpack.i.h.bf16 %v13854_v62  ;;  %v13855_v21 = vunpack.i.l.bf16 %v13854_v62  ;;  %v1095_v62 = vperm.slane %v14800_v54, 3 }
 0x393   : > { %4179 = vmatmul.bf16.vlgmr.msra.gmra.mxu2 %v14538_v5  ;;  %v9808_v48 = vld [vmem:[#allocation7 + $0x5f8] sm:$0xf0] }
 0x394   : > { %4151 = vmatmul.bf16.vlgmr.msrb.gmra.mxu0 %v14544_v11  ;;  %4245 = vmatpush.bf16.msrb.mxu2 %v10835_v56  ;;  %v14819_v56 = vmax.f32 %v3915_v1, 0.0  ;;  %v3889_v31 = vadd.f32 %v3888_v19, %v3875_v45  ;;  %v9744_v37 = vld [vmem:[#allocation7 + $0x578] sm:$0xf0]  ;;  %v14827_v42 = vmax.f32 %v4258_v43, %v13856_v41  ;;  %v14831_v26 = vmax.f32 %v4257_v35, %v13855_v21 }
 0x395   : > { %4213 = vmatpush.bf16.msra.mxu0 %v10067_v16  ;;  %4207 = vmatmul.bf16.vlgmr.msrb.gmra.mxu3 %v14544_v11  ;;  %v13176_v11 = vld [vmem:[#allocation7 + $0xc3c] sm:$0xf]  ;;  %v14816_v16 = vmax.f32 %v3859_v13, 0.0  ;;  %v3902_v63 = vpop.f32.mrf.mxu3  ;;  %v3916_v20 = vpop.f32.mrf.mxu0 }
 0x396   : > { %4235 = vmatmul.bf16.vlgmr.msra.gmra.mxu1 %v14538_v5  ;;  %v3847_v5 = vadd.f32 %v14805_v59, %v3833_v55  ;;  %v10643_v6 = vor.u32 %v13176_v11, %v10640_v12  ;;  %v3903_v46 = vadd.f32 %v3902_v63, %v3889_v31  ;;  %v9811_v59 = vor.u32 %v12968_v33, %v9808_v48  ;;  %v12936_v8 = vld [vmem:[#allocation7 + $0x4bc] sm:$0xf]  ;;  %v3942_v25 = vpop.f32.mrf.mxu1 }
 0x397   : > { %v13892_v58 = vpack.i.bf16 %v14819_v56, %v14816_v16  ;;  %v9680_v61 = vld [vmem:[#allocation7 + $0x4f8] sm:$0xf0]  ;;  %v13902_v24 = vpack.i.bf16 %v14827_v42, %v14831_v26  ;;  %v1094_v55 = vperm.slane %v14800_v54, 2 }
 0x398   : > { %4246 = vmatpush.bf16.msrb.mxu2 %v10771_v4  ;;  %v12952_v4 = vld [vmem:[#allocation7 + $0x53c] sm:$0xf]  ;;  %v3917_v22 = vadd.f32 %v3916_v20, %v3903_v46  ;;  %v9683_v35 = vor.u32 %v12936_v8, %v9680_v61 }
 0x399   : > { %4214 = vmatpush.bf16.msra.mxu0 %v10003_v44  ;;  %v3861_v44 = vadd.f32 %v14798_v7, %v3847_v5  ;;  %13893 = vrot.lane.b32.xlu1 %v13892_v58, %s14332_s20  ;;  %v9747_v30 = vor.u32 %v12952_v4, %v9744_v37  ;;  %v12920_v43 = vld [vmem:[#allocation7 + $0x43c] sm:$0xf] }
 0x39a   : > { %v14835_v7 = vmax.f32 %v3917_v22, 0.0  ;;  %v9616_v13 = vld [vmem:[#allocation7 + $0x478] sm:$0xf0] }
 0x39b   : > { %v14833_v52 = vmax.f32 %v3861_v44, 0.0  ;;  %v9619_v57 = vor.u32 %v12920_v43, %v9616_v13  ;;  %v1096_v43 = vperm.slane %v14800_v54, 4 }
 0x39c   : > { %4247 = vmatpush.bf16.msrb.mxu2 %v10707_v15 }
 0x39d   : > { %4215 = vmatpush.bf16.msra.mxu0 %v9939_v10  ;;  %v13897_v32 = vpack.i.bf16 %v14835_v7, %v14833_v52 }
 0x39e   : > { %v14855_v45 = vpop.f32.mrf.mxu1 }
 0x39f   : > { %13898 = vrot.lane.b32.xlu2 %v13897_v32, %s14332_s20 }
 0x3a0   : > { %4248 = vmatpush.bf16.msrb.mxu2 %v10643_v6 }
 0x3a1   : > { %4216 = vmatpush.bf16.msra.mxu0 %v9875_v49  ;;  %13903 = vrot.lane.b32.xlu1 %v13902_v24, %s14333_s21  ;;  %v3928_v10 = vpop.f32.mrf.mxu0 }
 0x3a2   : > { %v3929_v12 = vadd.f32 %v3928_v10, %v1094_v55 }
 0x3a3   : > { %10851 = vmatmul.msk.bf16.vlgmr.msrb.gmra.mxu2 %vm621_vm7, %v14518_v51  ;;  %v3970_v51 = vpop.f32.mrf.mxu3 }
 0x3a4   : > { %v3943_v5 = vadd.f32 %v3942_v25, %v3929_v12 }
 0x3a5   : > { %4217 = vmatpush.bf16.msra.mxu0 %v9811_v59 }
 0x3a6   : > { %v3956_v15 = vpop.f32.mrf.mxu2  ;;  %v4012_v48 = vpop.f32.mrf.mxu1 }
 0x3a7   : > { %v3957_v49 = vadd.f32 %v3956_v15, %v3943_v5 }
 0x3a9   : > { %4218 = vmatpush.bf16.msra.mxu0 %v9747_v30  ;;  %v14849_v1 = vpop.f32.mrf.mxu0  ;;  %v14858_v21 = vadd.f32 %v3970_v51, %v3957_v49 }
 0x3ab   : > { %v14846_v34 = vpop.f32.mrf.mxu3  ;;  %v4265_v63 = vmax.f32 %v14858_v21, 0.0 }
 0x3ad   : > { %4219 = vmatpush.bf16.msra.mxu0 %v9683_v35 }
 0x3ae   : > { %v14851_v11 = vpop.f32.mrf.mxu2  ;;  %v4014_v20 = vpop.f32.mrf.mxu1 }
 0x3b1   : > { %4220 = vmatpush.bf16.msra.mxu0 %v9619_v57 }
 0x3b4   : > { %4221 = vmatmul.bf16.vlgmr.msra.gmra.mxu0 %v14531_v40  ;;  %v3984_v40 = vpop.f32.mrf.mxu3 }
 0x3b5   : > { %v3985_v19 = vadd.f32 %v3984_v40, %v1095_v62 }
 0x3b6   : > { %v4026_v41 = vpop.f32.mrf.mxu2  ;;  %v4082_v8 = vpop.f32.mrf.mxu1 }
 0x3bc   : > { %v3986_v4 = vpop.f32.mrf.mxu3 }
 0x3bd   : > { %v3987_v61 = vadd.f32 %v3986_v4, %v1095_v62 }
 0x3be   : > { %v4028_v59 = vpop.f32.mrf.mxu2  ;;  %v4084_v15 = vpop.f32.mrf.mxu1 }
 0x3c1   : > { %v3998_v6 = vpop.f32.mrf.mxu0 }
 0x3c2   : > { %v3999_v33 = vadd.f32 %v3998_v6, %v3985_v19  ;;  %v1097_v6 = vperm.slane %v14800_v54, 5 }
 0x3c4   : > { %v4013_v31 = vadd.f32 %v4012_v48, %v3999_v33 }
 0x3c6   : > { %v14860_v58 = vadd.f32 %v4026_v41, %v4013_v31 }
 0x3c8   : > { %v4266_v44 = vmax.f32 %v14860_v58, 0.0 }
 0x3c9   : > { %v4000_v22 = vpop.f32.mrf.mxu0 }
 0x3ca   : > { %v13907_v46 = vpack.i.bf16 %v4266_v44, %v4265_v63  ;;  %v4054_v30 = vpop.f32.mrf.mxu3  ;;  %v4001_v35 = vadd.f32 %v4000_v22, %v3987_v61 }
 0x3cc   : > { %13908 = vrot.lane.b32.xlu2 %v13907_v46, %s14332_s20  ;;  %v4015_v57 = vadd.f32 %v4014_v20, %v4001_v35 }
 0x3ce   : > { %v14870_v12 = vadd.f32 %v4028_v59, %v4015_v57 }
 0x3d0   : > { %v15618_v62 = vmax.f32 %v14870_v12, 0.0 }
 0x3d1   : > { %v4096_v48 = vpop.f32.mrf.mxu1 }
 0x3d2   : > { %v4056_v51 = vpop.f32.mrf.mxu3  ;;  %v4097_v31 = vadd.f32 %v4096_v48, %v1097_v6 }
 0x3d6   : > { %v4040_v37 = vpop.f32.mrf.mxu2 }
 0x3d7   : > { %v4041_v49 = vadd.f32 %v4040_v37, %v1096_v43  ;;  %v13859_v37 = vpop.permute.xlu2 %13858 }
 0x3d8   : > { %v13861_v57 = vunpack.i.h.bf16 %v13859_v37 }
 0x3d9   : > { %v4055_v41 = vadd.f32 %v4054_v30, %v4041_v49  ;;  %v13860_v30 = vunpack.i.l.bf16 %v13859_v37  ;;  %v4098_v48 = vpop.f32.mrf.mxu1 }
 0x3da   : > { %v4099_v37 = vadd.f32 %v4098_v48, %v1097_v6 }
 0x3de   : > { %v4042_v24 = vpop.f32.mrf.mxu2 }
 0x3df   : > { %v4043_v13 = vadd.f32 %v4042_v24, %v1096_v43 }
 0x3e1   : > { %v4068_v32 = vpop.f32.mrf.mxu0  ;;  %v4057_v10 = vadd.f32 %v4056_v51, %v4043_v13  ;;  %v14892_v51 = vpop.permute.xlu2 %13873 }
 0x3e2   : > { %v4069_v46 = vadd.f32 %v4068_v32, %v4055_v41  ;;  %v13875_v49 = vunpack.i.l.bf16 %v14892_v51 }
 0x3e4   : > { %v14882_v22 = vadd.f32 %v4082_v8, %v4069_v46  ;;  %v14897_v8 = vmax.f32 %v4274_v28, %v13861_v57  ;;  %v14916_v14 = vmax.f32 %v14741_v23, %v13875_v49 }
 0x3e6   : > { %v15616_v43 = vmax.f32 %v14882_v22, 0.0 }
 0x3e9   : > { %v4070_v25 = vpop.f32.mrf.mxu0 }
 0x3ea   : > { %v4071_v40 = vadd.f32 %v4070_v25, %v4057_v10  ;;  %v4124_v4 = vpop.f32.mrf.mxu3  ;;  %v14901_v10 = vmax.f32 %v4273_v60, %v13860_v30  ;;  %v14918_v60 = vpop.permute.xlu2 %13888 }
 0x3ec   : > { %v14872_v5 = vadd.f32 %v4084_v15, %v4071_v40  ;;  %v14903_v15 = vpop.permute.xlu0 %13863  ;;  %v15620_v40 = vunpack.i.h.bf16 %v14892_v51 }
 0x3ee   : > { %v15619_v19 = vmax.f32 %v14872_v5, 0.0  ;;  %v14913_v0 = vmax.f32 %v14743_v50, %v15620_v40 }
 0x3f0   : > { %v13912_v33 = vpack.i.bf16 %v15619_v19, %v15618_v62 }
 0x3f2   : > { %13913 = vrot.lane.b32.xlu0 %v13912_v33, %s14332_s20  ;;  %v13922_v33 = vpack.i.bf16 %v14897_v8, %v14901_v10  ;;  %v4126_v41 = vpop.f32.mrf.mxu3 }
 0x3f3   : > { %v4138_v24 = vpop.f32.mrf.mxu0 }
 0x3f4   : > { %v14920_v28 = vpop.permute.xlu0 %13878 }
 0x3f6   : > { %v4110_v59 = vpop.f32.mrf.mxu2 }
 0x3f7   : > { %v4111_v20 = vadd.f32 %v4110_v59, %v4097_v31  ;;  %v15621_v59 = vunpack.i.l.bf16 %v14920_v28 }
 0x3f9   : > { %v4125_v61 = vadd.f32 %v4124_v4, %v4111_v20  ;;  %v13952_v20 = vpack.i.bf16 %v14913_v0, %v14916_v14  ;;  %v4166_v4 = vpop.f32.mrf.mxu1  ;;  %v14929_v57 = vpop.permute.xlu2 %13898 }
 0x3fa   : > { %v13901_v62 = vunpack.i.h.bf16 %v14929_v57  ;;  %v13900_v19 = vunpack.i.l.bf16 %v14929_v57 }
 0x3fb   : > { %v14884_v35 = vadd.f32 %v4138_v24, %v4125_v61  ;;  %v4140_v25 = vpop.f32.mrf.mxu0  ;;  %v4709_v61 = vmax.f32 %v14741_v23, %v15621_v59  ;;  %v4194_v24 = vpop.f32.mrf.mxu3 }
 0x3fc   : > { %v4714_v40 = vmax.f32 %v14833_v52, %v13901_v62 }
 0x3fd   : > { %v15617_v13 = vmax.f32 %v14884_v35, 0.0 }
 0x3fe   : > { %v4112_v31 = vpop.f32.mrf.mxu2 }
 0x3ff   : > { %v13917_v32 = vpack.i.bf16 %v15617_v13, %v15616_v43  ;;  %v1098_v43 = vperm.slane %v14800_v54, 6 }
 0x401   : > { %13918 = vrot.lane.b32.xlu0 %v13917_v32, %s14332_s20  ;;  %v4707_v32 = vmax.f32 %v14724_v2, %v13875_v49  ;;  %v4168_v23 = vpop.f32.mrf.mxu1  ;;  %v4712_v49 = vmax.f32 %v14770_v39, %v13900_v19 }
 0x403   : > { %v13962_v6 = vpack.i.bf16 %v4709_v61, %v4707_v32  ;;  %v4196_v53 = vpop.f32.mrf.mxu3 }
 0x409   : > { %13923 = vrot.lane.b32.xlu0 %v13922_v33, %s14333_s21  ;;  %v4113_v33 = vadd.f32 %v4112_v31, %v4099_v37 }
 0x40b   : > { %v4127_v48 = vadd.f32 %v4126_v41, %v4113_v33  ;;  %v13982_v41 = vpack.i.bf16 %v4714_v40, %v4712_v49 }
 0x40d   : > { %v14942_v59 = vadd.f32 %v4140_v25, %v4127_v48  ;;  %v1099_v25 = vperm.slane %v14800_v54, 7 }
 0x40f   : > { %v4284_v32 = vmax.f32 %v14942_v59, 0.0 }
 0x411   : > { %v4152_v46 = vpop.f32.mrf.mxu0  ;;  %13953 = vrot.lane.b32.xlu0 %v13952_v20, %s14333_s21 }
 0x416   : > { %v4180_v30 = vpop.f32.mrf.mxu2 }
 0x419   : > { %v4154_v13 = vpop.f32.mrf.mxu0  ;;  %13963 = vrot.lane.b32.xlu0 %v13962_v6, %s14333_s21  ;;  %v4208_v6 = vpop.f32.mrf.mxu3 }
 0x41a   : > { %v4155_v20 = vadd.f32 %v4154_v13, %v1098_v43  ;;  %v4209_v40 = vadd.f32 %v4208_v6, %v1099_v25 }
 0x41c   : > { %v4169_v31 = vadd.f32 %v4168_v23, %v4155_v20  ;;  %v4153_v20 = vadd.f32 %v4152_v46, %v1098_v43  ;;  %v4236_v23 = vpop.f32.mrf.mxu1  ;;  %v3931_v43 = vadd.f32 %v14849_v1, %v1094_v55 }
 0x41e   : > { %v4182_v37 = vpop.f32.mrf.mxu2  ;;  %v3945_v55 = vadd.f32 %v14855_v45, %v3931_v43 }
 0x41f   : > { %v4183_v17 = vadd.f32 %v4182_v37, %v4169_v31 }
 0x420   : > { %v3959_v58 = vadd.f32 %v14851_v11, %v3945_v55 }
 0x421   : > { %v14944_v13 = vadd.f32 %v4196_v53, %v4183_v17  ;;  %13983 = vrot.lane.b32.xlu0 %v13982_v41, %s14333_s21  ;;  %v4167_v53 = vadd.f32 %v4166_v4, %v4153_v20  ;;  %v4210_v6 = vpop.f32.mrf.mxu3 }
 0x422   : > { %v4211_v21 = vadd.f32 %v4210_v6, %v1099_v25  ;;  %v15626_v25 = vmax.f32 %v14704_v47, 0.0 }
 0x423   : > { %v4285_v61 = vmax.f32 %v14944_v13, 0.0  ;;  %v4181_v17 = vadd.f32 %v4180_v30, %v4167_v53  ;;  %v13865_v53 = vunpack.i.l.bf16 %v14903_v15 }
 0x425   : > { %v13927_v33 = vpack.i.bf16 %v4285_v61, %v4284_v32  ;;  %v14972_v30 = vadd.f32 %v4194_v24, %v4181_v17  ;;  %v13866_v24 = vunpack.i.h.bf16 %v14903_v15  ;;  %v15627_v15 = vmax.f32 %v14702_v27, 0.0 }
 0x426   : > { %v14955_v48 = vpop.permute.xlu2 %13908  ;;  %v4250_v41 = vpop.f32.mrf.mxu2 }
 0x427   : > { %13928 = vrot.lane.b32.xlu1 %v13927_v33, %s14332_s20  ;;  %v13911_v31 = vunpack.i.h.bf16 %v14955_v48  ;;  %v13910_v37 = vunpack.i.l.bf16 %v14955_v48  ;;  %v14999_v43 = vmax.f32 %v15627_v15, %v13865_v53 }
 0x429   : > { %v14964_v33 = vmax.f32 %v4266_v44, %v13911_v31  ;;  %v14970_v4 = vmax.f32 %v4265_v63, %v13910_v37  ;;  %v4269_v44 = vmax.f32 %v14972_v30, 0.0  ;;  %v14995_v31 = vmax.f32 %v15626_v25, %v13866_v24 }
 0x42b   : > { %v13987_v54 = vpack.i.bf16 %v14964_v33, %v14970_v4 }
 0x42d   : > { %13988 = vrot.lane.b32.xlu0 %v13987_v54, %s14333_s21 }
 0x431   : > { %v4222_v49 = vpop.f32.mrf.mxu0 }
 0x432   : > { %v4223_v46 = vadd.f32 %v4222_v49, %v4209_v40  ;;  %v14990_v49 = vadd.f32 %v14846_v34, %v3959_v58  ;;  %v13937_v34 = vpack.i.bf16 %v14995_v31, %v14999_v43 }
 0x434   : > { %v4237_v20 = vadd.f32 %v4236_v23, %v4223_v46  ;;  %v4238_v23 = vpop.f32.mrf.mxu1  ;;  %v4252_v46 = vpop.f32.mrf.mxu2  ;;  %v4281_v6 = vmax.f32 %v14990_v49, 0.0 }
 0x436   : > { %v14977_v1 = vadd.f32 %v4250_v41, %v4237_v20  ;;  %v13869_v20 = vpop.permute.xlu1 %13868 }
 0x437   : > { %v13871_v55 = vunpack.i.h.bf16 %v13869_v20  ;;  %v13870_v58 = vunpack.i.l.bf16 %v13869_v20 }
 0x438   : > { %v4270_v63 = vmax.f32 %v14977_v1, 0.0 }
 0x439   : > { %v4224_v17 = vpop.f32.mrf.mxu0  ;;  %v15010_v27 = vmax.f32 %v14726_v18, %v13871_v55  ;;  %v15013_v24 = vmax.f32 %v14724_v2, %v13870_v58 }
 0x43a   : > { %v4225_v40 = vadd.f32 %v4224_v17, %v4211_v21  ;;  %v13932_v45 = vpack.i.bf16 %v4270_v63, %v4269_v44  ;;  %v13881_v21 = vunpack.i.h.bf16 %v14920_v28  ;;  %v15628_v17 = vunpack.i.l.bf16 %v14920_v28 }
 0x43b   : > { %v13947_v15 = vpack.i.bf16 %v15010_v27, %v15013_v24 }
 0x43c   : > { %v4239_v11 = vadd.f32 %v4238_v23, %v4225_v40  ;;  %13933 = vrot.lane.b32.xlu1 %v13932_v45, %s14332_s20  ;;  %v15016_v53 = vmax.f32 %v14770_v39, %v13881_v21  ;;  %v15021_v40 = vmax.f32 %v14768_v38, %v15628_v17  ;;  %v4710_v2 = vmax.f32 %v14743_v50, %v13881_v21 }
 0x43e   : > { %v4253_v41 = vadd.f32 %v4252_v46, %v4239_v11  ;;  %v13894_v45 = vpop.permute.xlu1 %13893  ;;  %v13957_v25 = vpack.i.bf16 %v15016_v53, %v15021_v40  ;;  %v15629_v46 = vunpack.i.h.bf16 %v14892_v51 }
 0x43f   : > { %v13896_v23 = vunpack.i.h.bf16 %v13894_v45  ;;  %v13895_v11 = vunpack.i.l.bf16 %v13894_v45  ;;  %v15631_v45 = vmax.f32 %v14870_v12, 0.0 }
 0x440   : > { %v4286_v54 = vmax.f32 %v4253_v41, 0.0  ;;  %v4708_v41 = vmax.f32 %v14726_v18, %v15629_v46 }
 0x441   : > { %v4713_v39 = vmax.f32 %v14816_v16, %v13896_v23  ;;  %v4711_v28 = vmax.f32 %v14768_v38, %v13895_v11  ;;  %v15038_v55 = vmax.f32 %v14819_v56, %v13896_v23  ;;  %v15041_v58 = vmax.f32 %v14816_v16, %v13895_v11  ;;  %v13884_v38 = vpop.permute.xlu0 %13883 }
 0x442   : > { %v13942_v47 = vpack.i.bf16 %v4286_v54, %v4281_v6 }
 0x443   : > { %v13977_v20 = vpack.i.bf16 %v4713_v39, %v4711_v28  ;;  %v13972_v50 = vpack.i.bf16 %v15038_v55, %v15041_v58 }
 0x444   : > { %13938 = vrot.lane.b32.xlu1 %v13937_v34, %s14333_s21  ;;  %13943 = vrot.lane.b32.xlu2 %v13942_v47, %s14332_s20  ;;  %v13967_v34 = vpack.i.bf16 %v4710_v2, %v4708_v41  ;;  %v15630_v47 = vmax.f32 %v14872_v5, 0.0  ;;  %v15632_v2 = vmax.f32 %v14884_v35, 0.0  ;;  %v15633_v5 = vmax.f32 %v14882_v22, 0.0 }
 0x445   : > { %v15075_v35 = vmax.f32 %v14833_v52, %v13900_v19  ;;  %v4715_v22 = vmax.f32 %v14819_v56, %v13910_v37 }
 0x446   : > { %v13904_v46 = vpop.permute.xlu1 %13903 }
 0x447   : > { %v13905_v48 = vunpack.i.l.bf16 %v13904_v46 }
 0x44c   : > { %13958 = vrot.lane.b32.xlu1 %v13957_v25, %s14333_s21  ;;  %13948 = vrot.lane.b32.xlu2 %v13947_v15, %s14333_s21 }
 0x454   : > { %13978 = vrot.lane.b32.xlu1 %v13977_v20, %s14333_s21  ;;  %13968 = vrot.lane.b32.xlu2 %v13967_v34, %s14333_s21 }
 0x45c   : > { %13973 = vrot.lane.b32.xlu2 %v13972_v50, %s14333_s21 }
 0x464   : > { %v13914_v51 = vpop.permute.xlu0 %13913 }
 0x465   : > { %v13916_v18 = vunpack.i.h.bf16 %v13914_v51  ;;  %v13915_v21 = vunpack.i.l.bf16 %v13914_v51 }
 0x467   : > { %v15048_v17 = vmax.f32 %v15630_v47, %v13916_v18  ;;  %v15052_v23 = vmax.f32 %v15631_v45, %v13915_v21  ;;  %v13906_v47 = vunpack.i.h.bf16 %v13904_v46 }
 0x469   : > { %v13992_v16 = vpack.i.bf16 %v15048_v17, %v15052_v23  ;;  %v4485_v46 = vmax.f32 %v14827_v42, %v13906_v47 }
 0x46b   : > { %13993 = vrot.lane.b32.xlu1 %v13992_v16, %s14333_s21 }
 0x473   : > { %v13919_v11 = vpop.permute.xlu0 %13918 }
 0x474   : > { %v13921_v25 = vunpack.i.h.bf16 %v13919_v11  ;;  %v13920_v15 = vunpack.i.l.bf16 %v13919_v11  ;;  %v13886_v11 = vunpack.i.h.bf16 %v13884_v38 }
 0x476   : > { %v15059_v39 = vmax.f32 %v15632_v2, %v13921_v25  ;;  %v15063_v28 = vmax.f32 %v15633_v5, %v13920_v15  ;;  %v13885_v25 = vunpack.i.l.bf16 %v13884_v38  ;;  %v13891_v15 = vunpack.i.h.bf16 %v14918_v60 }
 0x477   : > { %v13890_v2 = vunpack.i.l.bf16 %v14918_v60  ;;  %v4465_v1 = vmax.f32 %v14779_v29, %v13886_v11 }
 0x478   : > { %v13997_v12 = vpack.i.bf16 %v15059_v39, %v15063_v28  ;;  %v4466_v30 = vmax.f32 %v14753_v9, %v13891_v15 }
 0x47a   : > { %13998 = vrot.lane.b32.xlu1 %v13997_v12, %s14333_s21 }
 0x47b   : > { %v13924_v19 = vpop.permute.xlu0 %13923 }
 0x47c   : > { %v13926_v45 = vunpack.i.h.bf16 %v13924_v19  ;;  %v13925_v56 = vunpack.i.l.bf16 %v13924_v19 }
 0x47e   : > { %v4476_v38 = vmax.f32 %v14901_v10, %v13925_v56 }
 0x483   : > { %v13954_v9 = vpop.permute.xlu0 %13953 }
 0x499   : > { %v13929_v52 = vpop.permute.xlu1 %13928 }
 0x49e   : > { %v15068_v41 = vpop.permute.xlu2 %13943 }
 0x49f   : > { %v13946_v20 = vunpack.i.h.bf16 %v15068_v41  ;;  %v13945_v34 = vunpack.i.l.bf16 %v15068_v41 }
 0x4a1   : > { %v15080_v50 = vmax.f32 %v4286_v54, %v13946_v20  ;;  %v4716_v51 = vmax.f32 %v14835_v7, %v13945_v34  ;;  %v4475_v20 = vmax.f32 %v14831_v26, %v13905_v48 }
 0x4a3   : > { %v14012_v18 = vpack.i.bf16 %v4716_v51, %v4715_v22  ;;  %v14017_v21 = vpack.i.bf16 %v15075_v35, %v15080_v50  ;;  %v4486_v22 = vmax.f32 %v14897_v8, %v13926_v45  ;;  %v13931_v51 = vunpack.i.h.bf16 %v13929_v52 }
 0x4a4   : > { %v4609_v42 = vmax.f32 %v4475_v20, %v4485_v46  ;;  %v15143_v46 = vmax.f32 %v14835_v7, %v13901_v62 }
 0x4a5   : > { %14013 = vrot.lane.b32.xlu0 %v14012_v18, %s14333_s21  ;;  %14018 = vrot.lane.b32.xlu1 %v14017_v21, %s14333_s21  ;;  %v13930_v18 = vunpack.i.l.bf16 %v13929_v52  ;;  %v4610_v26 = vmax.f32 %v4476_v38, %v4486_v22  ;;  %v15112_v10 = vmax.f32 %v4285_v61, %v13931_v51 }
 0x4a6   : > { %v13949_v45 = vpop.permute.xlu2 %13948 }
 0x4a7   : > { %v15116_v21 = vmax.f32 %v4284_v32, %v13930_v18  ;;  %v13956_v32 = vunpack.i.h.bf16 %v13954_v9 }
 0x4a9   : > { %v14007_v61 = vpack.i.bf16 %v15112_v10, %v15116_v21  ;;  %v4516_v51 = vmax.f32 %v14913_v0, %v13956_v32 }
 0x4ae   : > { %v13934_v37 = vpop.permute.xlu1 %13933 }
 0x4af   : > { %v13936_v54 = vunpack.i.h.bf16 %v13934_v37  ;;  %v13935_v16 = vunpack.i.l.bf16 %v13934_v37  ;;  %v13951_v37 = vunpack.i.h.bf16 %v13949_v45 }
 0x4b1   : > { %v15093_v5 = vmax.f32 %v4270_v63, %v13936_v54  ;;  %v15097_v12 = vmax.f32 %v4269_v44, %v13935_v16  ;;  %v4455_v63 = vmax.f32 %v14783_v3, %v13885_v25  ;;  %v4456_v44 = vmax.f32 %v14757_v36, %v13890_v2 }
 0x4b2   : > { %v13955_v54 = vunpack.i.l.bf16 %v13954_v9  ;;  %v13950_v16 = vunpack.i.l.bf16 %v13949_v45  ;;  %v15137_v25 = vmax.f32 %v4281_v6, %v13945_v34  ;;  %v4506_v41 = vmax.f32 %v15010_v27, %v13951_v37 }
 0x4b3   : > { %v14002_v60 = vpack.i.bf16 %v15093_v5, %v15097_v12  ;;  %v4607_v3 = vmax.f32 %v4455_v63, %v4465_v1  ;;  %v4608_v19 = vmax.f32 %v4456_v44, %v4466_v30 }
 0x4b4   : > { %v4515_v34 = vmax.f32 %v14916_v14, %v13955_v54  ;;  %v4505_v18 = vmax.f32 %v15013_v24, %v13950_v16  ;;  %v14022_v1 = vpack.i.bf16 %v15137_v25, %v15143_v46 }
 0x4b5   : > { %14003 = vrot.lane.b32.xlu2 %v14002_v60, %s14333_s21  ;;  %v15120_v48 = vmax.f32 %v4607_v3, %v4609_v42  ;;  %v15122_v56 = vmax.f32 %v4608_v19, %v4610_v26 }
 0x4b6   : > { %v13939_v8 = vpop.permute.xlu1 %13938 }
 0x4b7   : > { %v13941_v29 = vunpack.i.h.bf16 %v13939_v8  ;;  %v13940_v52 = vunpack.i.l.bf16 %v13939_v8  ;;  %v4870_v38 = vsel %vm4869_vm11, %v15122_v56, -inf }
 0x4b8   : > { %v4871_v44 = vrot.slane %v4870_v38, 4 }
 0x4b9   : > { %v4496_v36 = vmax.f32 %v14995_v31, %v13941_v29  ;;  %v4495_v47 = vmax.f32 %v14999_v43, %v13940_v52 }
 0x4bb   : > { %v4681_v13 = vmax.f32 %v4495_v47, %v15013_v24  ;;  %v4682_v59 = vmax.f32 %v4496_v36, %v15010_v27  ;;  %v4612_v7 = vmax.f32 %v4496_v36, %v4506_v41  ;;  %v4611_v63 = vmax.f32 %v4495_v47, %v4505_v18 }
 0x4bc   : > { %v4872_v36 = vmax.f32 %v4870_v38, %v4871_v44 }
 0x4bd   : > { %v4683_v31 = vmax.f32 %v15120_v48, %v4681_v13  ;;  %v15130_v43 = vmax.f32 %v15122_v56, %v4682_v59  ;;  %14008 = vrot.lane.b32.xlu2 %v14007_v61, %s14333_s21 }
 0x4be   : > { %v13959_v11 = vpop.permute.xlu1 %13958  ;;  %v4873_v54 = vrot.slane %v4872_v36, 2 }
 0x4bf   : > { %v4685_v15 = vsel %vm4638_vm10, %v4683_v31, -inf  ;;  %v13961_v2 = vunpack.i.h.bf16 %v13959_v11  ;;  %v4693_v20 = vsel %vm4692_vm12, %v4683_v31, -inf  ;;  %v13960_v22 = vunpack.i.l.bf16 %v13959_v11 }
 0x4c0   : > { %v4686_v49 = vrot.slane %v4685_v15, 4  ;;  %v4694_v62 = vrot.slane %v4693_v20, 4 }
 0x4c1   : > { %v4526_v6 = vmax.f32 %v15016_v53, %v13961_v2  ;;  %v4525_v57 = vmax.f32 %v15021_v40, %v13960_v22 }
 0x4c2   : > { %v4687_v26 = vmax.f32 %v4685_v15, %v4686_v49  ;;  %v4695_v3 = vmax.f32 %v4693_v20, %v4694_v62  ;;  %v4874_v49 = vmax.f32 %v4872_v36, %v4873_v54 }
 0x4c3   : > { %v4614_v60 = vmax.f32 %v4516_v51, %v4526_v6  ;;  %v4613_v30 = vmax.f32 %v4515_v34, %v4525_v57 }
 0x4c4   : > { %v4688_v45 = vrot.slane %v4687_v26, 2  ;;  %v4696_v31 = vrot.slane %v4695_v3, 2 }
 0x4c5   : > { %v4626_v42 = vmax.f32 %v4612_v7, %v4614_v60  ;;  %14023 = vrot.lane.b32.xlu2 %v14022_v1, %s14333_s21  ;;  %v15156_v8 = vmax.f32 %v4611_v63, %v4613_v30  ;;  %v4875_v63 = vrot.slane %v4874_v49, 1 }
 0x4c6   : > { %v4689_v15 = vmax.f32 %v4687_v26, %v4688_v45  ;;  %v4697_v51 = vmax.f32 %v4695_v3, %v4696_v31 }
 0x4c7   : > { %v15159_v29 = vmax.f32 %v15122_v56, %v4626_v42  ;;  %v4892_v52 = vsel %vm4860_vm13, %v4626_v42, -inf  ;;  %v4891_v19 = vsel %vm4655_vm14, %v15156_v8, -inf  ;;  %v15166_v9 = vmax.f32 %v15120_v48, %v15156_v8 }
 0x4c8   : > { %v15168_v47 = vmax.f32 %v4891_v19, %v4892_v52  ;;  %v4900_v16 = vsel %vm4869_vm11, %v4626_v42, -inf  ;;  %v4690_v34 = vrot.slane %v4689_v15, 1  ;;  %v4698_v60 = vrot.slane %v4697_v51, 1 }
 0x4c9   : > { %v4657_v13 = vsel %vm4638_vm10, %v15159_v29, -inf  ;;  %v4648_v59 = vsel %vm4647_vm15, %v15166_v9, -inf  ;;  %v4656_v61 = vsel %vm4655_vm14, %v15166_v9, -inf  ;;  %v4901_v20 = vrot.slane %v4900_v16, 4 }
 0x4ca   : > { %v4649_v32 = vrot.slane %v4648_v59, 4  ;;  %v4658_v37 = vmax.f32 %v4656_v61, %v4657_v13  ;;  %v4691_v44 = vmax.f32 %v4689_v15, %v4690_v34  ;;  %v4699_v45 = vmax.f32 %v4697_v51, %v4698_v60  ;;  %v13964_v61 = vpop.permute.xlu0 %13963 }
 0x4cb   : > { %v4902_v41 = vmax.f32 %v4900_v16, %v4901_v20  ;;  %v15177_v13 = vmax.f32 %v4874_v49, %v4875_v63  ;;  %v15185_v20 = vpop.permute.xlu1 %13978  ;;  %v4844_v51 = vsel %vm4843_vm1, %v15120_v48, -inf  ;;  %v4735_v34 = vmax.f32 %v14916_v14, %v15013_v24 }
 0x4cc   : > { %v4650_v11 = vmax.f32 %v4648_v59, %v4649_v32  ;;  %v4659_v2 = vrot.slane %v4658_v37, 4  ;;  %v13969_v32 = vpop.permute.xlu2 %13968 }
 0x4cd   : > { %v4903_v57 = vrot.slane %v4902_v41, 2  ;;  %v4725_v60 = vmax.f32 %v15021_v40, %v4735_v34  ;;  %v13965_v34 = vunpack.i.l.bf16 %v13964_v61 }
 0x4ce   : > { %v4651_v22 = vrot.slane %v4650_v11, 2  ;;  %v4660_v38 = vmax.f32 %v4658_v37, %v4659_v2 }
 0x4cf   : > { %v4904_v1 = vmax.f32 %v4902_v41, %v4903_v57  ;;  %v4852_v41 = vsel %vm4851_vm3, %v15120_v48, -inf  ;;  %v4767_v63 = vmax.f32 %v4725_v60, %v15038_v55 }
 0x4d0   : > { %v4652_v6 = vmax.f32 %v4650_v11, %v4651_v22  ;;  %v4661_v18 = vrot.slane %v4660_v38, 2  ;;  %v4853_v57 = vrot.slane %v4852_v41, 4 }
 0x4d1   : > { %v4905_v26 = vrot.slane %v4904_v1, 1  ;;  %v4745_v14 = vmax.f32 %v15041_v58, %v4767_v63 }
 0x4d2   : > { %v4653_v7 = vrot.slane %v4652_v6, 1  ;;  %v4662_v62 = vmax.f32 %v4660_v38, %v4661_v18  ;;  %v13984_v37 = vpop.permute.xlu0 %13983  ;;  %v4845_v18 = vrot.slane %v4844_v51, 4 }
 0x4d3   : > { %v15179_v3 = vmax.f32 %v4904_v1, %v4905_v26  ;;  %v4854_v26 = vmax.f32 %v4852_v41, %v4853_v57 }
 0x4d4   : > { %v4654_v30 = vmax.f32 %v4652_v6, %v4653_v7  ;;  %v4663_v42 = vrot.slane %v4662_v62, 1  ;;  %v13974_v31 = vpop.permute.xlu2 %13973  ;;  %v4700_v7 = vsel %vm4638_vm10, %v15130_v43, -inf  ;;  %v13986_v43 = vunpack.i.h.bf16 %v13984_v37 }
 0x4d5   : > { %v14062_v59 = vpack.i.bf16 %v15177_v13, %v15179_v3  ;;  %v13976_v16 = vunpack.i.h.bf16 %v13974_v31  ;;  %v13975_v11 = vunpack.i.l.bf16 %v13974_v31  ;;  %v13985_v31 = vunpack.i.l.bf16 %v13984_v37  ;;  %v13269_v13 = vld [vmem:[#allocation10 + $0x11c] sm:$0xf0] }
 0x4d6   : > { %v14027_v52 = vpack.i.bf16 %v4654_v30, %v4691_v44  ;;  %v4664_v19 = vmax.f32 %v4662_v62, %v4663_v42  ;;  %v4701_v30 = vrot.slane %v4700_v7, 4  ;;  %v4846_v42 = vmax.f32 %v4844_v51, %v4845_v18 }
 0x4d7   : > { %v4545_v22 = vmax.f32 %v15038_v55, %v13976_v16  ;;  %v4535_v38 = vmax.f32 %v15041_v58, %v13975_v11  ;;  %v13970_v55 = vunpack.i.l.bf16 %v13969_v32  ;;  %v4755_v16 = vmax.f32 %v14970_v4, %v4745_v14 }
 0x4d8   : > { %14028 = vrot.lane.b32.xlu0 %v14027_v52, %s14335_s22  ;;  %v14032_v36 = vpack.i.bf16 %v4664_v19, %v4699_v45  ;;  %v4702_v24 = vmax.f32 %v4700_v7, %v4701_v30  ;;  %v4847_v19 = vrot.slane %v4846_v42, 2  ;;  %v4855_v45 = vrot.slane %v4854_v26, 2 }
 0x4d9   : > { %v4615_v62 = vmax.f32 %v4535_v38, %v4545_v22  ;;  %v4756_v58 = vmax.f32 %v15075_v35, %v13986_v43  ;;  %v4746_v41 = vmax.f32 %v15016_v53, %v13985_v31  ;;  %v4726_v37 = vmax.f32 %v15010_v27, %v13970_v55 }
 0x4da   : > { %14033 = vrot.lane.b32.xlu1 %v14032_v36, %s14333_s21  ;;  %v13989_v54 = vpop.permute.xlu0 %13988  ;;  %v13966_v36 = vunpack.i.h.bf16 %v13964_v61  ;;  %v15209_v22 = vmax.f32 %v4846_v42, %v4847_v19  ;;  %v4877_v30 = vsel %vm4843_vm1, %v15156_v8, -inf  ;;  %v13980_v42 = vunpack.i.l.bf16 %v15185_v20 }
 0x4db   : > { %v13991_v15 = vunpack.i.h.bf16 %v13989_v54  ;;  %v13990_v2 = vunpack.i.l.bf16 %v13989_v54  ;;  %v13971_v54 = vunpack.i.h.bf16 %v13969_v32  ;;  %v13981_v32 = vunpack.i.h.bf16 %v15185_v20 }
 0x4dc   : > { %v4769_v51 = vmax.f32 %v13966_v36, %v4755_v16  ;;  %v4849_v60 = vrot.slane %v15209_v22, 1  ;;  %v4770_v53 = vmax.f32 %v4746_v41, %v4756_v58 }
 0x4dd   : > { %v4565_v49 = vmax.f32 %v14964_v33, %v13991_v15  ;;  %v4555_v6 = vmax.f32 %v14970_v4, %v13990_v2  ;;  %v15201_v44 = vpop.permute.xlu1 %13993  ;;  %v4703_v2 = vrot.slane %v4702_v24, 2 }
 0x4de   : > { %v4773_v63 = vmax.f32 %v13965_v34, %v4769_v51  ;;  %v13996_v20 = vunpack.i.h.bf16 %v15201_v44 }
 0x4df   : > { %v4617_v1 = vmax.f32 %v4555_v6, %v4565_v49  ;;  %v15213_v49 = vmax.f32 %v4854_v26, %v4855_v45  ;;  %v4736_v6 = vmax.f32 %v14913_v0, %v13971_v54  ;;  %v4800_v0 = vmax.f32 %v14970_v4, %v13991_v15 }
 0x4e0   : > { %v4765_v19 = vmax.f32 %v13981_v32, %v4773_v63 }
 0x4e1   : > { %v15203_v52 = vmax.f32 %v4615_v62, %v4617_v1  ;;  %v4704_v62 = vmax.f32 %v4702_v24, %v4703_v2  ;;  %v4857_v27 = vrot.slane %v15213_v49, 1  ;;  %v4768_v61 = vmax.f32 %v4726_v37, %v4736_v6 }
 0x4e2   : > { %v4771_v37 = vmax.f32 %v4765_v19, %v13980_v42 }
 0x4e3   : > { %v4914_v40 = vsel %vm4851_vm3, %v15203_v52, -inf  ;;  %v4907_v57 = vsel %vm4843_vm1, %v15203_v52, -inf  ;;  %v4705_v31 = vrot.slane %v4704_v62, 1 }
 0x4e4   : > { %v4915_v38 = vrot.slane %v4914_v40, 4  ;;  %v4908_v14 = vrot.slane %v4907_v57, 4 }
 0x4e5   : > { %v15238_v34 = vmax.f32 %v4704_v62, %v4705_v31 }
 0x4e6   : > { %v4916_v1 = vmax.f32 %v4914_v40, %v4915_v38  ;;  %v4878_v40 = vrot.slane %v4877_v30, 4  ;;  %v4774_v38 = vmax.f32 %v4768_v61, %v4770_v53  ;;  %v15236_v41 = vmax.f32 %v4907_v57, %v4908_v14 }
 0x4e8   : > { %v4917_v54 = vrot.slane %v4916_v1, 2  ;;  %v15245_v63 = vmax.f32 %v4877_v30, %v4878_v40 }
 0x4ec   : > { %v13999_v11 = vpop.permute.xlu1 %13998 }
 0x4ed   : > { %v14000_v18 = vunpack.i.l.bf16 %v13999_v11  ;;  %v14001_v7 = vunpack.i.h.bf16 %v13999_v11  ;;  %v13995_v11 = vunpack.i.l.bf16 %v15201_v44 }
 0x4ef   : > { %v4802_v24 = vmax.f32 %v14964_v33, %v14000_v18  ;;  %v4804_v43 = vmax.f32 %v15063_v28, %v14001_v7  ;;  %v4585_v33 = vmax.f32 %v15059_v39, %v14001_v7  ;;  %v4575_v2 = vmax.f32 %v15063_v28, %v14000_v18 }
 0x4f0   : > { %v4803_v28 = vmax.f32 %v15052_v23, %v13996_v20  ;;  %v4801_v18 = vmax.f32 %v15137_v25, %v13995_v11  ;;  %v4566_v14 = vmax.f32 %v15052_v23, %v13995_v11 }
 0x4f1   : > { %v4810_v51 = vmax.f32 %v4800_v0, %v4802_v24  ;;  %v4619_v57 = vmax.f32 %v4575_v2, %v4585_v33 }
 0x50f   : > { %v14004_v26 = vpop.permute.xlu2 %14003 }
 0x510   : > { %v14006_v45 = vunpack.i.h.bf16 %v14004_v26  ;;  %v14005_v36 = vunpack.i.l.bf16 %v14004_v26 }
 0x512   : > { %v4605_v55 = vmax.f32 %v15093_v5, %v14006_v45  ;;  %v4808_v16 = vmax.f32 %v15097_v12, %v14006_v45  ;;  %v4595_v4 = vmax.f32 %v15097_v12, %v14005_v36  ;;  %v4806_v15 = vmax.f32 %v15059_v39, %v14005_v36 }
 0x513   : > { %v15242_v12 = vsel %vm4851_vm3, %v15156_v8, -inf  ;;  %v15247_v39 = vmax.f32 %v4916_v1, %v4917_v54  ;;  %v4576_v1 = vmax.f32 %v15048_v17, %v13996_v20  ;;  %v4811_v45 = vmax.f32 %v4801_v18, %v4803_v28 }
 0x514   : > { %v4812_v58 = vmax.f32 %v4804_v43, %v4806_v15  ;;  %v4621_v6 = vmax.f32 %v4595_v4, %v4605_v55  ;;  %v4814_v32 = vmax.f32 %v4808_v16, %v15093_v5 }
 0x516   : > { %v4816_v44 = vmax.f32 %v4810_v51, %v4812_v58  ;;  %v15251_v42 = vmax.f32 %v4619_v57, %v4621_v6 }
 0x517   : > { %v14009_v7 = vpop.permute.xlu2 %14008  ;;  %v14014_v62 = vpop.permute.xlu0 %14013 }
 0x518   : > { %v4818_v53 = vmax.f32 %v4816_v44, %v4814_v32  ;;  %v14011_v0 = vunpack.i.h.bf16 %v14009_v7  ;;  %v14010_v8 = vunpack.i.l.bf16 %v14009_v7  ;;  %v14019_v61 = vpop.permute.xlu1 %14018  ;;  %v14016_v5 = vunpack.i.h.bf16 %v14014_v62 }
 0x519   : > { %v14015_v30 = vunpack.i.l.bf16 %v14014_v62  ;;  %v14020_v26 = vunpack.i.l.bf16 %v14019_v61  ;;  %v14021_v43 = vunpack.i.h.bf16 %v14019_v61  ;;  %v15265_v23 = vmax.f32 %v15203_v52, %v15251_v42 }
 0x51a   : > { %v4821_v19 = vsel %vm4820_vm4, %v4818_v53, -inf  ;;  %v4807_v24 = vmax.f32 %v15116_v21, %v14011_v0  ;;  %v4805_v36 = vmax.f32 %v15048_v17, %v14010_v8  ;;  %v4829_v31 = vsel %vm4828_vm5, %v4818_v53, -inf }
 0x51b   : > { %v4586_v40 = vmax.f32 %v15116_v21, %v14010_v8  ;;  %v4766_v54 = vmax.f32 %v15143_v46, %v14016_v5  ;;  %v15261_v55 = vmax.f32 %v14015_v30, %v4771_v37  ;;  %v4822_v16 = vrot.slane %v4821_v19, 4 }
 0x51c   : > { %v4813_v4 = vmax.f32 %v4805_v36, %v4807_v24  ;;  %v4809_v15 = vmax.f32 %v15112_v10, %v14020_v26  ;;  %v4596_v17 = vmax.f32 %v15112_v10, %v14011_v0  ;;  %v4606_v21 = vmax.f32 %v15080_v50, %v14020_v26 }
 0x51d   : > { %v4772_v20 = vmax.f32 %v4766_v54, %v15137_v25  ;;  %v4778_v11 = vsel %vm4777_vm6, %v15261_v55, -inf  ;;  %v4830_v33 = vrot.slane %v4829_v31, 4  ;;  %v4536_v51 = vmax.f32 %v15075_v35, %v14021_v43 }
 0x51e   : > { %v4817_v2 = vmax.f32 %v4811_v45, %v4813_v4  ;;  %v4815_v58 = vmax.f32 %v4809_v15, %v15080_v50  ;;  %v4620_v6 = vmax.f32 %v4576_v1, %v4586_v40  ;;  %v4779_v18 = vrot.slane %v4778_v11, 4 }
 0x51f   : > { %v14024_v37 = vpop.permute.xlu2 %14023  ;;  %v4776_v32 = vmax.f32 %v4774_v38, %v4772_v20  ;;  %v4665_v57 = vsel %vm4647_vm15, %v15265_v23, -inf  ;;  %v4823_v7 = vmax.f32 %v4821_v19, %v4822_v16  ;;  %v4622_v53 = vmax.f32 %v4596_v17, %v4606_v21 }
 0x520   : > { %v14026_v44 = vunpack.i.h.bf16 %v14024_v37  ;;  %v14025_v28 = vunpack.i.l.bf16 %v14024_v37  ;;  %v4819_v10 = vmax.f32 %v4817_v2, %v4815_v58  ;;  %v4666_v61 = vrot.slane %v4665_v57, 4 }
 0x521   : > { %v4793_v62 = vsel %vm4777_vm6, %v4776_v32, -inf  ;;  %v4885_v38 = vrot.slane %v15242_v12, 4  ;;  %v4824_v1 = vrot.slane %v4823_v7, 2  ;;  %v4831_v19 = vmax.f32 %v4829_v31, %v4830_v33 }
 0x522   : > { %v4556_v0 = vmax.f32 %v15137_v25, %v14026_v44  ;;  %v4546_v35 = vmax.f32 %v15143_v46, %v14025_v28  ;;  %v4794_v8 = vrot.slane %v4793_v62, 4  ;;  %v4836_v50 = vsel %vm4820_vm4, %v4819_v10, -inf }
 0x523   : > { %v4837_v5 = vrot.slane %v4836_v50, 4  ;;  %v4667_v24 = vmax.f32 %v4665_v57, %v4666_v61  ;;  %v4780_v36 = vmax.f32 %v4778_v11, %v4779_v18  ;;  %v15282_v43 = vmax.f32 %v4620_v6, %v4622_v53 }
 0x524   : > { %v4616_v30 = vmax.f32 %v4536_v51, %v4546_v35  ;;  %v4618_v26 = vmax.f32 %v4556_v0, %v4566_v14  ;;  %v4795_v45 = vmax.f32 %v4793_v62, %v4794_v8  ;;  %v4825_v25 = vmax.f32 %v4823_v7, %v4824_v1 }
 0x525   : > { %v4838_v46 = vmax.f32 %v4836_v50, %v4837_v5  ;;  %v4668_v54 = vrot.slane %v4667_v24, 2  ;;  %v4832_v4 = vrot.slane %v4831_v19, 2  ;;  %v4781_v15 = vrot.slane %v4780_v36, 2 }
 0x526   : > { %v15284_v40 = vmax.f32 %v4616_v30, %v4618_v26  ;;  %v4796_v16 = vrot.slane %v4795_v45, 2  ;;  %v4880_v14 = vrot.slane %v15245_v63, 2  ;;  %v4919_v21 = vrot.slane %v15247_v39, 1 }
 0x527   : > { %v4839_v20 = vrot.slane %v4838_v46, 2  ;;  %v4669_v31 = vmax.f32 %v4667_v24, %v4668_v54  ;;  %v4826_v33 = vrot.slane %v4825_v25, 1  ;;  %v4782_v2 = vmax.f32 %v4780_v36, %v4781_v15  ;;  %v11334_v36 = vld [vmem:[#allocation10 + $0x3c0] sm:$0xf] }
 0x528   : > { %v4634_v17 = vmax.f32 %v15284_v40, %v15282_v43  ;;  %v4797_v11 = vmax.f32 %v4795_v45, %v4796_v16  ;;  %v4672_v51 = vsel %vm4655_vm14, %v15265_v23, -inf  ;;  %v4833_v37 = vmax.f32 %v4831_v19, %v4832_v4 }
 0x529   : > { %v4840_v6 = vmax.f32 %v4838_v46, %v4839_v20  ;;  %v4670_v44 = vrot.slane %v4669_v31, 1  ;;  %v4886_v18 = vmax.f32 %v15242_v12, %v4885_v38  ;;  %v4783_v57 = vrot.slane %v4782_v2, 1  ;;  %v13349_v20 = vld [vmem:[#allocation10 + $0x39c] sm:$0xf0] }
 0x52a   : > { %v4673_v58 = vsel %vm4638_vm10, %v4634_v17, -inf  ;;  %v4798_v28 = vrot.slane %v4797_v11, 1  ;;  %v4636_v10 = vmax.f32 %v15159_v29, %v4634_v17  ;;  %v4930_v62 = vsel %vm4869_vm11, %v15284_v40, -inf }
 0x52b   : > { %v15293_v32 = vmax.f32 %v4672_v51, %v4673_v58  ;;  %v4841_v7 = vrot.slane %v4840_v6, 1  ;;  %v4671_v53 = vmax.f32 %v4669_v31, %v4670_v44  ;;  %v4827_v35 = vmax.f32 %v4825_v25, %v4826_v33  ;;  %v13357_v25 = vld [vmem:[#allocation10 + $0x3dc] sm:$0xf0] }
 0x52c   : > { %v4799_v0 = vmax.f32 %v4797_v11, %v4798_v28  ;;  %v4931_v8 = vrot.slane %v4930_v62, 4  ;;  %v4834_v50 = vrot.slane %v4833_v37, 1  ;;  %v4784_v61 = vmax.f32 %v4782_v2, %v4783_v57  ;;  %v11078_v31 = vld [vmem:[#allocation10 + $0x1c0] sm:$0xf] }
 0x52d   : > { %v4842_v5 = vmax.f32 %v4840_v6, %v4841_v7  ;;  %v4944_v30 = vsel %vm4851_vm3, %v15251_v42, -inf  ;;  %v14042_v26 = vpack.i.bf16 %v4671_v53, %v15238_v34  ;;  %v4937_v29 = vsel %vm4843_vm1, %v15251_v42, -inf  ;;  %v13341_v57 = vld [vmem:[#allocation10 + $0x35c] sm:$0xf0] }
 0x52e   : > { %v14037_v12 = vpack.i.bf16 %v4827_v35, %v4799_v0  ;;  %v4932_v38 = vmax.f32 %v4930_v62, %v4931_v8  ;;  %v4850_v1 = vmax.f32 %v15209_v22, %v4849_v60  ;;  %v4945_v45 = vrot.slane %v4944_v30, 4  ;;  %v11302_v60 = vld [vmem:[#allocation10 + $0x380] sm:$0xf] }
 0x52f   : > { %v14052_v24 = vpack.i.bf16 %v4842_v5, %v4784_v61  ;;  %v4960_v19 = vsel %vm4869_vm11, %v15282_v43, -inf  ;;  %v4639_v46 = vsel %vm4638_vm10, %v4636_v10, -inf  ;;  %14043 = vrot.lane.b32.xlu2 %v14042_v26, %s14332_s20  ;;  %v4881_v34 = vmax.f32 %v15245_v63, %v4880_v14  ;;  %v13293_v63 = vld [vmem:[#allocation10 + $0x1dc] sm:$0xf0] }
 0x530   : > { %14038 = vrot.lane.b32.xlu1 %v14037_v12, %s14335_s22  ;;  %v4910_v54 = vrot.slane %v15236_v41, 2  ;;  %v4635_v22 = vmax.f32 %v15166_v9, %v15265_v23  ;;  %v4835_v16 = vmax.f32 %v4833_v37, %v4834_v50  ;;  %v4887_v4 = vrot.slane %v4886_v18, 2  ;;  %v11046_v23 = vld [vmem:[#allocation10 + $0x180] sm:$0xf] }
 0x531   : > { %14053 = vrot.lane.b32.xlu0 %v14052_v24, %s14332_s20  ;;  %v4946_v15 = vmax.f32 %v4944_v30, %v4945_v45  ;;  %v11335_v17 = vor.u32 %v13357_v25, %v11334_v36  ;;  %v4933_v11 = vrot.slane %v4932_v38, 2  ;;  %v4938_v33 = vrot.slane %v4937_v29, 4  ;;  %v11270_v10 = vld [vmem:[#allocation10 + $0x340] sm:$0xf] }
 0x532   : > { %v4961_v2 = vrot.slane %v4960_v19, 4  ;;  %v4637_v51 = vsel %vm554_vm2, %v4635_v22, -inf  ;;  %v4920_v14 = vmax.f32 %v15247_v39, %v4919_v21  ;;  %v11303_v9 = vor.u32 %v13349_v20, %v11302_v60  ;;  %v13285_v7 = vld [vmem:[#allocation10 + $0x19c] sm:$0xf0] }
 0x533   : > { %v4947_v58 = vrot.slane %v4946_v15, 2  ;;  %v15319_v6 = vmax.f32 %v4637_v51, %v4639_v46  ;;  %8004 = vmatpush.bf16.msra.mxu3 %v11335_v17  ;;  %v4911_v37 = vmax.f32 %v15236_v41, %v4910_v54  ;;  %v4858_v44 = vmax.f32 %v15213_v49, %v4857_v27  ;;  %v11014_v30 = vld [vmem:[#allocation10 + $0x140] sm:$0xf] }
 0x534   : > { %v11079_v28 = vor.u32 %v13293_v63, %v11078_v31  ;;  %v14047_v62 = vpack.i.bf16 %v4850_v1, %v4835_v16  ;;  %v4882_v53 = vrot.slane %v4881_v34, 1  ;;  %v4888_v0 = vmax.f32 %v4886_v18, %v4887_v4  ;;  %v13277_v26 = vld [vmem:[#allocation10 + $0x15c] sm:$0xf0] }
 0x535   : > { %v4948_v39 = vmax.f32 %v4946_v15, %v4947_v58  ;;  %v4934_v21 = vmax.f32 %v4932_v38, %v4933_v11  ;;  %v4939_v35 = vmax.f32 %v4937_v29, %v4938_v33  ;;  %v4962_v8 = vmax.f32 %v4960_v19, %v4961_v2  ;;  %v11238_v27 = vld [vmem:[#allocation10 + $0x300] sm:$0xf] }
 0x536   : > { %7991 = vmatpush.bf16.msra.mxu2 %v11079_v28  ;;  %v11047_v50 = vor.u32 %v13285_v7, %v11046_v23  ;;  %v14057_v61 = vpack.i.bf16 %v4920_v14, %v4858_v44  ;;  %v11271_v41 = vor.u32 %v13341_v57, %v11270_v10  ;;  %v4912_v49 = vrot.slane %v4911_v37, 1  ;;  %v13333_v18 = vld [vmem:[#allocation10 + $0x31c] sm:$0xf0] }
 0x537   : > { %v4949_v5 = vrot.slane %v4948_v39, 1  ;;  %8005 = vmatpush.bf16.msra.mxu3 %v11303_v9  ;;  %14048 = vrot.lane.b32.xlu2 %v14047_v62, %s14333_s21  ;;  %v4883_v12 = vmax.f32 %v4881_v34, %v4882_v53  ;;  %v4889_v38 = vrot.slane %v4888_v0, 1  ;;  %v11590_v29 = vld [vmem:[#allocation10 + $0x5c0] sm:$0xf]  ;;  %v4935_v1 = vrot.slane %v4934_v21, 1 }
 0x538   : > { %14063 = vrot.lane.b32.xlu1 %v14062_v59, %s14335_s22  ;;  %v4940_v24 = vrot.slane %v4939_v35, 2  ;;  %v4963_v45 = vrot.slane %v4962_v8, 2  ;;  %v11015_v19 = vor.u32 %v13277_v26, %v11014_v30  ;;  %v13421_v36 = vld [vmem:[#allocation10 + $0x5dc] sm:$0xf0]  ;;  %v11239_v46 = vor.u32 %v13333_v18, %v11238_v27 }
 0x539   : > { %14058 = vrot.lane.b32.xlu0 %v14057_v61, %s14332_s20  ;;  %v4950_v25 = vmax.f32 %v4948_v39, %v4949_v5  ;;  %v10982_v54 = vld [vmem:[#allocation10 + $0x100] sm:$0xf]  ;;  %v11591_v3 = vor.u32 %v13421_v36, %v11590_v29  ;;  %v4913_v22 = vmax.f32 %v4911_v37, %v4912_v49  ;;  %v4890_v4 = vmax.f32 %v4888_v0, %v4889_v38 }
 0x53a   : > { %7992 = vmatpush.bf16.msra.mxu2 %v11047_v50  ;;  %v11558_v59 = vld [vmem:[#allocation10 + $0x580] sm:$0xf]  ;;  %v4936_v20 = vmax.f32 %v4934_v21, %v4935_v1  ;;  %v4941_v31 = vmax.f32 %v4939_v35, %v4940_v24  ;;  %v10983_v11 = vor.u32 %v13269_v13, %v10982_v54  ;;  %v4964_v51 = vmax.f32 %v4962_v8, %v4963_v45 }
 0x53b   : > { %8006 = vmatpush.bf16.msra.mxu3 %v11271_v41  ;;  %v11206_v60 = vld [vmem:[#allocation10 + $0x2c0] sm:$0xf]  ;;  %8017 = vmatpush.bf16.msrb.mxu0 %v11591_v3  ;;  %v14067_v17 = vpack.i.bf16 %v4883_v12, %v4913_v22  ;;  %v14072_v2 = vpack.i.bf16 %v4950_v25, %v4890_v4  ;;  %v4952_v62 = vsel %vm4860_vm13, %v15282_v43, -inf  ;;  %v4951_v61 = vsel %vm4655_vm14, %v15251_v42, -inf }
 0x53c   : > { %v13325_v34 = vld [vmem:[#allocation10 + $0x2dc] sm:$0xf0]  ;;  %v4942_v28 = vrot.slane %v4941_v31, 1  ;;  %v4965_v53 = vrot.slane %v4964_v51, 1  ;;  %v15338_v49 = vmax.f32 %v4951_v61, %v4952_v62 }
 0x53d   : > { %v13413_v16 = vld [vmem:[#allocation10 + $0x59c] sm:$0xf0]  ;;  %v11207_v63 = vor.u32 %v13325_v34, %v11206_v60 }
 0x53e   : > { %v11559_v15 = vor.u32 %v13413_v16, %v11558_v59  ;;  %7993 = vmatpush.bf16.msra.mxu2 %v11015_v19  ;;  %v11526_v33 = vld [vmem:[#allocation10 + $0x540] sm:$0xf]  ;;  %v4943_v5 = vmax.f32 %v4941_v31, %v4942_v28  ;;  %v4966_v43 = vmax.f32 %v4964_v51, %v4965_v53  ;;  %v4675_v51 = vrot.slane %v15293_v32, 4 }
 0x53f   : > { %8007 = vmatpush.bf16.msra.mxu3 %v11239_v46  ;;  %v10950_v14 = vld [vmem:[#allocation10 + $0xc0] sm:$0xf]  ;;  %14068 = vrot.lane.b32.xlu2 %v14067_v17, %s14333_s21 }
 0x540   : > { %v13261_v58 = vld [vmem:[#allocation10 + $0xdc] sm:$0xf0]  ;;  %5057 = vrot.lane.b32.xlu1 %v4936_v20, %s14335_s22  ;;  %8018 = vmatpush.bf16.msrb.mxu0 %v11559_v15 }
 0x541   : > { %v13405_v9 = vld [vmem:[#allocation10 + $0x55c] sm:$0xf0]  ;;  %14073 = vrot.lane.b32.xlu0 %v14072_v2, %s14332_s20  ;;  %v10951_v10 = vor.u32 %v13261_v58, %v10950_v14 }
 0x542   : > { %v11174_v23 = vld [vmem:[#allocation10 + $0x280] sm:$0xf]  ;;  %v11527_v44 = vor.u32 %v13405_v9, %v11526_v33  ;;  %7994 = vmatpush.bf16.msra.mxu2 %v10983_v11 }
 0x543   : > { %v13317_v37 = vld [vmem:[#allocation10 + $0x29c] sm:$0xf0]  ;;  %8008 = vmatpush.bf16.msra.mxu3 %v11207_v63  ;;  %v4641_v63 = vrot.slane %v15319_v6, 4 }
 0x544   : > { %v11494_v57 = vld [vmem:[#allocation10 + $0x500] sm:$0xf]  ;;  %v11175_v0 = vor.u32 %v13317_v37, %v11174_v23  ;;  %8019 = vmatpush.bf16.msrb.mxu0 %v11527_v44 }
 0x545   : > { %v13397_v7 = vld [vmem:[#allocation10 + $0x51c] sm:$0xf0] }
 0x546   : > { %v10918_v39 = vld [vmem:[#allocation10 + $0x80] sm:$0xf]  ;;  %v11495_v50 = vor.u32 %v13397_v7, %v11494_v57  ;;  %7995 = vmatpush.bf16.msra.mxu2 %v10951_v10 }
 0x547   : > { %v13253_v21 = vld [vmem:[#allocation10 + $0x9c] sm:$0xf0]  ;;  %8009 = vmatpush.bf16.msra.mxu3 %v11175_v0  ;;  %5061 = vrot.lane.b32.xlu2 %v4943_v5, %s14333_s21 }
 0x548   : > { %v11142_v35 = vld [vmem:[#allocation10 + $0x240] sm:$0xf]  ;;  %v10919_v41 = vor.u32 %v13253_v21, %v10918_v39  ;;  %8020 = vmatpush.bf16.msrb.mxu0 %v11495_v50 }
 0x549   : > { %v13309_v8 = vld [vmem:[#allocation10 + $0x25c] sm:$0xf0]  ;;  %5069 = vrot.lane.b32.xlu0 %v4966_v43, %s14335_s22 }
 0x54a   : > { %v11462_v30 = vld [vmem:[#allocation10 + $0x4c0] sm:$0xf]  ;;  %v11143_v27 = vor.u32 %v13309_v8, %v11142_v35  ;;  %7996 = vmatpush.bf16.msra.mxu2 %v10919_v41 }
 0x54b   : > { %v13389_v26 = vld [vmem:[#allocation10 + $0x4dc] sm:$0xf0] }
 0x54c   : > { %v10886_v18 = vld [vmem:[#allocation10 + $0x40] sm:$0xf]  ;;  %v11463_v24 = vor.u32 %v13389_v26, %v11462_v30  ;;  %8010 = vmatpush.bf16.msra.mxu3 %v11143_v27 }
 0x54d   : > { %v13245_v12 = vld [vmem:[#allocation10 + $0x5c] sm:$0xf0] }
 0x54e   : > { %v11110_v38 = vld [vmem:[#allocation10 + $0x200] sm:$0xf]  ;;  %v10887_v45 = vor.u32 %v13245_v12, %v10886_v18  ;;  %8021 = vmatpush.bf16.msrb.mxu0 %v11463_v24 }
 0x54f   : > { %v13301_v29 = vld [vmem:[#allocation10 + $0x21c] sm:$0xf0] }
 0x550   : > { %v12358_v1 = vld [vmem:[#allocation10 + $0xbc0] sm:$0xf]  ;;  %v11111_v19 = vor.u32 %v13301_v29, %v11110_v38  ;;  %7997 = vmatpush.bf16.msra.mxu2 %v10887_v45 }
 0x551   : > { %v13613_v42 = vld [vmem:[#allocation10 + $0xbdc] sm:$0xf0] }
 0x552   : > { %v10854_v36 = vld [vmem:[#allocation10] sm:$0xf]  ;;  %v12359_v46 = vor.u32 %v13613_v42, %v12358_v1  ;;  %8011 = vmatpush.bf16.msra.mxu3 %v11111_v19 }
 0x553   : > { %v13237_v25 = vld [vmem:[#allocation10 + $0x1c] sm:$0xf0] }
 0x554   : > { %v12102_v54 = vld [vmem:[#allocation10 + $0x9c0] sm:$0xf]  ;;  %v10855_v22 = vor.u32 %v13237_v25, %v10854_v36 }
 0x555   : > { %v13549_v13 = vld [vmem:[#allocation10 + $0x9dc] sm:$0xf0] }
 0x556   : > { %v12326_v3 = vld [vmem:[#allocation10 + $0xb80] sm:$0xf]  ;;  %v12103_v60 = vor.u32 %v13549_v13, %v12102_v54  ;;  %8056 = vmatpush.bf16.msrb.mxu3 %v12359_v46  ;;  %7998 = vmatpush.bf16.msra.mxu2 %v10855_v22  ;;  %v4676_v13 = vmax.f32 %v15293_v32, %v4675_v51 }
 0x557   : > { %v13605_v59 = vld [vmem:[#allocation10 + $0xb9c] sm:$0xf0] }
 0x558   : > { %v12327_v34 = vor.u32 %v13605_v59, %v12326_v3  ;;  %v12070_v16 = vld [vmem:[#allocation10 + $0x980] sm:$0xf]  ;;  %v4642_v3 = vmax.f32 %v15319_v6, %v4641_v63 }
 0x559   : > { %v13541_v4 = vld [vmem:[#allocation10 + $0x99c] sm:$0xf0] }
 0x55a   : > { %v12294_v15 = vld [vmem:[#allocation10 + $0xb40] sm:$0xf]  ;;  %8043 = vmatpush.bf16.msrb.mxu2 %v12103_v60  ;;  %v12071_v20 = vor.u32 %v13541_v4, %v12070_v16  ;;  %8057 = vmatpush.bf16.msrb.mxu3 %v12327_v34 }
 0x55b   : > { %v13597_v17 = vld [vmem:[#allocation10 + $0xb5c] sm:$0xf0] }
 0x55c   : > { %v12295_v31 = vor.u32 %v13597_v17, %v12294_v15  ;;  %v12262_v11 = vld [vmem:[#allocation10 + $0xb00] sm:$0xf] }
 0x55d   : > { %v13589_v33 = vld [vmem:[#allocation10 + $0xb1c] sm:$0xf0] }
 0x55e   : > { %8044 = vmatpush.bf16.msrb.mxu2 %v12071_v20  ;;  %8058 = vmatpush.bf16.msrb.mxu3 %v12295_v31  ;;  %v12263_v2 = vor.u32 %v13589_v33, %v12262_v11  ;;  %v11430_v14 = vld [vmem:[#allocation10 + $0x480] sm:$0xf]  ;;  %v4677_v33 = vrot.slane %v4676_v13, 2 }
 0x55f   : > { %v13381_v58 = vld [vmem:[#allocation10 + $0x49c] sm:$0xf0] }
 0x560   : > { %v11846_v9 = vld [vmem:[#allocation10 + $0x7c0] sm:$0xf]  ;;  %v11431_v23 = vor.u32 %v13381_v58, %v11430_v14 }
 0x561   : > { %v13485_v37 = vld [vmem:[#allocation10 + $0x7dc] sm:$0xf0] }
 0x562   : > { %8059 = vmatpush.bf16.msrb.mxu3 %v12263_v2  ;;  %v12038_v44 = vld [vmem:[#allocation10 + $0x940] sm:$0xf]  ;;  %v11847_v10 = vor.u32 %v13485_v37, %v11846_v9  ;;  %8022 = vmatpush.bf16.msrb.mxu0 %v11431_v23  ;;  %v4643_v2 = vrot.slane %v4642_v3, 2 }
 0x563   : > { %v13533_v28 = vld [vmem:[#allocation10 + $0x95c] sm:$0xf0] }
 0x564   : > { %v12039_v57 = vor.u32 %v13533_v28, %v12038_v44  ;;  %v12230_v7 = vld [vmem:[#allocation10 + $0xac0] sm:$0xf]  ;;  %8030 = vmatpush.bf16.msrb.mxu1 %v11847_v10  ;;  %v4678_v10 = vmax.f32 %v4676_v13, %v4677_v33 }
 0x565   : > { %v13581_v62 = vld [vmem:[#allocation10 + $0xadc] sm:$0xf0] }
 0x566   : > { %v11398_v53 = vld [vmem:[#allocation10 + $0x440] sm:$0xf]  ;;  %v12231_v0 = vor.u32 %v13581_v62, %v12230_v7  ;;  %8045 = vmatpush.bf16.msrb.mxu2 %v12039_v57  ;;  %v4644_v57 = vmax.f32 %v4642_v3, %v4643_v2 }
 0x567   : > { %v13373_v39 = vld [vmem:[#allocation10 + $0x45c] sm:$0xf0] }
 0x568   : > { %v11814_v21 = vld [vmem:[#allocation10 + $0x780] sm:$0xf]  ;;  %v11399_v8 = vor.u32 %v13373_v39, %v11398_v53  ;;  %8060 = vmatpush.bf16.msrb.mxu3 %v12231_v0 }
 0x569   : > { %v13477_v35 = vld [vmem:[#allocation10 + $0x79c] sm:$0xf0] }
 0x56a   : > { %v11815_v50 = vor.u32 %v13477_v35, %v11814_v21  ;;  %v12006_v61 = vld [vmem:[#allocation10 + $0x900] sm:$0xf]  ;;  %8023 = vmatpush.bf16.msrb.mxu0 %v11399_v8  ;;  %v14029_v35 = vpop.permute.xlu0 %14028 }
 0x56b   : > { %v13525_v5 = vld [vmem:[#allocation10 + $0x91c] sm:$0xf0] }
 0x56c   : > { %v12198_v41 = vld [vmem:[#allocation10 + $0xa80] sm:$0xf]  ;;  %v12007_v30 = vor.u32 %v13525_v5, %v12006_v61  ;;  %8031 = vmatpush.bf16.msrb.mxu1 %v11815_v50  ;;  %v4679_v61 = vrot.slane %v4678_v10, 1  ;;  %v4645_v5 = vrot.slane %v4644_v57, 1 }
 0x56d   : > { %v13573_v26 = vld [vmem:[#allocation10 + $0xa9c] sm:$0xf0] }
 0x56e   : > { %v11366_v43 = vld [vmem:[#allocation10 + $0x400] sm:$0xf]  ;;  %v12199_v18 = vor.u32 %v13573_v26, %v12198_v41  ;;  %8046 = vmatpush.bf16.msrb.mxu2 %v12007_v30 }
 0x56f   : > { %v13365_v27 = vld [vmem:[#allocation10 + $0x41c] sm:$0xf0] }
 0x570   : > { %v12614_v12 = vld [vmem:[#allocation10 + $0xdc0] sm:$0xf]  ;;  %v11367_v1 = vor.u32 %v13365_v27, %v11366_v43  ;;  %8061 = vmatpush.bf16.msrb.mxu3 %v12199_v18  ;;  %v14031_v18 = vunpack.i.h.bf16 %v14029_v35 }
 0x571   : > { %v13677_v38 = vld [vmem:[#allocation10 + $0xddc] sm:$0xf0] }
 0x572   : > { %v11782_v29 = vld [vmem:[#allocation10 + $0x740] sm:$0xf]  ;;  %v12615_v19 = vor.u32 %v13677_v38, %v12614_v12  ;;  %8024 = vmatpush.bf16.msrb.mxu0 %v11367_v1  ;;  %v14030_v12 = vunpack.i.l.bf16 %v14029_v35  ;;  %v14034_v38 = vpop.permute.xlu1 %14033 }
 0x573   : > { %v13469_v42 = vld [vmem:[#allocation10 + $0x75c] sm:$0xf0] }
 0x574   : > { %v11974_v24 = vld [vmem:[#allocation10 + $0x8c0] sm:$0xf]  ;;  %v11783_v36 = vor.u32 %v13469_v42, %v11782_v29 }
 0x575   : > { %v13517_v45 = vld [vmem:[#allocation10 + $0x8dc] sm:$0xf0] }
 0x576   : > { %v12166_v25 = vld [vmem:[#allocation10 + $0xa40] sm:$0xf]  ;;  %v11975_v59 = vor.u32 %v13517_v45, %v11974_v24  ;;  %8069 = vmatpush.bf16.msra.mxu0 %v12615_v19  ;;  %8032 = vmatpush.bf16.msrb.mxu1 %v11783_v36  ;;  %v4680_v24 = vmax.f32 %v4678_v10, %v4679_v61  ;;  %v4646_v45 = vmax.f32 %v4644_v57, %v4645_v5  ;;  %v13401_v61 = vld [vmem:[#allocation10 + $0x544] sm:$0xf] }
 0x577   : > { %v13565_v46 = vld [vmem:[#allocation10 + $0xa5c] sm:$0xf0] }
 0x578   : > { %v12582_v54 = vld [vmem:[#allocation10 + $0xd80] sm:$0xf]  ;;  %v12167_v22 = vor.u32 %v13565_v46, %v12166_v25  ;;  %8047 = vmatpush.bf16.msrb.mxu2 %v11975_v59  ;;  %v14036_v46 = vunpack.i.h.bf16 %v14034_v38  ;;  %v5019_v13 = vsel %vm554_vm2, %v4646_v45, %v14031_v18  ;;  %v5023_v3 = vsel %vm554_vm2, %v4680_v24, %v14030_v12  ;;  %v13417_v59 = vld [vmem:[#allocation10 + $0x5c4] sm:$0xf] }
 0x579   : > { %v13669_v60 = vld [vmem:[#allocation10 + $0xd9c] sm:$0xf0]  ;;  %v4861_v12 = vsel %vm4860_vm13, %v15122_v56, -inf  ;;  %v13393_v45 = vld [vmem:[#allocation10 + $0x504] sm:$0xf]  ;;  %v4894_v56 = vrot.slane %v15168_v47, 4 }
 0x57a   : > { %v11750_v34 = vld [vmem:[#allocation10 + $0x700] sm:$0xf]  ;;  %v12583_v31 = vor.u32 %v13669_v60, %v12582_v54  ;;  %8062 = vmatpush.bf16.msrb.mxu3 %v12167_v22  ;;  %v14035_v54 = vunpack.i.l.bf16 %v14034_v38 }
 0x57b   : > { %v13461_v16 = vld [vmem:[#allocation10 + $0x71c] sm:$0xf0] }
 0x57c   : > { %v11942_v4 = vld [vmem:[#allocation10 + $0x880] sm:$0xf]  ;;  %v11751_v11 = vor.u32 %v13461_v16, %v11750_v34  ;;  %8070 = vmatpush.bf16.msra.mxu0 %v12583_v31  ;;  %v11592_v16 = vld [vmem:[#allocation10 + $0x5e0] sm:$0xf0] }
 0x57d   : > { %v13509_v15 = vld [vmem:[#allocation10 + $0x89c] sm:$0xf0] }
 0x57e   : > { %v12134_v17 = vld [vmem:[#allocation10 + $0xa00] sm:$0xf]  ;;  %v11943_v32 = vor.u32 %v13509_v15, %v11942_v4  ;;  %8033 = vmatpush.bf16.msrb.mxu1 %v11751_v11  ;;  %v13353_v4 = vld [vmem:[#allocation10 + $0x3c4] sm:$0xf] }
 0x57f   : > { %v13557_v20 = vld [vmem:[#allocation10 + $0xa1c] sm:$0xf0]  ;;  %v11336_v15 = vld [vmem:[#allocation10 + $0x3e0] sm:$0xf0] }
 0x580   : > { %v12135_v6 = vor.u32 %v13557_v20, %v12134_v17  ;;  %v12550_v51 = vld [vmem:[#allocation10 + $0xd40] sm:$0xf]  ;;  %8048 = vmatpush.bf16.msrb.mxu2 %v11943_v32 }
 0x581   : > { %v13661_v63 = vld [vmem:[#allocation10 + $0xd5c] sm:$0xf0] }
 0x582   : > { %v11718_v14 = vld [vmem:[#allocation10 + $0x6c0] sm:$0xf]  ;;  %v12551_v37 = vor.u32 %v13661_v63, %v12550_v51  ;;  %8063 = vmatpush.bf16.msrb.mxu3 %v12135_v6  ;;  %v4786_v6 = vsel %vm4785_vm8, %v15261_v55, -inf  ;;  %v5020_v51 = vsel %vm621_vm7, %v5019_v13, %v14036_v46  ;;  %v5024_v63 = vsel %vm621_vm7, %v5023_v3, %v14035_v54  ;;  %v11304_v55 = vld [vmem:[#allocation10 + $0x3a0] sm:$0xf0] }
 0x583   : > { %v13453_v58 = vld [vmem:[#allocation10 + $0x6dc] sm:$0xf0]  ;;  %v4787_v35 = vrot.slane %v4786_v6, 4  ;;  %v13329_v46 = vld [vmem:[#allocation10 + $0x304] sm:$0xf] }
 0x584   : > { %v11910_v9 = vld [vmem:[#allocation10 + $0x840] sm:$0xf]  ;;  %v11719_v44 = vor.u32 %v13453_v58, %v11718_v14  ;;  %8071 = vmatpush.bf16.msra.mxu0 %v12551_v37  ;;  %v11595_v37 = vor.u32 %v13417_v59, %v11592_v16  ;;  %v11240_v54 = vld [vmem:[#allocation10 + $0x320] sm:$0xf0] }
 0x585   : > { %v13501_v23 = vld [vmem:[#allocation10 + $0x85c] sm:$0xf0]  ;;  %v4788_v38 = vmax.f32 %v4786_v6, %v4787_v35  ;;  %v11243_v16 = vor.u32 %v13329_v46, %v11240_v54  ;;  %v13313_v6 = vld [vmem:[#allocation10 + $0x284] sm:$0xf] }
 0x586   : > { %v12518_v28 = vld [vmem:[#allocation10 + $0xd00] sm:$0xf]  ;;  %v11911_v7 = vor.u32 %v13501_v23, %v11910_v9  ;;  %8034 = vmatpush.bf16.msrb.mxu1 %v11719_v44  ;;  %v13409_v44 = vld [vmem:[#allocation10 + $0x584] sm:$0xf] }
 0x587   : > { %v13653_v62 = vld [vmem:[#allocation10 + $0xd1c] sm:$0xf0]  ;;  %v4789_v59 = vrot.slane %v4788_v38, 2 }
 0x588   : > { %v11686_v53 = vld [vmem:[#allocation10 + $0x680] sm:$0xf]  ;;  %v12519_v8 = vor.u32 %v13653_v62, %v12518_v28  ;;  %8049 = vmatpush.bf16.msrb.mxu2 %v11911_v7  ;;  %v11339_v28 = vor.u32 %v13353_v4, %v11336_v15  ;;  %v11560_v7 = vld [vmem:[#allocation10 + $0x5a0] sm:$0xf0] }
 0x589   : > { %v13445_v0 = vld [vmem:[#allocation10 + $0x69c] sm:$0xf0]  ;;  %v14044_v34 = vpop.permute.xlu2 %14043  ;;  %v13345_v62 = vld [vmem:[#allocation10 + $0x384] sm:$0xf] }
 0x58a   : > { %v11878_v39 = vld [vmem:[#allocation10 + $0x800] sm:$0xf]  ;;  %v11687_v50 = vor.u32 %v13445_v0, %v11686_v53  ;;  %8072 = vmatpush.bf16.msra.mxu0 %v12519_v8  ;;  %v14046_v31 = vunpack.i.h.bf16 %v14044_v34  ;;  %v14045_v11 = vunpack.i.l.bf16 %v14044_v34  ;;  %v11307_v5 = vor.u32 %v13345_v62, %v11304_v55  ;;  %v13385_v34 = vld [vmem:[#allocation10 + $0x4c4] sm:$0xf] }
 0x58b   : > { %v13493_v21 = vld [vmem:[#allocation10 + $0x81c] sm:$0xf0]  ;;  %v13321_v4 = vld [vmem:[#allocation10 + $0x2c4] sm:$0xf] }
 0x58c   : > { %v11879_v41 = vor.u32 %v13493_v21, %v11878_v39  ;;  %v12486_v30 = vld [vmem:[#allocation10 + $0xcc0] sm:$0xf]  ;;  %8035 = vmatpush.bf16.msrb.mxu1 %v11687_v50  ;;  %v5022_v9 = vsel %vm5021_vm9, %v5020_v51, %v14046_v31  ;;  %v5025_v23 = vsel %vm5021_vm9, %v5024_v63, %v14045_v11  ;;  %v11563_v50 = vor.u32 %v13409_v44, %v11560_v7  ;;  %v11208_v15 = vld [vmem:[#allocation10 + $0x2e0] sm:$0xf0] }
 0x58d   : > { %v13645_v26 = vld [vmem:[#allocation10 + $0xcdc] sm:$0xf0]  ;;  %v15354_v10 = vpack.c.bf16 %v5022_v9, %v5022_v9  ;;  %v15356_v57 = vpack.c.bf16 %v5025_v23, %v5025_v23  ;;  %v4790_v31 = vmax.f32 %v4788_v38, %v4789_v59  ;;  %v11176_v51 = vld [vmem:[#allocation10 + $0x2a0] sm:$0xf0] }
 0x58e   : > { %v11654_v43 = vld [vmem:[#allocation10 + $0x640] sm:$0xf]  ;;  %v12487_v29 = vor.u32 %v13645_v26, %v12486_v30  ;;  %8050 = vmatpush.bf16.msrb.mxu2 %v11879_v41  ;;  %v11528_v30 = vld [vmem:[#allocation10 + $0x560] sm:$0xf0]  ;;  %v11179_v44 = vor.u32 %v13313_v6, %v11176_v51 }
 0x58f   : > { %v13437_v27 = vld [vmem:[#allocation10 + $0x65c] sm:$0xf0]  ;;  %7999 = vmatmul.bf16.vlgmr.msra.gmra.mxu2 %v15354_v10  ;;  %8012 = vmatmul.bf16.vlgmr.msra.gmra.mxu3 %v15356_v57  ;;  %v13337_v26 = vld [vmem:[#allocation10 + $0x344] sm:$0xf]  ;;  %v11531_v24 = vor.u32 %v13401_v61, %v11528_v30  ;;  %v4791_v9 = vrot.slane %v4790_v31, 1 }
 0x590   : > { %v11655_v1 = vor.u32 %v13437_v27, %v11654_v43  ;;  %v12454_v42 = vld [vmem:[#allocation10 + $0xc80] sm:$0xf]  ;;  %8073 = vmatpush.bf16.msra.mxu0 %v12487_v29  ;;  %8121 = vmatpush.bf16.msra.mxu3 %v11595_v37  ;;  %v11272_v43 = vld [vmem:[#allocation10 + $0x360] sm:$0xf0] }
 0x591   : > { %v13637_v19 = vld [vmem:[#allocation10 + $0xc9c] sm:$0xf0]  ;;  %v15370_v63 = vpop.permute.xlu2 %14048  ;;  %v11400_v7 = vld [vmem:[#allocation10 + $0x460] sm:$0xf0]  ;;  %v4792_v35 = vmax.f32 %v4790_v31, %v4791_v9 }
 0x592   : > { %v11622_v36 = vld [vmem:[#allocation10 + $0x600] sm:$0xf]  ;;  %8036 = vmatpush.bf16.msrb.mxu1 %v11655_v1  ;;  %v12455_v17 = vor.u32 %v13637_v19, %v12454_v42  ;;  %8108 = vmatpush.bf16.msra.mxu2 %v11339_v28  ;;  %v4922_v42 = vsel %vm4860_vm13, %v15284_v40, -inf  ;;  %v11275_v19 = vor.u32 %v13337_v26, %v11272_v43  ;;  %v4921_v40 = vsel %vm4655_vm14, %v15203_v52, -inf  ;;  %v13377_v52 = vld [vmem:[#allocation10 + $0x484] sm:$0xf] }
 0x593   : > { %v13429_v25 = vld [vmem:[#allocation10 + $0x61c] sm:$0xf0]  ;;  %v13305_v62 = vld [vmem:[#allocation10 + $0x244] sm:$0xf] }
 0x594   : > { %v12742_v22 = vld [vmem:[#allocation10 + $0xec0] sm:$0xf]  ;;  %v11623_v20 = vor.u32 %v13429_v25, %v11622_v36  ;;  %8074 = vmatpush.bf16.msra.mxu0 %v12455_v17  ;;  %8122 = vmatpush.bf16.msra.mxu3 %v11563_v50  ;;  %v4859_v36 = vsel %vm4655_vm14, %v15120_v48, -inf  ;;  %v11496_v25 = vld [vmem:[#allocation10 + $0x520] sm:$0xf0] }
 0x595   : > { %v13709_v60 = vld [vmem:[#allocation10 + $0xedc] sm:$0xf0]  ;;  %v4862_v13 = vmax.f32 %v4859_v36, %v4861_v12  ;;  %v11464_v48 = vld [vmem:[#allocation10 + $0x4e0] sm:$0xf0]  ;;  %v14050_v36 = vunpack.i.l.bf16 %v15370_v63 }
 0x596   : > { %v12743_v33 = vor.u32 %v13709_v60, %v12742_v22  ;;  %v12422_v2 = vld [vmem:[#allocation10 + $0xc40] sm:$0xf]  ;;  %8037 = vmatpush.bf16.msrb.mxu1 %v11623_v20  ;;  %8109 = vmatpush.bf16.msra.mxu2 %v11307_v5  ;;  %v4923_v22 = vmax.f32 %v4921_v40, %v4922_v42  ;;  %v11499_v60 = vor.u32 %v13393_v45, %v11496_v25  ;;  %v11144_v55 = vld [vmem:[#allocation10 + $0x260] sm:$0xf0] }
 0x597   : > { %v13629_v32 = vld [vmem:[#allocation10 + $0xc5c] sm:$0xf0]  ;;  %v4863_v17 = vrot.slane %v4862_v13, 4  ;;  %v4895_v20 = vmax.f32 %v15168_v47, %v4894_v56  ;;  %v13369_v47 = vld [vmem:[#allocation10 + $0x444] sm:$0xf]  ;;  %v11147_v43 = vor.u32 %v13305_v62, %v11144_v55 }
 0x598   : > { %v12710_v14 = vld [vmem:[#allocation10 + $0xe80] sm:$0xf]  ;;  %v12423_v53 = vor.u32 %v13629_v32, %v12422_v2  ;;  %8123 = vmatpush.bf16.msra.mxu3 %v11531_v24  ;;  %v4924_v11 = vrot.slane %v4923_v22, 4  ;;  %v11211_v2 = vor.u32 %v13321_v4, %v11208_v15  ;;  %v11432_v32 = vld [vmem:[#allocation10 + $0x4a0] sm:$0xf0]  ;;  %v11403_v30 = vor.u32 %v13369_v47, %v11400_v7 }
 0x599   : > { %v13701_v58 = vld [vmem:[#allocation10 + $0xe9c] sm:$0xf0]  ;;  %v11435_v37 = vor.u32 %v13377_v52, %v11432_v32  ;;  %v13481_v5 = vld [vmem:[#allocation10 + $0x7c4] sm:$0xf]  ;;  %v15378_v56 = vpop.permute.xlu2 %14068 }
 0x59a   : > { %8086 = vmatpush.bf16.msra.mxu1 %v12743_v33  ;;  %v12711_v0 = vor.u32 %v13701_v58, %v12710_v14  ;;  %v12390_v39 = vld [vmem:[#allocation10 + $0xc00] sm:$0xf]  ;;  %8075 = vmatpush.bf16.msra.mxu0 %v12423_v53  ;;  %v11467_v33 = vor.u32 %v13385_v34, %v11464_v48  ;;  %v4864_v14 = vmax.f32 %v4862_v13, %v4863_v17  ;;  %v4896_v58 = vrot.slane %v4895_v20, 2  ;;  %v13361_v26 = vld [vmem:[#allocation10 + $0x404] sm:$0xf] }
 0x59b   : > { %v13621_v21 = vld [vmem:[#allocation10 + $0xc1c] sm:$0xf0]  ;;  %8110 = vmatpush.bf16.msra.mxu2 %v11275_v19  ;;  %v4925_v23 = vmax.f32 %v4923_v22, %v4924_v11  ;;  %v11368_v38 = vld [vmem:[#allocation10 + $0x420] sm:$0xf0]  ;;  %v14070_v31 = vunpack.i.l.bf16 %v15378_v56 }
 0x59c   : > { %v12678_v8 = vld [vmem:[#allocation10 + $0xe40] sm:$0xf]  ;;  %v12391_v27 = vor.u32 %v13621_v21, %v12390_v39  ;;  %8124 = vmatpush.bf16.msra.mxu3 %v11499_v60  ;;  %v4897_v39 = vmax.f32 %v4895_v20, %v4896_v58  ;;  %v4954_v21 = vrot.slane %v15338_v49, 4  ;;  %v11816_v40 = vld [vmem:[#allocation10 + $0x7a0] sm:$0xf0]  ;;  %v11371_v59 = vor.u32 %v13361_v26, %v11368_v38 }
 0x59d   : > { %v13693_v41 = vld [vmem:[#allocation10 + $0xe5c] sm:$0xf0]  ;;  %v4926_v50 = vrot.slane %v4925_v23, 2  ;;  %v13289_v17 = vld [vmem:[#allocation10 + $0x1c4] sm:$0xf] }
 0x59e   : > { %8087 = vmatpush.bf16.msra.mxu1 %v12711_v0  ;;  %v12679_v18 = vor.u32 %v13693_v41, %v12678_v8  ;;  %v12646_v29 = vld [vmem:[#allocation10 + $0xe00] sm:$0xf]  ;;  %8076 = vmatpush.bf16.msra.mxu0 %v12391_v27  ;;  %v4865_v0 = vrot.slane %v4864_v14, 2  ;;  %v11848_v41 = vld [vmem:[#allocation10 + $0x7e0] sm:$0xf0]  ;;  %v4898_v45 = vrot.slane %v4897_v39, 1  ;;  %v4955_v19 = vmax.f32 %v15338_v49, %v4954_v21 }
 0x59f   : > { %v13685_v1 = vld [vmem:[#allocation10 + $0xe1c] sm:$0xf0]  ;;  %8111 = vmatpush.bf16.msra.mxu2 %v11243_v16  ;;  %v11851_v46 = vor.u32 %v13481_v5, %v11848_v41  ;;  %v4927_v54 = vmax.f32 %v4925_v23, %v4926_v50  ;;  %v14051_v49 = vunpack.i.h.bf16 %v15370_v63  ;;  %v11080_v20 = vld [vmem:[#allocation10 + $0x1e0] sm:$0xf0] }
 0x5a0   : > { %v12647_v3 = vor.u32 %v13685_v1, %v12646_v29  ;;  %8125 = vmatpush.bf16.msra.mxu3 %v11467_v33  ;;  %v13297_v29 = vld [vmem:[#allocation10 + $0x204] sm:$0xf]  ;;  %v4866_v24 = vmax.f32 %v4864_v14, %v4865_v0  ;;  %v4899_v48 = vmax.f32 %v4897_v39, %v4898_v45  ;;  %v4956_v9 = vrot.slane %v4955_v19, 2 }
 0x5a1   : > { %v11112_v1 = vld [vmem:[#allocation10 + $0x220] sm:$0xf0]  ;;  %v4928_v63 = vrot.slane %v4927_v54, 1  ;;  %v5062_v45 = vpop.permute.xlu2 %5061 }
 0x5a2   : > { %8088 = vmatpush.bf16.msra.mxu1 %v12679_v18  ;;  %v14039_v28 = vpop.permute.xlu1 %14038  ;;  %v11115_v22 = vor.u32 %v13297_v29, %v11112_v1  ;;  %v4867_v16 = vrot.slane %v4866_v24, 1  ;;  %v12616_v32 = vld [vmem:[#allocation10 + $0xde0] sm:$0xf0]  ;;  %v4957_v41 = vmax.f32 %v4955_v19, %v4956_v9 }
 0x5a3   : > { %8112 = vmatpush.bf16.msra.mxu2 %v11211_v2  ;;  %v14054_v53 = vpop.permute.xlu0 %14053  ;;  %v14040_v61 = vunpack.i.l.bf16 %v14039_v28  ;;  %v14041_v27 = vunpack.i.h.bf16 %v14039_v28  ;;  %v13673_v2 = vld [vmem:[#allocation10 + $0xdc4] sm:$0xf]  ;;  %v4929_v50 = vmax.f32 %v4927_v54, %v4928_v63 }
 0x5a4   : > { %v14055_v8 = vunpack.i.l.bf16 %v14054_v53  ;;  %8126 = vmatpush.bf16.msra.mxu3 %v11435_v37  ;;  %v14056_v18 = vunpack.i.h.bf16 %v14054_v53  ;;  %v13465_v14 = vld [vmem:[#allocation10 + $0x744] sm:$0xf]  ;;  %v12619_v62 = vor.u32 %v13673_v2, %v12616_v32  ;;  %v4868_v0 = vmax.f32 %v4866_v24, %v4867_v16 }
 0x5a5   : > { %v11784_v58 = vld [vmem:[#allocation10 + $0x760] sm:$0xf0] }
 0x5a6   : > { %8089 = vmatpush.bf16.msra.mxu1 %v12647_v3  ;;  %v5026_v12 = vsel %vm554_vm2, %v14055_v8, %v4792_v35  ;;  %v13473_v3 = vld [vmem:[#allocation10 + $0x784] sm:$0xf]  ;;  %v5029_v60 = vsel %vm554_vm2, %v14050_v36, %v14056_v18  ;;  %v11787_v21 = vor.u32 %v13465_v14, %v11784_v58  ;;  %v14071_v18 = vunpack.i.h.bf16 %v15378_v56 }
 0x5a7   : > { %8113 = vmatpush.bf16.msra.mxu2 %v11179_v44  ;;  %v5027_v42 = vsel %vm621_vm7, %v5026_v12, %v14040_v61  ;;  %v11819_v52 = vor.u32 %v13473_v3, %v11816_v40  ;;  %v5030_v51 = vsel %vm621_vm7, %v5029_v60, %v14051_v49  ;;  %v11083_v44 = vor.u32 %v13289_v17, %v11080_v20  ;;  %v13281_v55 = vld [vmem:[#allocation10 + $0x184] sm:$0xf] }
 0x5a8   : > { %v5028_v25 = vsel %vm5021_vm9, %v5027_v42, %v14041_v27  ;;  %8127 = vmatpush.bf16.msra.mxu3 %v11403_v30  ;;  %v11048_v53 = vld [vmem:[#allocation10 + $0x1a0] sm:$0xf0]  ;;  %v4958_v56 = vrot.slane %v4957_v41, 1 }
 0x5a9   : > { %v15380_v13 = vpack.c.bf16 %v5028_v25, %v5028_v25  ;;  %v13665_v35 = vld [vmem:[#allocation10 + $0xd84] sm:$0xf] }
 0x5aa   : > { %v14064_v34 = vpop.permute.xlu1 %14063  ;;  %v12584_v8 = vld [vmem:[#allocation10 + $0xda0] sm:$0xf0] }
 0x5ab   : > { %8114 = vmatpush.bf16.msra.mxu2 %v11147_v43  ;;  %v14065_v4 = vunpack.i.l.bf16 %v14064_v34  ;;  %v14059_v15 = vpop.permute.xlu0 %14058  ;;  %8025 = vmatmul.bf16.vlgmr.msrb.gmra.mxu0 %v15380_v13  ;;  %v14066_v23 = vunpack.i.h.bf16 %v14064_v34  ;;  %v13457_v61 = vld [vmem:[#allocation10 + $0x704] sm:$0xf]  ;;  %v11051_v43 = vor.u32 %v13281_v55, %v11048_v53  ;;  %v12587_v29 = vor.u32 %v13665_v35, %v12584_v8 }
 0x5ac   : > { %v14061_v11 = vunpack.i.h.bf16 %v14059_v15  ;;  %v14060_v33 = vunpack.i.l.bf16 %v14059_v15  ;;  %8134 = vmatpush.bf16.msrb.mxu0 %v11851_v46  ;;  %8128 = vmatpush.bf16.msra.mxu3 %v11371_v59  ;;  %v11752_v5 = vld [vmem:[#allocation10 + $0x720] sm:$0xf0] }
 0x5ad   : > { %v5075_v6 = vsel %vm554_vm2, %v4899_v48, %v14065_v4  ;;  %v5072_v30 = vsel %vm554_vm2, %v4868_v0, %v14066_v23  ;;  %v13273_v27 = vld [vmem:[#allocation10 + $0x144] sm:$0xf]  ;;  %v11755_v25 = vor.u32 %v13457_v61, %v11752_v5 }
 0x5ae   : > { %v5076_v37 = vsel %vm621_vm7, %v5075_v6, %v14070_v31  ;;  %v5031_v47 = vsel %vm5021_vm9, %v5030_v51, %v14060_v33  ;;  %v11016_v1 = vld [vmem:[#allocation10 + $0x160] sm:$0xf0]  ;;  %v5073_v40 = vsel %vm621_vm7, %v5072_v30, %v14071_v18  ;;  %v4959_v51 = vmax.f32 %v4957_v41, %v4958_v56 }
 0x5af   : > { %8115 = vmatpush.bf16.msra.mxu2 %v11115_v22  ;;  %v5077_v28 = vsel %vm5021_vm9, %v5076_v37, %v14061_v11  ;;  %v15391_v7 = vpack.c.bf16 %v5031_v47, %v5031_v47  ;;  %v13609_v42 = vld [vmem:[#allocation10 + $0xbc4] sm:$0xf]  ;;  %v11019_v49 = vor.u32 %v13273_v27, %v11016_v1 }
 0x5b0   : > { %v15393_v39 = vpack.c.bf16 %v5077_v28, %v5077_v28  ;;  %8135 = vmatpush.bf16.msrb.mxu0 %v11819_v52  ;;  %v12360_v24 = vld [vmem:[#allocation10 + $0xbe0] sm:$0xf0] }
 0x5b1   : > { %8038 = vmatmul.bf16.vlgmr.msrb.gmra.mxu1 %v15391_v7  ;;  %v13657_v46 = vld [vmem:[#allocation10 + $0xd44] sm:$0xf]  ;;  %v12363_v16 = vor.u32 %v13609_v42, %v12360_v24 }
 0x5b2   : > { %v5058_v26 = vpop.permute.xlu1 %5057  ;;  %8064 = vmatmul.bf16.vlgmr.msrb.gmra.mxu3 %v15393_v39  ;;  %8095 = vmatpush.bf16.msrb.mxu1 %v11083_v44  ;;  %v12552_v54 = vld [vmem:[#allocation10 + $0xd60] sm:$0xf0] }
 0x5b3   : > { %v5078_v12 = vsel %vm554_vm2, %v4929_v50, %v5058_v26  ;;  %8173 = vmatpush.bf16.msrb.mxu3 %v12619_v62  ;;  %v14074_v38 = vpop.permute.xlu0 %14073  ;;  %v13449_v59 = vld [vmem:[#allocation10 + $0x6c4] sm:$0xf]  ;;  %v12555_v15 = vor.u32 %v13657_v46, %v12552_v54 }
 0x5b4   : > { %v14076_v19 = vunpack.i.h.bf16 %v14074_v38  ;;  %v14075_v36 = vunpack.i.l.bf16 %v14074_v38  ;;  %8136 = vmatpush.bf16.msrb.mxu0 %v11787_v21  ;;  %v5079_v3 = vsel %vm621_vm7, %v5078_v12, %v5062_v45  ;;  %v11720_v22 = vld [vmem:[#allocation10 + $0x6e0] sm:$0xf0] }
 0x5b5   : > { %v13265_v48 = vld [vmem:[#allocation10 + $0x104] sm:$0xf]  ;;  %v11723_v11 = vor.u32 %v13449_v59, %v11720_v22 }
 0x5b6   : > { %v5080_v60 = vsel %vm5021_vm9, %v5079_v3, %v14076_v19  ;;  %v5074_v34 = vsel %vm5021_vm9, %v5073_v40, %v14075_v36  ;;  %8096 = vmatpush.bf16.msrb.mxu1 %v11051_v43  ;;  %v10984_v17 = vld [vmem:[#allocation10 + $0x120] sm:$0xf0] }
 0x5b7   : > { %v15404_v4 = vpack.c.bf16 %v5074_v34, %v5074_v34  ;;  %8174 = vmatpush.bf16.msrb.mxu3 %v12587_v29  ;;  %v13601_v20 = vld [vmem:[#allocation10 + $0xb84] sm:$0xf]  ;;  %v15406_v2 = vpack.c.bf16 %v5080_v60, %v5080_v60  ;;  %v10987_v63 = vor.u32 %v13265_v48, %v10984_v17 }
 0x5b8   : > { %v12328_v31 = vld [vmem:[#allocation10 + $0xba0] sm:$0xf0]  ;;  %8137 = vmatpush.bf16.msrb.mxu0 %v11755_v25 }
 0x5b9   : > { %v13649_v33 = vld [vmem:[#allocation10 + $0xd04] sm:$0xf]  ;;  %8051 = vmatmul.bf16.vlgmr.msrb.gmra.mxu2 %v15404_v4  ;;  %v12331_v14 = vor.u32 %v13601_v20, %v12328_v31 }
 0x5ba   : > { %v12520_v52 = vld [vmem:[#allocation10 + $0xd20] sm:$0xf0]  ;;  %8097 = vmatpush.bf16.msrb.mxu1 %v11019_v49  ;;  %8160 = vmatpush.bf16.msrb.mxu2 %v12363_v16 }
 0x5bb   : > { %v13441_v32 = vld [vmem:[#allocation10 + $0x684] sm:$0xf]  ;;  %8175 = vmatpush.bf16.msrb.mxu3 %v12555_v15  ;;  %v5070_v58 = vpop.permute.xlu0 %5069  ;;  %8077 = vmatmul.bf16.vlgmr.msra.gmra.mxu0 %v15406_v2  ;;  %v12523_v9 = vor.u32 %v13649_v33, %v12520_v52 }
 0x5bc   : > { %v11688_v6 = vld [vmem:[#allocation10 + $0x6a0] sm:$0xf0]  ;;  %v5081_v44 = vsel %vm554_vm2, %v4959_v51, %v5070_v58  ;;  %8138 = vmatpush.bf16.msrb.mxu0 %v11723_v11 }
 0x5bd   : > { %v13257_v23 = vld [vmem:[#allocation10 + $0xc4] sm:$0xf]  ;;  %v11691_v28 = vor.u32 %v13441_v32, %v11688_v6  ;;  %v15411_v8 = vpack.c.bf16 %v5081_v44, %v5081_v44  ;;  %v11854_v32 = vld [vmem:[#allocation10 + $0x7c8] sm:$0xf] }
 0x5be   : > { %v10952_v37 = vld [vmem:[#allocation10 + $0xe0] sm:$0xf0]  ;;  %8098 = vmatpush.bf16.msrb.mxu1 %v10987_v63  ;;  %8161 = vmatpush.bf16.msrb.mxu2 %v12331_v14  ;;  %v13486_v6 = vld [vmem:[#allocation10 + $0x7e4] sm:$0xf0] }
 0x5bf   : > { %v13593_v47 = vld [vmem:[#allocation10 + $0xb44] sm:$0xf]  ;;  %v10955_v35 = vor.u32 %v13257_v23, %v10952_v37  ;;  %8176 = vmatpush.bf16.msrb.mxu3 %v12523_v9  ;;  %v11855_v37 = vor.u32 %v13486_v6, %v11854_v32  ;;  %v11726_v32 = vld [vmem:[#allocation10 + $0x6c8] sm:$0xf] }
 0x5c0   : > { %v12296_v62 = vld [vmem:[#allocation10 + $0xb60] sm:$0xf0]  ;;  %8139 = vmatpush.bf16.msrb.mxu0 %v11691_v28  ;;  %v13454_v6 = vld [vmem:[#allocation10 + $0x6e4] sm:$0xf0] }
 0x5c1   : > { %v13641_v55 = vld [vmem:[#allocation10 + $0xcc4] sm:$0xf]  ;;  %v12299_v50 = vor.u32 %v13593_v47, %v12296_v62  ;;  %12772 = vmatmul.msk.bf16.vlgmr.msra.gmra.mxu1 %vm621_vm7, %v15411_v8 }
 0x5c2   : > { %v12488_v53 = vld [vmem:[#allocation10 + $0xce0] sm:$0xf0]  ;;  %8099 = vmatpush.bf16.msrb.mxu1 %v10955_v35  ;;  %8129 = vmatmul.bf16.vlgmr.msra.gmra.mxu3 %v15380_v13 }
 0x5c3   : > { %v13433_v0 = vld [vmem:[#allocation10 + $0x644] sm:$0xf]  ;;  %v12491_v61 = vor.u32 %v13641_v55, %v12488_v53  ;;  %8162 = vmatpush.bf16.msrb.mxu2 %v12299_v50  ;;  %v11822_v53 = vld [vmem:[#allocation10 + $0x788] sm:$0xf] }
 0x5c4   : > { %v11656_v21 = vld [vmem:[#allocation10 + $0x660] sm:$0xf0] }
 0x5c5   : > { %v13249_v5 = vld [vmem:[#allocation10 + $0x84] sm:$0xf]  ;;  %v11659_v26 = vor.u32 %v13433_v0, %v11656_v21  ;;  %8177 = vmatpush.bf16.msrb.mxu3 %v12491_v61  ;;  %v13478_v0 = vld [vmem:[#allocation10 + $0x7a4] sm:$0xf0] }
 0x5c6   : > { %v10920_v41 = vld [vmem:[#allocation10 + $0xa0] sm:$0xf0]  ;;  %v11086_v61 = vld [vmem:[#allocation10 + $0x1c8] sm:$0xf] }
 0x5c7   : > { %v13585_v30 = vld [vmem:[#allocation10 + $0xb04] sm:$0xf]  ;;  %v10923_v29 = vor.u32 %v13249_v5, %v10920_v41  ;;  %8140 = vmatpush.bf16.msrb.mxu0 %v11659_v26  ;;  %v13294_v5 = vld [vmem:[#allocation10 + $0x1e4] sm:$0xf0] }
 0x5c8   : > { %v12264_v43 = vld [vmem:[#allocation10 + $0xb20] sm:$0xf0] }
 0x5c9   : > { %v13633_v27 = vld [vmem:[#allocation10 + $0xc84] sm:$0xf]  ;;  %v12267_v24 = vor.u32 %v13585_v30, %v12264_v43  ;;  %8100 = vmatpush.bf16.msrb.mxu1 %v10923_v29  ;;  %8116 = vmatmul.bf16.vlgmr.msra.gmra.mxu2 %v15356_v57  ;;  %v11823_v30 = vor.u32 %v13478_v0, %v11822_v53  ;;  %v13422_v29 = vld [vmem:[#allocation10 + $0x5e4] sm:$0xf0] }
 0x5ca   : > { %v12456_v18 = vld [vmem:[#allocation10 + $0xca0] sm:$0xf0]  ;;  %v10958_v53 = vld [vmem:[#allocation10 + $0xc8] sm:$0xf] }
 0x5cb   : > { %v13425_v12 = vld [vmem:[#allocation10 + $0x604] sm:$0xf]  ;;  %v12459_v45 = vor.u32 %v13633_v27, %v12456_v18  ;;  %8163 = vmatpush.bf16.msrb.mxu2 %v12267_v24  ;;  %v13470_v24 = vld [vmem:[#allocation10 + $0x764] sm:$0xf0] }
 0x5cc   : > { %v11624_v38 = vld [vmem:[#allocation10 + $0x620] sm:$0xf0]  ;;  %v13262_v0 = vld [vmem:[#allocation10 + $0xe4] sm:$0xf0] }
 0x5cd   : > { %v13705_v1 = vld [vmem:[#allocation10 + $0xec4] sm:$0xf]  ;;  %v11627_v46 = vor.u32 %v13425_v12, %v11624_v38  ;;  %8178 = vmatpush.bf16.msrb.mxu3 %v12459_v45  ;;  %v11598_v38 = vld [vmem:[#allocation10 + $0x5c8] sm:$0xf] }
 0x5ce   : > { %v12744_v42 = vld [vmem:[#allocation10 + $0xee0] sm:$0xf0] }
 0x5cf   : > { %v13241_v19 = vld [vmem:[#allocation10 + $0x44] sm:$0xf]  ;;  %v12747_v56 = vor.u32 %v13705_v1, %v12744_v42  ;;  %8141 = vmatpush.bf16.msrb.mxu0 %v11627_v46  ;;  %v11087_v1 = vor.u32 %v13294_v5, %v11086_v61  ;;  %v11790_v42 = vld [vmem:[#allocation10 + $0x748] sm:$0xf]  ;;  %v11599_v46 = vor.u32 %v13422_v29, %v11598_v38 }
 0x5d0   : > { %v10888_v36 = vld [vmem:[#allocation10 + $0x60] sm:$0xf0] }
 0x5d1   : > { %v13577_v25 = vld [vmem:[#allocation10 + $0xac4] sm:$0xf]  ;;  %v10891_v59 = vor.u32 %v13241_v19, %v10888_v36  ;;  %v11054_v19 = vld [vmem:[#allocation10 + $0x188] sm:$0xf] }
 0x5d2   : > { %v12232_v54 = vld [vmem:[#allocation10 + $0xae0] sm:$0xf0]  ;;  %8142 = vmatmul.bf16.vlgmr.msrb.gmra.mxu0 %v15391_v7  ;;  %v13286_v36 = vld [vmem:[#allocation10 + $0x1a4] sm:$0xf0] }
 0x5d3   : > { %v13625_v3 = vld [vmem:[#allocation10 + $0xc44] sm:$0xf]  ;;  %v12235_v49 = vor.u32 %v13577_v25, %v12232_v54  ;;  %8190 = vmatpush.bf16.msra.mxu0 %v12747_v56  ;;  %8101 = vmatpush.bf16.msrb.mxu1 %v10891_v59  ;;  %v11566_v56 = vld [vmem:[#allocation10 + $0x588] sm:$0xf] }
 0x5d4   : > { %v12424_v40 = vld [vmem:[#allocation10 + $0xc60] sm:$0xf0]  ;;  %v13414_v59 = vld [vmem:[#allocation10 + $0x5a4] sm:$0xf0] }
 0x5d5   : > { %v13697_v22 = vld [vmem:[#allocation10 + $0xe84] sm:$0xf]  ;;  %v12427_v16 = vor.u32 %v13625_v3, %v12424_v40  ;;  %8164 = vmatpush.bf16.msrb.mxu2 %v12235_v49  ;;  %v11791_v3 = vor.u32 %v13470_v24, %v11790_v42  ;;  %v11022_v49 = vld [vmem:[#allocation10 + $0x148] sm:$0xf] }
 0x5d6   : > { %v12712_v60 = vld [vmem:[#allocation10 + $0xea0] sm:$0xf0]  ;;  %v11438_v24 = vld [vmem:[#allocation10 + $0x488] sm:$0xf] }
 0x5d7   : > { %v13233_v34 = vld [vmem:[#allocation10 + $0x4] sm:$0xf]  ;;  %v12715_v33 = vor.u32 %v13697_v22, %v12712_v60  ;;  %8179 = vmatpush.bf16.msrb.mxu3 %v12427_v16  ;;  %v11055_v22 = vor.u32 %v13286_v36, %v11054_v19  ;;  %v11758_v60 = vld [vmem:[#allocation10 + $0x708] sm:$0xf] }
 0x5d8   : > { %v10856_v48 = vld [vmem:[#allocation10 + $0x20] sm:$0xf0]  ;;  %v13278_v16 = vld [vmem:[#allocation10 + $0x164] sm:$0xf0] }
 0x5d9   : > { %v13569_v15 = vld [vmem:[#allocation10 + $0xa84] sm:$0xf]  ;;  %v10859_v51 = vor.u32 %v13233_v34, %v10856_v48  ;;  %8191 = vmatpush.bf16.msra.mxu0 %v12715_v33  ;;  %v13462_v34 = vld [vmem:[#allocation10 + $0x724] sm:$0xf0] }
 0x5da   : > { %v12200_v17 = vld [vmem:[#allocation10 + $0xaa0] sm:$0xf0]  ;;  %v13406_v33 = vld [vmem:[#allocation10 + $0x564] sm:$0xf0] }
 0x5db   : > { %v13617_v20 = vld [vmem:[#allocation10 + $0xc04] sm:$0xf]  ;;  %v12203_v58 = vor.u32 %v13569_v15, %v12200_v17  ;;  %8102 = vmatpush.bf16.msrb.mxu1 %v10859_v51  ;;  %v11567_v15 = vor.u32 %v13414_v59, %v11566_v56  ;;  %v10990_v51 = vld [vmem:[#allocation10 + $0x108] sm:$0xf] }
 0x5dc   : > { %v12392_v31 = vld [vmem:[#allocation10 + $0xc20] sm:$0xf0]  ;;  %v13382_v19 = vld [vmem:[#allocation10 + $0x4a4] sm:$0xf0] }
 0x5dd   : > { %v13545_v11 = vld [vmem:[#allocation10 + $0x9c4] sm:$0xf]  ;;  %v12395_v9 = vor.u32 %v13617_v20, %v12392_v31  ;;  %8165 = vmatpush.bf16.msrb.mxu2 %v12203_v58  ;;  %v11759_v20 = vor.u32 %v13462_v34, %v11758_v60  ;;  %v11630_v36 = vld [vmem:[#allocation10 + $0x608] sm:$0xf]  ;;  %v11439_v34 = vor.u32 %v13382_v19, %v11438_v24 }
 0x5de   : > { %v12104_v52 = vld [vmem:[#allocation10 + $0x9e0] sm:$0xf0]  ;;  %8103 = vmatmul.bf16.vlgmr.msrb.gmra.mxu1 %v15354_v10  ;;  %v13710_v56 = vld [vmem:[#allocation10 + $0xee4] sm:$0xf0] }
 0x5df   : > { %v13689_v63 = vld [vmem:[#allocation10 + $0xe44] sm:$0xf]  ;;  %v12107_v23 = vor.u32 %v13545_v11, %v12104_v52  ;;  %8180 = vmatpush.bf16.msrb.mxu3 %v12395_v9  ;;  %v11534_v11 = vld [vmem:[#allocation10 + $0x548] sm:$0xf]  ;;  %v11023_v52 = vor.u32 %v13278_v16, %v11022_v49 }
 0x5e0   : > { %v12680_v14 = vld [vmem:[#allocation10 + $0xe60] sm:$0xf0]  ;;  %v11535_v58 = vor.u32 %v13406_v33, %v11534_v11  ;;  %v10894_v59 = vld [vmem:[#allocation10 + $0x48] sm:$0xf] }
 0x5e1   : > { %v13561_v47 = vld [vmem:[#allocation10 + $0xa44] sm:$0xf]  ;;  %v12683_v62 = vor.u32 %v13689_v63, %v12680_v14  ;;  %8147 = vmatpush.bf16.msra.mxu1 %v12107_v23  ;;  %v13270_v63 = vld [vmem:[#allocation10 + $0x124] sm:$0xf0]  ;;  %v11727_v23 = vor.u32 %v13454_v6, %v11726_v32 }
 0x5e2   : > { %v12168_v44 = vld [vmem:[#allocation10 + $0xa60] sm:$0xf0]  ;;  %8181 = vmatmul.bf16.vlgmr.msrb.gmra.mxu3 %v15406_v2  ;;  %v13350_v11 = vld [vmem:[#allocation10 + $0x3a4] sm:$0xf0] }
 0x5e3   : > { %v13537_v28 = vld [vmem:[#allocation10 + $0x984] sm:$0xf]  ;;  %v12171_v50 = vor.u32 %v13561_v47, %v12168_v44  ;;  %8238 = vmatpush.bf16.msra.mxu3 %v11855_v37  ;;  %8192 = vmatpush.bf16.msra.mxu0 %v12683_v62  ;;  %v11502_v47 = vld [vmem:[#allocation10 + $0x508] sm:$0xf] }
 0x5e4   : > { %v12072_v55 = vld [vmem:[#allocation10 + $0x9a0] sm:$0xf0]  ;;  %v13398_v44 = vld [vmem:[#allocation10 + $0x524] sm:$0xf0] }
 0x5e5   : > { %v13681_v21 = vld [vmem:[#allocation10 + $0xe04] sm:$0xf]  ;;  %v12075_v41 = vor.u32 %v13537_v28, %v12072_v55  ;;  %8166 = vmatpush.bf16.msrb.mxu2 %v12171_v50  ;;  %v10991_v28 = vor.u32 %v13270_v63, %v10990_v51  ;;  %v11694_v62 = vld [vmem:[#allocation10 + $0x688] sm:$0xf] }
 0x5e6   : > { %v12648_v35 = vld [vmem:[#allocation10 + $0xe20] sm:$0xf0]  ;;  %v13446_v55 = vld [vmem:[#allocation10 + $0x6a4] sm:$0xf0] }
 0x5e7   : > { %v13553_v26 = vld [vmem:[#allocation10 + $0xa04] sm:$0xf]  ;;  %v12651_v18 = vor.u32 %v13681_v21, %v12648_v35  ;;  %8148 = vmatpush.bf16.msra.mxu1 %v12075_v41  ;;  %8239 = vmatpush.bf16.msra.mxu3 %v11823_v30  ;;  %v11503_v35 = vor.u32 %v13398_v44, %v11502_v47  ;;  %v11695_v61 = vor.u32 %v13446_v55, %v11694_v62  ;;  %v11470_v41 = vld [vmem:[#allocation10 + $0x4c8] sm:$0xf] }
 0x5e8   : > { %v12136_v43 = vld [vmem:[#allocation10 + $0xa20] sm:$0xf0]  ;;  %v13390_v30 = vld [vmem:[#allocation10 + $0x4e4] sm:$0xf0] }
 0x5e9   : > { %v13529_v27 = vld [vmem:[#allocation10 + $0x944] sm:$0xf]  ;;  %v12139_v45 = vor.u32 %v13553_v26, %v12136_v43  ;;  %8193 = vmatpush.bf16.msra.mxu0 %v12651_v18  ;;  %v10959_v26 = vor.u32 %v13262_v0, %v10958_v53  ;;  %v11662_v43 = vld [vmem:[#allocation10 + $0x648] sm:$0xf]  ;;  %v11471_v29 = vor.u32 %v13390_v30, %v11470_v41 }
 0x5ea   : > { %v12040_v12 = vld [vmem:[#allocation10 + $0x960] sm:$0xf0]  ;;  %v10926_v18 = vld [vmem:[#allocation10 + $0x88] sm:$0xf] }
 0x5eb   : > { %v12043_v25 = vor.u32 %v13529_v27, %v12040_v12  ;;  %v13521_v54 = vld [vmem:[#allocation10 + $0x904] sm:$0xf]  ;;  %8167 = vmatpush.bf16.msrb.mxu2 %v12139_v45  ;;  %8240 = vmatpush.bf16.msra.mxu3 %v11791_v3  ;;  %v13438_v27 = vld [vmem:[#allocation10 + $0x664] sm:$0xf0] }
 0x5ec   : > { %v12008_v40 = vld [vmem:[#allocation10 + $0x920] sm:$0xf0]  ;;  %12773 = vmatmul.msk.bf16.vlgmr.msra.gmra.mxu0 %vm621_vm7, %v15411_v8  ;;  %v13254_v12 = vld [vmem:[#allocation10 + $0xa4] sm:$0xf0]  ;;  %v11663_v45 = vor.u32 %v13438_v27, %v11662_v43 }
 0x5ed   : > { %8199 = vmatpush.bf16.msrb.mxu0 %v11087_v1  ;;  %8149 = vmatpush.bf16.msra.mxu1 %v12043_v25  ;;  %v12011_v48 = vor.u32 %v13521_v54, %v12008_v40  ;;  %v13513_v17 = vld [vmem:[#allocation10 + $0x8c4] sm:$0xf]  ;;  %v13430_v25 = vld [vmem:[#allocation10 + $0x624] sm:$0xf0] }
 0x5ee   : > { %v11976_v31 = vld [vmem:[#allocation10 + $0x8e0] sm:$0xf0]  ;;  %8168 = vmatmul.bf16.vlgmr.msrb.gmra.mxu2 %v15393_v39  ;;  %v11342_v54 = vld [vmem:[#allocation10 + $0x3c8] sm:$0xf]  ;;  %v11631_v49 = vor.u32 %v13430_v25, %v11630_v36 }
 0x5ef   : > { %8225 = vmatpush.bf16.msra.mxu2 %v11599_v46  ;;  %v11979_v14 = vor.u32 %v13513_v17, %v11976_v31  ;;  %v13505_v9 = vld [vmem:[#allocation10 + $0x884] sm:$0xf]  ;;  %8241 = vmatpush.bf16.msra.mxu3 %v11759_v20  ;;  %v10927_v46 = vor.u32 %v13254_v12, %v10926_v18  ;;  %v13358_v3 = vld [vmem:[#allocation10 + $0x3e4] sm:$0xf0] }
 0x5f0   : > { %v11944_v37 = vld [vmem:[#allocation10 + $0x8a0] sm:$0xf0]  ;;  %v12750_v40 = vld [vmem:[#allocation10 + $0xec8] sm:$0xf]  ;;  %v11343_v16 = vor.u32 %v13358_v3, %v11342_v54 }
 0x5f1   : > { %8200 = vmatpush.bf16.msrb.mxu0 %v11055_v22  ;;  %8150 = vmatpush.bf16.msra.mxu1 %v12011_v48  ;;  %v11947_v21 = vor.u32 %v13505_v9, %v11944_v37  ;;  %v13497_v50 = vld [vmem:[#allocation10 + $0x844] sm:$0xf]  ;;  %v13246_v22 = vld [vmem:[#allocation10 + $0x64] sm:$0xf0]  ;;  %v12751_v17 = vor.u32 %v13710_v56, %v12750_v40 }
 0x5f2   : > { %v11912_v5 = vld [vmem:[#allocation10 + $0x860] sm:$0xf0]  ;;  %v11406_v48 = vld [vmem:[#allocation10 + $0x448] sm:$0xf]  ;;  %v10895_v20 = vor.u32 %v13246_v22, %v10894_v59  ;;  %v13282_v22 = vld [vmem:[#allocation10 + $0x18c] sm:$0xf] }
 0x5f3   : > { %8226 = vmatpush.bf16.msra.mxu2 %v11567_v15  ;;  %8242 = vmatpush.bf16.msra.mxu3 %v11727_v23  ;;  %v11915_v38 = vor.u32 %v13497_v50, %v11912_v5  ;;  %v13489_v1 = vld [vmem:[#allocation10 + $0x804] sm:$0xf]  ;;  %v13374_v15 = vld [vmem:[#allocation10 + $0x464] sm:$0xf0] }
 0x5f4   : > { %v11880_v42 = vld [vmem:[#allocation10 + $0x820] sm:$0xf0]  ;;  %v11310_v31 = vld [vmem:[#allocation10 + $0x388] sm:$0xf]  ;;  %v11407_v51 = vor.u32 %v13374_v15, %v11406_v48 }
 0x5f5   : > { %8201 = vmatpush.bf16.msrb.mxu0 %v11023_v52  ;;  %8151 = vmatpush.bf16.msra.mxu1 %v11979_v14  ;;  %v11883_v60 = vor.u32 %v13489_v1, %v11880_v42  ;;  %v12718_v33 = vld [vmem:[#allocation10 + $0xe88] sm:$0xf]  ;;  %v13290_v1 = vld [vmem:[#allocation10 + $0x1cc] sm:$0xf] }
 0x5f6   : > { %v13702_v52 = vld [vmem:[#allocation10 + $0xea4] sm:$0xf0]  ;;  %v11088_v42 = vld [vmem:[#allocation10 + $0x1e8] sm:$0xf0] }
 0x5f7   : > { %8227 = vmatpush.bf16.msra.mxu2 %v11535_v58  ;;  %8243 = vmatpush.bf16.msra.mxu3 %v11695_v61  ;;  %v10862_v32 = vld [vmem:[#allocation10 + $0x8] sm:$0xf]  ;;  %v11311_v58 = vor.u32 %v13350_v11, %v11310_v31  ;;  %v12719_v47 = vor.u32 %v13702_v52, %v12718_v33  ;;  %v11091_v56 = vor.u32 %v13290_v1, %v11088_v42  ;;  %v13274_v52 = vld [vmem:[#allocation10 + $0x14c] sm:$0xf] }
 0x5f8   : > { %v13238_v6 = vld [vmem:[#allocation10 + $0x24] sm:$0xf0] }
 0x5f9   : > { %8202 = vmatpush.bf16.msrb.mxu0 %v10991_v28  ;;  %8152 = vmatpush.bf16.msra.mxu1 %v11947_v21  ;;  %v12110_v63 = vld [vmem:[#allocation10 + $0x9c8] sm:$0xf]  ;;  %v10863_v44 = vor.u32 %v13238_v6, %v10862_v32  ;;  %v11024_v32 = vld [vmem:[#allocation10 + $0x168] sm:$0xf0] }
 0x5fa   : > { %v13550_v14 = vld [vmem:[#allocation10 + $0x9e4] sm:$0xf0] }
 0x5fb   : > { %8228 = vmatpush.bf16.msra.mxu2 %v11503_v35  ;;  %8244 = vmatpush.bf16.msra.mxu3 %v11663_v45  ;;  %v11374_v9 = vld [vmem:[#allocation10 + $0x408] sm:$0xf]  ;;  %v12111_v53 = vor.u32 %v13550_v14, %v12110_v63 }
 0x5fc   : > { %v13366_v23 = vld [vmem:[#allocation10 + $0x424] sm:$0xf0] }
 0x5fd   : > { %8203 = vmatpush.bf16.msrb.mxu0 %v10959_v26  ;;  %8153 = vmatpush.bf16.msra.mxu1 %v11915_v38  ;;  %v11278_v37 = vld [vmem:[#allocation10 + $0x348] sm:$0xf]  ;;  %v11375_v35 = vor.u32 %v13366_v23, %v11374_v9 }
 0x5fe   : > { %v13342_v28 = vld [vmem:[#allocation10 + $0x364] sm:$0xf0] }
 0x5ff   : > { %8229 = vmatpush.bf16.msra.mxu2 %v11471_v29  ;;  %8245 = vmatpush.bf16.msra.mxu3 %v11631_v49  ;;  %v12622_v62 = vld [vmem:[#allocation10 + $0xdc8] sm:$0xf]  ;;  %v11279_v5 = vor.u32 %v13342_v28, %v11278_v37  ;;  %v13266_v28 = vld [vmem:[#allocation10 + $0x10c] sm:$0xf] }
 0x600   : > { %v13678_v55 = vld [vmem:[#allocation10 + $0xde4] sm:$0xf0] }
 0x601   : > { %8204 = vmatpush.bf16.msrb.mxu0 %v10927_v46  ;;  %8154 = vmatpush.bf16.msra.mxu1 %v11883_v60  ;;  %v12686_v0 = vld [vmem:[#allocation10 + $0xe48] sm:$0xf]  ;;  %v12623_v41 = vor.u32 %v13678_v55, %v12622_v62  ;;  %v11056_v60 = vld [vmem:[#allocation10 + $0x1a8] sm:$0xf0] }
 0x602   : > { %v13694_v21 = vld [vmem:[#allocation10 + $0xe64] sm:$0xf0]  ;;  %8246 = vmatmul.bf16.vlgmr.msra.gmra.mxu3 %v15391_v7  ;;  %v11059_v11 = vor.u32 %v13282_v22, %v11056_v60  ;;  %v10992_v62 = vld [vmem:[#allocation10 + $0x128] sm:$0xf0]  ;;  %v15429_v22 = vld [vmem:[#allocation11] sm:$0xff] }
 0x603   : > { %8230 = vmatpush.bf16.msra.mxu2 %v11439_v34  ;;  %8294 = vmatpush.bf16.msrb.mxu3 %v12751_v17  ;;  %v12078_v50 = vld [vmem:[#allocation10 + $0x988] sm:$0xf]  ;;  %v12687_v26 = vor.u32 %v13694_v21, %v12686_v0  ;;  %v13354_v60 = vld [vmem:[#allocation10 + $0x3cc] sm:$0xf] }
 0x604   : > { %8155 = vmatmul.bf16.vlgmr.msra.gmra.mxu1 %v15404_v4  ;;  %v13542_v61 = vld [vmem:[#allocation10 + $0x9a4] sm:$0xf0] }
 0x605   : > { %8212 = vmatpush.bf16.msrb.mxu1 %v11343_v16  ;;  %8205 = vmatpush.bf16.msrb.mxu0 %v10895_v20  ;;  %v11246_v30 = vld [vmem:[#allocation10 + $0x308] sm:$0xf]  ;;  %v12079_v12 = vor.u32 %v13542_v61, %v12078_v50 }
 0x606   : > { %v13334_v43 = vld [vmem:[#allocation10 + $0x324] sm:$0xf0] }
 0x607   : > { %8231 = vmatpush.bf16.msra.mxu2 %v11407_v51  ;;  %8295 = vmatpush.bf16.msrb.mxu3 %v12719_v47  ;;  %v12590_v27 = vld [vmem:[#allocation10 + $0xd88] sm:$0xf]  ;;  %v11247_v19 = vor.u32 %v13334_v43, %v11246_v30  ;;  %v11027_v47 = vor.u32 %v13274_v52, %v11024_v32  ;;  %v13242_v32 = vld [vmem:[#allocation10 + $0x4c] sm:$0xf] }
 0x608   : > { %v13670_v18 = vld [vmem:[#allocation10 + $0xda4] sm:$0xf0] }
 0x609   : > { %8213 = vmatpush.bf16.msrb.mxu1 %v11311_v58  ;;  %8206 = vmatpush.bf16.msrb.mxu0 %v10863_v44  ;;  %v12654_v38 = vld [vmem:[#allocation10 + $0xe08] sm:$0xf]  ;;  %v12591_v36 = vor.u32 %v13670_v18, %v12590_v27  ;;  %v13258_v27 = vld [vmem:[#allocation10 + $0xcc] sm:$0xf] }
 0x60a   : > { %v13686_v29 = vld [vmem:[#allocation10 + $0xe24] sm:$0xf0]  ;;  %v10960_v18 = vld [vmem:[#allocation10 + $0xe8] sm:$0xf0] }
 0x60b   : > { %8232 = vmatpush.bf16.msra.mxu2 %v11375_v35  ;;  %v12046_v24 = vld [vmem:[#allocation10 + $0x948] sm:$0xf]  ;;  %8296 = vmatpush.bf16.msrb.mxu3 %v12687_v26  ;;  %v12655_v46 = vor.u32 %v13686_v29, %v12654_v38 }
 0x60c   : > { %v13534_v45 = vld [vmem:[#allocation10 + $0x964] sm:$0xf0]  ;;  %8207 = vmatmul.bf16.vlgmr.msrb.gmra.mxu0 %v15354_v10 }
 0x60d   : > { %8251 = vmatpush.bf16.msra.mxu0 %v12111_v53  ;;  %8214 = vmatpush.bf16.msrb.mxu1 %v11279_v5  ;;  %v11214_v25 = vld [vmem:[#allocation10 + $0x2c8] sm:$0xf]  ;;  %v12047_v59 = vor.u32 %v13534_v45, %v12046_v24 }
 0x60e   : > { %v13326_v54 = vld [vmem:[#allocation10 + $0x2e4] sm:$0xf0]  ;;  %8233 = vmatmul.bf16.vlgmr.msra.gmra.mxu2 %v15380_v13 }
 0x60f   : > { %8277 = vmatpush.bf16.msrb.mxu2 %v12623_v41  ;;  %v12558_v3 = vld [vmem:[#allocation10 + $0xd48] sm:$0xf]  ;;  %v11215_v16 = vor.u32 %v13326_v54, %v11214_v25  ;;  %8297 = vmatpush.bf16.msrb.mxu3 %v12655_v46  ;;  %v10995_v41 = vor.u32 %v13266_v28, %v10992_v62  ;;  %v13250_v54 = vld [vmem:[#allocation10 + $0x8c] sm:$0xf] }
 0x610   : > { %v13662_v40 = vld [vmem:[#allocation10 + $0xd64] sm:$0xf0]  ;;  %v13474_v28 = vld [vmem:[#allocation10 + $0x78c] sm:$0xf] }
 0x611   : > { %8252 = vmatpush.bf16.msra.mxu0 %v12079_v12  ;;  %v12014_v34 = vld [vmem:[#allocation10 + $0x908] sm:$0xf]  ;;  %8215 = vmatpush.bf16.msrb.mxu1 %v11247_v19  ;;  %v12559_v48 = vor.u32 %v13662_v40, %v12558_v3  ;;  %v10963_v19 = vor.u32 %v13258_v27, %v10960_v18  ;;  %v10928_v3 = vld [vmem:[#allocation10 + $0xa8] sm:$0xf0] }
 0x612   : > { %v13526_v49 = vld [vmem:[#allocation10 + $0x924] sm:$0xf0]  ;;  %12774 = vmatmul.msk.bf16.vlgmr.msrb.gmra.mxu3 %vm621_vm7, %v15411_v8  ;;  %v11824_v62 = vld [vmem:[#allocation10 + $0x7a8] sm:$0xf0] }
 0x613   : > { %8278 = vmatpush.bf16.msrb.mxu2 %v12591_v36  ;;  %v11182_v15 = vld [vmem:[#allocation10 + $0x288] sm:$0xf]  ;;  %8303 = vmatpush.bf16.msra.mxu3 %v11091_v56  ;;  %v12015_v33 = vor.u32 %v13526_v49, %v12014_v34  ;;  %v11344_v34 = vld [vmem:[#allocation10 + $0x3e8] sm:$0xf0] }
 0x614   : > { %v13318_v17 = vld [vmem:[#allocation10 + $0x2a4] sm:$0xf0]  ;;  %v11347_v52 = vor.u32 %v13354_v60, %v11344_v34  ;;  %v13458_v60 = vld [vmem:[#allocation10 + $0x70c] sm:$0xf] }
 0x615   : > { %v12526_v20 = vld [vmem:[#allocation10 + $0xd08] sm:$0xf]  ;;  %8253 = vmatpush.bf16.msra.mxu0 %v12047_v59  ;;  %8216 = vmatpush.bf16.msrb.mxu1 %v11215_v16  ;;  %v11183_v63 = vor.u32 %v13318_v17, %v11182_v15  ;;  %v10931_v17 = vor.u32 %v13250_v54, %v10928_v3  ;;  %v11760_v34 = vld [vmem:[#allocation10 + $0x728] sm:$0xf0] }
 0x616   : > { %v13654_v31 = vld [vmem:[#allocation10 + $0xd24] sm:$0xf0] }
 0x617   : > { %v11982_v6 = vld [vmem:[#allocation10 + $0x8c8] sm:$0xf]  ;;  %8279 = vmatpush.bf16.msrb.mxu2 %v12559_v48  ;;  %v12527_v14 = vor.u32 %v13654_v31, %v12526_v20  ;;  %8304 = vmatpush.bf16.msra.mxu3 %v11059_v11  ;;  %v13482_v11 = vld [vmem:[#allocation10 + $0x7cc] sm:$0xf] }
 0x618   : > { %v13518_v51 = vld [vmem:[#allocation10 + $0x8e4] sm:$0xf0] }
 0x619   : > { %v11150_v58 = vld [vmem:[#allocation10 + $0x248] sm:$0xf]  ;;  %8254 = vmatpush.bf16.msra.mxu0 %v12015_v33  ;;  %v11983_v44 = vor.u32 %v13518_v51, %v11982_v6  ;;  %8217 = vmatpush.bf16.msrb.mxu1 %v11183_v63  ;;  %v11856_v33 = vld [vmem:[#allocation10 + $0x7e8] sm:$0xf0] }
 0x61a   : > { %v13310_v9 = vld [vmem:[#allocation10 + $0x264] sm:$0xf0]  ;;  %v10896_v6 = vld [vmem:[#allocation10 + $0x68] sm:$0xf0] }
 0x61b   : > { %v12494_v23 = vld [vmem:[#allocation10 + $0xcc8] sm:$0xf]  ;;  %8280 = vmatpush.bf16.msrb.mxu2 %v12527_v14  ;;  %v11151_v0 = vor.u32 %v13310_v9, %v11150_v58  ;;  %8305 = vmatpush.bf16.msra.mxu3 %v11027_v47  ;;  %v13346_v63 = vld [vmem:[#allocation10 + $0x38c] sm:$0xf]  ;;  %v7972_v58 = vperm.slane %v15429_v22, 0  ;;  %v10899_v47 = vor.u32 %v13242_v32, %v10896_v6 }
 0x61c   : > { %v13646_v37 = vld [vmem:[#allocation10 + $0xce4] sm:$0xf0]  ;;  %v11312_v14 = vld [vmem:[#allocation10 + $0x3a8] sm:$0xf0] }
 0x61d   : > { %v11950_v55 = vld [vmem:[#allocation10 + $0x888] sm:$0xf]  ;;  %v12495_v21 = vor.u32 %v13646_v37, %v12494_v23  ;;  %8255 = vmatpush.bf16.msra.mxu0 %v11983_v44  ;;  %8218 = vmatpush.bf16.msrb.mxu1 %v11151_v0  ;;  %v11859_v23 = vor.u32 %v13482_v11, %v11856_v33  ;;  %v10864_v0 = vld [vmem:[#allocation10 + $0x28] sm:$0xf0]  ;;  %v11763_v11 = vor.u32 %v13458_v60, %v11760_v34 }
 0x61e   : > { %v13510_v53 = vld [vmem:[#allocation10 + $0x8a4] sm:$0xf0] }
 0x61f   : > { %v11118_v35 = vld [vmem:[#allocation10 + $0x208] sm:$0xf]  ;;  %v11951_v30 = vor.u32 %v13510_v53, %v11950_v55  ;;  %8281 = vmatpush.bf16.msrb.mxu2 %v12495_v21  ;;  %8306 = vmatpush.bf16.msra.mxu3 %v10995_v41  ;;  %v11315_v55 = vor.u32 %v13346_v63, %v11312_v14  ;;  %v13234_v53 = vld [vmem:[#allocation10 + $0xc] sm:$0xf]  ;;  %v11827_v41 = vor.u32 %v13474_v28, %v11824_v62 }
 0x620   : > { %v13302_v50 = vld [vmem:[#allocation10 + $0x224] sm:$0xf0]  ;;  %v13546_v21 = vld [vmem:[#allocation10 + $0x9cc] sm:$0xf] }
 0x621   : > { %v12462_v61 = vld [vmem:[#allocation10 + $0xc88] sm:$0xf]  ;;  %v11119_v29 = vor.u32 %v13302_v50, %v11118_v35  ;;  %8256 = vmatpush.bf16.msra.mxu0 %v11951_v30  ;;  %v12112_v35 = vld [vmem:[#allocation10 + $0x9e8] sm:$0xf0]  ;;  %v8000_v30 = vpop.f32.mrf.mxu2 }
 0x622   : > { %v13638_v5 = vld [vmem:[#allocation10 + $0xca4] sm:$0xf0]  ;;  %v13338_v50 = vld [vmem:[#allocation10 + $0x34c] sm:$0xf] }
 0x623   : > { %v12366_v26 = vld [vmem:[#allocation10 + $0xbc8] sm:$0xf]  ;;  %v12463_v1 = vor.u32 %v13638_v5, %v12462_v61  ;;  %8219 = vmatpush.bf16.msrb.mxu1 %v11119_v29  ;;  %8307 = vmatpush.bf16.msra.mxu3 %v10963_v19  ;;  %v11280_v61 = vld [vmem:[#allocation10 + $0x368] sm:$0xf0] }
 0x624   : > { %v13614_v43 = vld [vmem:[#allocation10 + $0xbe4] sm:$0xf0]  ;;  %v11283_v29 = vor.u32 %v13338_v50, %v11280_v61  ;;  %v13330_v19 = vld [vmem:[#allocation10 + $0x30c] sm:$0xf] }
 0x625   : > { %v11918_v12 = vld [vmem:[#allocation10 + $0x848] sm:$0xf]  ;;  %v12367_v42 = vor.u32 %v13614_v43, %v12366_v26  ;;  %8282 = vmatpush.bf16.msrb.mxu2 %v12463_v1  ;;  %v8013_v26 = vpop.f32.mrf.mxu3  ;;  %v10867_v43 = vor.u32 %v13234_v53, %v10864_v0  ;;  %v13466_v1 = vld [vmem:[#allocation10 + $0x74c] sm:$0xf] }
 0x626   : > { %v13502_v38 = vld [vmem:[#allocation10 + $0x864] sm:$0xf0]  ;;  %8220 = vmatmul.bf16.vlgmr.msrb.gmra.mxu1 %v15356_v57  ;;  %v11728_v63 = vld [vmem:[#allocation10 + $0x6e8] sm:$0xf0] }
 0x627   : > { %v12430_v24 = vld [vmem:[#allocation10 + $0xc48] sm:$0xf]  ;;  %v11919_v36 = vor.u32 %v13502_v38, %v11918_v12  ;;  %8264 = vmatpush.bf16.msra.mxu1 %v12367_v42  ;;  %8308 = vmatpush.bf16.msra.mxu3 %v10931_v17  ;;  %v8001_v12 = vadd.f32 %v8000_v30, %v7972_v58  ;;  %v12115_v38 = vor.u32 %v13546_v21, %v12112_v35  ;;  %v11792_v42 = vld [vmem:[#allocation10 + $0x768] sm:$0xf0] }
 0x628   : > { %v13630_v45 = vld [vmem:[#allocation10 + $0xc64] sm:$0xf0]  ;;  %v11795_v54 = vor.u32 %v13466_v1, %v11792_v42  ;;  %v13522_v14 = vld [vmem:[#allocation10 + $0x90c] sm:$0xf] }
 0x629   : > { %v12334_v25 = vld [vmem:[#allocation10 + $0xb88] sm:$0xf]  ;;  %v12431_v59 = vor.u32 %v13630_v45, %v12430_v24  ;;  %8257 = vmatpush.bf16.msra.mxu0 %v11919_v36  ;;  %v13538_v24 = vld [vmem:[#allocation10 + $0x98c] sm:$0xf] }
 0x62a   : > { %v13606_v46 = vld [vmem:[#allocation10 + $0xba4] sm:$0xf0]  ;;  %v12080_v45 = vld [vmem:[#allocation10 + $0x9a8] sm:$0xf0] }
 0x62b   : > { %v11886_v40 = vld [vmem:[#allocation10 + $0x808] sm:$0xf]  ;;  %v12335_v49 = vor.u32 %v13606_v46, %v12334_v25  ;;  %8283 = vmatpush.bf16.msrb.mxu2 %v12431_v59  ;;  %8309 = vmatpush.bf16.msra.mxu3 %v10899_v47  ;;  %v11248_v36 = vld [vmem:[#allocation10 + $0x328] sm:$0xf0]  ;;  %v15435_v25 = vadd.f32 %v8013_v26, %v8001_v12 }
 0x62c   : > { %v13494_v56 = vld [vmem:[#allocation10 + $0x824] sm:$0xf0]  ;;  %v11251_v59 = vor.u32 %v13330_v19, %v11248_v36  ;;  %v12016_v58 = vld [vmem:[#allocation10 + $0x928] sm:$0xf0] }
 0x62d   : > { %v12398_v16 = vld [vmem:[#allocation10 + $0xc08] sm:$0xf]  ;;  %v11887_v20 = vor.u32 %v13494_v56, %v11886_v40  ;;  %8265 = vmatpush.bf16.msra.mxu1 %v12335_v49  ;;  %v12083_v56 = vor.u32 %v13538_v24, %v12080_v45  ;;  %v13530_v49 = vld [vmem:[#allocation10 + $0x94c] sm:$0xf]  ;;  %v12019_v53 = vor.u32 %v13522_v14, %v12016_v58 }
 0x62e   : > { %v13622_v48 = vld [vmem:[#allocation10 + $0xc24] sm:$0xf0]  ;;  %v13442_v62 = vld [vmem:[#allocation10 + $0x68c] sm:$0xf] }
 0x62f   : > { %v12302_v15 = vld [vmem:[#allocation10 + $0xb48] sm:$0xf]  ;;  %v12399_v51 = vor.u32 %v13622_v48, %v12398_v16  ;;  %8258 = vmatpush.bf16.msra.mxu0 %v11887_v20  ;;  %8310 = vmatpush.bf16.msra.mxu3 %v10867_v43  ;;  %v12048_v16 = vld [vmem:[#allocation10 + $0x968] sm:$0xf0]  ;;  %v8002_v20 = vpop.f32.mrf.mxu2 }
 0x630   : > { %v13598_v31 = vld [vmem:[#allocation10 + $0xb64] sm:$0xf0]  ;;  %v13322_v48 = vld [vmem:[#allocation10 + $0x2cc] sm:$0xf]  ;;  %v12051_v32 = vor.u32 %v13530_v49, %v12048_v16 }
 0x631   : > { %v12303_v9 = vor.u32 %v13598_v31, %v12302_v15  ;;  %v12270_v37 = vld [vmem:[#allocation10 + $0xb08] sm:$0xf]  ;;  %8284 = vmatpush.bf16.msrb.mxu2 %v12399_v51  ;;  %v11216_v15 = vld [vmem:[#allocation10 + $0x2e8] sm:$0xf0]  ;;  %v8015_v31 = vpop.f32.mrf.mxu3 }
 0x632   : > { %v13590_v44 = vld [vmem:[#allocation10 + $0xb24] sm:$0xf0]  ;;  %8259 = vmatmul.bf16.vlgmr.msra.gmra.mxu0 %v15404_v4  ;;  %8311 = vmatmul.bf16.vlgmr.msra.gmra.mxu3 %v15354_v10  ;;  %v11219_v6 = vor.u32 %v13322_v48, %v11216_v15  ;;  %v13450_v51 = vld [vmem:[#allocation10 + $0x6cc] sm:$0xf] }
 0x633   : > { %8316 = vmatpush.bf16.msrb.mxu0 %v11347_v52  ;;  %8266 = vmatpush.bf16.msra.mxu1 %v12303_v9  ;;  %v12271_v5 = vor.u32 %v13590_v44, %v12270_v37  ;;  %v12238_v27 = vld [vmem:[#allocation10 + $0xac8] sm:$0xf]  ;;  %v13314_v9 = vld [vmem:[#allocation10 + $0x28c] sm:$0xf]  ;;  %v11731_v44 = vor.u32 %v13450_v51, %v11728_v63 }
 0x634   : > { %v13582_v18 = vld [vmem:[#allocation10 + $0xae4] sm:$0xf0]  ;;  %8285 = vmatmul.bf16.vlgmr.msrb.gmra.mxu2 %v15406_v2  ;;  %8355 = vmatpush.bf16.msrb.mxu3 %v12115_v38  ;;  %v13418_v21 = vld [vmem:[#allocation10 + $0x5cc] sm:$0xf] }
 0x635   : > { %8342 = vmatpush.bf16.msra.mxu2 %v11859_v23  ;;  %v12239_v46 = vor.u32 %v13582_v18, %v12238_v27  ;;  %v12206_v3 = vld [vmem:[#allocation10 + $0xa88] sm:$0xf]  ;;  %v11184_v23 = vld [vmem:[#allocation10 + $0x2a8] sm:$0xf0] }
 0x636   : > { %v13574_v40 = vld [vmem:[#allocation10 + $0xaa4] sm:$0xf0]  ;;  %v11187_v0 = vor.u32 %v13314_v9, %v11184_v23  ;;  %v11600_v35 = vld [vmem:[#allocation10 + $0x5e8] sm:$0xf0] }
 0x637   : > { %8317 = vmatpush.bf16.msrb.mxu0 %v11315_v55  ;;  %8267 = vmatpush.bf16.msra.mxu1 %v12271_v5  ;;  %v12207_v17 = vor.u32 %v13574_v40, %v12206_v3  ;;  %v12174_v33 = vld [vmem:[#allocation10 + $0xa48] sm:$0xf]  ;;  %v11696_v55 = vld [vmem:[#allocation10 + $0x6a8] sm:$0xf0]  ;;  %v11603_v43 = vor.u32 %v13418_v21, %v11600_v35 }
 0x638   : > { %v13566_v52 = vld [vmem:[#allocation10 + $0xa64] sm:$0xf0]  ;;  %8356 = vmatpush.bf16.msrb.mxu3 %v12083_v56  ;;  %v13514_v50 = vld [vmem:[#allocation10 + $0x8cc] sm:$0xf]  ;;  %v11699_v26 = vor.u32 %v13442_v62, %v11696_v55  ;;  %v13359_v62 = vld [vmem:[#allocation10 + $0x3ec] sm:$0xf0] }
 0x639   : > { %8343 = vmatpush.bf16.msra.mxu2 %v11827_v41  ;;  %v12175_v37 = vor.u32 %v13566_v52, %v12174_v33  ;;  %v12142_v47 = vld [vmem:[#allocation10 + $0xa08] sm:$0xf]  ;;  %v11984_v61 = vld [vmem:[#allocation10 + $0x8e8] sm:$0xf0] }
 0x63a   : > { %v13558_v28 = vld [vmem:[#allocation10 + $0xa24] sm:$0xf0]  ;;  %v13306_v5 = vld [vmem:[#allocation10 + $0x24c] sm:$0xf]  ;;  %v11987_v12 = vor.u32 %v13514_v50, %v11984_v61 }
 0x63b   : > { %8318 = vmatpush.bf16.msrb.mxu0 %v11283_v29  ;;  %8268 = vmatpush.bf16.msra.mxu1 %v12239_v46  ;;  %v11152_v41 = vld [vmem:[#allocation10 + $0x268] sm:$0xf0]  ;;  %v12143_v30 = vor.u32 %v13558_v28, %v12142_v47  ;;  %v8039_v47 = vpop.f32.mrf.mxu1  ;;  %v11350_v28 = vld [vmem:[#allocation10 + $0x3d0] sm:$0xf] }
 0x63c   : > { %8357 = vmatpush.bf16.msrb.mxu3 %v12051_v32  ;;  %v13434_v27 = vld [vmem:[#allocation10 + $0x64c] sm:$0xf]  ;;  %v11155_v38 = vor.u32 %v13306_v5, %v11152_v41 }
 0x63d   : > { %8344 = vmatpush.bf16.msra.mxu2 %v11795_v54  ;;  %v11664_v18 = vld [vmem:[#allocation10 + $0x668] sm:$0xf0] }
 0x63e   : > { %v13410_v29 = vld [vmem:[#allocation10 + $0x58c] sm:$0xf]  ;;  %v11667_v54 = vor.u32 %v13434_v27, %v11664_v18  ;;  %v11318_v18 = vld [vmem:[#allocation10 + $0x390] sm:$0xf] }
 0x63f   : > { %8319 = vmatpush.bf16.msrb.mxu0 %v11251_v59  ;;  %8269 = vmatpush.bf16.msra.mxu1 %v12207_v17  ;;  %v11568_v1 = vld [vmem:[#allocation10 + $0x5a8] sm:$0xf0]  ;;  %v8026_v59 = vpop.f32.mrf.mxu0 }
 0x640   : > { %8358 = vmatpush.bf16.msrb.mxu3 %v12019_v53  ;;  %v13506_v42 = vld [vmem:[#allocation10 + $0x88c] sm:$0xf]  ;;  %v11571_v3 = vor.u32 %v13410_v29, %v11568_v1  ;;  %v8027_v15 = vadd.f32 %v8026_v59, %v15435_v25  ;;  %v13295_v59 = vld [vmem:[#allocation10 + $0x1ec] sm:$0xf0] }
 0x641   : > { %8345 = vmatpush.bf16.msra.mxu2 %v11763_v11  ;;  %v11952_v24 = vld [vmem:[#allocation10 + $0x8a8] sm:$0xf0] }
 0x642   : > { %v13298_v45 = vld [vmem:[#allocation10 + $0x20c] sm:$0xf]  ;;  %v11955_v60 = vor.u32 %v13506_v42, %v11952_v24  ;;  %v15440_v55 = vadd.f32 %v8039_v47, %v8027_v15 }
 0x643   : > { %8320 = vmatpush.bf16.msrb.mxu0 %v11219_v6  ;;  %8270 = vmatpush.bf16.msra.mxu1 %v12175_v37  ;;  %v11120_v19 = vld [vmem:[#allocation10 + $0x228] sm:$0xf0] }
 0x644   : > { %v13610_v36 = vld [vmem:[#allocation10 + $0xbcc] sm:$0xf]  ;;  %8359 = vmatpush.bf16.msrb.mxu3 %v11987_v12  ;;  %v11123_v34 = vor.u32 %v13298_v45, %v11120_v19  ;;  %v13351_v12 = vld [vmem:[#allocation10 + $0x3ac] sm:$0xf0]  ;;  %v8065_v19 = vpop.f32.mrf.mxu3 }
 0x645   : > { %8346 = vmatpush.bf16.msra.mxu2 %v11731_v44  ;;  %v12368_v46 = vld [vmem:[#allocation10 + $0xbe8] sm:$0xf0] }
 0x646   : > { %v13426_v40 = vld [vmem:[#allocation10 + $0x60c] sm:$0xf]  ;;  %v12371_v17 = vor.u32 %v13610_v36, %v12368_v46  ;;  %v11319_v36 = vor.u32 %v13351_v12, %v11318_v18 }
 0x647   : > { %8321 = vmatpush.bf16.msrb.mxu0 %v11187_v0  ;;  %8271 = vmatpush.bf16.msra.mxu1 %v12143_v30  ;;  %v11632_v56 = vld [vmem:[#allocation10 + $0x628] sm:$0xf0]  ;;  %v8028_v35 = vpop.f32.mrf.mxu0  ;;  %v11351_v30 = vor.u32 %v13359_v62, %v11350_v28 }
 0x648   : > { %v13402_v49 = vld [vmem:[#allocation10 + $0x54c] sm:$0xf]  ;;  %v11635_v33 = vor.u32 %v13426_v40, %v11632_v56  ;;  %8360 = vmatpush.bf16.msrb.mxu3 %v11955_v60  ;;  %v8041_v40 = vpop.f32.mrf.mxu1  ;;  %v11286_v60 = vld [vmem:[#allocation10 + $0x350] sm:$0xf] }
 0x649   : > { %8347 = vmatpush.bf16.msra.mxu2 %v11699_v26  ;;  %v11536_v16 = vld [vmem:[#allocation10 + $0x568] sm:$0xf0] }
 0x64a   : > { %v13498_v48 = vld [vmem:[#allocation10 + $0x84c] sm:$0xf]  ;;  %8272 = vmatmul.bf16.vlgmr.msra.gmra.mxu1 %v15393_v39  ;;  %v11539_v52 = vor.u32 %v13402_v49, %v11536_v16 }
 0x64b   : > { %8329 = vmatpush.bf16.msrb.mxu1 %v11603_v43  ;;  %8322 = vmatpush.bf16.msrb.mxu0 %v11155_v38  ;;  %v11920_v20 = vld [vmem:[#allocation10 + $0x868] sm:$0xf0] }
 0x64c   : > { %v13706_v31 = vld [vmem:[#allocation10 + $0xecc] sm:$0xf]  ;;  %v11923_v51 = vor.u32 %v13498_v48, %v11920_v20 }
 0x64d   : > { %v12752_v11 = vld [vmem:[#allocation10 + $0xee8] sm:$0xf0]  ;;  %8348 = vmatpush.bf16.msra.mxu2 %v11667_v54 }
 0x64e   : > { %v13602_v32 = vld [vmem:[#allocation10 + $0xb8c] sm:$0xf]  ;;  %v12755_v63 = vor.u32 %v13706_v31, %v12752_v11  ;;  %8361 = vmatpush.bf16.msrb.mxu3 %v11923_v51  ;;  %v11254_v51 = vld [vmem:[#allocation10 + $0x310] sm:$0xf] }
 0x64f   : > { %8330 = vmatpush.bf16.msrb.mxu1 %v11571_v3  ;;  %v12336_v6 = vld [vmem:[#allocation10 + $0xba8] sm:$0xf0]  ;;  %8323 = vmatpush.bf16.msrb.mxu0 %v11123_v34  ;;  %v11094_v3 = vld [vmem:[#allocation10 + $0x1d0] sm:$0xf]  ;;  %v8078_v15 = vpop.f32.mrf.mxu0 }
 0x650   : > { %v13394_v14 = vld [vmem:[#allocation10 + $0x50c] sm:$0xf]  ;;  %v12339_v44 = vor.u32 %v13602_v32, %v12336_v6  ;;  %v13343_v34 = vld [vmem:[#allocation10 + $0x36c] sm:$0xf0]  ;;  %v11095_v11 = vor.u32 %v13295_v59, %v11094_v3  ;;  %v8091_v35 = vpop.f32.mrf.mxu1 }
 0x651   : > { %v11504_v58 = vld [vmem:[#allocation10 + $0x528] sm:$0xf0]  ;;  %8349 = vmatpush.bf16.msra.mxu2 %v11635_v33  ;;  %v11287_v33 = vor.u32 %v13343_v34, %v11286_v60  ;;  %v13287_v6 = vld [vmem:[#allocation10 + $0x1ac] sm:$0xf0] }
 0x652   : > { %v13490_v9 = vld [vmem:[#allocation10 + $0x80c] sm:$0xf]  ;;  %v11507_v53 = vor.u32 %v13394_v14, %v11504_v58  ;;  %8324 = vmatmul.bf16.vlgmr.msrb.gmra.mxu0 %v15356_v57  ;;  %v11606_v60 = vld [vmem:[#allocation10 + $0x5d0] sm:$0xf] }
 0x653   : > { %8368 = vmatpush.bf16.msra.mxu0 %v12371_v17  ;;  %v11888_v23 = vld [vmem:[#allocation10 + $0x828] sm:$0xf0]  ;;  %8331 = vmatpush.bf16.msrb.mxu1 %v11539_v52  ;;  %v11062_v52 = vld [vmem:[#allocation10 + $0x190] sm:$0xf] }
 0x654   : > { %v13698_v25 = vld [vmem:[#allocation10 + $0xe8c] sm:$0xf]  ;;  %v11891_v50 = vor.u32 %v13490_v9, %v11888_v23  ;;  %8350 = vmatmul.bf16.vlgmr.msra.gmra.mxu2 %v15391_v7  ;;  %v8052_v23 = vpop.f32.mrf.mxu2  ;;  %v11063_v28 = vor.u32 %v13287_v6, %v11062_v52  ;;  %v13423_v34 = vld [vmem:[#allocation10 + $0x5ec] sm:$0xf0] }
 0x655   : > { %v12720_v37 = vld [vmem:[#allocation10 + $0xea8] sm:$0xf0]  ;;  %8398 = vmatpush.bf16.msrb.mxu2 %v12755_v63  ;;  %v13335_v63 = vld [vmem:[#allocation10 + $0x32c] sm:$0xf0]  ;;  %v8053_v47 = vadd.f32 %v8052_v23, %v15440_v55  ;;  %v11607_v6 = vor.u32 %v13423_v34, %v11606_v60 }
 0x656   : > { %v13594_v0 = vld [vmem:[#allocation10 + $0xb4c] sm:$0xf]  ;;  %v12723_v61 = vor.u32 %v13698_v25, %v12720_v37  ;;  %8362 = vmatpush.bf16.msrb.mxu3 %v11891_v50  ;;  %v11255_v62 = vor.u32 %v13335_v63, %v11254_v51  ;;  %v11158_v52 = vld [vmem:[#allocation10 + $0x250] sm:$0xf] }
 0x657   : > { %v12304_v21 = vld [vmem:[#allocation10 + $0xb68] sm:$0xf0]  ;;  %8369 = vmatpush.bf16.msra.mxu0 %v12339_v44  ;;  %8332 = vmatpush.bf16.msrb.mxu1 %v11507_v53  ;;  %v8067_v44 = vpop.f32.mrf.mxu3  ;;  %v8080_v18 = vpop.f32.mrf.mxu0  ;;  %v11574_v63 = vld [vmem:[#allocation10 + $0x590] sm:$0xf] }
 0x658   : > { %v13386_v5 = vld [vmem:[#allocation10 + $0x4cc] sm:$0xf]  ;;  %v12307_v27 = vor.u32 %v13594_v0, %v12304_v21  ;;  %v11030_v21 = vld [vmem:[#allocation10 + $0x150] sm:$0xf] }
 0x659   : > { %v11472_v41 = vld [vmem:[#allocation10 + $0x4e8] sm:$0xf0]  ;;  %8399 = vmatpush.bf16.msrb.mxu2 %v12723_v61  ;;  %8363 = vmatmul.bf16.vlgmr.msrb.gmra.mxu3 %v15404_v4  ;;  %v13279_v61 = vld [vmem:[#allocation10 + $0x16c] sm:$0xf0] }
 0x65a   : > { %v13690_v26 = vld [vmem:[#allocation10 + $0xe4c] sm:$0xf]  ;;  %v11475_v38 = vor.u32 %v13386_v5, %v11472_v41  ;;  %8420 = vmatpush.bf16.msra.mxu3 %v11351_v30  ;;  %v11222_v5 = vld [vmem:[#allocation10 + $0x2d0] sm:$0xf]  ;;  %v8066_v30 = vadd.f32 %v8065_v19, %v8053_v47 }
 0x65b   : > { %v12688_v43 = vld [vmem:[#allocation10 + $0xe68] sm:$0xf0]  ;;  %8370 = vmatpush.bf16.msra.mxu0 %v12307_v27  ;;  %v13327_v41 = vld [vmem:[#allocation10 + $0x2ec] sm:$0xf0] }
 0x65c   : > { %v13586_v29 = vld [vmem:[#allocation10 + $0xb0c] sm:$0xf]  ;;  %v12691_v42 = vor.u32 %v13690_v26, %v12688_v43  ;;  %8333 = vmatpush.bf16.msrb.mxu1 %v11475_v38  ;;  %v8079_v55 = vadd.f32 %v8078_v15, %v8066_v30  ;;  %v11031_v38 = vor.u32 %v13279_v61, %v11030_v21  ;;  %v13271_v19 = vld [vmem:[#allocation10 + $0x12c] sm:$0xf0] }
 0x65d   : > { %v12272_v1 = vld [vmem:[#allocation10 + $0xb28] sm:$0xf0]  ;;  %v10934_v47 = vld [vmem:[#allocation10 + $0x90] sm:$0xf] }
 0x65e   : > { %v13378_v24 = vld [vmem:[#allocation10 + $0x48c] sm:$0xf]  ;;  %v12275_v56 = vor.u32 %v13586_v29, %v12272_v1  ;;  %8400 = vmatpush.bf16.msrb.mxu2 %v12691_v42  ;;  %8421 = vmatpush.bf16.msra.mxu3 %v11319_v36  ;;  %v11223_v29 = vor.u32 %v13327_v41, %v11222_v5  ;;  %v11190_v36 = vld [vmem:[#allocation10 + $0x290] sm:$0xf] }
 0x65f   : > { %v11440_v45 = vld [vmem:[#allocation10 + $0x4a8] sm:$0xf0]  ;;  %v13255_v44 = vld [vmem:[#allocation10 + $0xac] sm:$0xf0] }
 0x660   : > { %v13682_v46 = vld [vmem:[#allocation10 + $0xe0c] sm:$0xf]  ;;  %v11443_v49 = vor.u32 %v13378_v24, %v11440_v45  ;;  %8371 = vmatpush.bf16.msra.mxu0 %v12275_v56  ;;  %v10998_v24 = vld [vmem:[#allocation10 + $0x110] sm:$0xf]  ;;  %v8054_v56 = vpop.f32.mrf.mxu2 }
 0x661   : > { %v12656_v54 = vld [vmem:[#allocation10 + $0xe28] sm:$0xf0]  ;;  %v12374_v21 = vld [vmem:[#allocation10 + $0xbd0] sm:$0xf] }
 0x662   : > { %v13578_v16 = vld [vmem:[#allocation10 + $0xacc] sm:$0xf]  ;;  %v12659_v17 = vor.u32 %v13682_v46, %v12656_v54  ;;  %8334 = vmatpush.bf16.msrb.mxu1 %v11443_v49  ;;  %8422 = vmatpush.bf16.msra.mxu3 %v11287_v33  ;;  %v13319_v46 = vld [vmem:[#allocation10 + $0x2ac] sm:$0xf0]  ;;  %v15448_v54 = vadd.f32 %v8091_v35, %v8079_v55  ;;  %v15450_v49 = vpop.f32.mrf.mxu3 }
 0x663   : > { %v12240_v48 = vld [vmem:[#allocation10 + $0xae8] sm:$0xf0]  ;;  %v13263_v33 = vld [vmem:[#allocation10 + $0xec] sm:$0xf0] }
 0x664   : > { %v13370_v20 = vld [vmem:[#allocation10 + $0x44c] sm:$0xf]  ;;  %v12243_v32 = vor.u32 %v13578_v16, %v12240_v48  ;;  %8401 = vmatpush.bf16.msrb.mxu2 %v12659_v17  ;;  %v10999_v16 = vor.u32 %v13271_v19, %v10998_v24  ;;  %v11191_v48 = vor.u32 %v13319_v46, %v11190_v36  ;;  %v13615_v35 = vld [vmem:[#allocation10 + $0xbec] sm:$0xf0] }
 0x665   : > { %v11408_v31 = vld [vmem:[#allocation10 + $0x468] sm:$0xf0]  ;;  %v11542_v5 = vld [vmem:[#allocation10 + $0x550] sm:$0xf]  ;;  %v12375_v55 = vor.u32 %v13615_v35, %v12374_v21 }
 0x666   : > { %v11411_v14 = vor.u32 %v13370_v20, %v11408_v31  ;;  %v13570_v58 = vld [vmem:[#allocation10 + $0xa8c] sm:$0xf]  ;;  %8372 = vmatpush.bf16.msra.mxu0 %v12243_v32  ;;  %8423 = vmatpush.bf16.msra.mxu3 %v11255_v62  ;;  %v10966_v20 = vld [vmem:[#allocation10 + $0xd0] sm:$0xf]  ;;  %v8093_v31 = vpop.f32.mrf.mxu1 }
 0x667   : > { %v12208_v9 = vld [vmem:[#allocation10 + $0xaa8] sm:$0xf0]  ;;  %12775 = vmatmul.msk.bf16.vlgmr.msrb.gmra.mxu2 %vm621_vm7, %v15411_v8  ;;  %v13311_v32 = vld [vmem:[#allocation10 + $0x26c] sm:$0xf0] }
 0x668   : > { %v13362_v25 = vld [vmem:[#allocation10 + $0x40c] sm:$0xf]  ;;  %8407 = vmatpush.bf16.msra.mxu2 %v11095_v11  ;;  %v12211_v50 = vor.u32 %v13570_v58, %v12208_v9  ;;  %8335 = vmatpush.bf16.msrb.mxu1 %v11411_v14  ;;  %v13415_v14 = vld [vmem:[#allocation10 + $0x5ac] sm:$0xf0]  ;;  %v15453_v58 = vpop.f32.mrf.mxu0  ;;  %v10967_v9 = vor.u32 %v13263_v33, %v10966_v20  ;;  %v11159_v23 = vor.u32 %v13311_v32, %v11158_v52 }
 0x669   : > { %v11376_v37 = vld [vmem:[#allocation10 + $0x428] sm:$0xf0]  ;;  %v13303_v62 = vld [vmem:[#allocation10 + $0x22c] sm:$0xf0] }
 0x66a   : > { %v13674_v53 = vld [vmem:[#allocation10 + $0xdcc] sm:$0xf]  ;;  %v11379_v26 = vor.u32 %v13362_v25, %v11376_v37  ;;  %8373 = vmatpush.bf16.msra.mxu0 %v12211_v50  ;;  %8424 = vmatpush.bf16.msra.mxu3 %v11223_v29  ;;  %v8117_v50 = vpop.f32.mrf.mxu2  ;;  %v13407_v41 = vld [vmem:[#allocation10 + $0x56c] sm:$0xf0]  ;;  %v8132_v30 = vpop.f32.mrf.mxu3 }
 0x66b   : > { %v12624_v0 = vld [vmem:[#allocation10 + $0xde8] sm:$0xf0]  ;;  %v13607_v24 = vld [vmem:[#allocation10 + $0xbac] sm:$0xf0] }
 0x66c   : > { %v13562_v43 = vld [vmem:[#allocation10 + $0xa4c] sm:$0xf]  ;;  %v12627_v12 = vor.u32 %v13674_v53, %v12624_v0  ;;  %8408 = vmatpush.bf16.msra.mxu2 %v11063_v28  ;;  %8336 = vmatpush.bf16.msrb.mxu1 %v11379_v26  ;;  %v11126_v28 = vld [vmem:[#allocation10 + $0x210] sm:$0xf]  ;;  %v11575_v53 = vor.u32 %v13415_v14, %v11574_v63  ;;  %v7973_v0 = vperm.slane %v15429_v22, 1  ;;  %v10935_v26 = vor.u32 %v13255_v44, %v10934_v47 }
 0x66d   : > { %v12176_v27 = vld [vmem:[#allocation10 + $0xa68] sm:$0xf0]  ;;  %v13247_v22 = vld [vmem:[#allocation10 + $0x6c] sm:$0xf0] }
 0x66e   : > { %v13666_v1 = vld [vmem:[#allocation10 + $0xd8c] sm:$0xf]  ;;  %v12179_v45 = vor.u32 %v13562_v43, %v12176_v27  ;;  %8425 = vmatpush.bf16.msra.mxu3 %v11191_v48  ;;  %v11127_v43 = vor.u32 %v13303_v62, %v11126_v28  ;;  %v11510_v19 = vld [vmem:[#allocation10 + $0x510] sm:$0xf] }
 0x66f   : > { %v12592_v42 = vld [vmem:[#allocation10 + $0xda8] sm:$0xf0]  ;;  %8337 = vmatmul.bf16.vlgmr.msrb.gmra.mxu1 %v15380_v13  ;;  %v13399_v36 = vld [vmem:[#allocation10 + $0x52c] sm:$0xf0] }
 0x670   : > { %v13554_v3 = vld [vmem:[#allocation10 + $0xa0c] sm:$0xf]  ;;  %8381 = vmatpush.bf16.msra.mxu1 %v12627_v12  ;;  %v12595_v59 = vor.u32 %v13666_v1, %v12592_v42  ;;  %8409 = vmatpush.bf16.msra.mxu2 %v11031_v38  ;;  %v8104_v12 = vpop.f32.mrf.mxu1  ;;  %v10902_v38 = vld [vmem:[#allocation10 + $0x50] sm:$0xf]  ;;  %v11543_v1 = vor.u32 %v13407_v41, %v11542_v5 }
 0x671   : > { %v12144_v40 = vld [vmem:[#allocation10 + $0xa28] sm:$0xf0]  ;;  %8374 = vmatpush.bf16.msra.mxu0 %v12179_v45  ;;  %v8105_v29 = vadd.f32 %v8104_v12, %v7973_v0  ;;  %v12342_v42 = vld [vmem:[#allocation10 + $0xb90] sm:$0xf] }
 0x672   : > { %v13658_v15 = vld [vmem:[#allocation10 + $0xd4c] sm:$0xf]  ;;  %v12147_v11 = vor.u32 %v13554_v3, %v12144_v40  ;;  %8426 = vmatpush.bf16.msra.mxu3 %v11159_v23  ;;  %v8145_v3 = vpop.f32.mrf.mxu0  ;;  %v10903_v40 = vor.u32 %v13247_v22, %v10902_v38  ;;  %v12343_v60 = vor.u32 %v13607_v24, %v12342_v42  ;;  %v10870_v34 = vld [vmem:[#allocation10 + $0x10] sm:$0xf]  ;;  %v8119_v33 = vpop.f32.mrf.mxu2 }
 0x673   : > { %v12560_v17 = vld [vmem:[#allocation10 + $0xd68] sm:$0xf0]  ;;  %v8118_v46 = vadd.f32 %v8117_v50, %v8105_v29  ;;  %v12118_v48 = vld [vmem:[#allocation10 + $0x9d0] sm:$0xf] }
 0x674   : > { %8382 = vmatpush.bf16.msra.mxu1 %v12595_v59  ;;  %v12563_v51 = vor.u32 %v13658_v15, %v12560_v17  ;;  %8410 = vmatpush.bf16.msra.mxu2 %v10999_v16  ;;  %v13650_v25 = vld [vmem:[#allocation10 + $0xd0c] sm:$0xf]  ;;  %v13239_v16 = vld [vmem:[#allocation10 + $0x2c] sm:$0xf0]  ;;  %v11511_v15 = vor.u32 %v13399_v36, %v11510_v19 }
 0x675   : > { %v12528_v37 = vld [vmem:[#allocation10 + $0xd28] sm:$0xf0]  ;;  %8375 = vmatpush.bf16.msra.mxu0 %v12147_v11  ;;  %v13551_v17 = vld [vmem:[#allocation10 + $0x9ec] sm:$0xf0]  ;;  %v8131_v11 = vadd.f32 %v15450_v49, %v8118_v46  ;;  %v10871_v63 = vor.u32 %v13239_v16, %v10870_v34 }
 0x676   : > { %v12531_v61 = vor.u32 %v13650_v25, %v12528_v37  ;;  %v13642_v27 = vld [vmem:[#allocation10 + $0xccc] sm:$0xf]  ;;  %8427 = vmatpush.bf16.msra.mxu3 %v11127_v43  ;;  %v12310_v20 = vld [vmem:[#allocation10 + $0xb50] sm:$0xf]  ;;  %v12119_v37 = vor.u32 %v13551_v17, %v12118_v48 }
 0x677   : > { %v12496_v18 = vld [vmem:[#allocation10 + $0xce8] sm:$0xf0]  ;;  %v13599_v31 = vld [vmem:[#allocation10 + $0xb6c] sm:$0xf0]  ;;  %v15462_v23 = vadd.f32 %v15453_v58, %v8131_v11 }
 0x678   : > { %8383 = vmatpush.bf16.msra.mxu1 %v12563_v51  ;;  %8411 = vmatpush.bf16.msra.mxu2 %v10967_v9  ;;  %v12499_v45 = vor.u32 %v13642_v27, %v12496_v18  ;;  %v13634_v56 = vld [vmem:[#allocation10 + $0xc8c] sm:$0xf]  ;;  %v11478_v32 = vld [vmem:[#allocation10 + $0x4d0] sm:$0xf]  ;;  %v15459_v51 = vpop.f32.mrf.mxu3  ;;  %v8106_v25 = vpop.f32.mrf.mxu1  ;;  %v12311_v49 = vor.u32 %v13599_v31, %v12310_v20 }
 0x679   : > { %8433 = vmatpush.bf16.msrb.mxu0 %v11607_v6  ;;  %v12464_v59 = vld [vmem:[#allocation10 + $0xca8] sm:$0xf0]  ;;  %8428 = vmatmul.bf16.vlgmr.msra.gmra.mxu3 %v15356_v57  ;;  %v13391_v6 = vld [vmem:[#allocation10 + $0x4ec] sm:$0xf0] }
 0x67a   : > { %8376 = vmatmul.bf16.vlgmr.msra.gmra.mxu0 %v15393_v39  ;;  %8472 = vmatpush.bf16.msrb.mxu3 %v12375_v55  ;;  %v12467_v52 = vor.u32 %v13634_v56, %v12464_v59  ;;  %v13626_v14 = vld [vmem:[#allocation10 + $0xc4c] sm:$0xf]  ;;  %v12086_v47 = vld [vmem:[#allocation10 + $0x990] sm:$0xf]  ;;  %v11479_v44 = vor.u32 %v13391_v6, %v11478_v32  ;;  %v15464_v58 = vpop.f32.mrf.mxu0 }
 0x67b   : > { %v12432_v9 = vld [vmem:[#allocation10 + $0xc68] sm:$0xf0]  ;;  %v13543_v28 = vld [vmem:[#allocation10 + $0x9ac] sm:$0xf0] }
 0x67c   : > { %8384 = vmatpush.bf16.msra.mxu1 %v12531_v61  ;;  %8412 = vmatpush.bf16.msra.mxu2 %v10935_v26  ;;  %v12278_v62 = vld [vmem:[#allocation10 + $0xb10] sm:$0xf]  ;;  %v12435_v0 = vor.u32 %v13626_v14, %v12432_v9  ;;  %v13618_v50 = vld [vmem:[#allocation10 + $0xc0c] sm:$0xf]  ;;  %v12087_v5 = vor.u32 %v13543_v28, %v12086_v47 }
 0x67d   : > { %8434 = vmatpush.bf16.msrb.mxu0 %v11575_v53  ;;  %v13591_v53 = vld [vmem:[#allocation10 + $0xb2c] sm:$0xf0]  ;;  %v12400_v61 = vld [vmem:[#allocation10 + $0xc28] sm:$0xf0] }
 0x67e   : > { %8473 = vmatpush.bf16.msrb.mxu3 %v12343_v60  ;;  %v11446_v21 = vld [vmem:[#allocation10 + $0x490] sm:$0xf]  ;;  %v12279_v41 = vor.u32 %v13591_v53, %v12278_v62  ;;  %v12403_v38 = vor.u32 %v13618_v50, %v12400_v61 }
 0x67f   : > { %v13383_v35 = vld [vmem:[#allocation10 + $0x4ac] sm:$0xf0] }
 0x680   : > { %8385 = vmatpush.bf16.msra.mxu1 %v12499_v45  ;;  %8413 = vmatpush.bf16.msra.mxu2 %v10903_v40  ;;  %v11862_v30 = vld [vmem:[#allocation10 + $0x7d0] sm:$0xf]  ;;  %v11447_v27 = vor.u32 %v13383_v35, %v11446_v21  ;;  %v8184_v42 = vpop.f32.mrf.mxu3 }
 0x681   : > { %8435 = vmatpush.bf16.msrb.mxu0 %v11543_v1  ;;  %v13487_v26 = vld [vmem:[#allocation10 + $0x7ec] sm:$0xf0]  ;;  %v15467_v1 = vpop.f32.mrf.mxu2 }
 0x682   : > { %8474 = vmatpush.bf16.msrb.mxu3 %v12311_v49  ;;  %v12054_v43 = vld [vmem:[#allocation10 + $0x950] sm:$0xf]  ;;  %v11863_v24 = vor.u32 %v13487_v26, %v11862_v30  ;;  %v8197_v20 = vpop.f32.mrf.mxu0  ;;  %v11608_v30 = vld [vmem:[#allocation10 + $0x5f0] sm:$0xf0] }
 0x683   : > { %v13535_v18 = vld [vmem:[#allocation10 + $0x96c] sm:$0xf0]  ;;  %v13355_v20 = vld [vmem:[#allocation10 + $0x3d4] sm:$0xf] }
 0x684   : > { %8386 = vmatpush.bf16.msra.mxu1 %v12467_v52  ;;  %8414 = vmatpush.bf16.msra.mxu2 %v10871_v63  ;;  %v12246_v12 = vld [vmem:[#allocation10 + $0xad0] sm:$0xf]  ;;  %v12055_v45 = vor.u32 %v13535_v18, %v12054_v43 }
 0x685   : > { %8436 = vmatpush.bf16.msrb.mxu0 %v11511_v15  ;;  %v13583_v55 = vld [vmem:[#allocation10 + $0xaec] sm:$0xf0] }
 0x686   : > { %v11414_v22 = vld [vmem:[#allocation10 + $0x450] sm:$0xf]  ;;  %8475 = vmatpush.bf16.msrb.mxu3 %v12279_v41  ;;  %v12247_v19 = vor.u32 %v13583_v55, %v12246_v12  ;;  %v13419_v41 = vld [vmem:[#allocation10 + $0x5d4] sm:$0xf] }
 0x687   : > { %8415 = vmatmul.bf16.vlgmr.msra.gmra.mxu2 %v15354_v10  ;;  %v13375_v29 = vld [vmem:[#allocation10 + $0x46c] sm:$0xf0] }
 0x688   : > { %8459 = vmatpush.bf16.msrb.mxu2 %v12119_v37  ;;  %8387 = vmatpush.bf16.msra.mxu1 %v12435_v0  ;;  %v11830_v36 = vld [vmem:[#allocation10 + $0x790] sm:$0xf]  ;;  %v11415_v40 = vor.u32 %v13375_v29, %v11414_v22  ;;  %v11611_v22 = vor.u32 %v13419_v41, %v11608_v30 }
 0x689   : > { %8437 = vmatpush.bf16.msrb.mxu0 %v11479_v44  ;;  %v13479_v46 = vld [vmem:[#allocation10 + $0x7ac] sm:$0xf0]  ;;  %v8171_v37 = vpop.f32.mrf.mxu2 }
 0x68a   : > { %v12022_v3 = vld [vmem:[#allocation10 + $0x910] sm:$0xf]  ;;  %v11831_v48 = vor.u32 %v13479_v46, %v11830_v36  ;;  %8476 = vmatpush.bf16.msrb.mxu3 %v12247_v19  ;;  %v13411_v19 = vld [vmem:[#allocation10 + $0x594] sm:$0xf]  ;;  %v15478_v37 = vpop.f32.mrf.mxu3 }
 0x68b   : > { %v13527_v56 = vld [vmem:[#allocation10 + $0x92c] sm:$0xf0]  ;;  %v11576_v36 = vld [vmem:[#allocation10 + $0x5b0] sm:$0xf0] }
 0x68c   : > { %8460 = vmatpush.bf16.msrb.mxu2 %v12087_v5  ;;  %v12214_v59 = vld [vmem:[#allocation10 + $0xa90] sm:$0xf]  ;;  %8388 = vmatpush.bf16.msra.mxu1 %v12403_v38  ;;  %v12023_v31 = vor.u32 %v13527_v56, %v12022_v3 }
 0x68d   : > { %8438 = vmatpush.bf16.msrb.mxu0 %v11447_v27  ;;  %v13575_v60 = vld [vmem:[#allocation10 + $0xaac] sm:$0xf0] }
 0x68e   : > { %v11382_v34 = vld [vmem:[#allocation10 + $0x410] sm:$0xf]  ;;  %v12215_v11 = vor.u32 %v13575_v60, %v12214_v59 }
 0x68f   : > { %v13367_v16 = vld [vmem:[#allocation10 + $0x42c] sm:$0xf0]  ;;  %8389 = vmatmul.bf16.vlgmr.msra.gmra.mxu1 %v15406_v2 }
 0x690   : > { %8446 = vmatpush.bf16.msrb.mxu1 %v11863_v24  ;;  %v12630_v15 = vld [vmem:[#allocation10 + $0xdd0] sm:$0xf]  ;;  %8461 = vmatpush.bf16.msrb.mxu2 %v12055_v45  ;;  %v11383_v6 = vor.u32 %v13367_v16, %v11382_v34  ;;  %v8156_v24 = vpop.f32.mrf.mxu1 }
 0x691   : > { %v13679_v17 = vld [vmem:[#allocation10 + $0xdec] sm:$0xf0]  ;;  %8439 = vmatpush.bf16.msrb.mxu0 %v11415_v40  ;;  %8477 = vmatpush.bf16.msrb.mxu3 %v12215_v11  ;;  %v8157_v46 = vadd.f32 %v8156_v24, %v15462_v23  ;;  %v11352_v11 = vld [vmem:[#allocation10 + $0x3f0] sm:$0xf0] }
 0x692   : > { %v11798_v33 = vld [vmem:[#allocation10 + $0x750] sm:$0xf]  ;;  %v12631_v25 = vor.u32 %v13679_v17, %v12630_v15  ;;  %v13403_v23 = vld [vmem:[#allocation10 + $0x554] sm:$0xf] }
 0x693   : > { %v13471_v52 = vld [vmem:[#allocation10 + $0x76c] sm:$0xf0]  ;;  %v8170_v16 = vadd.f32 %v15467_v1, %v8157_v46 }
 0x694   : > { %v11990_v32 = vld [vmem:[#allocation10 + $0x8d0] sm:$0xf]  ;;  %8447 = vmatpush.bf16.msrb.mxu1 %v11831_v48  ;;  %v11799_v49 = vor.u32 %v13471_v52, %v11798_v33  ;;  %8462 = vmatpush.bf16.msrb.mxu2 %v12023_v31  ;;  %v11579_v48 = vor.u32 %v13411_v19, %v11576_v36  ;;  %v11544_v33 = vld [vmem:[#allocation10 + $0x570] sm:$0xf0] }
 0x695   : > { %v13519_v63 = vld [vmem:[#allocation10 + $0x8ec] sm:$0xf0]  ;;  %8440 = vmatpush.bf16.msrb.mxu0 %v11383_v6  ;;  %v8183_v52 = vadd.f32 %v15459_v51, %v8170_v16  ;;  %v11547_v51 = vor.u32 %v13403_v23, %v11544_v33 }
 0x696   : > { %v12182_v14 = vld [vmem:[#allocation10 + $0xa50] sm:$0xf]  ;;  %v11991_v28 = vor.u32 %v13519_v63, %v11990_v32 }
 0x697   : > { %v13567_v9 = vld [vmem:[#allocation10 + $0xa6c] sm:$0xf0] }
 0x698   : > { %v12598_v47 = vld [vmem:[#allocation10 + $0xd90] sm:$0xf]  ;;  %v12183_v62 = vor.u32 %v13567_v9, %v12182_v14  ;;  %8448 = vmatpush.bf16.msrb.mxu1 %v11799_v49  ;;  %8463 = vmatpush.bf16.msrb.mxu2 %v11991_v28  ;;  %v15480_v49 = vpop.f32.mrf.mxu0  ;;  %v8158_v28 = vpop.f32.mrf.mxu1 }
 0x699   : > { %v13671_v44 = vld [vmem:[#allocation10 + $0xdac] sm:$0xf0]  ;;  %8485 = vmatpush.bf16.msra.mxu0 %v12631_v25  ;;  %v15476_v25 = vadd.f32 %v15464_v58, %v8183_v52  ;;  %v15482_v58 = vld [vmem:[#allocation13] sm:$0xff]  ;;  %v13371_v28 = vld [vmem:[#allocation10 + $0x454] sm:$0xf] }
 0x69a   : > { %v11766_v53 = vld [vmem:[#allocation10 + $0x710] sm:$0xf]  ;;  %v12599_v5 = vor.u32 %v13671_v44, %v12598_v47  ;;  %8478 = vmatpush.bf16.msrb.mxu3 %v12183_v62  ;;  %8441 = vmatmul.bf16.vlgmr.msrb.gmra.mxu0 %v15380_v13  ;;  %v11355_v47 = vor.u32 %v13355_v20, %v11352_v11  ;;  %v13347_v44 = vld [vmem:[#allocation10 + $0x394] sm:$0xf]  ;;  %v8834_v46 = vperm.slane %v15482_v58, 1 }
 0x69b   : > { %v13463_v0 = vld [vmem:[#allocation10 + $0x72c] sm:$0xf0]  ;;  %v8824_v36 = vmax.f32 %v15476_v25, 0.0  ;;  %v13379_v20 = vld [vmem:[#allocation10 + $0x494] sm:$0xf] }
 0x69c   : > { %v11958_v21 = vld [vmem:[#allocation10 + $0x890] sm:$0xf]  ;;  %v11767_v26 = vor.u32 %v13463_v0, %v11766_v53  ;;  %v11320_v53 = vld [vmem:[#allocation10 + $0x3b0] sm:$0xf0] }
 0x69d   : > { %v13511_v35 = vld [vmem:[#allocation10 + $0x8ac] sm:$0xf0]  ;;  %8486 = vmatpush.bf16.msra.mxu0 %v12599_v5  ;;  %v13395_v0 = vld [vmem:[#allocation10 + $0x514] sm:$0xf]  ;;  %v11323_v30 = vor.u32 %v13347_v44, %v11320_v53  ;;  %v8850_v52 = vmul.f32 %v8834_v46, %v8824_v36 }
 0x69e   : > { %v12150_v50 = vld [vmem:[#allocation10 + $0xa10] sm:$0xf]  ;;  %v11959_v18 = vor.u32 %v13511_v35, %v11958_v21  ;;  %8449 = vmatpush.bf16.msrb.mxu1 %v11767_v26  ;;  %v11512_v21 = vld [vmem:[#allocation10 + $0x530] sm:$0xf0] }
 0x69f   : > { %v13559_v61 = vld [vmem:[#allocation10 + $0xa2c] sm:$0xf0]  ;;  %v11515_v26 = vor.u32 %v13395_v0, %v11512_v21  ;;  %v11224_v44 = vld [vmem:[#allocation10 + $0x2f0] sm:$0xf0] }
 0x6a0   : > { %v12566_v43 = vld [vmem:[#allocation10 + $0xd50] sm:$0xf]  ;;  %v12151_v12 = vor.u32 %v13559_v61, %v12150_v50  ;;  %8464 = vmatpush.bf16.msrb.mxu2 %v11959_v18  ;;  %v13339_v18 = vld [vmem:[#allocation10 + $0x354] sm:$0xf] }
 0x6a1   : > { %v13663_v27 = vld [vmem:[#allocation10 + $0xd6c] sm:$0xf0]  ;;  %v13475_v21 = vld [vmem:[#allocation10 + $0x794] sm:$0xf] }
 0x6a2   : > { %v11734_v55 = vld [vmem:[#allocation10 + $0x6d0] sm:$0xf]  ;;  %v12567_v45 = vor.u32 %v13663_v27, %v12566_v43  ;;  %8479 = vmatpush.bf16.msrb.mxu3 %v12151_v12  ;;  %v12632_v36 = vld [vmem:[#allocation10 + $0xdf0] sm:$0xf0] }
 0x6a3   : > { %v13455_v38 = vld [vmem:[#allocation10 + $0x6ec] sm:$0xf0] }
 0x6a4   : > { %v11926_v29 = vld [vmem:[#allocation10 + $0x850] sm:$0xf]  ;;  %v11735_v3 = vor.u32 %v13455_v38, %v11734_v55  ;;  %8487 = vmatpush.bf16.msra.mxu0 %v12567_v45  ;;  %v11288_v55 = vld [vmem:[#allocation10 + $0x370] sm:$0xf0] }
 0x6a5   : > { %v13503_v42 = vld [vmem:[#allocation10 + $0x86c] sm:$0xf0]  ;;  %8480 = vmatmul.bf16.vlgmr.msrb.gmra.mxu3 %v15393_v39  ;;  %v13387_v38 = vld [vmem:[#allocation10 + $0x4d4] sm:$0xf] }
 0x6a6   : > { %v12534_v40 = vld [vmem:[#allocation10 + $0xd10] sm:$0xf]  ;;  %v11927_v59 = vor.u32 %v13503_v42, %v11926_v29  ;;  %8537 = vmatpush.bf16.msra.mxu3 %v11611_v22  ;;  %8450 = vmatpush.bf16.msrb.mxu1 %v11735_v3  ;;  %v11480_v22 = vld [vmem:[#allocation10 + $0x4f0] sm:$0xf0]  ;;  %v8823_v29 = vmax.f32 %v15448_v54, 0.0  ;;  %v8833_v42 = vperm.slane %v15482_v58, 0  ;;  %v15489_v3 = vpop.f32.mrf.mxu2  ;;  %v11291_v54 = vor.u32 %v13339_v18, %v11288_v55 }
 0x6a7   : > { %v13655_v56 = vld [vmem:[#allocation10 + $0xd2c] sm:$0xf0]  ;;  %v13315_v55 = vld [vmem:[#allocation10 + $0x294] sm:$0xf] }
 0x6a8   : > { %v11702_v60 = vld [vmem:[#allocation10 + $0x690] sm:$0xf]  ;;  %v12535_v31 = vor.u32 %v13655_v56, %v12534_v40  ;;  %8465 = vmatpush.bf16.msrb.mxu2 %v11927_v59  ;;  %v8249_v56 = vpop.f32.mrf.mxu3  ;;  %v8210_v59 = vpop.f32.mrf.mxu0  ;;  %v8849_v11 = vmul.f32 %v8833_v42, %v8823_v29  ;;  %v11384_v29 = vld [vmem:[#allocation10 + $0x430] sm:$0xf0] }
 0x6a9   : > { %v13447_v34 = vld [vmem:[#allocation10 + $0x6ac] sm:$0xf0]  ;;  %v13291_v42 = vld [vmem:[#allocation10 + $0x1d4] sm:$0xf] }
 0x6aa   : > { %v11894_v15 = vld [vmem:[#allocation10 + $0x810] sm:$0xf]  ;;  %v11703_v32 = vor.u32 %v13447_v34, %v11702_v60  ;;  %8538 = vmatpush.bf16.msra.mxu3 %v11579_v48  ;;  %8488 = vmatpush.bf16.msra.mxu0 %v12535_v31  ;;  %v11483_v60 = vor.u32 %v13387_v38, %v11480_v22  ;;  %v13331_v48 = vld [vmem:[#allocation10 + $0x314] sm:$0xf]  ;;  %v8857_v53 = vsel %vm471_vm0, %v8849_v11, 0.0 }
 0x6ab   : > { %v13495_v17 = vld [vmem:[#allocation10 + $0x82c] sm:$0xf0]  ;;  %v11448_v31 = vld [vmem:[#allocation10 + $0x4b0] sm:$0xf0] }
 0x6ac   : > { %v12502_v6 = vld [vmem:[#allocation10 + $0xcd0] sm:$0xf]  ;;  %v11895_v1 = vor.u32 %v13495_v17, %v11894_v15  ;;  %8451 = vmatpush.bf16.msrb.mxu1 %v11703_v32  ;;  %v11256_v17 = vld [vmem:[#allocation10 + $0x330] sm:$0xf0] }
 0x6ad   : > { %v13647_v63 = vld [vmem:[#allocation10 + $0xcec] sm:$0xf0]  ;;  %v11192_v38 = vld [vmem:[#allocation10 + $0x2b0] sm:$0xf0] }
 0x6ae   : > { %v11670_v14 = vld [vmem:[#allocation10 + $0x650] sm:$0xf]  ;;  %v12503_v62 = vor.u32 %v13647_v63, %v12502_v6  ;;  %8466 = vmatpush.bf16.msrb.mxu2 %v11895_v1  ;;  %8539 = vmatpush.bf16.msra.mxu3 %v11547_v51  ;;  %v13483_v6 = vld [vmem:[#allocation10 + $0x7d4] sm:$0xf]  ;;  %v11259_v1 = vor.u32 %v13331_v48, %v11256_v17 }
 0x6af   : > { %v13439_v9 = vld [vmem:[#allocation10 + $0x66c] sm:$0xf0]  ;;  %v11864_v63 = vld [vmem:[#allocation10 + $0x7f0] sm:$0xf0] }
 0x6b0   : > { %v11671_v35 = vor.u32 %v13439_v9, %v11670_v14  ;;  %v12470_v50 = vld [vmem:[#allocation10 + $0xc90] sm:$0xf]  ;;  %8489 = vmatpush.bf16.msra.mxu0 %v12503_v62  ;;  %v11451_v14 = vor.u32 %v13379_v20, %v11448_v31  ;;  %v11416_v62 = vld [vmem:[#allocation10 + $0x470] sm:$0xf0]  ;;  %v11867_v0 = vor.u32 %v13483_v6, %v11864_v63  ;;  %v8221_v31 = vpop.f32.mrf.mxu1 }
 0x6b1   : > { %v13639_v61 = vld [vmem:[#allocation10 + $0xcac] sm:$0xf0]  ;;  %8467 = vmatmul.bf16.vlgmr.msrb.gmra.mxu2 %v15404_v4  ;;  %v11419_v18 = vor.u32 %v13371_v28, %v11416_v62  ;;  %v13363_v22 = vld [vmem:[#allocation10 + $0x414] sm:$0xf] }
 0x6b2   : > { %v11638_v5 = vld [vmem:[#allocation10 + $0x610] sm:$0xf]  ;;  %8524 = vmatpush.bf16.msra.mxu2 %v11355_v47  ;;  %v12471_v12 = vor.u32 %v13639_v61, %v12470_v50  ;;  %8452 = vmatpush.bf16.msrb.mxu1 %v11671_v35  ;;  %v13323_v47 = vld [vmem:[#allocation10 + $0x2d4] sm:$0xf]  ;;  %v8858_v35 = vsel %vm471_vm0, %v8850_v52, 0.0  ;;  %v15494_v50 = vld [vmem:[#allocation11] sm:$0xff] }
 0x6b3   : > { %v13431_v41 = vld [vmem:[#allocation10 + $0x62c] sm:$0xf0]  ;;  %8540 = vmatpush.bf16.msra.mxu3 %v11515_v26  ;;  %v7974_v61 = vperm.slane %v15494_v50, 2  ;;  %v15499_v46 = vadd.f32 %v8858_v35, %v8857_v53  ;;  %v13467_v56 = vld [vmem:[#allocation10 + $0x754] sm:$0xf] }
 0x6b4   : > { %v12758_v43 = vld [vmem:[#allocation10 + $0xed0] sm:$0xf]  ;;  %v11639_v24 = vor.u32 %v13431_v41, %v11638_v5  ;;  %8490 = vmatpush.bf16.msra.mxu0 %v12471_v12  ;;  %v8236_v5 = vpop.f32.mrf.mxu2  ;;  %v11800_v59 = vld [vmem:[#allocation10 + $0x770] sm:$0xf0] }
 0x6b5   : > { %v13711_v27 = vld [vmem:[#allocation10 + $0xeec] sm:$0xf0]  ;;  %v11160_v17 = vld [vmem:[#allocation10 + $0x270] sm:$0xf0]  ;;  %v11803_v11 = vor.u32 %v13467_v56, %v11800_v59 }
 0x6b6   : > { %v12438_v45 = vld [vmem:[#allocation10 + $0xc50] sm:$0xf]  ;;  %v12759_v40 = vor.u32 %v13711_v27, %v12758_v43  ;;  %8525 = vmatpush.bf16.msra.mxu2 %v11323_v30  ;;  %8453 = vmatpush.bf16.msrb.mxu1 %v11639_v24  ;;  %v11832_v30 = vld [vmem:[#allocation10 + $0x7b0] sm:$0xf0]  ;;  %v15497_v43 = vpop.f32.mrf.mxu3  ;;  %v11227_v27 = vor.u32 %v13323_v47, %v11224_v44 }
 0x6b7   : > { %v13631_v19 = vld [vmem:[#allocation10 + $0xc6c] sm:$0xf0]  ;;  %8541 = vmatpush.bf16.msra.mxu3 %v11483_v60  ;;  %v11835_v24 = vor.u32 %v13475_v21, %v11832_v30  ;;  %v11387_v60 = vor.u32 %v13363_v22, %v11384_v29  ;;  %v13283_v20 = vld [vmem:[#allocation10 + $0x194] sm:$0xf]  ;;  %v8260_v30 = vpop.f32.mrf.mxu0 }
 0x6b8   : > { %v12726_v34 = vld [vmem:[#allocation10 + $0xe90] sm:$0xf]  ;;  %v12439_v15 = vor.u32 %v13631_v19, %v12438_v45  ;;  %v11096_v45 = vld [vmem:[#allocation10 + $0x1f0] sm:$0xf0] }
 0x6b9   : > { %v13703_v16 = vld [vmem:[#allocation10 + $0xeac] sm:$0xf0]  ;;  %8454 = vmatmul.bf16.vlgmr.msrb.gmra.mxu1 %v15391_v7  ;;  %v13675_v19 = vld [vmem:[#allocation10 + $0xdd4] sm:$0xf] }
 0x6ba   : > { %v12406_v23 = vld [vmem:[#allocation10 + $0xc10] sm:$0xf]  ;;  %8502 = vmatpush.bf16.msra.mxu1 %v12759_v40  ;;  %v12727_v32 = vor.u32 %v13703_v16, %v12726_v34  ;;  %8526 = vmatpush.bf16.msra.mxu2 %v11291_v54  ;;  %v11195_v54 = vor.u32 %v13315_v55, %v11192_v38  ;;  %v8209_v34 = vadd.f32 %v15480_v49, %v7974_v61  ;;  %v12600_v52 = vld [vmem:[#allocation10 + $0xdb0] sm:$0xf0]  ;;  %v8223_v38 = vpop.f32.mrf.mxu1 }
 0x6bb   : > { %v13623_v33 = vld [vmem:[#allocation10 + $0xc2c] sm:$0xf0]  ;;  %8491 = vmatpush.bf16.msra.mxu0 %v12439_v15  ;;  %8542 = vmatpush.bf16.msra.mxu3 %v11451_v14  ;;  %v11099_v16 = vor.u32 %v13291_v42, %v11096_v45  ;;  %v12635_v48 = vor.u32 %v13675_v19, %v12632_v36  ;;  %v13307_v15 = vld [vmem:[#allocation10 + $0x254] sm:$0xf] }
 0x6bc   : > { %v12694_v9 = vld [vmem:[#allocation10 + $0xe50] sm:$0xf]  ;;  %v12407_v51 = vor.u32 %v13623_v33, %v12406_v23  ;;  %v11064_v23 = vld [vmem:[#allocation10 + $0x1b0] sm:$0xf0]  ;;  %v11163_v49 = vor.u32 %v13307_v15, %v11160_v17 }
 0x6bd   : > { %v13695_v25 = vld [vmem:[#allocation10 + $0xe6c] sm:$0xf0]  ;;  %v13667_v33 = vld [vmem:[#allocation10 + $0xd94] sm:$0xf] }
 0x6be   : > { %8503 = vmatpush.bf16.msra.mxu1 %v12727_v32  ;;  %v12695_v41 = vor.u32 %v13695_v25, %v12694_v9  ;;  %v12662_v26 = vld [vmem:[#allocation10 + $0xe10] sm:$0xf]  ;;  %8527 = vmatpush.bf16.msra.mxu2 %v11259_v1  ;;  %v8222_v32 = vadd.f32 %v8221_v31, %v8209_v34  ;;  %v13459_v6 = vld [vmem:[#allocation10 + $0x714] sm:$0xf]  ;;  %v8301_v1 = vpop.f32.mrf.mxu3  ;;  %v11067_v25 = vor.u32 %v13283_v20, %v11064_v23 }
 0x6bf   : > { %v13687_v12 = vld [vmem:[#allocation10 + $0xe2c] sm:$0xf0]  ;;  %8492 = vmatpush.bf16.msra.mxu0 %v12407_v51  ;;  %8543 = vmatpush.bf16.msra.mxu3 %v11419_v18  ;;  %v11768_v63 = vld [vmem:[#allocation10 + $0x730] sm:$0xf0]  ;;  %v12603_v47 = vor.u32 %v13667_v33, %v12600_v52  ;;  %v8262_v23 = vpop.f32.mrf.mxu0 }
 0x6c0   : > { %v12663_v40 = vor.u32 %v13687_v12, %v12662_v26  ;;  %v13299_v14 = vld [vmem:[#allocation10 + $0x214] sm:$0xf]  ;;  %v8235_v9 = vadd.f32 %v15489_v3, %v8222_v32  ;;  %v11771_v62 = vor.u32 %v13459_v6, %v11768_v63 }
 0x6c1   : > { %v11128_v51 = vld [vmem:[#allocation10 + $0x230] sm:$0xf0] }
 0x6c2   : > { %8504 = vmatpush.bf16.msra.mxu1 %v12695_v41  ;;  %8528 = vmatpush.bf16.msra.mxu2 %v11227_v27  ;;  %v13275_v44 = vld [vmem:[#allocation10 + $0x154] sm:$0xf]  ;;  %v8248_v35 = vadd.f32 %v15478_v37, %v8235_v9  ;;  %v11131_v3 = vor.u32 %v13299_v14, %v11128_v51 }
 0x6c3   : > { %8550 = vmatpush.bf16.msrb.mxu0 %v11867_v0  ;;  %8544 = vmatpush.bf16.msra.mxu3 %v11387_v60  ;;  %v11032_v28 = vld [vmem:[#allocation10 + $0x170] sm:$0xf0] }
 0x6c4   : > { %8493 = vmatmul.bf16.vlgmr.msra.gmra.mxu0 %v15406_v2  ;;  %v13611_v53 = vld [vmem:[#allocation10 + $0xbd4] sm:$0xf]  ;;  %v11035_v26 = vor.u32 %v13275_v44, %v11032_v28  ;;  %v15506_v55 = vadd.f32 %v8260_v30, %v8248_v35 }
 0x6c5   : > { %v12376_v0 = vld [vmem:[#allocation10 + $0xbf0] sm:$0xf0] }
 0x6c6   : > { %8505 = vmatpush.bf16.msra.mxu1 %v12663_v40  ;;  %8529 = vmatpush.bf16.msra.mxu2 %v11195_v54  ;;  %v13659_v21 = vld [vmem:[#allocation10 + $0xd54] sm:$0xf]  ;;  %v12379_v27 = vor.u32 %v13611_v53, %v12376_v0 }
 0x6c7   : > { %8551 = vmatpush.bf16.msrb.mxu0 %v11835_v24  ;;  %8589 = vmatpush.bf16.msrb.mxu3 %v12635_v48  ;;  %v12568_v61 = vld [vmem:[#allocation10 + $0xd70] sm:$0xf0] }
 0x6c8   : > { %8545 = vmatmul.bf16.vlgmr.msra.gmra.mxu3 %v15380_v13  ;;  %v13451_v5 = vld [vmem:[#allocation10 + $0x6d4] sm:$0xf]  ;;  %v12571_v37 = vor.u32 %v13659_v21, %v12568_v61  ;;  %v15513_v21 = vpop.f32.mrf.mxu3 }
 0x6c9   : > { %v11736_v41 = vld [vmem:[#allocation10 + $0x6f0] sm:$0xf0]  ;;  %12776 = vmatmul.msk.bf16.vlgmr.msra.gmra.mxu1 %vm621_vm7, %v15411_v8 }
 0x6ca   : > { %8511 = vmatpush.bf16.msrb.mxu1 %v11099_v16  ;;  %8530 = vmatpush.bf16.msra.mxu2 %v11163_v49  ;;  %v13267_v18 = vld [vmem:[#allocation10 + $0x114] sm:$0xf]  ;;  %v11739_v22 = vor.u32 %v13451_v5, %v11736_v41 }
 0x6cb   : > { %8552 = vmatpush.bf16.msrb.mxu0 %v11803_v11  ;;  %8590 = vmatpush.bf16.msrb.mxu3 %v12603_v47  ;;  %v11000_v12 = vld [vmem:[#allocation10 + $0x130] sm:$0xf0]  ;;  %v15511_v11 = vpop.f32.mrf.mxu2 }
 0x6cc   : > { %v13603_v29 = vld [vmem:[#allocation10 + $0xb94] sm:$0xf]  ;;  %v11003_v40 = vor.u32 %v13267_v18, %v11000_v12 }
 0x6cd   : > { %v12344_v42 = vld [vmem:[#allocation10 + $0xbb0] sm:$0xf0] }
 0x6ce   : > { %8512 = vmatpush.bf16.msrb.mxu1 %v11067_v25  ;;  %v13651_v24 = vld [vmem:[#allocation10 + $0xd14] sm:$0xf]  ;;  %8531 = vmatpush.bf16.msra.mxu2 %v11131_v3  ;;  %v12347_v56 = vor.u32 %v13603_v29, %v12344_v42 }
 0x6cf   : > { %8553 = vmatpush.bf16.msrb.mxu0 %v11771_v62  ;;  %v12536_v45 = vld [vmem:[#allocation10 + $0xd30] sm:$0xf0]  ;;  %8591 = vmatpush.bf16.msrb.mxu3 %v12571_v37 }
 0x6d0   : > { %v13443_v19 = vld [vmem:[#allocation10 + $0x694] sm:$0xf]  ;;  %v12539_v60 = vor.u32 %v13651_v24, %v12536_v45 }
 0x6d1   : > { %v11704_v36 = vld [vmem:[#allocation10 + $0x6b0] sm:$0xf0]  ;;  %8532 = vmatmul.bf16.vlgmr.msra.gmra.mxu2 %v15356_v57 }
 0x6d2   : > { %8513 = vmatpush.bf16.msrb.mxu1 %v11035_v26  ;;  %8576 = vmatpush.bf16.msrb.mxu2 %v12379_v27  ;;  %v13259_v59 = vld [vmem:[#allocation10 + $0xd4] sm:$0xf]  ;;  %v11707_v34 = vor.u32 %v13443_v19, %v11704_v36 }
 0x6d3   : > { %v10968_v54 = vld [vmem:[#allocation10 + $0xf0] sm:$0xf0]  ;;  %8554 = vmatpush.bf16.msrb.mxu0 %v11739_v22  ;;  %8592 = vmatpush.bf16.msrb.mxu3 %v12539_v60  ;;  %v8288_v18 = vpop.f32.mrf.mxu2  ;;  %v11870_v60 = vld [vmem:[#allocation10 + $0x7d8] sm:$0xf] }
 0x6d4   : > { %v13595_v16 = vld [vmem:[#allocation10 + $0xb54] sm:$0xf]  ;;  %v10971_v33 = vor.u32 %v13259_v59, %v10968_v54 }
 0x6d5   : > { %v12312_v48 = vld [vmem:[#allocation10 + $0xb70] sm:$0xf0] }
 0x6d6   : > { %v13643_v15 = vld [vmem:[#allocation10 + $0xcd4] sm:$0xf]  ;;  %8514 = vmatpush.bf16.msrb.mxu1 %v11003_v40  ;;  %8577 = vmatpush.bf16.msrb.mxu2 %v12347_v56  ;;  %v12315_v52 = vor.u32 %v13595_v16, %v12312_v48 }
 0x6d7   : > { %v12504_v17 = vld [vmem:[#allocation10 + $0xcf0] sm:$0xf0]  ;;  %8555 = vmatpush.bf16.msrb.mxu0 %v11707_v34  ;;  %v13488_v34 = vld [vmem:[#allocation10 + $0x7f4] sm:$0xf0] }
 0x6d8   : > { %v13435_v20 = vld [vmem:[#allocation10 + $0x654] sm:$0xf]  ;;  %v12507_v63 = vor.u32 %v13643_v15, %v12504_v17 }
 0x6d9   : > { %v11672_v31 = vld [vmem:[#allocation10 + $0x670] sm:$0xf0] }
 0x6da   : > { %v13251_v32 = vld [vmem:[#allocation10 + $0x94] sm:$0xf]  ;;  %v11675_v1 = vor.u32 %v13435_v20, %v11672_v31  ;;  %8515 = vmatpush.bf16.msrb.mxu1 %v10971_v33  ;;  %8578 = vmatpush.bf16.msrb.mxu2 %v12315_v52  ;;  %v8314_v20 = vpop.f32.mrf.mxu3 }
 0x6db   : > { %v10936_v6 = vld [vmem:[#allocation10 + $0xb0] sm:$0xf0]  ;;  %8593 = vmatpush.bf16.msrb.mxu3 %v12507_v63 }
 0x6dc   : > { %v13587_v49 = vld [vmem:[#allocation10 + $0xb14] sm:$0xf]  ;;  %v10939_v62 = vor.u32 %v13251_v32, %v10936_v6  ;;  %8556 = vmatpush.bf16.msrb.mxu0 %v11675_v1  ;;  %v8273_v32 = vpop.f32.mrf.mxu1  ;;  %v11871_v6 = vor.u32 %v13488_v34, %v11870_v60  ;;  %v13416_v34 = vld [vmem:[#allocation10 + $0x5b4] sm:$0xf0] }
 0x6dd   : > { %v12280_v14 = vld [vmem:[#allocation10 + $0xb30] sm:$0xf0] }
 0x6de   : > { %v13635_v9 = vld [vmem:[#allocation10 + $0xc94] sm:$0xf]  ;;  %v12283_v53 = vor.u32 %v13587_v49, %v12280_v14  ;;  %8516 = vmatpush.bf16.msrb.mxu1 %v10939_v62  ;;  %v11838_v14 = vld [vmem:[#allocation10 + $0x798] sm:$0xf] }
 0x6df   : > { %v12472_v25 = vld [vmem:[#allocation10 + $0xcb0] sm:$0xf0]  ;;  %v11102_v62 = vld [vmem:[#allocation10 + $0x1d8] sm:$0xf] }
 0x6e0   : > { %v13427_v47 = vld [vmem:[#allocation10 + $0x614] sm:$0xf]  ;;  %v12475_v35 = vor.u32 %v13635_v9, %v12472_v25  ;;  %8579 = vmatpush.bf16.msrb.mxu2 %v12283_v53  ;;  %v8274_v9 = vadd.f32 %v8273_v32, %v15506_v55  ;;  %v13480_v25 = vld [vmem:[#allocation10 + $0x7b4] sm:$0xf0] }
 0x6e1   : > { %v11640_v51 = vld [vmem:[#allocation10 + $0x630] sm:$0xf0]  ;;  %v13296_v53 = vld [vmem:[#allocation10 + $0x1f4] sm:$0xf0]  ;;  %v11839_v55 = vor.u32 %v13480_v25, %v11838_v14 }
 0x6e2   : > { %v13707_v44 = vld [vmem:[#allocation10 + $0xed4] sm:$0xf]  ;;  %v11643_v61 = vor.u32 %v13427_v47, %v11640_v51  ;;  %8594 = vmatpush.bf16.msrb.mxu3 %v12475_v35  ;;  %v13456_v14 = vld [vmem:[#allocation10 + $0x6f4] sm:$0xf0] }
 0x6e3   : > { %v12760_v28 = vld [vmem:[#allocation10 + $0xef0] sm:$0xf0]  ;;  %v13272_v25 = vld [vmem:[#allocation10 + $0x134] sm:$0xf0] }
 0x6e4   : > { %v13243_v0 = vld [vmem:[#allocation10 + $0x54] sm:$0xf]  ;;  %v12763_v30 = vor.u32 %v13707_v44, %v12760_v28  ;;  %8557 = vmatpush.bf16.msrb.mxu0 %v11643_v61  ;;  %v7975_v44 = vperm.slane %v15494_v50, 3 }
 0x6e5   : > { %v10904_v5 = vld [vmem:[#allocation10 + $0x70] sm:$0xf0] }
 0x6e6   : > { %v13579_v41 = vld [vmem:[#allocation10 + $0xad4] sm:$0xf]  ;;  %v10907_v37 = vor.u32 %v13243_v0, %v10904_v5  ;;  %v8287_v0 = vadd.f32 %v15511_v11, %v8274_v9  ;;  %v13472_v11 = vld [vmem:[#allocation10 + $0x774] sm:$0xf0] }
 0x6e7   : > { %v12248_v3 = vld [vmem:[#allocation10 + $0xaf0] sm:$0xf0]  ;;  %8558 = vmatmul.bf16.vlgmr.msrb.gmra.mxu0 %v15391_v7  ;;  %v11006_v9 = vld [vmem:[#allocation10 + $0x118] sm:$0xf] }
 0x6e8   : > { %v13627_v26 = vld [vmem:[#allocation10 + $0xc54] sm:$0xf]  ;;  %v12251_v22 = vor.u32 %v13579_v41, %v12248_v3  ;;  %8606 = vmatpush.bf16.msra.mxu0 %v12763_v30  ;;  %8517 = vmatpush.bf16.msrb.mxu1 %v10907_v37  ;;  %v8300_v18 = vadd.f32 %v15497_v43, %v8287_v0 }
 0x6e9   : > { %v12440_v27 = vld [vmem:[#allocation10 + $0xc70] sm:$0xf0] }
 0x6ea   : > { %v13699_v12 = vld [vmem:[#allocation10 + $0xe94] sm:$0xf]  ;;  %v12443_v45 = vor.u32 %v13627_v26, %v12440_v27  ;;  %8580 = vmatpush.bf16.msrb.mxu2 %v12251_v22  ;;  %v11614_v26 = vld [vmem:[#allocation10 + $0x5d8] sm:$0xf] }
 0x6eb   : > { %v12728_v38 = vld [vmem:[#allocation10 + $0xeb0] sm:$0xf0]  ;;  %v13424_v27 = vld [vmem:[#allocation10 + $0x5f4] sm:$0xf0] }
 0x6ec   : > { %v13235_v29 = vld [vmem:[#allocation10 + $0x14] sm:$0xf]  ;;  %v12731_v56 = vor.u32 %v13699_v12, %v12728_v38  ;;  %8595 = vmatpush.bf16.msrb.mxu3 %v12443_v45  ;;  %v11103_v12 = vor.u32 %v13296_v53, %v11102_v62  ;;  %v11806_v38 = vld [vmem:[#allocation10 + $0x758] sm:$0xf]  ;;  %v11615_v45 = vor.u32 %v13424_v27, %v11614_v26 }
 0x6ed   : > { %v10872_v42 = vld [vmem:[#allocation10 + $0x30] sm:$0xf0]  ;;  %v11070_v22 = vld [vmem:[#allocation10 + $0x198] sm:$0xf]  ;;  %v11807_v43 = vor.u32 %v13472_v11, %v11806_v38 }
 0x6ee   : > { %v13571_v24 = vld [vmem:[#allocation10 + $0xa94] sm:$0xf]  ;;  %v10875_v15 = vor.u32 %v13235_v29, %v10872_v42  ;;  %8607 = vmatpush.bf16.msra.mxu0 %v12731_v56  ;;  %v13288_v29 = vld [vmem:[#allocation10 + $0x1b4] sm:$0xf0]  ;;  %v8313_v42 = vadd.f32 %v15513_v21, %v7975_v44 }
 0x6ef   : > { %v12216_v19 = vld [vmem:[#allocation10 + $0xab0] sm:$0xf0]  ;;  %v11071_v60 = vor.u32 %v13288_v29, %v11070_v22  ;;  %v11038_v21 = vld [vmem:[#allocation10 + $0x158] sm:$0xf] }
 0x6f0   : > { %v13619_v36 = vld [vmem:[#allocation10 + $0xc14] sm:$0xf]  ;;  %v12219_v17 = vor.u32 %v13571_v24, %v12216_v19  ;;  %8518 = vmatpush.bf16.msrb.mxu1 %v10875_v15  ;;  %v8325_v19 = vpop.f32.mrf.mxu0  ;;  %v13280_v15 = vld [vmem:[#allocation10 + $0x174] sm:$0xf0] }
 0x6f1   : > { %v12408_v40 = vld [vmem:[#allocation10 + $0xc30] sm:$0xf0]  ;;  %v11486_v22 = vld [vmem:[#allocation10 + $0x4d8] sm:$0xf] }
 0x6f2   : > { %v13547_v59 = vld [vmem:[#allocation10 + $0x9d4] sm:$0xf]  ;;  %v12411_v31 = vor.u32 %v13619_v36, %v12408_v40  ;;  %8581 = vmatpush.bf16.msrb.mxu2 %v12219_v17  ;;  %v8275_v36 = vpop.f32.mrf.mxu1 }
 0x6f3   : > { %v12120_v54 = vld [vmem:[#allocation10 + $0x9f0] sm:$0xf0]  ;;  %8519 = vmatmul.bf16.vlgmr.msrb.gmra.mxu1 %v15354_v10  ;;  %v13256_v36 = vld [vmem:[#allocation10 + $0xb4] sm:$0xf0] }
 0x6f4   : > { %v13691_v16 = vld [vmem:[#allocation10 + $0xe54] sm:$0xf]  ;;  %v12123_v23 = vor.u32 %v13547_v59, %v12120_v54  ;;  %8596 = vmatpush.bf16.msrb.mxu3 %v12411_v31  ;;  %v11582_v59 = vld [vmem:[#allocation10 + $0x598] sm:$0xf]  ;;  %v15523_v54 = vadd.f32 %v8325_v19, %v8313_v42  ;;  %v8825_v31 = vmax.f32 %v8300_v18, 0.0 }
 0x6f5   : > { %v12696_v48 = vld [vmem:[#allocation10 + $0xe70] sm:$0xf0]  ;;  %v13392_v42 = vld [vmem:[#allocation10 + $0x4f4] sm:$0xf0] }
 0x6f6   : > { %v13563_v33 = vld [vmem:[#allocation10 + $0xa54] sm:$0xf]  ;;  %v12699_v63 = vor.u32 %v13691_v16, %v12696_v48  ;;  %8563 = vmatpush.bf16.msra.mxu1 %v12123_v23  ;;  %v11774_v16 = vld [vmem:[#allocation10 + $0x718] sm:$0xf]  ;;  %v8835_v23 = vperm.slane %v15482_v58, 2 }
 0x6f7   : > { %v12184_v52 = vld [vmem:[#allocation10 + $0xa70] sm:$0xf0]  ;;  %8597 = vmatmul.bf16.vlgmr.msrb.gmra.mxu3 %v15406_v2  ;;  %v13464_v48 = vld [vmem:[#allocation10 + $0x734] sm:$0xf0] }
 0x6f8   : > { %v13539_v1 = vld [vmem:[#allocation10 + $0x994] sm:$0xf]  ;;  %v12187_v28 = vor.u32 %v13563_v33, %v12184_v52  ;;  %8654 = vmatpush.bf16.msra.mxu3 %v11871_v6  ;;  %8608 = vmatpush.bf16.msra.mxu0 %v12699_v63  ;;  %v11583_v33 = vor.u32 %v13416_v34, %v11582_v59  ;;  %v11775_v52 = vor.u32 %v13464_v48, %v11774_v16  ;;  %v11550_v6 = vld [vmem:[#allocation10 + $0x558] sm:$0xf]  ;;  %v8327_v44 = vpop.f32.mrf.mxu0 }
 0x6f9   : > { %v12088_v49 = vld [vmem:[#allocation10 + $0x9b0] sm:$0xf0]  ;;  %v11039_v63 = vor.u32 %v13280_v15, %v11038_v21  ;;  %v10942_v19 = vld [vmem:[#allocation10 + $0x98] sm:$0xf] }
 0x6fa   : > { %v13683_v47 = vld [vmem:[#allocation10 + $0xe14] sm:$0xf]  ;;  %v12091_v35 = vor.u32 %v13539_v1, %v12088_v49  ;;  %8582 = vmatpush.bf16.msrb.mxu2 %v12187_v28  ;;  %v13408_v1 = vld [vmem:[#allocation10 + $0x574] sm:$0xf0]  ;;  %v10943_v15 = vor.u32 %v13256_v36, %v10942_v19 }
 0x6fb   : > { %v12664_v51 = vld [vmem:[#allocation10 + $0xe30] sm:$0xf0]  ;;  %v11742_v49 = vld [vmem:[#allocation10 + $0x6d8] sm:$0xf]  ;;  %v11551_v28 = vor.u32 %v13408_v1, %v11550_v6 }
 0x6fc   : > { %v13555_v61 = vld [vmem:[#allocation10 + $0xa14] sm:$0xf]  ;;  %v12667_v3 = vor.u32 %v13683_v47, %v12664_v51  ;;  %8564 = vmatpush.bf16.msra.mxu1 %v12091_v35  ;;  %8655 = vmatpush.bf16.msra.mxu3 %v11839_v55  ;;  %v15527_v47 = vpop.f32.mrf.mxu2  ;;  %v8851_v51 = vmul.f32 %v8835_v23, %v8825_v31  ;;  %v11743_v62 = vor.u32 %v13456_v14, %v11742_v49  ;;  %v11518_v35 = vld [vmem:[#allocation10 + $0x518] sm:$0xf]  ;;  %v8338_v14 = vpop.f32.mrf.mxu1 }
 0x6fd   : > { %v12152_v5 = vld [vmem:[#allocation10 + $0xa30] sm:$0xf0]  ;;  %v13448_v55 = vld [vmem:[#allocation10 + $0x6b4] sm:$0xf0] }
 0x6fe   : > { %v13531_v41 = vld [vmem:[#allocation10 + $0x954] sm:$0xf]  ;;  %v12155_v37 = vor.u32 %v13555_v61, %v12152_v5  ;;  %8609 = vmatpush.bf16.msra.mxu0 %v12667_v3  ;;  %v11007_v61 = vor.u32 %v13272_v25, %v11006_v9  ;;  %v13400_v5 = vld [vmem:[#allocation10 + $0x534] sm:$0xf0]  ;;  %v8860_v18 = vsel %vm471_vm0, %v8851_v51, 0.0 }
 0x6ff   : > { %v12056_v30 = vld [vmem:[#allocation10 + $0x970] sm:$0xf0]  ;;  %v10974_v3 = vld [vmem:[#allocation10 + $0xd8] sm:$0xf]  ;;  %v11519_v38 = vor.u32 %v13400_v5, %v11518_v35  ;;  %v15535_v59 = vadd.f32 %v8860_v18, %v15499_v46 }
 0x700   : > { %v12059_v24 = vor.u32 %v13531_v41, %v12056_v30  ;;  %v13523_v40 = vld [vmem:[#allocation10 + $0x914] sm:$0xf]  ;;  %8583 = vmatpush.bf16.msrb.mxu2 %v12155_v37  ;;  %8656 = vmatpush.bf16.msra.mxu3 %v11807_v43  ;;  %v11710_v41 = vld [vmem:[#allocation10 + $0x698] sm:$0xf] }
 0x701   : > { %v12024_v56 = vld [vmem:[#allocation10 + $0x930] sm:$0xf0]  ;;  %12777 = vmatmul.msk.bf16.vlgmr.msra.gmra.mxu0 %vm621_vm7, %v15411_v8  ;;  %v13264_v30 = vld [vmem:[#allocation10 + $0xf4] sm:$0xf0]  ;;  %v11711_v11 = vor.u32 %v13448_v55, %v11710_v41 }
 0x702   : > { %8615 = vmatpush.bf16.msrb.mxu0 %v11103_v12  ;;  %8565 = vmatpush.bf16.msra.mxu1 %v12059_v24  ;;  %v12027_v17 = vor.u32 %v13523_v40, %v12024_v56  ;;  %v13515_v20 = vld [vmem:[#allocation10 + $0x8d4] sm:$0xf]  ;;  %v15532_v12 = vpop.f32.mrf.mxu3  ;;  %v10975_v29 = vor.u32 %v13264_v30, %v10974_v3  ;;  %v11678_v24 = vld [vmem:[#allocation10 + $0x658] sm:$0xf] }
 0x703   : > { %v11992_v32 = vld [vmem:[#allocation10 + $0x8f0] sm:$0xf0]  ;;  %8584 = vmatmul.bf16.vlgmr.msrb.gmra.mxu2 %v15393_v39  ;;  %v11454_v48 = vld [vmem:[#allocation10 + $0x498] sm:$0xf] }
 0x704   : > { %8641 = vmatpush.bf16.msra.mxu2 %v11615_v45  ;;  %v11995_v58 = vor.u32 %v13515_v20, %v11992_v32  ;;  %8657 = vmatpush.bf16.msra.mxu3 %v11775_v52  ;;  %v13507_v53 = vld [vmem:[#allocation10 + $0x894] sm:$0xf]  ;;  %v13440_v45 = vld [vmem:[#allocation10 + $0x674] sm:$0xf0]  ;;  %v8353_v43 = vpop.f32.mrf.mxu2 }
 0x705   : > { %v11960_v0 = vld [vmem:[#allocation10 + $0x8b0] sm:$0xf0]  ;;  %v11679_v34 = vor.u32 %v13440_v45, %v11678_v24  ;;  %v13384_v21 = vld [vmem:[#allocation10 + $0x4b4] sm:$0xf0] }
 0x706   : > { %8616 = vmatpush.bf16.msrb.mxu0 %v11071_v60  ;;  %8566 = vmatpush.bf16.msra.mxu1 %v12027_v17  ;;  %v11963_v26 = vor.u32 %v13507_v53, %v11960_v0  ;;  %v13499_v27 = vld [vmem:[#allocation10 + $0x854] sm:$0xf]  ;;  %v11487_v60 = vor.u32 %v13392_v42, %v11486_v22  ;;  %v11646_v17 = vld [vmem:[#allocation10 + $0x618] sm:$0xf]  ;;  %v11455_v1 = vor.u32 %v13384_v21, %v11454_v48 }
 0x707   : > { %v11928_v37 = vld [vmem:[#allocation10 + $0x870] sm:$0xf0]  ;;  %v13432_v20 = vld [vmem:[#allocation10 + $0x634] sm:$0xf0] }
 0x708   : > { %8642 = vmatpush.bf16.msra.mxu2 %v11583_v33  ;;  %8658 = vmatpush.bf16.msra.mxu3 %v11743_v62  ;;  %v11931_v40 = vor.u32 %v13499_v27, %v11928_v37  ;;  %v13491_v56 = vld [vmem:[#allocation10 + $0x814] sm:$0xf]  ;;  %v11358_v31 = vld [vmem:[#allocation10 + $0x3d8] sm:$0xf]  ;;  %v11647_v49 = vor.u32 %v13432_v20, %v11646_v17 }
 0x709   : > { %v11896_v16 = vld [vmem:[#allocation10 + $0x830] sm:$0xf0]  ;;  %v13360_v23 = vld [vmem:[#allocation10 + $0x3f4] sm:$0xf0] }
 0x70a   : > { %8617 = vmatpush.bf16.msrb.mxu0 %v11039_v63  ;;  %8567 = vmatpush.bf16.msra.mxu1 %v11995_v58  ;;  %v12766_v33 = vld [vmem:[#allocation10 + $0xed8] sm:$0xf]  ;;  %v11899_v32 = vor.u32 %v13491_v56, %v11896_v16  ;;  %v8366_v63 = vpop.f32.mrf.mxu3  ;;  %v11359_v9 = vor.u32 %v13360_v23, %v11358_v31  ;;  %v8377_v56 = vpop.f32.mrf.mxu0 }
 0x70b   : > { %v13712_v52 = vld [vmem:[#allocation10 + $0xef4] sm:$0xf0] }
 0x70c   : > { %8643 = vmatpush.bf16.msra.mxu2 %v11551_v28  ;;  %8659 = vmatpush.bf16.msra.mxu3 %v11711_v11  ;;  %v10910_v6 = vld [vmem:[#allocation10 + $0x58] sm:$0xf]  ;;  %v12767_v25 = vor.u32 %v13712_v52, %v12766_v33  ;;  %v8339_v28 = vadd.f32 %v8338_v14, %v15523_v54 }
 0x70d   : > { %v13248_v46 = vld [vmem:[#allocation10 + $0x74] sm:$0xf0] }
 0x70e   : > { %8618 = vmatpush.bf16.msrb.mxu0 %v11007_v61  ;;  %8568 = vmatpush.bf16.msra.mxu1 %v11963_v26  ;;  %v11422_v58 = vld [vmem:[#allocation10 + $0x458] sm:$0xf]  ;;  %v10911_v62 = vor.u32 %v13248_v46, %v10910_v6  ;;  %v15538_v61 = vpop.f32.mrf.mxu2  ;;  %v8352_v55 = vadd.f32 %v15527_v47, %v8339_v28  ;;  %v11104_v6 = vld [vmem:[#allocation10 + $0x1f8] sm:$0xf0] }
 0x70f   : > { %v13376_v51 = vld [vmem:[#allocation10 + $0x474] sm:$0xf0] }
 0x710   : > { %8644 = vmatpush.bf16.msra.mxu2 %v11519_v38  ;;  %8660 = vmatpush.bf16.msra.mxu3 %v11679_v34  ;;  %v11326_v44 = vld [vmem:[#allocation10 + $0x398] sm:$0xf]  ;;  %v11423_v3 = vor.u32 %v13376_v51, %v11422_v58  ;;  %v8365_v37 = vadd.f32 %v15532_v12, %v8352_v55 }
 0x711   : > { %v13352_v53 = vld [vmem:[#allocation10 + $0x3b4] sm:$0xf0] }
 0x712   : > { %8619 = vmatpush.bf16.msrb.mxu0 %v10975_v29  ;;  %8569 = vmatpush.bf16.msra.mxu1 %v11931_v40  ;;  %v12734_v0 = vld [vmem:[#allocation10 + $0xe98] sm:$0xf]  ;;  %v11327_v27 = vor.u32 %v13352_v53, %v11326_v44  ;;  %v15544_v48 = vadd.f32 %v8377_v56, %v8365_v37  ;;  %v11072_v53 = vld [vmem:[#allocation10 + $0x1b8] sm:$0xf0] }
 0x713   : > { %v13704_v35 = vld [vmem:[#allocation10 + $0xeb4] sm:$0xf0]  ;;  %v13268_v56 = vld [vmem:[#allocation10 + $0x11c] sm:$0xf] }
 0x714   : > { %8645 = vmatpush.bf16.msra.mxu2 %v11487_v60  ;;  %v10878_v5 = vld [vmem:[#allocation10 + $0x18] sm:$0xf]  ;;  %8661 = vmatpush.bf16.msra.mxu3 %v11647_v49  ;;  %v12735_v54 = vor.u32 %v13704_v35, %v12734_v0  ;;  %v8340_v60 = vpop.f32.mrf.mxu1 }
 0x715   : > { %v13240_v41 = vld [vmem:[#allocation10 + $0x34] sm:$0xf0]  ;;  %v11008_v60 = vld [vmem:[#allocation10 + $0x138] sm:$0xf0] }
 0x716   : > { %8620 = vmatpush.bf16.msrb.mxu0 %v10943_v15  ;;  %8570 = vmatpush.bf16.msra.mxu1 %v11899_v32  ;;  %v12126_v30 = vld [vmem:[#allocation10 + $0x9d8] sm:$0xf]  ;;  %v10879_v22 = vor.u32 %v13240_v41, %v10878_v5  ;;  %v8405_v31 = vpop.f32.mrf.mxu2  ;;  %v13292_v32 = vld [vmem:[#allocation10 + $0x1dc] sm:$0xf]  ;;  %v8379_v5 = vpop.f32.mrf.mxu0 }
 0x717   : > { %v13552_v26 = vld [vmem:[#allocation10 + $0x9f4] sm:$0xf0]  ;;  %8662 = vmatmul.bf16.vlgmr.msra.gmra.mxu3 %v15391_v7  ;;  %v11107_v44 = vor.u32 %v13292_v32, %v11104_v6 }
 0x718   : > { %8646 = vmatpush.bf16.msra.mxu2 %v11455_v1  ;;  %8710 = vmatpush.bf16.msrb.mxu3 %v12767_v25  ;;  %v11390_v18 = vld [vmem:[#allocation10 + $0x418] sm:$0xf]  ;;  %v12127_v24 = vor.u32 %v13552_v26, %v12126_v30 }
 0x719   : > { %v13368_v38 = vld [vmem:[#allocation10 + $0x434] sm:$0xf0]  ;;  %8571 = vmatmul.bf16.vlgmr.msra.gmra.mxu1 %v15404_v4 }
 0x71a   : > { %8628 = vmatpush.bf16.msrb.mxu1 %v11359_v9  ;;  %v11294_v11 = vld [vmem:[#allocation10 + $0x358] sm:$0xf]  ;;  %8621 = vmatpush.bf16.msrb.mxu0 %v10911_v62  ;;  %v11391_v36 = vor.u32 %v13368_v38, %v11390_v18  ;;  %v13284_v62 = vld [vmem:[#allocation10 + $0x19c] sm:$0xf] }
 0x71b   : > { %v13344_v29 = vld [vmem:[#allocation10 + $0x374] sm:$0xf0]  ;;  %v13276_v38 = vld [vmem:[#allocation10 + $0x15c] sm:$0xf] }
 0x71c   : > { %v12638_v47 = vld [vmem:[#allocation10 + $0xdd8] sm:$0xf]  ;;  %8647 = vmatpush.bf16.msra.mxu2 %v11423_v3  ;;  %8711 = vmatpush.bf16.msrb.mxu3 %v12735_v54  ;;  %v11295_v34 = vor.u32 %v13344_v29, %v11294_v11  ;;  %v11075_v54 = vor.u32 %v13284_v62, %v11072_v53  ;;  %v11040_v11 = vld [vmem:[#allocation10 + $0x178] sm:$0xf0]  ;;  %v8429_v29 = vpop.f32.mrf.mxu3 }
 0x71d   : > { %v13680_v42 = vld [vmem:[#allocation10 + $0xdf4] sm:$0xf0] }
 0x71e   : > { %v12702_v45 = vld [vmem:[#allocation10 + $0xe58] sm:$0xf]  ;;  %8629 = vmatpush.bf16.msrb.mxu1 %v11327_v27  ;;  %v12639_v16 = vor.u32 %v13680_v42, %v12638_v47  ;;  %8622 = vmatpush.bf16.msrb.mxu0 %v10879_v22 }
 0x71f   : > { %v13696_v19 = vld [vmem:[#allocation10 + $0xe74] sm:$0xf0] }
 0x720   : > { %v12094_v43 = vld [vmem:[#allocation10 + $0x998] sm:$0xf]  ;;  %v12703_v21 = vor.u32 %v13696_v19, %v12702_v45  ;;  %8648 = vmatpush.bf16.msra.mxu2 %v11391_v36 }
 0x721   : > { %v13544_v40 = vld [vmem:[#allocation10 + $0x9b4] sm:$0xf0]  ;;  %8623 = vmatmul.bf16.vlgmr.msrb.gmra.mxu0 %v15354_v10 }
 0x722   : > { %v11262_v12 = vld [vmem:[#allocation10 + $0x318] sm:$0xf]  ;;  %8667 = vmatpush.bf16.msra.mxu0 %v12127_v24  ;;  %v12095_v23 = vor.u32 %v13544_v40, %v12094_v43  ;;  %8630 = vmatpush.bf16.msrb.mxu1 %v11295_v34  ;;  %v11043_v43 = vor.u32 %v13276_v38, %v11040_v11  ;;  %v13356_v38 = vld [vmem:[#allocation10 + $0x3dc] sm:$0xf] }
 0x723   : > { %v13336_v15 = vld [vmem:[#allocation10 + $0x334] sm:$0xf0]  ;;  %8712 = vmatpush.bf16.msrb.mxu3 %v12703_v21  ;;  %8649 = vmatmul.bf16.vlgmr.msra.gmra.mxu2 %v15380_v13  ;;  %v11360_v11 = vld [vmem:[#allocation10 + $0x3f8] sm:$0xf0] }
 0x724   : > { %v12606_v17 = vld [vmem:[#allocation10 + $0xd98] sm:$0xf]  ;;  %8693 = vmatpush.bf16.msrb.mxu2 %v12639_v16  ;;  %v11263_v1 = vor.u32 %v13336_v15, %v11262_v12  ;;  %v7976_v15 = vperm.slane %v15494_v50, 4 }
 0x725   : > { %v13672_v20 = vld [vmem:[#allocation10 + $0xdb4] sm:$0xf0] }
 0x726   : > { %v12670_v33 = vld [vmem:[#allocation10 + $0xe18] sm:$0xf]  ;;  %v12607_v49 = vor.u32 %v13672_v20, %v12606_v17  ;;  %8668 = vmatpush.bf16.msra.mxu0 %v12095_v23  ;;  %8631 = vmatpush.bf16.msrb.mxu1 %v11263_v1 }
 0x727   : > { %v13688_v52 = vld [vmem:[#allocation10 + $0xe34] sm:$0xf0] }
 0x728   : > { %v12062_v46 = vld [vmem:[#allocation10 + $0x958] sm:$0xf]  ;;  %v12671_v9 = vor.u32 %v13688_v52, %v12670_v33  ;;  %8694 = vmatpush.bf16.msrb.mxu2 %v12607_v49  ;;  %v11011_v33 = vor.u32 %v13268_v56, %v11008_v60  ;;  %v13348_v60 = vld [vmem:[#allocation10 + $0x39c] sm:$0xf] }
 0x729   : > { %v13536_v63 = vld [vmem:[#allocation10 + $0x974] sm:$0xf0] }
 0x72a   : > { %v11230_v14 = vld [vmem:[#allocation10 + $0x2d8] sm:$0xf]  ;;  %v12063_v28 = vor.u32 %v13536_v63, %v12062_v46  ;;  %8713 = vmatpush.bf16.msrb.mxu3 %v12671_v9  ;;  %v13260_v46 = vld [vmem:[#allocation10 + $0xdc] sm:$0xf]  ;;  %v8431_v9 = vpop.f32.mrf.mxu3 }
 0x72b   : > { %v13328_v25 = vld [vmem:[#allocation10 + $0x2f4] sm:$0xf0]  ;;  %v10976_v63 = vld [vmem:[#allocation10 + $0xf8] sm:$0xf0] }
 0x72c   : > { %v12574_v58 = vld [vmem:[#allocation10 + $0xd58] sm:$0xf]  ;;  %v11231_v41 = vor.u32 %v13328_v25, %v11230_v14  ;;  %8669 = vmatpush.bf16.msra.mxu0 %v12063_v28  ;;  %v8416_v14 = vpop.f32.mrf.mxu2  ;;  %v12128_v9 = vld [vmem:[#allocation10 + $0x9f8] sm:$0xf0] }
 0x72d   : > { %v13664_v51 = vld [vmem:[#allocation10 + $0xd74] sm:$0xf0]  ;;  %12778 = vmatmul.msk.bf16.vlgmr.msrb.gmra.mxu3 %vm621_vm7, %v15411_v8 }
 0x72e   : > { %v12030_v0 = vld [vmem:[#allocation10 + $0x918] sm:$0xf]  ;;  %v12575_v55 = vor.u32 %v13664_v51, %v12574_v58  ;;  %8719 = vmatpush.bf16.msra.mxu3 %v11107_v44  ;;  %8632 = vmatpush.bf16.msrb.mxu1 %v11231_v41  ;;  %v8417_v58 = vadd.f32 %v8416_v14, %v7976_v15  ;;  %v8390_v51 = vpop.f32.mrf.mxu1  ;;  %v8442_v15 = vpop.f32.mrf.mxu0  ;;  %v13548_v14 = vld [vmem:[#allocation10 + $0x9dc] sm:$0xf] }
 0x72f   : > { %v13528_v35 = vld [vmem:[#allocation10 + $0x934] sm:$0xf0]  ;;  %v8391_v53 = vadd.f32 %v8390_v51, %v15544_v48 }
 0x730   : > { %v11198_v3 = vld [vmem:[#allocation10 + $0x298] sm:$0xf]  ;;  %v12031_v18 = vor.u32 %v13528_v35, %v12030_v0  ;;  %8695 = vmatpush.bf16.msrb.mxu2 %v12575_v55  ;;  %v10979_v0 = vor.u32 %v13260_v46, %v10976_v63  ;;  %v13252_v55 = vld [vmem:[#allocation10 + $0x9c] sm:$0xf] }
 0x731   : > { %v13320_v30 = vld [vmem:[#allocation10 + $0x2b4] sm:$0xf0]  ;;  %v11840_v46 = vld [vmem:[#allocation10 + $0x7b8] sm:$0xf0] }
 0x732   : > { %v12542_v26 = vld [vmem:[#allocation10 + $0xd18] sm:$0xf]  ;;  %v11199_v47 = vor.u32 %v13320_v30, %v11198_v3  ;;  %8720 = vmatpush.bf16.msra.mxu3 %v11075_v54  ;;  %8670 = vmatpush.bf16.msra.mxu0 %v12031_v18  ;;  %v10944_v3 = vld [vmem:[#allocation10 + $0xb8] sm:$0xf0]  ;;  %v8430_v30 = vadd.f32 %v8429_v29, %v8417_v58  ;;  %v8404_v54 = vadd.f32 %v15538_v61, %v8391_v53 }
 0x733   : > { %v13656_v27 = vld [vmem:[#allocation10 + $0xd34] sm:$0xf0]  ;;  %v13484_v29 = vld [vmem:[#allocation10 + $0x7dc] sm:$0xf]  ;;  %v11363_v61 = vor.u32 %v13356_v38, %v11360_v11 }
 0x734   : > { %v11998_v37 = vld [vmem:[#allocation10 + $0x8d8] sm:$0xf]  ;;  %v12543_v42 = vor.u32 %v13656_v27, %v12542_v26  ;;  %8633 = vmatpush.bf16.msrb.mxu1 %v11199_v47 }
 0x735   : > { %v13520_v22 = vld [vmem:[#allocation10 + $0x8f4] sm:$0xf0] }
 0x736   : > { %v11166_v24 = vld [vmem:[#allocation10 + $0x258] sm:$0xf]  ;;  %v11999_v40 = vor.u32 %v13520_v22, %v11998_v37  ;;  %8696 = vmatpush.bf16.msrb.mxu2 %v12543_v42  ;;  %8721 = vmatpush.bf16.msra.mxu3 %v11043_v43  ;;  %v10947_v42 = vor.u32 %v13252_v55, %v10944_v3  ;;  %v10912_v43 = vld [vmem:[#allocation10 + $0x78] sm:$0xf0] }
 0x737   : > { %v13312_v45 = vld [vmem:[#allocation10 + $0x274] sm:$0xf0]  ;;  %v13540_v55 = vld [vmem:[#allocation10 + $0x99c] sm:$0xf] }
 0x738   : > { %v12510_v19 = vld [vmem:[#allocation10 + $0xcd8] sm:$0xf]  ;;  %v11167_v12 = vor.u32 %v13312_v45, %v11166_v24  ;;  %8671 = vmatpush.bf16.msra.mxu0 %v11999_v40  ;;  %v8418_v40 = vpop.f32.mrf.mxu2  ;;  %v12096_v3 = vld [vmem:[#allocation10 + $0x9b8] sm:$0xf0] }
 0x739   : > { %v13648_v36 = vld [vmem:[#allocation10 + $0xcf4] sm:$0xf0] }
 0x73a   : > { %v11966_v34 = vld [vmem:[#allocation10 + $0x898] sm:$0xf]  ;;  %v12511_v21 = vor.u32 %v13648_v36, %v12510_v19  ;;  %8634 = vmatpush.bf16.msrb.mxu1 %v11167_v12  ;;  %8722 = vmatpush.bf16.msra.mxu3 %v11011_v33  ;;  %v11872_v19 = vld [vmem:[#allocation10 + $0x7f8] sm:$0xf0]  ;;  %v15554_v12 = vld [vmem:[#allocation13] sm:$0xff]  ;;  %v15557_v33 = vadd.f32 %v8442_v15, %v8430_v30 }
 0x73b   : > { %v13512_v16 = vld [vmem:[#allocation10 + $0x8b4] sm:$0xf0]  ;;  %v13244_v36 = vld [vmem:[#allocation10 + $0x5c] sm:$0xf] }
 0x73c   : > { %v11134_v17 = vld [vmem:[#allocation10 + $0x218] sm:$0xf]  ;;  %v11967_v52 = vor.u32 %v13512_v16, %v11966_v34  ;;  %8697 = vmatpush.bf16.msrb.mxu2 %v12511_v21  ;;  %v11328_v34 = vld [vmem:[#allocation10 + $0x3b8] sm:$0xf0]  ;;  %v8826_v16 = vmax.f32 %v8404_v54, 0.0  ;;  %v8836_v21 = vperm.slane %v15554_v12, 3  ;;  %v8444_v54 = vpop.f32.mrf.mxu0 }
 0x73d   : > { %v13304_v20 = vld [vmem:[#allocation10 + $0x234] sm:$0xf0]  ;;  %v11331_v63 = vor.u32 %v13348_v60, %v11328_v34  ;;  %v13332_v30 = vld [vmem:[#allocation10 + $0x31c] sm:$0xf] }
 0x73e   : > { %v12478_v31 = vld [vmem:[#allocation10 + $0xc98] sm:$0xf]  ;;  %v11135_v25 = vor.u32 %v13304_v20, %v11134_v17  ;;  %8672 = vmatpush.bf16.msra.mxu0 %v11967_v52  ;;  %8723 = vmatpush.bf16.msra.mxu3 %v10979_v0  ;;  %v8392_v17 = vpop.f32.mrf.mxu1  ;;  %v10915_v52 = vor.u32 %v13244_v36, %v10912_v43  ;;  %v8852_v58 = vmul.f32 %v8836_v21, %v8826_v16  ;;  %v15566_v36 = vpop.f32.mrf.mxu3  ;;  %v13452_v21 = vld [vmem:[#allocation10 + $0x6dc] sm:$0xf] }
 0x73f   : > { %v13640_v23 = vld [vmem:[#allocation10 + $0xcb4] sm:$0xf0]  ;;  %v12131_v0 = vor.u32 %v13548_v14, %v12128_v9  ;;  %v11744_v15 = vld [vmem:[#allocation10 + $0x6f8] sm:$0xf0] }
 0x740   : > { %v12382_v32 = vld [vmem:[#allocation10 + $0xbd8] sm:$0xf]  ;;  %v12479_v50 = vor.u32 %v13640_v23, %v12478_v31  ;;  %8635 = vmatpush.bf16.msrb.mxu1 %v11135_v25  ;;  %v11875_v31 = vor.u32 %v13484_v29, %v11872_v19  ;;  %v13340_v25 = vld [vmem:[#allocation10 + $0x35c] sm:$0xf] }
 0x741   : > { %v13616_v6 = vld [vmem:[#allocation10 + $0xbf4] sm:$0xf0]  ;;  %v13324_v29 = vld [vmem:[#allocation10 + $0x2dc] sm:$0xf] }
 0x742   : > { %v11934_v1 = vld [vmem:[#allocation10 + $0x858] sm:$0xf]  ;;  %v12383_v44 = vor.u32 %v13616_v6, %v12382_v32  ;;  %8698 = vmatpush.bf16.msrb.mxu2 %v12479_v50  ;;  %8724 = vmatpush.bf16.msra.mxu3 %v10947_v42  ;;  %v13476_v6 = vld [vmem:[#allocation10 + $0x79c] sm:$0xf] }
 0x743   : > { %v13504_v49 = vld [vmem:[#allocation10 + $0x874] sm:$0xf0]  ;;  %8636 = vmatmul.bf16.vlgmr.msrb.gmra.mxu1 %v15356_v57  ;;  %v11296_v50 = vld [vmem:[#allocation10 + $0x378] sm:$0xf0] }
 0x744   : > { %v12446_v28 = vld [vmem:[#allocation10 + $0xc58] sm:$0xf]  ;;  %v11935_v35 = vor.u32 %v13504_v49, %v11934_v1  ;;  %8680 = vmatpush.bf16.msra.mxu1 %v12383_v44  ;;  %v13236_v1 = vld [vmem:[#allocation10 + $0x1c] sm:$0xf]  ;;  %v11843_v44 = vor.u32 %v13476_v6, %v11840_v46 }
 0x745   : > { %v13632_v62 = vld [vmem:[#allocation10 + $0xc74] sm:$0xf0]  ;;  %v10880_v49 = vld [vmem:[#allocation10 + $0x38] sm:$0xf0] }
 0x746   : > { %v12350_v5 = vld [vmem:[#allocation10 + $0xb98] sm:$0xf]  ;;  %v12447_v18 = vor.u32 %v13632_v62, %v12446_v28  ;;  %8673 = vmatpush.bf16.msra.mxu0 %v11935_v35  ;;  %8725 = vmatpush.bf16.msra.mxu3 %v10915_v52  ;;  %v10883_v28 = vor.u32 %v13236_v1, %v10880_v49  ;;  %v11299_v35 = vor.u32 %v13340_v25, %v11296_v50  ;;  %v11776_v42 = vld [vmem:[#allocation10 + $0x738] sm:$0xf0] }
 0x747   : > { %v13608_v41 = vld [vmem:[#allocation10 + $0xbb4] sm:$0xf0]  ;;  %v11232_v19 = vld [vmem:[#allocation10 + $0x2f8] sm:$0xf0]  ;;  %v11747_v52 = vor.u32 %v13452_v21, %v11744_v15 }
 0x748   : > { %v11902_v26 = vld [vmem:[#allocation10 + $0x818] sm:$0xf]  ;;  %v12351_v37 = vor.u32 %v13608_v41, %v12350_v5  ;;  %8699 = vmatpush.bf16.msrb.mxu2 %v12447_v18  ;;  %v13468_v5 = vld [vmem:[#allocation10 + $0x75c] sm:$0xf]  ;;  %v11235_v16 = vor.u32 %v13324_v29, %v11232_v19 }
 0x749   : > { %v13496_v27 = vld [vmem:[#allocation10 + $0x834] sm:$0xf0]  ;;  %v11808_v41 = vld [vmem:[#allocation10 + $0x778] sm:$0xf0] }
 0x74a   : > { %v12414_v48 = vld [vmem:[#allocation10 + $0xc18] sm:$0xf]  ;;  %v11903_v24 = vor.u32 %v13496_v27, %v11902_v26  ;;  %8681 = vmatpush.bf16.msra.mxu1 %v12351_v37  ;;  %v11264_v26 = vld [vmem:[#allocation10 + $0x338] sm:$0xf0]  ;;  %v8862_v27 = vsel %vm471_vm0, %v8852_v58, 0.0  ;;  %8726 = vmatpush.bf16.msra.mxu3 %v10883_v28  ;;  %v11811_v38 = vor.u32 %v13468_v5, %v11808_v41 }
 0x74b   : > { %v13624_v22 = vld [vmem:[#allocation10 + $0xc34] sm:$0xf0]  ;;  %v13524_v17 = vld [vmem:[#allocation10 + $0x91c] sm:$0xf] }
 0x74c   : > { %v12318_v47 = vld [vmem:[#allocation10 + $0xb58] sm:$0xf]  ;;  %v12415_v56 = vor.u32 %v13624_v22, %v12414_v48  ;;  %8674 = vmatpush.bf16.msra.mxu0 %v11903_v24  ;;  %v12099_v48 = vor.u32 %v13540_v55, %v12096_v3  ;;  %v11267_v22 = vor.u32 %v13332_v30, %v11264_v26  ;;  %v13532_v24 = vld [vmem:[#allocation10 + $0x95c] sm:$0xf] }
 0x74d   : > { %v13600_v45 = vld [vmem:[#allocation10 + $0xb74] sm:$0xf0]  ;;  %8727 = vmatmul.bf16.vlgmr.msra.gmra.mxu3 %v15354_v10  ;;  %v13444_v6 = vld [vmem:[#allocation10 + $0x69c] sm:$0xf] }
 0x74e   : > { %v12319_v20 = vor.u32 %v13600_v45, %v12318_v47  ;;  %v12286_v23 = vld [vmem:[#allocation10 + $0xb18] sm:$0xf]  ;;  %8700 = vmatpush.bf16.msrb.mxu2 %v12415_v56  ;;  %8771 = vmatpush.bf16.msrb.mxu3 %v12131_v0  ;;  %v13460_v47 = vld [vmem:[#allocation10 + $0x71c] sm:$0xf] }
 0x74f   : > { %v13592_v32 = vld [vmem:[#allocation10 + $0xb34] sm:$0xf0]  ;;  %8675 = vmatmul.bf16.vlgmr.msra.gmra.mxu0 %v15404_v4  ;;  %v12064_v45 = vld [vmem:[#allocation10 + $0x978] sm:$0xf0]  ;;  %v11779_v40 = vor.u32 %v13460_v47, %v11776_v42 }
 0x750   : > { %8732 = vmatpush.bf16.msrb.mxu0 %v11363_v61  ;;  %8682 = vmatpush.bf16.msra.mxu1 %v12319_v20  ;;  %v12287_v51 = vor.u32 %v13592_v32, %v12286_v23  ;;  %v12254_v62 = vld [vmem:[#allocation10 + $0xad8] sm:$0xf]  ;;  %v15563_v61 = vadd.f32 %v8862_v27, %v15535_v59  ;;  %v12067_v34 = vor.u32 %v13532_v24, %v12064_v45  ;;  %v12032_v20 = vld [vmem:[#allocation10 + $0x938] sm:$0xf0] }
 0x751   : > { %v13584_v53 = vld [vmem:[#allocation10 + $0xaf4] sm:$0xf0]  ;;  %8701 = vmatmul.bf16.vlgmr.msrb.gmra.mxu2 %v15406_v2  ;;  %v13316_v59 = vld [vmem:[#allocation10 + $0x29c] sm:$0xf] }
 0x752   : > { %8758 = vmatpush.bf16.msra.mxu2 %v11875_v31  ;;  %v12255_v18 = vor.u32 %v13584_v53, %v12254_v62  ;;  %v12222_v11 = vld [vmem:[#allocation10 + $0xa98] sm:$0xf]  ;;  %8772 = vmatpush.bf16.msrb.mxu3 %v12099_v48  ;;  %v11200_v31 = vld [vmem:[#allocation10 + $0x2b8] sm:$0xf0]  ;;  %v8455_v62 = vpop.f32.mrf.mxu1 }
 0x753   : > { %v13576_v37 = vld [vmem:[#allocation10 + $0xab4] sm:$0xf0]  ;;  %v11712_v46 = vld [vmem:[#allocation10 + $0x6b8] sm:$0xf0]  ;;  %v11203_v1 = vor.u32 %v13316_v59, %v11200_v31  ;;  %v8456_v41 = vadd.f32 %v8455_v62, %v15557_v33 }
 0x754   : > { %8733 = vmatpush.bf16.msrb.mxu0 %v11331_v63  ;;  %8683 = vmatpush.bf16.msra.mxu1 %v12287_v51  ;;  %v12223_v43 = vor.u32 %v13576_v37, %v12222_v11  ;;  %v12190_v56 = vld [vmem:[#allocation10 + $0xa58] sm:$0xf]  ;;  %v12035_v63 = vor.u32 %v13524_v17, %v12032_v20  ;;  %v13420_v49 = vld [vmem:[#allocation10 + $0x5dc] sm:$0xf]  ;;  %v8468_v51 = vpop.f32.mrf.mxu2  ;;  %v11715_v53 = vor.u32 %v13444_v6, %v11712_v46  ;;  %v8494_v20 = vpop.f32.mrf.mxu0 }
 0x755   : > { %v13568_v60 = vld [vmem:[#allocation10 + $0xa74] sm:$0xf0]  ;;  %v11616_v14 = vld [vmem:[#allocation10 + $0x5f8] sm:$0xf0]  ;;  %v8469_v11 = vadd.f32 %v8468_v51, %v8456_v41 }
 0x756   : > { %8759 = vmatpush.bf16.msra.mxu2 %v11843_v44  ;;  %v12191_v10 = vor.u32 %v13568_v60, %v12190_v56  ;;  %v12158_v23 = vld [vmem:[#allocation10 + $0xa18] sm:$0xf]  ;;  %8773 = vmatpush.bf16.msrb.mxu3 %v12067_v34  ;;  %v13516_v9 = vld [vmem:[#allocation10 + $0x8dc] sm:$0xf]  ;;  %v8483_v44 = vpop.f32.mrf.mxu3  ;;  %v11619_v0 = vor.u32 %v13420_v49, %v11616_v14 }
 0x757   : > { %v13560_v32 = vld [vmem:[#allocation10 + $0xa34] sm:$0xf0]  ;;  %v12000_v25 = vld [vmem:[#allocation10 + $0x8f8] sm:$0xf0]  ;;  %v8482_v24 = vadd.f32 %v15566_v36, %v8469_v11 }
 0x758   : > { %8734 = vmatpush.bf16.msrb.mxu0 %v11299_v35  ;;  %8684 = vmatpush.bf16.msra.mxu1 %v12255_v18  ;;  %v13308_v50 = vld [vmem:[#allocation10 + $0x25c] sm:$0xf]  ;;  %v12159_v28 = vor.u32 %v13560_v32, %v12158_v23  ;;  %v12003_v55 = vor.u32 %v13516_v9, %v12000_v25 }
 0x759   : > { %v11168_v58 = vld [vmem:[#allocation10 + $0x278] sm:$0xf0] }
 0x75a   : > { %8760 = vmatpush.bf16.msra.mxu2 %v11811_v38  ;;  %v13436_v35 = vld [vmem:[#allocation10 + $0x65c] sm:$0xf]  ;;  %8774 = vmatpush.bf16.msrb.mxu3 %v12035_v63  ;;  %v11171_v3 = vor.u32 %v13308_v50, %v11168_v58  ;;  %v8457_v59 = vpop.f32.mrf.mxu1 }
 0x75b   : > { %v11680_v5 = vld [vmem:[#allocation10 + $0x678] sm:$0xf0] }
 0x75c   : > { %8735 = vmatpush.bf16.msrb.mxu0 %v11267_v22  ;;  %8685 = vmatpush.bf16.msra.mxu1 %v12223_v43  ;;  %v13412_v30 = vld [vmem:[#allocation10 + $0x59c] sm:$0xf]  ;;  %v11683_v22 = vor.u32 %v13436_v35, %v11680_v5  ;;  %v8496_v41 = vpop.f32.mrf.mxu0 }
 0x75d   : > { %v11584_v26 = vld [vmem:[#allocation10 + $0x5b8] sm:$0xf0] }
 0x75e   : > { %8761 = vmatpush.bf16.msra.mxu2 %v11779_v40  ;;  %v13508_v27 = vld [vmem:[#allocation10 + $0x89c] sm:$0xf]  ;;  %v11587_v47 = vor.u32 %v13412_v30, %v11584_v26  ;;  %8775 = vmatpush.bf16.msrb.mxu3 %v12003_v55 }
 0x75f   : > { %v11968_v54 = vld [vmem:[#allocation10 + $0x8b8] sm:$0xf0] }
 0x760   : > { %8736 = vmatpush.bf16.msrb.mxu0 %v11235_v16  ;;  %8686 = vmatpush.bf16.msra.mxu1 %v12191_v10  ;;  %v13300_v18 = vld [vmem:[#allocation10 + $0x21c] sm:$0xf]  ;;  %v11971_v33 = vor.u32 %v13508_v27, %v11968_v54  ;;  %v8470_v16 = vpop.f32.mrf.mxu2  ;;  %v8495_v10 = vadd.f32 %v8494_v20, %v8482_v24  ;;  %v8837_v27 = vperm.slane %v15554_v12, 4 }
 0x761   : > { %v11136_v38 = vld [vmem:[#allocation10 + $0x238] sm:$0xf0] }
 0x762   : > { %8762 = vmatpush.bf16.msra.mxu2 %v11747_v52  ;;  %v13612_v37 = vld [vmem:[#allocation10 + $0xbdc] sm:$0xf]  ;;  %v11139_v45 = vor.u32 %v13300_v18, %v11136_v38  ;;  %8776 = vmatpush.bf16.msrb.mxu3 %v11971_v33 }
 0x763   : > { %v12384_v48 = vld [vmem:[#allocation10 + $0xbf8] sm:$0xf0] }
 0x764   : > { %8737 = vmatpush.bf16.msrb.mxu0 %v11203_v1  ;;  %8687 = vmatpush.bf16.msra.mxu1 %v12159_v28  ;;  %v13428_v42 = vld [vmem:[#allocation10 + $0x61c] sm:$0xf]  ;;  %v12387_v40 = vor.u32 %v13612_v37, %v12384_v48 }
 0x765   : > { %v11648_v29 = vld [vmem:[#allocation10 + $0x638] sm:$0xf0] }
 0x766   : > { %8763 = vmatpush.bf16.msra.mxu2 %v11715_v53  ;;  %v13404_v19 = vld [vmem:[#allocation10 + $0x55c] sm:$0xf]  ;;  %v11651_v31 = vor.u32 %v13428_v42, %v11648_v29 }
 0x767   : > { %v11552_v43 = vld [vmem:[#allocation10 + $0x578] sm:$0xf0]  ;;  %8688 = vmatmul.bf16.vlgmr.msra.gmra.mxu1 %v15393_v39 }
 0x768   : > { %8745 = vmatpush.bf16.msrb.mxu1 %v11619_v0  ;;  %8738 = vmatpush.bf16.msrb.mxu0 %v11171_v3  ;;  %v13500_v56 = vld [vmem:[#allocation10 + $0x85c] sm:$0xf]  ;;  %v11555_v36 = vor.u32 %v13404_v19, %v11552_v43  ;;  %v8507_v3 = vpop.f32.mrf.mxu1 }
 0x769   : > { %v11936_v60 = vld [vmem:[#allocation10 + $0x878] sm:$0xf0]  ;;  %v8508_v26 = vadd.f32 %v8507_v3, %v8495_v10 }
 0x76a   : > { %v13604_v34 = vld [vmem:[#allocation10 + $0xb9c] sm:$0xf]  ;;  %8764 = vmatpush.bf16.msra.mxu2 %v11683_v22  ;;  %v11939_v23 = vor.u32 %v13500_v56, %v11936_v60  ;;  %v15575_v22 = vpop.f32.mrf.mxu3 }
 0x76b   : > { %v12352_v21 = vld [vmem:[#allocation10 + $0xbb8] sm:$0xf0]  ;;  %v8827_v48 = vmax.f32 %v8508_v26, 0.0 }
 0x76c   : > { %v13708_v15 = vld [vmem:[#allocation10 + $0xedc] sm:$0xf]  ;;  %8746 = vmatpush.bf16.msrb.mxu1 %v11587_v47  ;;  %8739 = vmatpush.bf16.msrb.mxu0 %v11139_v45  ;;  %v12355_v6 = vor.u32 %v13604_v34, %v12352_v21 }
 0x76d   : > { %v12768_v17 = vld [vmem:[#allocation10 + $0xef8] sm:$0xf0]  ;;  %8777 = vmatpush.bf16.msrb.mxu3 %v11939_v23  ;;  %v8853_v24 = vmul.f32 %v8837_v27, %v8827_v48 }
 0x76e   : > { %v13396_v52 = vld [vmem:[#allocation10 + $0x51c] sm:$0xf]  ;;  %v12771_v46 = vor.u32 %v13708_v15, %v12768_v17  ;;  %8765 = vmatpush.bf16.msra.mxu2 %v11651_v31  ;;  %v8533_v31 = vpop.f32.mrf.mxu2 }
 0x76f   : > { %v11520_v32 = vld [vmem:[#allocation10 + $0x538] sm:$0xf0]  ;;  %8740 = vmatmul.bf16.vlgmr.msrb.gmra.mxu0 %v15356_v57 }
 0x770   : > { %8784 = vmatpush.bf16.msra.mxu0 %v12387_v40  ;;  %v13492_v63 = vld [vmem:[#allocation10 + $0x81c] sm:$0xf]  ;;  %8747 = vmatpush.bf16.msrb.mxu1 %v11555_v36  ;;  %v11523_v50 = vor.u32 %v13396_v52, %v11520_v32  ;;  %v8864_v40 = vsel %vm471_vm0, %v8853_v24, 0.0 }
 0x771   : > { %v11904_v1 = vld [vmem:[#allocation10 + $0x838] sm:$0xf0]  ;;  %8766 = vmatmul.bf16.vlgmr.msra.gmra.mxu2 %v15391_v7  ;;  %v15579_v60 = vadd.f32 %v8864_v40, %v15563_v61 }
 0x772   : > { %v13596_v49 = vld [vmem:[#allocation10 + $0xb5c] sm:$0xf]  ;;  %v11907_v58 = vor.u32 %v13492_v63, %v11904_v1  ;;  %8814 = vmatpush.bf16.msrb.mxu2 %v12771_v46  ;;  %v8548_v36 = vpop.f32.mrf.mxu3 }
 0x773   : > { %v12320_v14 = vld [vmem:[#allocation10 + $0xb78] sm:$0xf0] }
 0x774   : > { %v13700_v9 = vld [vmem:[#allocation10 + $0xe9c] sm:$0xf]  ;;  %8785 = vmatpush.bf16.msra.mxu0 %v12355_v6  ;;  %v12323_v28 = vor.u32 %v13596_v49, %v12320_v14  ;;  %8748 = vmatpush.bf16.msrb.mxu1 %v11523_v50 }
 0x775   : > { %v12736_v25 = vld [vmem:[#allocation10 + $0xeb8] sm:$0xf0]  ;;  %8778 = vmatpush.bf16.msrb.mxu3 %v11907_v58 }
 0x776   : > { %v13388_v51 = vld [vmem:[#allocation10 + $0x4dc] sm:$0xf]  ;;  %v12739_v62 = vor.u32 %v13700_v9, %v12736_v25  ;;  %v8535_v9 = vpop.f32.mrf.mxu2  ;;  %v8559_v25 = vpop.f32.mrf.mxu0 }
 0x777   : > { %v11488_v44 = vld [vmem:[#allocation10 + $0x4f8] sm:$0xf0] }
 0x778   : > { %v13588_v53 = vld [vmem:[#allocation10 + $0xb1c] sm:$0xf]  ;;  %v11491_v55 = vor.u32 %v13388_v51, %v11488_v44  ;;  %8786 = vmatpush.bf16.msra.mxu0 %v12323_v28  ;;  %8815 = vmatpush.bf16.msrb.mxu2 %v12739_v62  ;;  %v15584_v44 = vld [vmem:[#allocation11] sm:$0xff] }
 0x779   : > { %v12288_v0 = vld [vmem:[#allocation10 + $0xb38] sm:$0xf0]  ;;  %8779 = vmatmul.bf16.vlgmr.msrb.gmra.mxu3 %v15404_v4  ;;  %v8509_v4 = vpop.f32.mrf.mxu1 }
 0x77a   : > { %v13692_v35 = vld [vmem:[#allocation10 + $0xe5c] sm:$0xf]  ;;  %v12291_v54 = vor.u32 %v13588_v53, %v12288_v0  ;;  %8749 = vmatpush.bf16.msrb.mxu1 %v11491_v55  ;;  %v8598_v26 = vpop.f32.mrf.mxu3 }
 0x77b   : > { %v12704_v5 = vld [vmem:[#allocation10 + $0xe78] sm:$0xf0] }
 0x77c   : > { %v13380_v30 = vld [vmem:[#allocation10 + $0x49c] sm:$0xf]  ;;  %v12707_v18 = vor.u32 %v13692_v35, %v12704_v5  ;;  %8787 = vmatpush.bf16.msra.mxu0 %v12291_v54 }
 0x77d   : > { %v11456_v57 = vld [vmem:[#allocation10 + $0x4b8] sm:$0xf0] }
 0x77e   : > { %v13580_v38 = vld [vmem:[#allocation10 + $0xadc] sm:$0xf]  ;;  %v11459_v47 = vor.u32 %v13380_v30, %v11456_v57  ;;  %8816 = vmatpush.bf16.msrb.mxu2 %v12707_v18 }
 0x77f   : > { %v12256_v11 = vld [vmem:[#allocation10 + $0xaf8] sm:$0xf0] }
 0x780   : > { %v13684_v7 = vld [vmem:[#allocation10 + $0xe1c] sm:$0xf]  ;;  %v12259_v45 = vor.u32 %v13580_v38, %v12256_v11  ;;  %8750 = vmatpush.bf16.msrb.mxu1 %v11459_v47 }
 0x781   : > { %v12672_v37 = vld [vmem:[#allocation10 + $0xe38] sm:$0xf0]  ;;  %v8520_v0 = vpop.f32.mrf.mxu1 }
 0x782   : > { %v13372_v42 = vld [vmem:[#allocation10 + $0x45c] sm:$0xf]  ;;  %v12675_v29 = vor.u32 %v13684_v7, %v12672_v37  ;;  %8788 = vmatpush.bf16.msra.mxu0 %v12259_v45 }
 0x783   : > { %v11424_v33 = vld [vmem:[#allocation10 + $0x478] sm:$0xf0] }
 0x784   : > { %v13572_v19 = vld [vmem:[#allocation10 + $0xa9c] sm:$0xf]  ;;  %v11427_v56 = vor.u32 %v13372_v42, %v11424_v33  ;;  %8817 = vmatpush.bf16.msrb.mxu2 %v12675_v29  ;;  %v8600_v42 = vpop.f32.mrf.mxu3 }
 0x785   : > { %v12224_v43 = vld [vmem:[#allocation10 + $0xab8] sm:$0xf0] }
 0x786   : > { %v13364_v34 = vld [vmem:[#allocation10 + $0x41c] sm:$0xf]  ;;  %v12227_v21 = vor.u32 %v13572_v19, %v12224_v43  ;;  %8751 = vmatpush.bf16.msrb.mxu1 %v11427_v56  ;;  %v8585_v48 = vpop.f32.mrf.mxu2 }
 0x787   : > { %v11392_v16 = vld [vmem:[#allocation10 + $0x438] sm:$0xf0]  ;;  %12779 = vmatmul.msk.bf16.vlgmr.msrb.gmra.mxu2 %vm621_vm7, %v15411_v8  ;;  %v7977_v8 = vperm.slane %v15584_v44, 5  ;;  %vm8895_vm7 = vcmask 0  }
 0x788   : > { %v13676_v15 = vld [vmem:[#allocation10 + $0xddc] sm:$0xf]  ;;  %v11395_v10 = vor.u32 %v13364_v34, %v11392_v16  ;;  %8789 = vmatpush.bf16.msra.mxu0 %v12227_v21 }
 0x789   : > { %v12640_v17 = vld [vmem:[#allocation10 + $0xdf8] sm:$0xf0]  ;;  %v8521_v35 = vadd.f32 %v8520_v0, %v7977_v8 }
 0x78a   : > { %v13564_v20 = vld [vmem:[#allocation10 + $0xa5c] sm:$0xf]  ;;  %v12643_v23 = vor.u32 %v13676_v15, %v12640_v17  ;;  %8752 = vmatpush.bf16.msrb.mxu1 %v11395_v10  ;;  %v8838_v17 = vperm.slane %v15554_v12, 5  ;;  %v7978_v10 = vperm.slane %v15584_v44, 6 }
 0x78b   : > { %v12192_v59 = vld [vmem:[#allocation10 + $0xa78] sm:$0xf0]  ;;  %v8534_v41 = vadd.f32 %v8533_v31, %v8521_v35 }
 0x78c   : > { %v12195_v52 = vor.u32 %v13564_v20, %v12192_v59  ;;  %v13668_v32 = vld [vmem:[#allocation10 + $0xd9c] sm:$0xf] }
 0x78d   : > { %v12608_v61 = vld [vmem:[#allocation10 + $0xdb8] sm:$0xf0]  ;;  %8753 = vmatmul.bf16.vlgmr.msrb.gmra.mxu1 %v15380_v13  ;;  %v8561_v13 = vpop.f32.mrf.mxu0  ;;  %v8547_v30 = vadd.f32 %v15575_v22, %v8534_v41 }
 0x78e   : > { %v13556_v6 = vld [vmem:[#allocation10 + $0xa1c] sm:$0xf]  ;;  %8797 = vmatpush.bf16.msra.mxu1 %v12643_v23  ;;  %v12611_v63 = vor.u32 %v13668_v32, %v12608_v61  ;;  %8790 = vmatpush.bf16.msra.mxu0 %v12195_v52  ;;  %v8587_v22 = vpop.f32.mrf.mxu2 }
 0x78f   : > { %v12160_v46 = vld [vmem:[#allocation10 + $0xa38] sm:$0xf0]  ;;  %v8560_v18 = vadd.f32 %v8559_v25, %v8547_v30 }
 0x790   : > { %v12163_v1 = vor.u32 %v13556_v6, %v12160_v46  ;;  %v13660_v49 = vld [vmem:[#allocation10 + $0xd5c] sm:$0xf] }
 0x791   : > { %v12576_v14 = vld [vmem:[#allocation10 + $0xd78] sm:$0xf0] }
 0x792   : > { %8798 = vmatpush.bf16.msra.mxu1 %v12611_v63  ;;  %v12579_v50 = vor.u32 %v13660_v49, %v12576_v14  ;;  %8791 = vmatpush.bf16.msra.mxu0 %v12163_v1  ;;  %v13652_v58 = vld [vmem:[#allocation10 + $0xd1c] sm:$0xf] }
 0x793   : > { %v12544_v51 = vld [vmem:[#allocation10 + $0xd38] sm:$0xf0] }
 0x794   : > { %v12547_v28 = vor.u32 %v13652_v58, %v12544_v51  ;;  %v13644_v62 = vld [vmem:[#allocation10 + $0xcdc] sm:$0xf] }
 0x795   : > { %8792 = vmatmul.bf16.vlgmr.msra.gmra.mxu0 %v15393_v39  ;;  %v12512_v53 = vld [vmem:[#allocation10 + $0xcf8] sm:$0xf0]  ;;  %v8522_v39 = vpop.f32.mrf.mxu1  ;;  %v8611_v38 = vpop.f32.mrf.mxu0 }
 0x796   : > { %8799 = vmatpush.bf16.msra.mxu1 %v12579_v50  ;;  %v12515_v5 = vor.u32 %v13644_v62, %v12512_v53  ;;  %v13636_v55 = vld [vmem:[#allocation10 + $0xc9c] sm:$0xf]  ;;  %v7979_v39 = vperm.slane %v15584_v44, 7 }
 0x797   : > { %v12480_v3 = vld [vmem:[#allocation10 + $0xcb8] sm:$0xf0] }
 0x798   : > { %v12483_v57 = vor.u32 %v13636_v55, %v12480_v3  ;;  %v13628_v27 = vld [vmem:[#allocation10 + $0xc5c] sm:$0xf] }
 0x799   : > { %v12448_v54 = vld [vmem:[#allocation10 + $0xc78] sm:$0xf0] }
 0x79a   : > { %8800 = vmatpush.bf16.msra.mxu1 %v12547_v28  ;;  %v12451_v11 = vor.u32 %v13628_v27, %v12448_v54  ;;  %v13620_v7 = vld [vmem:[#allocation10 + $0xc1c] sm:$0xf]  ;;  %v8663_v40 = vpop.f32.mrf.mxu3 }
 0x79b   : > { %v12416_v37 = vld [vmem:[#allocation10 + $0xc38] sm:$0xf0] }
 0x79c   : > { %v12419_v47 = vor.u32 %v13620_v7, %v12416_v37 }
 0x79d   : > { %v8613_v33 = vpop.f32.mrf.mxu0  ;;  %v8572_v24 = vpop.f32.mrf.mxu1 }
 0x79e   : > { %8801 = vmatpush.bf16.msra.mxu1 %v12515_v5  ;;  %v8573_v45 = vadd.f32 %v8572_v24, %v8560_v18  ;;  %v8839_v5 = vperm.slane %v15554_v12, 6 }
 0x7a0   : > { %v8586_v29 = vadd.f32 %v8585_v48, %v8573_v45 }
 0x7a2   : > { %8802 = vmatpush.bf16.msra.mxu1 %v12483_v57  ;;  %v8599_v19 = vadd.f32 %v8598_v26, %v8586_v29  ;;  %v8665_v16 = vpop.f32.mrf.mxu3 }
 0x7a4   : > { %v8612_v43 = vadd.f32 %v8611_v38, %v8599_v19  ;;  %v8840_v19 = vperm.slane %v15554_v12, 7 }
 0x7a5   : > { %v8624_v56 = vpop.f32.mrf.mxu0  ;;  %v8574_v4 = vpop.f32.mrf.mxu1 }
 0x7a6   : > { %8803 = vmatpush.bf16.msra.mxu1 %v12451_v11  ;;  %v8650_v34 = vpop.f32.mrf.mxu2  ;;  %v8828_v15 = vmax.f32 %v8612_v43, 0.0  ;;  %v8625_v23 = vadd.f32 %v8624_v56, %v7978_v10 }
 0x7a8   : > { %v8854_v20 = vmul.f32 %v8838_v17, %v8828_v15 }
 0x7aa   : > { %8804 = vmatpush.bf16.msra.mxu1 %v12419_v47  ;;  %v8866_v31 = vsel %vm471_vm0, %v8854_v20, 0.0 }
 0x7ab   : > { %v8867_v36 = vadd.f32 %v8866_v31, %v15579_v60 }
 0x7ad   : > { %8805 = vmatmul.bf16.vlgmr.msra.gmra.mxu1 %v15406_v2  ;;  %v8626_v21 = vpop.f32.mrf.mxu0 }
 0x7ae   : > { %v8652_v59 = vpop.f32.mrf.mxu2 }
 0x7b0   : > { %v8715_v2 = vpop.f32.mrf.mxu3 }
 0x7b8   : > { %v8717_v61 = vpop.f32.mrf.mxu3 }
 0x7c0   : > { %v8637_v52 = vpop.f32.mrf.mxu1 }
 0x7c1   : > { %v8638_v32 = vadd.f32 %v8637_v52, %v8625_v23 }
 0x7c3   : > { %v8651_v6 = vadd.f32 %v8650_v34, %v8638_v32  ;;  %v8874_v34 = vld [vmem:[#allocation2] sm:$0x1] }
 0x7c5   : > { %v8664_v46 = vadd.f32 %v8663_v40, %v8651_v6 }
 0x7c8   : > { %v8639_v49 = vpop.f32.mrf.mxu1 }
 0x7cc   : > { %v8676_v63 = vpop.f32.mrf.mxu0 }
 0x7cd   : > { %v8677_v1 = vadd.f32 %v8676_v63, %v8664_v46 }
 0x7d0   : > { %v8728_v25 = vpop.f32.mrf.mxu3 }
 0x7d1   : > { %v8729_v7 = vadd.f32 %v8728_v25, %v7979_v39 }
 0x7d4   : > { %v8702_v14 = vpop.f32.mrf.mxu2  ;;  %v8678_v9 = vpop.f32.mrf.mxu0 }
 0x7d8   : > { %v8730_v58 = vpop.f32.mrf.mxu3 }
 0x7dc   : > { %v8704_v50 = vpop.f32.mrf.mxu2 }
 0x7e4   : > { %v8689_v51 = vpop.f32.mrf.mxu1 }
 0x7e5   : > { %v8690_v8 = vadd.f32 %v8689_v51, %v8677_v1 }
 0x7e7   : > { %v8703_v28 = vadd.f32 %v8702_v14, %v8690_v8 }
 0x7e9   : > { %v8716_v60 = vadd.f32 %v8715_v2, %v8703_v28 }
 0x7eb   : > { %v8829_v0 = vmax.f32 %v8716_v60, 0.0 }
 0x7ec   : > { %v8741_v62 = vpop.f32.mrf.mxu0  ;;  %v8691_v53 = vpop.f32.mrf.mxu1 }
 0x7ed   : > { %v8855_v41 = vmul.f32 %v8839_v5, %v8829_v0  ;;  %v8742_v37 = vadd.f32 %v8741_v62, %v8729_v7 }
 0x7ef   : > { %v8868_v3 = vsel %vm471_vm0, %v8855_v41, 0.0 }
 0x7f0   : > { %v8869_v30 = vadd.f32 %v8868_v3, %v8867_v36 }
 0x7f4   : > { %v8767_v35 = vpop.f32.mrf.mxu2  ;;  %v8743_v13 = vpop.f32.mrf.mxu0 }
 0x7fc   : > { %v8780_v55 = vpop.f32.mrf.mxu3  ;;  %v8769_v57 = vpop.f32.mrf.mxu2 }
 0x804   : > { %v8782_v26 = vpop.f32.mrf.mxu3 }
 0x80a   : > { %v8754_v27 = vpop.f32.mrf.mxu1  ;;  %v8819_v54 = vpop.f32.mrf.mxu2 }
 0x80b   : > { %v8755_v47 = vadd.f32 %v8754_v27, %v8742_v37 }
 0x80d   : > { %v8768_v42 = vadd.f32 %v8767_v35, %v8755_v47 }
 0x80f   : > { %v8781_v33 = vadd.f32 %v8780_v55, %v8768_v42 }
 0x812   : > { %v8793_v18 = vpop.f32.mrf.mxu0  ;;  %v8756_v38 = vpop.f32.mrf.mxu1 }
 0x813   : > { %v8821_v11 = vpop.f32.mrf.mxu2  ;;  %v8794_v22 = vadd.f32 %v8793_v18, %v8781_v33 }
 0x81a   : > { %v8795_v48 = vpop.f32.mrf.mxu0 }
 0x82a   : > { %v8806_v24 = vpop.f32.mrf.mxu1 }
 0x82b   : > { %v8807_v45 = vadd.f32 %v8806_v24, %v8794_v22 }
 0x82d   : > { %v8820_v29 = vadd.f32 %v8819_v54, %v8807_v45 }
 0x82f   : > { %v8830_v43 = vmax.f32 %v8820_v29, 0.0 }
 0x831   : > { %v8856_v40 = vmul.f32 %v8840_v19, %v8830_v43 }
 0x832   : > { %v8808_v56 = vpop.f32.mrf.mxu1 }
 0x833   : > { %v8870_v4 = vsel %vm471_vm0, %v8856_v40, 0.0 }
 0x834   : > { %v8871_v44 = vadd.f32 %v8870_v4, %v8869_v30 }
 0x836   : > { %8872 = vadd.xlane.f32.xlu1 %v8871_v44 }
 0x8a9   : > { %v8873_v16 = vpop.xlane.xlu1 %8872 }
 0x8aa   : > { %v8875_v21 = vadd.f32 %v8874_v34, %v8873_v16 }
 0x8ac   : > { %v8876_v15 = vsub.f32 0.0, %v8875_v21 }
 0x8ae   : > { %v8877_v17 = vmul.f32 1.442695, %v8876_v15 }
 0x8b0   : > { %14077 = vpow2.f32 %v8877_v17 }
 0x8b6   : > { %v14078_v20 = vpop.eup %14077 }
 0x8b7   : > { %v8879_v59 = vadd.f32 1.0, %v14078_v20 }
 0x8b9   : > { %14079 = vrcp.f32 %v8879_v59  ;;  %v8891_v36 = vand.u32 2147483648, %v8879_v59  ;;  %v8889_v23 = vand.u32 2147483647, %v8879_v59  ;;  %vm8885_vm0 = vweird.f32 %v8879_v59 }
 0x8bb   : > { %v8892_v32 = vor.u32 1.1754944e-38, %v8891_v36  ;;  %vm8890_vm11 = vcmp.eq.f32.partialorder %v8889_v23, 8.507059e+37 }
 0x8bf   : > { %v14080_v31 = vpop.eup %14079 }
 0x8c0   : > { %v8881_v2 = vmul.f32 %v14080_v31, %v8879_v59  ;;  %vm8886_vm2 = vweird.f32 %v14080_v31 }
 0x8c1   : > { %vm8887_vm10 = vmor %vm8885_vm0, %vm8886_vm2 }
 0x8c2   : > { %v8882_v12 = vsub.f32 1.0, %v8881_v2 }
 0x8c4   : > { %v8883_v10 = vmul.f32 %v14080_v31, %v8882_v12 }
 0x8c6   : > { %v8884_v52 = vadd.f32 %v14080_v31, %v8883_v10 }
 0x8c8   : > { %v8888_v61 = vsel %vm8887_vm10, %v14080_v31, %v8884_v52 }
 0x8c9   : > { %v8893_v6 = vsel %vm8890_vm11, %v8892_v32, %v8888_v61 }
 0x8ca   : > { %8896 = vst.msk [vmem:[%s438_s26] sm:$0x1] %vm8895_vm7, %v8893_v6 }
 0x8cb PF: > { %s25_s11 = sadd.s32 1, %s14317_s11  }
 0x8cc   : > { %p22_p7 = scmp.ge.s32.totalorder %s25_s11, 4  }
 0x8ce   :  { %24 = sbr.rel (!%p22_p7) target bundleno = 7 (0x7), region = 115 }
 0x8d3   :  { %8914 = vsyncpa [#allocation4], 1 }
 0x8d4   :  { %8916 = vsyncpa [#allocation4 + $0x1], 1 }
 0x8d5   :  { %8917 = vsyncpa [#allocation6], 1 }
 0x8d6   :  { %8918 = vsyncpa [#allocation9], 1 }
 0x8d7   :  { %8919 = vsyncpa [#allocation12], 1 }

</bundles_post_ra>
